<compile_context>
chip_gen: v6e
topology: v6e:2x2x1
jax: 0.10.0
libtpu: 0.0.40
codegen_flags: <defaults>
</compile_context>

<pallas_src>
import functools

import jax
import jax.numpy as jnp
from jax import lax
from jax.experimental import pallas as pl
from jax.experimental.pallas import tpu as pltpu


_COMPUTE = jnp.bfloat16      # MXU feed dtype (accumulation stays f32)


# ------------------------------ small helpers -------------------------------

def _round_up(x, m):
    return (x + m - 1) // m * m


def _k_target():
    """MXU contraction depth worth packing up to (128 on <=v5, 256 on v6e/v7x)."""
    try:
        kind = jax.devices()[0].device_kind.lower()
    except Exception:
        return 256
    return 128 if any(v in kind for v in ("v2", "v3", "v4", "v5")) else 256


def _group_taps(taps, g):
    return tuple(tuple(taps[i:i + g]) for i in range(0, len(taps), g))


def _pack_groups(tap_mats, g):
    """tap_mats: list of (k, n) weight slices -> (n_groups, g*k, n), zero-padded."""
    k, n = tap_mats[0].shape
    out = []
    for i in range(0, len(tap_mats), g):
        chunk = list(tap_mats[i:i + g])
        while len(chunk) < g:
            chunk.append(jnp.zeros((k, n), tap_mats[0].dtype))
        out.append(jnp.concatenate(chunk, axis=0))
    return jnp.stack(out)


def _pick_tile(extent, width, rows_per_unit, max_m=4096):
    """Largest divisor d of `extent` with d*rows_per_unit*width <= max_m rows."""
    best = 1
    for d in range(1, extent + 1):
        if extent % d == 0 and d * rows_per_unit * width <= max_m:
            best = d
    return best


# ------------------------------ Pallas kernels ------------------------------

def _conv_relu_pool_kernel(x_ref, w_ref, b_ref, o_ref, scr_ref, *,
                           tile_ho, out_w, wo, cin, groups):
    """Fused Conv2d(3x3, pad=1) + ReLU + MaxPool2d(2,2) for one (batch, row-tile).

      x_ref:   (1, Hp, Wp, cin)              padded NHWC input (whole image)
      w_ref:   (n_groups, K_pack, cout)      K-packed per-tap-group weights
      b_ref:   (1, cout)                     f32 bias
      o_ref:   (1, tile_ho, wo, cout)        pooled output rows
      scr_ref: (2*tile_ho, out_w, K_pack)    VMEM im2col staging buffer
    """
    t = pl.program_id(1)
    rows = 2 * tile_ho                       # conv rows computed this step
    row0 = pl.multiple_of(t * rows, rows)
    m = rows * out_w
    k_pack = scr_ref.shape[-1]
    g_size = k_pack // cin
    cout = w_ref.shape[-1]

    if len(groups[0]) < g_size:              # static: keep the matmul tail finite
        pad_k = (g_size - len(groups[0])) * cin
        scr_ref[:, :, pl.ds(len(groups[0]) * cin, pad_k)] = jnp.zeros(
            (rows, out_w, pad_k), scr_ref.dtype)

    acc = jnp.zeros((m, cout), jnp.float32)
    for g, taps in enumerate(groups):
        # stage this tap group along K in VMEM, then a single MXU matmul
        for j, (dy, dx) in enumerate(taps):
            scr_ref[:, :, pl.ds(j * cin, cin)] = (
                x_ref[0, pl.ds(row0 + dy, rows), pl.ds(dx, out_w), :])
        lhs = scr_ref[...].reshape(m, k_pack)
        acc = acc + jnp.dot(lhs, w_ref[g], preferred_element_type=jnp.float32)

    y = jnp.maximum(acc + b_ref[...], 0.0)                  # bias + ReLU (f32)
    # fused 2x2 max pool: H pairs first (vreg-aligned regroup), then W pairs
    y4 = y.reshape(tile_ho, 2, out_w, cout)
    hmax = jnp.maximum(y4[:, 0], y4[:, 1])                  # (tile_ho, out_w, cout)
    w4 = hmax.reshape(tile_ho, out_w // 2, 2, cout)
    pooled = jnp.maximum(w4[:, :, 0], w4[:, :, 1])          # (tile_ho, out_w//2, cout)
    o_ref[0] = pooled[:, :wo, :].astype(o_ref.dtype)


def _deconv_act_kernel(x_ref, w_ref, b_ref, o_ref, scr_ref, *,
                       tile_h, cmp_w, out_w, cin, groups, act):
    """ConvTranspose2d(3x3, stride=2, pad=1, output_pad=1) + activation via the
    4-phase (no zero-dilation) decomposition.  Depth-to-space is done by the
    output layout: the kernel writes output-row phases py=0/1 into a
    (1, tile_h, 2, out_w, 2*cout) block whose row-major layout is the
    interleaved image.

      x_ref:   (1, Hp, Wp, cin)                  bottom/right padded input
      w_ref:   (n_groups, 2, K_pack, 2*cout)     (py split, (px, c) on lanes)
      b_ref:   (1, 2*cout)
      scr_ref: (tile_h, cmp_w, K_pack)
    """
    t = pl.program_id(1)
    row0 = pl.multiple_of(t * tile_h, tile_h)
    m = tile_h * cmp_w
    k_pack = scr_ref.shape[-1]
    g_size = k_pack // cin
    c2 = w_ref.shape[-1]                     # 2 * cout

    if len(groups[0]) < g_size:
        pad_k = (g_size - len(groups[0])) * cin
        scr_ref[:, :, pl.ds(len(groups[0]) * cin, pad_k)] = jnp.zeros(
            (tile_h, cmp_w, pad_k), scr_ref.dtype)

    acc0 = jnp.zeros((m, c2), jnp.float32)   # output rows 2i   (py = 0)
    acc1 = jnp.zeros((m, c2), jnp.float32)   # output rows 2i+1 (py = 1)
    for g, taps in enumerate(groups):
        for j, (dy, dx) in enumerate(taps):
            scr_ref[:, :, pl.ds(j * cin, cin)] = (
                x_ref[0, pl.ds(row0 + dy, tile_h), pl.ds(dx, cmp_w), :])
        lhs = scr_ref[...].reshape(m, k_pack)
        acc0 = acc0 + jnp.dot(lhs, w_ref[g, 0], preferred_element_type=jnp.float32)
        acc1 = acc1 + jnp.dot(lhs, w_ref[g, 1], preferred_element_type=jnp.float32)

    b = b_ref[...]
    y0 = acc0 + b
    y1 = acc1 + b
    if act == "relu":
        y0 = jnp.maximum(y0, 0.0)
        y1 = jnp.maximum(y1, 0.0)
    else:  # numerically stable sigmoid on the EUP
        y0 = 0.5 * (jnp.tanh(0.5 * y0) + 1.0)
        y1 = 0.5 * (jnp.tanh(0.5 * y1) + 1.0)

    y0 = y0.reshape(tile_h, cmp_w, c2)[:, :out_w, :].astype(o_ref.dtype)
    y1 = y1.reshape(tile_h, cmp_w, c2)[:, :out_w, :].astype(o_ref.dtype)
    o_ref[0, :, 0] = y0                      # out rows 2i   ((px, c) on lanes)
    o_ref[0, :, 1] = y1                      # out rows 2i+1


# ------------------------------ layer wrappers -------------------------------

def conv3x3_relu_pool(x, w_oihw, b, out_dtype):
    """nn.Conv2d(cin, cout, 3, stride=1, padding=1) + ReLU + MaxPool2d(2) on NHWC."""
    n, h, w, cin = x.shape
    cout = w_oihw.shape[0]
    assert h % 2 == 0 and w % 2 == 0
    ho, wo = h // 2, w // 2
    cmp_w = _round_up(w, 8)                  # vreg-friendly compute width
    xp = jnp.pad(x.astype(_COMPUTE),
                 ((0, 0), (1, 1), (1, 1 + cmp_w - w), (0, 0)))

    taps = tuple((dy, dx) for dy in range(3) for dx in range(3))
    g = max(1, min(len(taps), _k_target() // cin))
    groups = _group_taps(taps, g)
    wt = jnp.transpose(w_oihw, (2, 3, 1, 0))               # (3, 3, cin, cout)
    w_packed = _pack_groups([wt[dy, dx] for dy, dx in taps], g).astype(_COMPUTE)
    b2 = b.reshape(1, cout).astype(jnp.float32)

    tile_ho = _pick_tile(ho, cmp_w, rows_per_unit=2)
    grid = (n, ho // tile_ho)
    kernel = functools.partial(_conv_relu_pool_kernel, tile_ho=tile_ho,
                               out_w=cmp_w, wo=wo, cin=cin, groups=groups)
    return pl.pallas_call(
        kernel,
        out_shape=jax.ShapeDtypeStruct((n, ho, wo, cout), out_dtype),
        grid=grid,
        in_specs=[
            pl.BlockSpec((1, h + 2, cmp_w + 2, cin), lambda i, t: (i, 0, 0, 0)),
            pl.BlockSpec(w_packed.shape, lambda i, t: (0, 0, 0)),
            pl.BlockSpec((1, cout), lambda i, t: (0, 0)),
        ],
        out_specs=pl.BlockSpec((1, tile_ho, wo, cout), lambda i, t: (i, t, 0, 0)),
        scratch_shapes=[pltpu.VMEM((2 * tile_ho, cmp_w, g * cin), _COMPUTE)],
        compiler_params=pltpu.CompilerParams(
            dimension_semantics=("parallel", "parallel")),
    )(xp, w_packed, b2)


def _deconv_phase_weights(w_t):
    """PyTorch ConvTranspose2d weight (cin, cout, 3, 3) -> (4, cin, 2, 2*cout).

    Tap index = di*2 + dj (2x2 input neighbourhood); last dims are (py, px, c):
    out[2i+py, 2j+px] += x[i+di, j+dj] @ w_t[:, :, 1-2*di+py, 1-2*dj+px]
    whenever those kernel indices are in [0, 2], else zero.
    """
    cin, cout = w_t.shape[0], w_t.shape[1]
    w_all = jnp.zeros((2, 2, cin, 2, 2, cout), w_t.dtype)
    for di in range(2):
        for dj in range(2):
            for py in range(2):
                for px in range(2):
                    ty = 1 - 2 * di + py
                    tx = 1 - 2 * dj + px
                    if 0 <= ty <= 2 and 0 <= tx <= 2:
                        w_all = w_all.at[di, dj, :, py, px, :].set(w_t[:, :, ty, tx])
    return w_all.reshape(4, cin, 2, 2 * cout)


def conv_transpose3x3_s2(x, w_t, b, act, out_dtype):
    """nn.ConvTranspose2d(cin, cout, 3, stride=2, padding=1, output_padding=1)
    (+ activation) on NHWC x."""
    n, h, w, cin = x.shape
    cout = w_t.shape[1]
    cmp_w = _round_up(w, 8)
    xp = jnp.pad(x.astype(_COMPUTE),
                 ((0, 0), (0, 1), (0, 1 + cmp_w - w), (0, 0)))

    taps = ((0, 0), (0, 1), (1, 0), (1, 1))
    g = max(1, min(len(taps), _k_target() // cin))
    groups = _group_taps(taps, g)
    w_phase = _deconv_phase_weights(w_t)                     # (4, cin, 2, 2*cout)
    w_p0 = _pack_groups([w_phase[k, :, 0, :] for k in range(4)], g)
    w_p1 = _pack_groups([w_phase[k, :, 1, :] for k in range(4)], g)
    w_packed = jnp.stack([w_p0, w_p1], axis=1).astype(_COMPUTE)
    b2 = jnp.tile(b, 2).reshape(1, 2 * cout).astype(jnp.float32)

    tile_h = _pick_tile(h, cmp_w, rows_per_unit=1)
    grid = (n, h // tile_h)
    kernel = functools.partial(_deconv_act_kernel, tile_h=tile_h, cmp_w=cmp_w,
                               out_w=w, cin=cin, groups=groups, act=act)
    y = pl.pallas_call(
        kernel,
        out_shape=jax.ShapeDtypeStruct((n, h, 2, w, 2 * cout), out_dtype),
        grid=grid,
        in_specs=[
            pl.BlockSpec((1, h + 1, cmp_w + 1, cin), lambda i, t: (i, 0, 0, 0)),
            pl.BlockSpec(w_packed.shape, lambda i, t: (0, 0, 0, 0)),
            pl.BlockSpec((1, 2 * cout), lambda i, t: (0, 0)),
        ],
        out_specs=pl.BlockSpec((1, tile_h, 2, w, 2 * cout),
                               lambda i, t: (i, t, 0, 0, 0)),
        scratch_shapes=[pltpu.VMEM((tile_h, cmp_w, g * cin), _COMPUTE)],
        compiler_params=pltpu.CompilerParams(
            dimension_semantics=("parallel", "parallel")),
    )(xp, w_packed, b2)
    # (n, h, 2, w, 2*cout) already has the interleaved row-major layout -> free reshape
    return y.reshape(n, 2 * h, 2 * w, cout)


# -------------------------------- full model --------------------------------

def autoencoder_forward(x_nchw, p):
    cd = _COMPUTE
    x = jnp.transpose(x_nchw, (0, 2, 3, 1))                  # NCHW -> NHWC
    # encoder: conv + relu + 2x2 maxpool fused per layer
    x = conv3x3_relu_pool(x, p["e1w"], p["e1b"], out_dtype=cd)
    x = conv3x3_relu_pool(x, p["e2w"], p["e2b"], out_dtype=cd)
    x = conv3x3_relu_pool(x, p["e3w"], p["e3b"], out_dtype=cd)
    # decoder: stride-2 deconvs, depth-to-space handled by the output layout
    x = conv_transpose3x3_s2(x, p["d1w"], p["d1b"], act="relu", out_dtype=cd)
    x = conv_transpose3x3_s2(x, p["d2w"], p["d2b"], act="relu", out_dtype=cd)
    x = conv_transpose3x3_s2(x, p["d3w"], p["d3b"], act="sigmoid", out_dtype=cd)
    # TODO(synk): tiny-image regime could fuse the whole net into one pallas_call
    # (all weights resident in VMEM); large images should halo-tile the conv
    # input block over rows instead of delivering the whole padded image.
    return jnp.transpose(x, (0, 3, 1, 2)).astype(jnp.float32)  # NHWC -> NCHW


def init_params(key):
    ks = jax.random.split(key, 12)

    def conv_w(k, co, ci):    # nn.Conv2d weight (Cout, Cin, 3, 3)
        return jax.random.normal(k, (co, ci, 3, 3), jnp.float32) / jnp.sqrt(ci * 9.0)

    def convt_w(k, ci, co):   # nn.ConvTranspose2d weight (Cin, Cout, 3, 3)
        return jax.random.normal(k, (ci, co, 3, 3), jnp.float32) / jnp.sqrt(ci * 9.0)

    def bias(k, c):
        return jax.random.normal(k, (c,), jnp.float32) * 0.01

    return {
        "e1w": conv_w(ks[0], 32, 3),    "e1b": bias(ks[1], 32),
        "e2w": conv_w(ks[2], 64, 32),   "e2b": bias(ks[3], 64),
        "e3w": conv_w(ks[4], 128, 64),  "e3b": bias(ks[5], 128),
        "d1w": convt_w(ks[6], 128, 64), "d1b": bias(ks[7], 64),
        "d2w": convt_w(ks[8], 64, 32),  "d2b": bias(ks[9], 32),
        "d3w": convt_w(ks[10], 32, 3),  "d3b": bias(ks[11], 3),
    }


# ---------------------- pure-JAX reference (for checking) -------------------

def ref_forward(x, p):
    dn = ("NCHW", "OIHW", "NCHW")
    hi = lax.Precision.HIGHEST

    def conv(x, w, b):
        y = lax.conv_general_dilated(x, w, (1, 1), ((1, 1), (1, 1)),
                                     dimension_numbers=dn, precision=hi)
        return y + b[None, :, None, None]

    def pool(x):
        return lax.reduce_window(x, -jnp.inf, lax.max,
                                 (1, 1, 2, 2), (1, 1, 2, 2), "VALID")

    def deconv(x, w_t, b):
        w_eq = jnp.flip(w_t, (2, 3)).transpose(1, 0, 2, 3)
        y = lax.conv_general_dilated(x, w_eq, (1, 1), ((1, 2), (1, 2)),
                                     lhs_dilation=(2, 2),
                                     dimension_numbers=dn, precision=hi)
        return y + b[None, :, None, None]

    x = pool(jnp.maximum(conv(x, p["e1w"], p["e1b"]), 0.0))
    x = pool(jnp.maximum(conv(x, p["e2w"], p["e2b"]), 0.0))
    x = pool(jnp.maximum(conv(x, p["e3w"], p["e3b"]), 0.0))
    x = jnp.maximum(deconv(x, p["d1w"], p["d1b"]), 0.0)
    x = jnp.maximum(deconv(x, p["d2w"], p["d2b"]), 0.0)
    x = deconv(x, p["d3w"], p["d3b"])
    return jax.nn.sigmoid(x)


if __name__ == "__main__":
    key = jax.random.PRNGKey(0)
    kx, kp = jax.random.split(key)
    x = jax.random.uniform(kx, (2, 3, 16, 16), jnp.float32)     # small NCHW input
    params = init_params(kp)

    fwd = jax.jit(autoencoder_forward)
    y = jax.block_until_ready(fwd(x, params))
    assert y.shape == (2, 3, 16, 16) and y.dtype == jnp.float32

    y_ref = ref_forward(x, params)
    max_err = float(jnp.max(jnp.abs(y - y_ref)))
    # bf16 MXU feeds / bf16 activation storage with f32 accumulation.
    assert max_err < 4e-2, f"mismatch vs reference: {max_err}"
    print("KERNEL_OK")
</pallas_src>

<mosaic_0001>
module attributes {stable_mosaic.version = 11 : i64} {
  func.func @_conv_relu_pool_kernel(%arg0: i32, %arg1: i32, %arg2: memref<1x18x18x3xbf16, #tpu.memory_space<vmem>>, %arg3: memref<1x27x32xbf16, #tpu.memory_space<vmem>>, %arg4: memref<1x32xf32, #tpu.memory_space<vmem>>, %arg5: memref<1x8x8x32xbf16, #tpu.memory_space<vmem>>, %arg6: memref<16x16x27xbf16, #tpu.memory_space<vmem>>) attributes {dimension_semantics = [#tpu.dimension_semantics<parallel>, #tpu.dimension_semantics<parallel>], iteration_bounds = array<i64: 2, 1>, scalar_prefetch = 0 : i64, scratch_operands = 1 : i64, tpu.core_type = #tpu.core_type<tc>, window_params = [{transform_indices = @transform_0, window_bounds = array<i64: 1, 18, 18, 3>}, {pipeline_mode = #tpu.pipeline_mode<synchronous>, transform_indices = @transform_1, window_bounds = array<i64: 1, 27, 32>}, {pipeline_mode = #tpu.pipeline_mode<synchronous>, transform_indices = @transform_2, window_bounds = array<i64: 1, 32>}, {transform_indices = @transform_3, window_bounds = array<i64: 1, 8, 8, 32>}]} {
    %c16_i32 = arith.constant 16 : i32
    %0 = arith.muli %arg1, %c16_i32 : i32
    %1 = tpu.assume_multiple %0, 16 : i32
    %cst = arith.constant 0.000000e+00 : f32
    %2 = vector.broadcast %cst : f32 to vector<256x32xf32>
    %c0_i32 = arith.constant 0 : i32
    %3 = arith.addi %1, %c0_i32 : i32
    %c0 = arith.constant 0 : index
    %4 = arith.index_cast %3 : i32 to index
    %c0_0 = arith.constant 0 : index
    %c0_1 = arith.constant 0 : index
    %5 = vector.load %arg2[%c0, %4, %c0_0, %c0_1] : memref<1x18x18x3xbf16, #tpu.memory_space<vmem>>, vector<1x16x16x3xbf16>
    %6 = vector.shape_cast %5 : vector<1x16x16x3xbf16> to vector<16x16x3xbf16>
    %c0_2 = arith.constant 0 : index
    %c0_3 = arith.constant 0 : index
    %c0_4 = arith.constant 0 : index
    %7 = vector.load %arg6[%c0_2, %c0_3, %c0_4] : memref<16x16x27xbf16, #tpu.memory_space<vmem>>, vector<16x16x3xbf16>
    tpu.vector_store %arg6[%c0_2, %c0_3, %c0_4], %6 {strides = array<i32>} : memref<16x16x27xbf16, #tpu.memory_space<vmem>>, vector<16x16x3xbf16>,
    %c0_i32_5 = arith.constant 0 : i32
    %8 = arith.addi %1, %c0_i32_5 : i32
    %c0_6 = arith.constant 0 : index
    %9 = arith.index_cast %8 : i32 to index
    %c1 = arith.constant 1 : index
    %c0_7 = arith.constant 0 : index
    %10 = vector.load %arg2[%c0_6, %9, %c1, %c0_7] : memref<1x18x18x3xbf16, #tpu.memory_space<vmem>>, vector<1x16x16x3xbf16>
    %11 = vector.shape_cast %10 : vector<1x16x16x3xbf16> to vector<16x16x3xbf16>
    %c0_8 = arith.constant 0 : index
    %c0_9 = arith.constant 0 : index
    %c3 = arith.constant 3 : index
    %12 = vector.load %arg6[%c0_8, %c0_9, %c3] : memref<16x16x27xbf16, #tpu.memory_space<vmem>>, vector<16x16x3xbf16>
    tpu.vector_store %arg6[%c0_8, %c0_9, %c3], %11 {strides = array<i32>} : memref<16x16x27xbf16, #tpu.memory_space<vmem>>, vector<16x16x3xbf16>,
    %c0_i32_10 = arith.constant 0 : i32
    %13 = arith.addi %1, %c0_i32_10 : i32
    %c0_11 = arith.constant 0 : index
    %14 = arith.index_cast %13 : i32 to index
    %c2 = arith.constant 2 : index
    %c0_12 = arith.constant 0 : index
    %15 = vector.load %arg2[%c0_11, %14, %c2, %c0_12] : memref<1x18x18x3xbf16, #tpu.memory_space<vmem>>, vector<1x16x16x3xbf16>
    %16 = vector.shape_cast %15 : vector<1x16x16x3xbf16> to vector<16x16x3xbf16>
    %c0_13 = arith.constant 0 : index
    %c0_14 = arith.constant 0 : index
    %c6 = arith.constant 6 : index
    %17 = vector.load %arg6[%c0_13, %c0_14, %c6] : memref<16x16x27xbf16, #tpu.memory_space<vmem>>, vector<16x16x3xbf16>
    tpu.vector_store %arg6[%c0_13, %c0_14, %c6], %16 {strides = array<i32>} : memref<16x16x27xbf16, #tpu.memory_space<vmem>>, vector<16x16x3xbf16>,
    %c1_i32 = arith.constant 1 : i32
    %18 = arith.addi %1, %c1_i32 : i32
    %c0_15 = arith.constant 0 : index
    %19 = arith.index_cast %18 : i32 to index
    %c0_16 = arith.constant 0 : index
    %c0_17 = arith.constant 0 : index
    %20 = vector.load %arg2[%c0_15, %19, %c0_16, %c0_17] : memref<1x18x18x3xbf16, #tpu.memory_space<vmem>>, vector<1x16x16x3xbf16>
    %21 = vector.shape_cast %20 : vector<1x16x16x3xbf16> to vector<16x16x3xbf16>
    %c0_18 = arith.constant 0 : index
    %c0_19 = arith.constant 0 : index
    %c9 = arith.constant 9 : index
    %22 = vector.load %arg6[%c0_18, %c0_19, %c9] : memref<16x16x27xbf16, #tpu.memory_space<vmem>>, vector<16x16x3xbf16>
    tpu.vector_store %arg6[%c0_18, %c0_19, %c9], %21 {strides = array<i32>} : memref<16x16x27xbf16, #tpu.memory_space<vmem>>, vector<16x16x3xbf16>,
    %c1_i32_20 = arith.constant 1 : i32
    %23 = arith.addi %1, %c1_i32_20 : i32
    %c0_21 = arith.constant 0 : index
    %24 = arith.index_cast %23 : i32 to index
    %c1_22 = arith.constant 1 : index
    %c0_23 = arith.constant 0 : index
    %25 = vector.load %arg2[%c0_21, %24, %c1_22, %c0_23] : memref<1x18x18x3xbf16, #tpu.memory_space<vmem>>, vector<1x16x16x3xbf16>
    %26 = vector.shape_cast %25 : vector<1x16x16x3xbf16> to vector<16x16x3xbf16>
    %c0_24 = arith.constant 0 : index
    %c0_25 = arith.constant 0 : index
    %c12 = arith.constant 12 : index
    %27 = vector.load %arg6[%c0_24, %c0_25, %c12] : memref<16x16x27xbf16, #tpu.memory_space<vmem>>, vector<16x16x3xbf16>
    tpu.vector_store %arg6[%c0_24, %c0_25, %c12], %26 {strides = array<i32>} : memref<16x16x27xbf16, #tpu.memory_space<vmem>>, vector<16x16x3xbf16>,
    %c1_i32_26 = arith.constant 1 : i32
    %28 = arith.addi %1, %c1_i32_26 : i32
    %c0_27 = arith.constant 0 : index
    %29 = arith.index_cast %28 : i32 to index
    %c2_28 = arith.constant 2 : index
    %c0_29 = arith.constant 0 : index
    %30 = vector.load %arg2[%c0_27, %29, %c2_28, %c0_29] : memref<1x18x18x3xbf16, #tpu.memory_space<vmem>>, vector<1x16x16x3xbf16>
    %31 = vector.shape_cast %30 : vector<1x16x16x3xbf16> to vector<16x16x3xbf16>
    %c0_30 = arith.constant 0 : index
    %c0_31 = arith.constant 0 : index
    %c15 = arith.constant 15 : index
    %32 = vector.load %arg6[%c0_30, %c0_31, %c15] : memref<16x16x27xbf16, #tpu.memory_space<vmem>>, vector<16x16x3xbf16>
    tpu.vector_store %arg6[%c0_30, %c0_31, %c15], %31 {strides = array<i32>} : memref<16x16x27xbf16, #tpu.memory_space<vmem>>, vector<16x16x3xbf16>,
    %c2_i32 = arith.constant 2 : i32
    %33 = arith.addi %1, %c2_i32 : i32
    %c0_32 = arith.constant 0 : index
    %34 = arith.index_cast %33 : i32 to index
    %c0_33 = arith.constant 0 : index
    %c0_34 = arith.constant 0 : index
    %35 = vector.load %arg2[%c0_32, %34, %c0_33, %c0_34] : memref<1x18x18x3xbf16, #tpu.memory_space<vmem>>, vector<1x16x16x3xbf16>
    %36 = vector.shape_cast %35 : vector<1x16x16x3xbf16> to vector<16x16x3xbf16>
    %c0_35 = arith.constant 0 : index
    %c0_36 = arith.constant 0 : index
    %c18 = arith.constant 18 : index
    %37 = vector.load %arg6[%c0_35, %c0_36, %c18] : memref<16x16x27xbf16, #tpu.memory_space<vmem>>, vector<16x16x3xbf16>
    tpu.vector_store %arg6[%c0_35, %c0_36, %c18], %36 {strides = array<i32>} : memref<16x16x27xbf16, #tpu.memory_space<vmem>>, vector<16x16x3xbf16>,
    %c2_i32_37 = arith.constant 2 : i32
    %38 = arith.addi %1, %c2_i32_37 : i32
    %c0_38 = arith.constant 0 : index
    %39 = arith.index_cast %38 : i32 to index
    %c1_39 = arith.constant 1 : index
    %c0_40 = arith.constant 0 : index
    %40 = vector.load %arg2[%c0_38, %39, %c1_39, %c0_40] : memref<1x18x18x3xbf16, #tpu.memory_space<vmem>>, vector<1x16x16x3xbf16>
    %41 = vector.shape_cast %40 : vector<1x16x16x3xbf16> to vector<16x16x3xbf16>
    %c0_41 = arith.constant 0 : index
    %c0_42 = arith.constant 0 : index
    %c21 = arith.constant 21 : index
    %42 = vector.load %arg6[%c0_41, %c0_42, %c21] : memref<16x16x27xbf16, #tpu.memory_space<vmem>>, vector<16x16x3xbf16>
    tpu.vector_store %arg6[%c0_41, %c0_42, %c21], %41 {strides = array<i32>} : memref<16x16x27xbf16, #tpu.memory_space<vmem>>, vector<16x16x3xbf16>,
    %c2_i32_43 = arith.constant 2 : i32
    %43 = arith.addi %1, %c2_i32_43 : i32
    %c0_44 = arith.constant 0 : index
    %44 = arith.index_cast %43 : i32 to index
    %c2_45 = arith.constant 2 : index
    %c0_46 = arith.constant 0 : index
    %45 = vector.load %arg2[%c0_44, %44, %c2_45, %c0_46] : memref<1x18x18x3xbf16, #tpu.memory_space<vmem>>, vector<1x16x16x3xbf16>
    %46 = vector.shape_cast %45 : vector<1x16x16x3xbf16> to vector<16x16x3xbf16>
    %c0_47 = arith.constant 0 : index
    %c0_48 = arith.constant 0 : index
    %c24 = arith.constant 24 : index
    %47 = vector.load %arg6[%c0_47, %c0_48, %c24] : memref<16x16x27xbf16, #tpu.memory_space<vmem>>, vector<16x16x3xbf16>
    tpu.vector_store %arg6[%c0_47, %c0_48, %c24], %46 {strides = array<i32>} : memref<16x16x27xbf16, #tpu.memory_space<vmem>>, vector<16x16x3xbf16>,
    %c0_49 = arith.constant 0 : index
    %c0_50 = arith.constant 0 : index
    %c0_51 = arith.constant 0 : index
    %48 = vector.load %arg6[%c0_49, %c0_50, %c0_51] : memref<16x16x27xbf16, #tpu.memory_space<vmem>>, vector<16x16x27xbf16>
    %49 = vector.shape_cast %48 : vector<16x16x27xbf16> to vector<256x27xbf16>
    %c0_52 = arith.constant 0 : index
    %c0_53 = arith.constant 0 : index
    %c0_54 = arith.constant 0 : index
    %50 = vector.load %arg3[%c0_52, %c0_53, %c0_54] : memref<1x27x32xbf16, #tpu.memory_space<vmem>>, vector<1x27x32xbf16>
    %51 = vector.shape_cast %50 : vector<1x27x32xbf16> to vector<27x32xbf16>
    %cst_55 = arith.constant dense<0.000000e+00> : vector<256x32xf32>
    %52 = tpu.matmul %49, %51, %cst_55 {dimension_numbers = #tpu.dot_dimension_numbers<[1], [0], [0], [1], [0, 0, 1, 1], [], []>} : vector<256x27xbf16>, vector<27x32xbf16>, vector<256x32xf32> -> vector<256x32xf32>
    %53 = arith.addf %2, %52 : vector<256x32xf32>
    %c0_56 = arith.constant 0 : index
    %c0_57 = arith.constant 0 : index
    %54 = vector.load %arg4[%c0_56, %c0_57] : memref<1x32xf32, #tpu.memory_space<vmem>>, vector<1x32xf32>
    %55 = vector.broadcast %54 : vector<1x32xf32> to vector<256x32xf32>
    %56 = arith.addf %53, %55 : vector<256x32xf32>
    %cst_58 = arith.constant 0.000000e+00 : f32
    %57 = vector.broadcast %cst_58 : f32 to vector<256x32xf32>
    %58 = arith.maximumf %56, %57 : vector<256x32xf32>
    %59 = vector.shape_cast %58 : vector<256x32xf32> to vector<8x2x16x32xf32>
    %60 = vector.extract_strided_slice %59 {offsets = [0, 0, 0, 0], sizes = [8, 1, 16, 32], strides = [1, 1, 1, 1]} : vector<8x2x16x32xf32> to vector<8x1x16x32xf32>
    %61 = vector.shape_cast %60 : vector<8x1x16x32xf32> to vector<8x16x32xf32>
    %62 = vector.extract_strided_slice %59 {offsets = [0, 1, 0, 0], sizes = [8, 1, 16, 32], strides = [1, 1, 1, 1]} : vector<8x2x16x32xf32> to vector<8x1x16x32xf32>
    %63 = vector.shape_cast %62 : vector<8x1x16x32xf32> to vector<8x16x32xf32>
    %64 = arith.maximumf %61, %63 : vector<8x16x32xf32>
    %65 = vector.shape_cast %64 : vector<8x16x32xf32> to vector<8x8x2x32xf32>
    %66 = vector.extract_strided_slice %65 {offsets = [0, 0, 0, 0], sizes = [8, 8, 1, 32], strides = [1, 1, 1, 1]} : vector<8x8x2x32xf32> to vector<8x8x1x32xf32>
    %67 = vector.shape_cast %66 : vector<8x8x1x32xf32> to vector<8x8x32xf32>
    %68 = vector.extract_strided_slice %65 {offsets = [0, 0, 1, 0], sizes = [8, 8, 1, 32], strides = [1, 1, 1, 1]} : vector<8x8x2x32xf32> to vector<8x8x1x32xf32>
    %69 = vector.shape_cast %68 : vector<8x8x1x32xf32> to vector<8x8x32xf32>
    %70 = arith.maximumf %67, %69 : vector<8x8x32xf32>
    %71 = arith.truncf %70 : vector<8x8x32xf32> to vector<8x8x32xbf16>
    %c0_59 = arith.constant 0 : index
    %c0_60 = arith.constant 0 : index
    %c0_61 = arith.constant 0 : index
    %c0_62 = arith.constant 0 : index
    %72 = vector.load %arg5[%c0_59, %c0_60, %c0_61, %c0_62] : memref<1x8x8x32xbf16, #tpu.memory_space<vmem>>, vector<1x8x8x32xbf16>
    %73 = vector.shape_cast %72 : vector<1x8x8x32xbf16> to vector<8x8x32xbf16>
    %74 = vector.shape_cast %71 : vector<8x8x32xbf16> to vector<1x8x8x32xbf16>
    tpu.vector_store %arg5[%c0_59, %c0_60, %c0_61, %c0_62], %74 {strides = array<i32>} : memref<1x8x8x32xbf16, #tpu.memory_space<vmem>>, vector<1x8x8x32xbf16>,
    return
  }
  func.func @transform_0(%arg0: i32, %arg1: i32) -> (i32, i32, i32, i32) {
    %c0_i32 = arith.constant 0 : i32
    %c0_i32_0 = arith.constant 0 : i32
    %c0_i32_1 = arith.constant 0 : i32
    %c0_i32_2 = arith.constant 0 : i32
    return %arg0, %c0_i32, %c0_i32_0, %c0_i32_1 : i32, i32, i32, i32
  }
  func.func @transform_1(%arg0: i32, %arg1: i32) -> (i32, i32, i32) {
    %c0_i32 = arith.constant 0 : i32
    %c0_i32_0 = arith.constant 0 : i32
    %c0_i32_1 = arith.constant 0 : i32
    %c0_i32_2 = arith.constant 0 : i32
    return %c0_i32, %c0_i32_0, %c0_i32_1 : i32, i32, i32
  }
  func.func @transform_2(%arg0: i32, %arg1: i32) -> (i32, i32) {
    %c0_i32 = arith.constant 0 : i32
    %c0_i32_0 = arith.constant 0 : i32
    %c0_i32_1 = arith.constant 0 : i32
    return %c0_i32, %c0_i32_0 : i32, i32
  }
  func.func @transform_3(%arg0: i32, %arg1: i32) -> (i32, i32, i32, i32) {
    %c0_i32 = arith.constant 0 : i32
    %c0_i32_0 = arith.constant 0 : i32
    %c0_i32_1 = arith.constant 0 : i32
    return %arg0, %arg1, %c0_i32, %c0_i32_0 : i32, i32, i32, i32
  }
}

module attributes {stable_mosaic.version = 11 : i64} {
  func.func @_conv_relu_pool_kernel(%arg0: i32, %arg1: i32, %arg2: memref<1x10x10x32xbf16, #tpu.memory_space<vmem>>, %arg3: memref<2x256x64xbf16, #tpu.memory_space<vmem>>, %arg4: memref<1x64xf32, #tpu.memory_space<vmem>>, %arg5: memref<1x4x4x64xbf16, #tpu.memory_space<vmem>>, %arg6: memref<8x8x256xbf16, #tpu.memory_space<vmem>>) attributes {dimension_semantics = [#tpu.dimension_semantics<parallel>, #tpu.dimension_semantics<parallel>], iteration_bounds = array<i64: 2, 1>, scalar_prefetch = 0 : i64, scratch_operands = 1 : i64, tpu.core_type = #tpu.core_type<tc>, window_params = [{transform_indices = @transform_0, window_bounds = array<i64: 1, 10, 10, 32>}, {pipeline_mode = #tpu.pipeline_mode<synchronous>, transform_indices = @transform_1, window_bounds = array<i64: 2, 256, 64>}, {pipeline_mode = #tpu.pipeline_mode<synchronous>, transform_indices = @transform_2, window_bounds = array<i64: 1, 64>}, {transform_indices = @transform_3, window_bounds = array<i64: 1, 4, 4, 64>}]} {
    %c8_i32 = arith.constant 8 : i32
    %0 = arith.muli %arg1, %c8_i32 : i32
    %1 = tpu.assume_multiple %0, 8 : i32
    %cst = arith.constant 0.000000e+00 : f32
    %2 = vector.broadcast %cst : f32 to vector<64x64xf32>
    %c0_i32 = arith.constant 0 : i32
    %3 = arith.addi %1, %c0_i32 : i32
    %c0 = arith.constant 0 : index
    %4 = arith.index_cast %3 : i32 to index
    %c0_0 = arith.constant 0 : index
    %c0_1 = arith.constant 0 : index
    %5 = vector.load %arg2[%c0, %4, %c0_0, %c0_1] : memref<1x10x10x32xbf16, #tpu.memory_space<vmem>>, vector<1x8x8x32xbf16>
    %6 = vector.shape_cast %5 : vector<1x8x8x32xbf16> to vector<8x8x32xbf16>
    %c0_2 = arith.constant 0 : index
    %c0_3 = arith.constant 0 : index
    %c0_4 = arith.constant 0 : index
    %7 = vector.load %arg6[%c0_2, %c0_3, %c0_4] : memref<8x8x256xbf16, #tpu.memory_space<vmem>>, vector<8x8x32xbf16>
    tpu.vector_store %arg6[%c0_2, %c0_3, %c0_4], %6 {strides = array<i32>} : memref<8x8x256xbf16, #tpu.memory_space<vmem>>, vector<8x8x32xbf16>,
    %c0_i32_5 = arith.constant 0 : i32
    %8 = arith.addi %1, %c0_i32_5 : i32
    %c0_6 = arith.constant 0 : index
    %9 = arith.index_cast %8 : i32 to index
    %c1 = arith.constant 1 : index
    %c0_7 = arith.constant 0 : index
    %10 = vector.load %arg2[%c0_6, %9, %c1, %c0_7] : memref<1x10x10x32xbf16, #tpu.memory_space<vmem>>, vector<1x8x8x32xbf16>
    %11 = vector.shape_cast %10 : vector<1x8x8x32xbf16> to vector<8x8x32xbf16>
    %c0_8 = arith.constant 0 : index
    %c0_9 = arith.constant 0 : index
    %c32 = arith.constant 32 : index
    %12 = vector.load %arg6[%c0_8, %c0_9, %c32] : memref<8x8x256xbf16, #tpu.memory_space<vmem>>, vector<8x8x32xbf16>
    tpu.vector_store %arg6[%c0_8, %c0_9, %c32], %11 {strides = array<i32>} : memref<8x8x256xbf16, #tpu.memory_space<vmem>>, vector<8x8x32xbf16>,
    %c0_i32_10 = arith.constant 0 : i32
    %13 = arith.addi %1, %c0_i32_10 : i32
    %c0_11 = arith.constant 0 : index
    %14 = arith.index_cast %13 : i32 to index
    %c2 = arith.constant 2 : index
    %c0_12 = arith.constant 0 : index
    %15 = vector.load %arg2[%c0_11, %14, %c2, %c0_12] : memref<1x10x10x32xbf16, #tpu.memory_space<vmem>>, vector<1x8x8x32xbf16>
    %16 = vector.shape_cast %15 : vector<1x8x8x32xbf16> to vector<8x8x32xbf16>
    %c0_13 = arith.constant 0 : index
    %c0_14 = arith.constant 0 : index
    %c64 = arith.constant 64 : index
    %17 = vector.load %arg6[%c0_13, %c0_14, %c64] : memref<8x8x256xbf16, #tpu.memory_space<vmem>>, vector<8x8x32xbf16>
    tpu.vector_store %arg6[%c0_13, %c0_14, %c64], %16 {strides = array<i32>} : memref<8x8x256xbf16, #tpu.memory_space<vmem>>, vector<8x8x32xbf16>,
    %c1_i32 = arith.constant 1 : i32
    %18 = arith.addi %1, %c1_i32 : i32
    %c0_15 = arith.constant 0 : index
    %19 = arith.index_cast %18 : i32 to index
    %c0_16 = arith.constant 0 : index
    %c0_17 = arith.constant 0 : index
    %20 = vector.load %arg2[%c0_15, %19, %c0_16, %c0_17] : memref<1x10x10x32xbf16, #tpu.memory_space<vmem>>, vector<1x8x8x32xbf16>
    %21 = vector.shape_cast %20 : vector<1x8x8x32xbf16> to vector<8x8x32xbf16>
    %c0_18 = arith.constant 0 : index
    %c0_19 = arith.constant 0 : index
    %c96 = arith.constant 96 : index
    %22 = vector.load %arg6[%c0_18, %c0_19, %c96] : memref<8x8x256xbf16, #tpu.memory_space<vmem>>, vector<8x8x32xbf16>
    tpu.vector_store %arg6[%c0_18, %c0_19, %c96], %21 {strides = array<i32>} : memref<8x8x256xbf16, #tpu.memory_space<vmem>>, vector<8x8x32xbf16>,
    %c1_i32_20 = arith.constant 1 : i32
    %23 = arith.addi %1, %c1_i32_20 : i32
    %c0_21 = arith.constant 0 : index
    %24 = arith.index_cast %23 : i32 to index
    %c1_22 = arith.constant 1 : index
    %c0_23 = arith.constant 0 : index
    %25 = vector.load %arg2[%c0_21, %24, %c1_22, %c0_23] : memref<1x10x10x32xbf16, #tpu.memory_space<vmem>>, vector<1x8x8x32xbf16>
    %26 = vector.shape_cast %25 : vector<1x8x8x32xbf16> to vector<8x8x32xbf16>
    %c0_24 = arith.constant 0 : index
    %c0_25 = arith.constant 0 : index
    %c128 = arith.constant 128 : index
    %27 = vector.load %arg6[%c0_24, %c0_25, %c128] : memref<8x8x256xbf16, #tpu.memory_space<vmem>>, vector<8x8x32xbf16>
    tpu.vector_store %arg6[%c0_24, %c0_25, %c128], %26 {strides = array<i32>} : memref<8x8x256xbf16, #tpu.memory_space<vmem>>, vector<8x8x32xbf16>,
    %c1_i32_26 = arith.constant 1 : i32
    %28 = arith.addi %1, %c1_i32_26 : i32
    %c0_27 = arith.constant 0 : index
    %29 = arith.index_cast %28 : i32 to index
    %c2_28 = arith.constant 2 : index
    %c0_29 = arith.constant 0 : index
    %30 = vector.load %arg2[%c0_27, %29, %c2_28, %c0_29] : memref<1x10x10x32xbf16, #tpu.memory_space<vmem>>, vector<1x8x8x32xbf16>
    %31 = vector.shape_cast %30 : vector<1x8x8x32xbf16> to vector<8x8x32xbf16>
    %c0_30 = arith.constant 0 : index
    %c0_31 = arith.constant 0 : index
    %c160 = arith.constant 160 : index
    %32 = vector.load %arg6[%c0_30, %c0_31, %c160] : memref<8x8x256xbf16, #tpu.memory_space<vmem>>, vector<8x8x32xbf16>
    tpu.vector_store %arg6[%c0_30, %c0_31, %c160], %31 {strides = array<i32>} : memref<8x8x256xbf16, #tpu.memory_space<vmem>>, vector<8x8x32xbf16>,
    %c2_i32 = arith.constant 2 : i32
    %33 = arith.addi %1, %c2_i32 : i32
    %c0_32 = arith.constant 0 : index
    %34 = arith.index_cast %33 : i32 to index
    %c0_33 = arith.constant 0 : index
    %c0_34 = arith.constant 0 : index
    %35 = vector.load %arg2[%c0_32, %34, %c0_33, %c0_34] : memref<1x10x10x32xbf16, #tpu.memory_space<vmem>>, vector<1x8x8x32xbf16>
    %36 = vector.shape_cast %35 : vector<1x8x8x32xbf16> to vector<8x8x32xbf16>
    %c0_35 = arith.constant 0 : index
    %c0_36 = arith.constant 0 : index
    %c192 = arith.constant 192 : index
    %37 = vector.load %arg6[%c0_35, %c0_36, %c192] : memref<8x8x256xbf16, #tpu.memory_space<vmem>>, vector<8x8x32xbf16>
    tpu.vector_store %arg6[%c0_35, %c0_36, %c192], %36 {strides = array<i32>} : memref<8x8x256xbf16, #tpu.memory_space<vmem>>, vector<8x8x32xbf16>,
    %c2_i32_37 = arith.constant 2 : i32
    %38 = arith.addi %1, %c2_i32_37 : i32
    %c0_38 = arith.constant 0 : index
    %39 = arith.index_cast %38 : i32 to index
    %c1_39 = arith.constant 1 : index
    %c0_40 = arith.constant 0 : index
    %40 = vector.load %arg2[%c0_38, %39, %c1_39, %c0_40] : memref<1x10x10x32xbf16, #tpu.memory_space<vmem>>, vector<1x8x8x32xbf16>
    %41 = vector.shape_cast %40 : vector<1x8x8x32xbf16> to vector<8x8x32xbf16>
    %c0_41 = arith.constant 0 : index
    %c0_42 = arith.constant 0 : index
    %c224 = arith.constant 224 : index
    %42 = vector.load %arg6[%c0_41, %c0_42, %c224] : memref<8x8x256xbf16, #tpu.memory_space<vmem>>, vector<8x8x32xbf16>
    tpu.vector_store %arg6[%c0_41, %c0_42, %c224], %41 {strides = array<i32>} : memref<8x8x256xbf16, #tpu.memory_space<vmem>>, vector<8x8x32xbf16>,
    %c0_43 = arith.constant 0 : index
    %c0_44 = arith.constant 0 : index
    %c0_45 = arith.constant 0 : index
    %43 = vector.load %arg6[%c0_43, %c0_44, %c0_45] : memref<8x8x256xbf16, #tpu.memory_space<vmem>>, vector<8x8x256xbf16>
    %44 = vector.shape_cast %43 : vector<8x8x256xbf16> to vector<64x256xbf16>
    %c0_46 = arith.constant 0 : index
    %c0_47 = arith.constant 0 : index
    %c0_48 = arith.constant 0 : index
    %45 = vector.load %arg3[%c0_46, %c0_47, %c0_48] : memref<2x256x64xbf16, #tpu.memory_space<vmem>>, vector<1x256x64xbf16>
    %46 = vector.shape_cast %45 : vector<1x256x64xbf16> to vector<256x64xbf16>
    %cst_49 = arith.constant dense<0.000000e+00> : vector<64x64xf32>
    %47 = tpu.matmul %44, %46, %cst_49 {dimension_numbers = #tpu.dot_dimension_numbers<[1], [0], [0], [1], [0, 0, 1, 1], [], []>} : vector<64x256xbf16>, vector<256x64xbf16>, vector<64x64xf32> -> vector<64x64xf32>
    %48 = arith.addf %2, %47 : vector<64x64xf32>
    %c2_i32_50 = arith.constant 2 : i32
    %49 = arith.addi %1, %c2_i32_50 : i32
    %c0_51 = arith.constant 0 : index
    %50 = arith.index_cast %49 : i32 to index
    %c2_52 = arith.constant 2 : index
    %c0_53 = arith.constant 0 : index
    %51 = vector.load %arg2[%c0_51, %50, %c2_52, %c0_53] : memref<1x10x10x32xbf16, #tpu.memory_space<vmem>>, vector<1x8x8x32xbf16>
    %52 = vector.shape_cast %51 : vector<1x8x8x32xbf16> to vector<8x8x32xbf16>
    %c0_54 = arith.constant 0 : index
    %c0_55 = arith.constant 0 : index
    %c0_56 = arith.constant 0 : index
    %53 = vector.load %arg6[%c0_54, %c0_55, %c0_56] : memref<8x8x256xbf16, #tpu.memory_space<vmem>>, vector<8x8x32xbf16>
    tpu.vector_store %arg6[%c0_54, %c0_55, %c0_56], %52 {strides = array<i32>} : memref<8x8x256xbf16, #tpu.memory_space<vmem>>, vector<8x8x32xbf16>,
    %c0_57 = arith.constant 0 : index
    %c0_58 = arith.constant 0 : index
    %c0_59 = arith.constant 0 : index
    %54 = vector.load %arg6[%c0_57, %c0_58, %c0_59] : memref<8x8x256xbf16, #tpu.memory_space<vmem>>, vector<8x8x256xbf16>
    %55 = vector.shape_cast %54 : vector<8x8x256xbf16> to vector<64x256xbf16>
    %c1_60 = arith.constant 1 : index
    %c0_61 = arith.constant 0 : index
    %c0_62 = arith.constant 0 : index
    %56 = vector.load %arg3[%c1_60, %c0_61, %c0_62] : memref<2x256x64xbf16, #tpu.memory_space<vmem>>, vector<1x256x64xbf16>
    %57 = vector.shape_cast %56 : vector<1x256x64xbf16> to vector<256x64xbf16>
    %cst_63 = arith.constant dense<0.000000e+00> : vector<64x64xf32>
    %58 = tpu.matmul %55, %57, %cst_63 {dimension_numbers = #tpu.dot_dimension_numbers<[1], [0], [0], [1], [0, 0, 1, 1], [], []>} : vector<64x256xbf16>, vector<256x64xbf16>, vector<64x64xf32> -> vector<64x64xf32>
    %59 = arith.addf %48, %58 : vector<64x64xf32>
    %c0_64 = arith.constant 0 : index
    %c0_65 = arith.constant 0 : index
    %60 = vector.load %arg4[%c0_64, %c0_65] : memref<1x64xf32, #tpu.memory_space<vmem>>, vector<1x64xf32>
    %61 = vector.broadcast %60 : vector<1x64xf32> to vector<64x64xf32>
    %62 = arith.addf %59, %61 : vector<64x64xf32>
    %cst_66 = arith.constant 0.000000e+00 : f32
    %63 = vector.broadcast %cst_66 : f32 to vector<64x64xf32>
    %64 = arith.maximumf %62, %63 : vector<64x64xf32>
    %65 = vector.shape_cast %64 : vector<64x64xf32> to vector<4x2x8x64xf32>
    %66 = vector.extract_strided_slice %65 {offsets = [0, 0, 0, 0], sizes = [4, 1, 8, 64], strides = [1, 1, 1, 1]} : vector<4x2x8x64xf32> to vector<4x1x8x64xf32>
    %67 = vector.shape_cast %66 : vector<4x1x8x64xf32> to vector<4x8x64xf32>
    %68 = vector.extract_strided_slice %65 {offsets = [0, 1, 0, 0], sizes = [4, 1, 8, 64], strides = [1, 1, 1, 1]} : vector<4x2x8x64xf32> to vector<4x1x8x64xf32>
    %69 = vector.shape_cast %68 : vector<4x1x8x64xf32> to vector<4x8x64xf32>
    %70 = arith.maximumf %67, %69 : vector<4x8x64xf32>
    %71 = vector.shape_cast %70 : vector<4x8x64xf32> to vector<4x4x2x64xf32>
    %72 = vector.extract_strided_slice %71 {offsets = [0, 0, 0, 0], sizes = [4, 4, 1, 64], strides = [1, 1, 1, 1]} : vector<4x4x2x64xf32> to vector<4x4x1x64xf32>
    %73 = vector.shape_cast %72 : vector<4x4x1x64xf32> to vector<4x4x64xf32>
    %74 = vector.extract_strided_slice %71 {offsets = [0, 0, 1, 0], sizes = [4, 4, 1, 64], strides = [1, 1, 1, 1]} : vector<4x4x2x64xf32> to vector<4x4x1x64xf32>
    %75 = vector.shape_cast %74 : vector<4x4x1x64xf32> to vector<4x4x64xf32>
    %76 = arith.maximumf %73, %75 : vector<4x4x64xf32>
    %77 = arith.truncf %76 : vector<4x4x64xf32> to vector<4x4x64xbf16>
    %c0_67 = arith.constant 0 : index
    %c0_68 = arith.constant 0 : index
    %c0_69 = arith.constant 0 : index
    %c0_70 = arith.constant 0 : index
    %78 = vector.load %arg5[%c0_67, %c0_68, %c0_69, %c0_70] : memref<1x4x4x64xbf16, #tpu.memory_space<vmem>>, vector<1x4x4x64xbf16>
    %79 = vector.shape_cast %78 : vector<1x4x4x64xbf16> to vector<4x4x64xbf16>
    %80 = vector.shape_cast %77 : vector<4x4x64xbf16> to vector<1x4x4x64xbf16>
    tpu.vector_store %arg5[%c0_67, %c0_68, %c0_69, %c0_70], %80 {strides = array<i32>} : memref<1x4x4x64xbf16, #tpu.memory_space<vmem>>, vector<1x4x4x64xbf16>,
    return
  }
  func.func @transform_0(%arg0: i32, %arg1: i32) -> (i32, i32, i32, i32) {
    %c0_i32 = arith.constant 0 : i32
    %c0_i32_0 = arith.constant 0 : i32
    %c0_i32_1 = arith.constant 0 : i32
    %c0_i32_2 = arith.constant 0 : i32
    return %arg0, %c0_i32, %c0_i32_0, %c0_i32_1 : i32, i32, i32, i32
  }
  func.func @transform_1(%arg0: i32, %arg1: i32) -> (i32, i32, i32) {
    %c0_i32 = arith.constant 0 : i32
    %c0_i32_0 = arith.constant 0 : i32
    %c0_i32_1 = arith.constant 0 : i32
    %c0_i32_2 = arith.constant 0 : i32
    return %c0_i32, %c0_i32_0, %c0_i32_1 : i32, i32, i32
  }
  func.func @transform_2(%arg0: i32, %arg1: i32) -> (i32, i32) {
    %c0_i32 = arith.constant 0 : i32
    %c0_i32_0 = arith.constant 0 : i32
    %c0_i32_1 = arith.constant 0 : i32
    return %c0_i32, %c0_i32_0 : i32, i32
  }
  func.func @transform_3(%arg0: i32, %arg1: i32) -> (i32, i32, i32, i32) {
    %c0_i32 = arith.constant 0 : i32
    %c0_i32_0 = arith.constant 0 : i32
    %c0_i32_1 = arith.constant 0 : i32
    return %arg0, %arg1, %c0_i32, %c0_i32_0 : i32, i32, i32, i32
  }
}

module attributes {stable_mosaic.version = 11 : i64} {
  func.func @_conv_relu_pool_kernel(%arg0: i32, %arg1: i32, %arg2: memref<1x6x10x64xbf16, #tpu.memory_space<vmem>>, %arg3: memref<3x256x128xbf16, #tpu.memory_space<vmem>>, %arg4: memref<1x128xf32, #tpu.memory_space<vmem>>, %arg5: memref<1x2x2x128xbf16, #tpu.memory_space<vmem>>, %arg6: memref<4x8x256xbf16, #tpu.memory_space<vmem>>) attributes {dimension_semantics = [#tpu.dimension_semantics<parallel>, #tpu.dimension_semantics<parallel>], iteration_bounds = array<i64: 2, 1>, scalar_prefetch = 0 : i64, scratch_operands = 1 : i64, tpu.core_type = #tpu.core_type<tc>, window_params = [{transform_indices = @transform_0, window_bounds = array<i64: 1, 6, 10, 64>}, {pipeline_mode = #tpu.pipeline_mode<synchronous>, transform_indices = @transform_1, window_bounds = array<i64: 3, 256, 128>}, {pipeline_mode = #tpu.pipeline_mode<synchronous>, transform_indices = @transform_2, window_bounds = array<i64: 1, 128>}, {transform_indices = @transform_3, window_bounds = array<i64: 1, 2, 2, 128>}]} {
    %c4_i32 = arith.constant 4 : i32
    %0 = arith.muli %arg1, %c4_i32 : i32
    %1 = tpu.assume_multiple %0, 4 : i32
    %cst = arith.constant 0.000000e+00 : f32
    %2 = vector.broadcast %cst : f32 to vector<32x128xf32>
    %c0_i32 = arith.constant 0 : i32
    %3 = arith.addi %1, %c0_i32 : i32
    %c0 = arith.constant 0 : index
    %4 = arith.index_cast %3 : i32 to index
    %c0_0 = arith.constant 0 : index
    %c0_1 = arith.constant 0 : index
    %5 = vector.load %arg2[%c0, %4, %c0_0, %c0_1] : memref<1x6x10x64xbf16, #tpu.memory_space<vmem>>, vector<1x4x8x64xbf16>
    %6 = vector.shape_cast %5 : vector<1x4x8x64xbf16> to vector<4x8x64xbf16>
    %c0_2 = arith.constant 0 : index
    %c0_3 = arith.constant 0 : index
    %c0_4 = arith.constant 0 : index
    %7 = vector.load %arg6[%c0_2, %c0_3, %c0_4] : memref<4x8x256xbf16, #tpu.memory_space<vmem>>, vector<4x8x64xbf16>
    tpu.vector_store %arg6[%c0_2, %c0_3, %c0_4], %6 {strides = array<i32>} : memref<4x8x256xbf16, #tpu.memory_space<vmem>>, vector<4x8x64xbf16>,
    %c0_i32_5 = arith.constant 0 : i32
    %8 = arith.addi %1, %c0_i32_5 : i32
    %c0_6 = arith.constant 0 : index
    %9 = arith.index_cast %8 : i32 to index
    %c1 = arith.constant 1 : index
    %c0_7 = arith.constant 0 : index
    %10 = vector.load %arg2[%c0_6, %9, %c1, %c0_7] : memref<1x6x10x64xbf16, #tpu.memory_space<vmem>>, vector<1x4x8x64xbf16>
    %11 = vector.shape_cast %10 : vector<1x4x8x64xbf16> to vector<4x8x64xbf16>
    %c0_8 = arith.constant 0 : index
    %c0_9 = arith.constant 0 : index
    %c64 = arith.constant 64 : index
    %12 = vector.load %arg6[%c0_8, %c0_9, %c64] : memref<4x8x256xbf16, #tpu.memory_space<vmem>>, vector<4x8x64xbf16>
    tpu.vector_store %arg6[%c0_8, %c0_9, %c64], %11 {strides = array<i32>} : memref<4x8x256xbf16, #tpu.memory_space<vmem>>, vector<4x8x64xbf16>,
    %c0_i32_10 = arith.constant 0 : i32
    %13 = arith.addi %1, %c0_i32_10 : i32
    %c0_11 = arith.constant 0 : index
    %14 = arith.index_cast %13 : i32 to index
    %c2 = arith.constant 2 : index
    %c0_12 = arith.constant 0 : index
    %15 = vector.load %arg2[%c0_11, %14, %c2, %c0_12] : memref<1x6x10x64xbf16, #tpu.memory_space<vmem>>, vector<1x4x8x64xbf16>
    %16 = vector.shape_cast %15 : vector<1x4x8x64xbf16> to vector<4x8x64xbf16>
    %c0_13 = arith.constant 0 : index
    %c0_14 = arith.constant 0 : index
    %c128 = arith.constant 128 : index
    %17 = vector.load %arg6[%c0_13, %c0_14, %c128] : memref<4x8x256xbf16, #tpu.memory_space<vmem>>, vector<4x8x64xbf16>
    tpu.vector_store %arg6[%c0_13, %c0_14, %c128], %16 {strides = array<i32>} : memref<4x8x256xbf16, #tpu.memory_space<vmem>>, vector<4x8x64xbf16>,
    %c1_i32 = arith.constant 1 : i32
    %18 = arith.addi %1, %c1_i32 : i32
    %c0_15 = arith.constant 0 : index
    %19 = arith.index_cast %18 : i32 to index
    %c0_16 = arith.constant 0 : index
    %c0_17 = arith.constant 0 : index
    %20 = vector.load %arg2[%c0_15, %19, %c0_16, %c0_17] : memref<1x6x10x64xbf16, #tpu.memory_space<vmem>>, vector<1x4x8x64xbf16>
    %21 = vector.shape_cast %20 : vector<1x4x8x64xbf16> to vector<4x8x64xbf16>
    %c0_18 = arith.constant 0 : index
    %c0_19 = arith.constant 0 : index
    %c192 = arith.constant 192 : index
    %22 = vector.load %arg6[%c0_18, %c0_19, %c192] : memref<4x8x256xbf16, #tpu.memory_space<vmem>>, vector<4x8x64xbf16>
    tpu.vector_store %arg6[%c0_18, %c0_19, %c192], %21 {strides = array<i32>} : memref<4x8x256xbf16, #tpu.memory_space<vmem>>, vector<4x8x64xbf16>,
    %c0_20 = arith.constant 0 : index
    %c0_21 = arith.constant 0 : index
    %c0_22 = arith.constant 0 : index
    %23 = vector.load %arg6[%c0_20, %c0_21, %c0_22] : memref<4x8x256xbf16, #tpu.memory_space<vmem>>, vector<4x8x256xbf16>
    %24 = vector.shape_cast %23 : vector<4x8x256xbf16> to vector<32x256xbf16>
    %c0_23 = arith.constant 0 : index
    %c0_24 = arith.constant 0 : index
    %c0_25 = arith.constant 0 : index
    %25 = vector.load %arg3[%c0_23, %c0_24, %c0_25] : memref<3x256x128xbf16, #tpu.memory_space<vmem>>, vector<1x256x128xbf16>
    %26 = vector.shape_cast %25 : vector<1x256x128xbf16> to vector<256x128xbf16>
    %cst_26 = arith.constant dense<0.000000e+00> : vector<32x128xf32>
    %27 = tpu.matmul %24, %26, %cst_26 {dimension_numbers = #tpu.dot_dimension_numbers<[1], [0], [0], [1], [0, 0, 1, 1], [], []>} : vector<32x256xbf16>, vector<256x128xbf16>, vector<32x128xf32> -> vector<32x128xf32>
    %28 = arith.addf %2, %27 : vector<32x128xf32>
    %c1_i32_27 = arith.constant 1 : i32
    %29 = arith.addi %1, %c1_i32_27 : i32
    %c0_28 = arith.constant 0 : index
    %30 = arith.index_cast %29 : i32 to index
    %c1_29 = arith.constant 1 : index
    %c0_30 = arith.constant 0 : index
    %31 = vector.load %arg2[%c0_28, %30, %c1_29, %c0_30] : memref<1x6x10x64xbf16, #tpu.memory_space<vmem>>, vector<1x4x8x64xbf16>
    %32 = vector.shape_cast %31 : vector<1x4x8x64xbf16> to vector<4x8x64xbf16>
    %c0_31 = arith.constant 0 : index
    %c0_32 = arith.constant 0 : index
    %c0_33 = arith.constant 0 : index
    %33 = vector.load %arg6[%c0_31, %c0_32, %c0_33] : memref<4x8x256xbf16, #tpu.memory_space<vmem>>, vector<4x8x64xbf16>
    tpu.vector_store %arg6[%c0_31, %c0_32, %c0_33], %32 {strides = array<i32>} : memref<4x8x256xbf16, #tpu.memory_space<vmem>>, vector<4x8x64xbf16>,
    %c1_i32_34 = arith.constant 1 : i32
    %34 = arith.addi %1, %c1_i32_34 : i32
    %c0_35 = arith.constant 0 : index
    %35 = arith.index_cast %34 : i32 to index
    %c2_36 = arith.constant 2 : index
    %c0_37 = arith.constant 0 : index
    %36 = vector.load %arg2[%c0_35, %35, %c2_36, %c0_37] : memref<1x6x10x64xbf16, #tpu.memory_space<vmem>>, vector<1x4x8x64xbf16>
    %37 = vector.shape_cast %36 : vector<1x4x8x64xbf16> to vector<4x8x64xbf16>
    %c0_38 = arith.constant 0 : index
    %c0_39 = arith.constant 0 : index
    %c64_40 = arith.constant 64 : index
    %38 = vector.load %arg6[%c0_38, %c0_39, %c64_40] : memref<4x8x256xbf16, #tpu.memory_space<vmem>>, vector<4x8x64xbf16>
    tpu.vector_store %arg6[%c0_38, %c0_39, %c64_40], %37 {strides = array<i32>} : memref<4x8x256xbf16, #tpu.memory_space<vmem>>, vector<4x8x64xbf16>,
    %c2_i32 = arith.constant 2 : i32
    %39 = arith.addi %1, %c2_i32 : i32
    %c0_41 = arith.constant 0 : index
    %40 = arith.index_cast %39 : i32 to index
    %c0_42 = arith.constant 0 : index
    %c0_43 = arith.constant 0 : index
    %41 = vector.load %arg2[%c0_41, %40, %c0_42, %c0_43] : memref<1x6x10x64xbf16, #tpu.memory_space<vmem>>, vector<1x4x8x64xbf16>
    %42 = vector.shape_cast %41 : vector<1x4x8x64xbf16> to vector<4x8x64xbf16>
    %c0_44 = arith.constant 0 : index
    %c0_45 = arith.constant 0 : index
    %c128_46 = arith.constant 128 : index
    %43 = vector.load %arg6[%c0_44, %c0_45, %c128_46] : memref<4x8x256xbf16, #tpu.memory_space<vmem>>, vector<4x8x64xbf16>
    tpu.vector_store %arg6[%c0_44, %c0_45, %c128_46], %42 {strides = array<i32>} : memref<4x8x256xbf16, #tpu.memory_space<vmem>>, vector<4x8x64xbf16>,
    %c2_i32_47 = arith.constant 2 : i32
    %44 = arith.addi %1, %c2_i32_47 : i32
    %c0_48 = arith.constant 0 : index
    %45 = arith.index_cast %44 : i32 to index
    %c1_49 = arith.constant 1 : index
    %c0_50 = arith.constant 0 : index
    %46 = vector.load %arg2[%c0_48, %45, %c1_49, %c0_50] : memref<1x6x10x64xbf16, #tpu.memory_space<vmem>>, vector<1x4x8x64xbf16>
    %47 = vector.shape_cast %46 : vector<1x4x8x64xbf16> to vector<4x8x64xbf16>
    %c0_51 = arith.constant 0 : index
    %c0_52 = arith.constant 0 : index
    %c192_53 = arith.constant 192 : index
    %48 = vector.load %arg6[%c0_51, %c0_52, %c192_53] : memref<4x8x256xbf16, #tpu.memory_space<vmem>>, vector<4x8x64xbf16>
    tpu.vector_store %arg6[%c0_51, %c0_52, %c192_53], %47 {strides = array<i32>} : memref<4x8x256xbf16, #tpu.memory_space<vmem>>, vector<4x8x64xbf16>,
    %c0_54 = arith.constant 0 : index
    %c0_55 = arith.constant 0 : index
    %c0_56 = arith.constant 0 : index
    %49 = vector.load %arg6[%c0_54, %c0_55, %c0_56] : memref<4x8x256xbf16, #tpu.memory_space<vmem>>, vector<4x8x256xbf16>
    %50 = vector.shape_cast %49 : vector<4x8x256xbf16> to vector<32x256xbf16>
    %c1_57 = arith.constant 1 : index
    %c0_58 = arith.constant 0 : index
    %c0_59 = arith.constant 0 : index
    %51 = vector.load %arg3[%c1_57, %c0_58, %c0_59] : memref<3x256x128xbf16, #tpu.memory_space<vmem>>, vector<1x256x128xbf16>
    %52 = vector.shape_cast %51 : vector<1x256x128xbf16> to vector<256x128xbf16>
    %cst_60 = arith.constant dense<0.000000e+00> : vector<32x128xf32>
    %53 = tpu.matmul %50, %52, %cst_60 {dimension_numbers = #tpu.dot_dimension_numbers<[1], [0], [0], [1], [0, 0, 1, 1], [], []>} : vector<32x256xbf16>, vector<256x128xbf16>, vector<32x128xf32> -> vector<32x128xf32>
    %54 = arith.addf %28, %53 : vector<32x128xf32>
    %c2_i32_61 = arith.constant 2 : i32
    %55 = arith.addi %1, %c2_i32_61 : i32
    %c0_62 = arith.constant 0 : index
    %56 = arith.index_cast %55 : i32 to index
    %c2_63 = arith.constant 2 : index
    %c0_64 = arith.constant 0 : index
    %57 = vector.load %arg2[%c0_62, %56, %c2_63, %c0_64] : memref<1x6x10x64xbf16, #tpu.memory_space<vmem>>, vector<1x4x8x64xbf16>
    %58 = vector.shape_cast %57 : vector<1x4x8x64xbf16> to vector<4x8x64xbf16>
    %c0_65 = arith.constant 0 : index
    %c0_66 = arith.constant 0 : index
    %c0_67 = arith.constant 0 : index
    %59 = vector.load %arg6[%c0_65, %c0_66, %c0_67] : memref<4x8x256xbf16, #tpu.memory_space<vmem>>, vector<4x8x64xbf16>
    tpu.vector_store %arg6[%c0_65, %c0_66, %c0_67], %58 {strides = array<i32>} : memref<4x8x256xbf16, #tpu.memory_space<vmem>>, vector<4x8x64xbf16>,
    %c0_68 = arith.constant 0 : index
    %c0_69 = arith.constant 0 : index
    %c0_70 = arith.constant 0 : index
    %60 = vector.load %arg6[%c0_68, %c0_69, %c0_70] : memref<4x8x256xbf16, #tpu.memory_space<vmem>>, vector<4x8x256xbf16>
    %61 = vector.shape_cast %60 : vector<4x8x256xbf16> to vector<32x256xbf16>
    %c2_71 = arith.constant 2 : index
    %c0_72 = arith.constant 0 : index
    %c0_73 = arith.constant 0 : index
    %62 = vector.load %arg3[%c2_71, %c0_72, %c0_73] : memref<3x256x128xbf16, #tpu.memory_space<vmem>>, vector<1x256x128xbf16>
    %63 = vector.shape_cast %62 : vector<1x256x128xbf16> to vector<256x128xbf16>
    %cst_74 = arith.constant dense<0.000000e+00> : vector<32x128xf32>
    %64 = tpu.matmul %61, %63, %cst_74 {dimension_numbers = #tpu.dot_dimension_numbers<[1], [0], [0], [1], [0, 0, 1, 1], [], []>} : vector<32x256xbf16>, vector<256x128xbf16>, vector<32x128xf32> -> vector<32x128xf32>
    %65 = arith.addf %54, %64 : vector<32x128xf32>
    %c0_75 = arith.constant 0 : index
    %c0_76 = arith.constant 0 : index
    %66 = vector.load %arg4[%c0_75, %c0_76] : memref<1x128xf32, #tpu.memory_space<vmem>>, vector<1x128xf32>
    %67 = vector.broadcast %66 : vector<1x128xf32> to vector<32x128xf32>
    %68 = arith.addf %65, %67 : vector<32x128xf32>
    %cst_77 = arith.constant 0.000000e+00 : f32
    %69 = vector.broadcast %cst_77 : f32 to vector<32x128xf32>
    %70 = arith.maximumf %68, %69 : vector<32x128xf32>
    %71 = vector.shape_cast %70 : vector<32x128xf32> to vector<2x2x8x128xf32>
    %72 = vector.extract_strided_slice %71 {offsets = [0, 0, 0, 0], sizes = [2, 1, 8, 128], strides = [1, 1, 1, 1]} : vector<2x2x8x128xf32> to vector<2x1x8x128xf32>
    %73 = vector.shape_cast %72 : vector<2x1x8x128xf32> to vector<2x8x128xf32>
    %74 = vector.extract_strided_slice %71 {offsets = [0, 1, 0, 0], sizes = [2, 1, 8, 128], strides = [1, 1, 1, 1]} : vector<2x2x8x128xf32> to vector<2x1x8x128xf32>
    %75 = vector.shape_cast %74 : vector<2x1x8x128xf32> to vector<2x8x128xf32>
    %76 = arith.maximumf %73, %75 : vector<2x8x128xf32>
    %77 = vector.shape_cast %76 : vector<2x8x128xf32> to vector<2x4x2x128xf32>
    %78 = vector.extract_strided_slice %77 {offsets = [0, 0, 0, 0], sizes = [2, 4, 1, 128], strides = [1, 1, 1, 1]} : vector<2x4x2x128xf32> to vector<2x4x1x128xf32>
    %79 = vector.shape_cast %78 : vector<2x4x1x128xf32> to vector<2x4x128xf32>
    %80 = vector.extract_strided_slice %77 {offsets = [0, 0, 1, 0], sizes = [2, 4, 1, 128], strides = [1, 1, 1, 1]} : vector<2x4x2x128xf32> to vector<2x4x1x128xf32>
    %81 = vector.shape_cast %80 : vector<2x4x1x128xf32> to vector<2x4x128xf32>
    %82 = arith.maximumf %79, %81 : vector<2x4x128xf32>
    %83 = vector.extract_strided_slice %82 {offsets = [0, 0, 0], sizes = [2, 2, 128], strides = [1, 1, 1]} : vector<2x4x128xf32> to vector<2x2x128xf32>
    %84 = arith.truncf %83 : vector<2x2x128xf32> to vector<2x2x128xbf16>
    %c0_78 = arith.constant 0 : index
    %c0_79 = arith.constant 0 : index
    %c0_80 = arith.constant 0 : index
    %c0_81 = arith.constant 0 : index
    %85 = vector.load %arg5[%c0_78, %c0_79, %c0_80, %c0_81] : memref<1x2x2x128xbf16, #tpu.memory_space<vmem>>, vector<1x2x2x128xbf16>
    %86 = vector.shape_cast %85 : vector<1x2x2x128xbf16> to vector<2x2x128xbf16>
    %87 = vector.shape_cast %84 : vector<2x2x128xbf16> to vector<1x2x2x128xbf16>
    tpu.vector_store %arg5[%c0_78, %c0_79, %c0_80, %c0_81], %87 {strides = array<i32>} : memref<1x2x2x128xbf16, #tpu.memory_space<vmem>>, vector<1x2x2x128xbf16>,
    return
  }
  func.func @transform_0(%arg0: i32, %arg1: i32) -> (i32, i32, i32, i32) {
    %c0_i32 = arith.constant 0 : i32
    %c0_i32_0 = arith.constant 0 : i32
    %c0_i32_1 = arith.constant 0 : i32
    %c0_i32_2 = arith.constant 0 : i32
    return %arg0, %c0_i32, %c0_i32_0, %c0_i32_1 : i32, i32, i32, i32
  }
  func.func @transform_1(%arg0: i32, %arg1: i32) -> (i32, i32, i32) {
    %c0_i32 = arith.constant 0 : i32
    %c0_i32_0 = arith.constant 0 : i32
    %c0_i32_1 = arith.constant 0 : i32
    %c0_i32_2 = arith.constant 0 : i32
    return %c0_i32, %c0_i32_0, %c0_i32_1 : i32, i32, i32
  }
  func.func @transform_2(%arg0: i32, %arg1: i32) -> (i32, i32) {
    %c0_i32 = arith.constant 0 : i32
    %c0_i32_0 = arith.constant 0 : i32
    %c0_i32_1 = arith.constant 0 : i32
    return %c0_i32, %c0_i32_0 : i32, i32
  }
  func.func @transform_3(%arg0: i32, %arg1: i32) -> (i32, i32, i32, i32) {
    %c0_i32 = arith.constant 0 : i32
    %c0_i32_0 = arith.constant 0 : i32
    %c0_i32_1 = arith.constant 0 : i32
    return %arg0, %arg1, %c0_i32, %c0_i32_0 : i32, i32, i32, i32
  }
}

module attributes {stable_mosaic.version = 11 : i64} {
  func.func @_deconv_act_kernel(%arg0: i32, %arg1: i32, %arg2: memref<1x3x9x128xbf16, #tpu.memory_space<vmem>>, %arg3: memref<2x2x256x128xbf16, #tpu.memory_space<vmem>>, %arg4: memref<1x128xf32, #tpu.memory_space<vmem>>, %arg5: memref<1x2x2x2x128xbf16, #tpu.memory_space<vmem>>, %arg6: memref<2x8x256xbf16, #tpu.memory_space<vmem>>) attributes {dimension_semantics = [#tpu.dimension_semantics<parallel>, #tpu.dimension_semantics<parallel>], iteration_bounds = array<i64: 2, 1>, scalar_prefetch = 0 : i64, scratch_operands = 1 : i64, tpu.core_type = #tpu.core_type<tc>, window_params = [{transform_indices = @transform_0, window_bounds = array<i64: 1, 3, 9, 128>}, {pipeline_mode = #tpu.pipeline_mode<synchronous>, transform_indices = @transform_1, window_bounds = array<i64: 2, 2, 256, 128>}, {pipeline_mode = #tpu.pipeline_mode<synchronous>, transform_indices = @transform_2, window_bounds = array<i64: 1, 128>}, {transform_indices = @transform_3, window_bounds = array<i64: 1, 2, 2, 2, 128>}]} {
    %c2_i32 = arith.constant 2 : i32
    %0 = arith.muli %arg1, %c2_i32 : i32
    %1 = tpu.assume_multiple %0, 2 : i32
    %cst = arith.constant 0.000000e+00 : f32
    %2 = vector.broadcast %cst : f32 to vector<16x128xf32>
    %cst_0 = arith.constant 0.000000e+00 : f32
    %3 = vector.broadcast %cst_0 : f32 to vector<16x128xf32>
    %c0_i32 = arith.constant 0 : i32
    %4 = arith.addi %1, %c0_i32 : i32
    %c0 = arith.constant 0 : index
    %5 = arith.index_cast %4 : i32 to index
    %c0_1 = arith.constant 0 : index
    %c0_2 = arith.constant 0 : index
    %6 = vector.load %arg2[%c0, %5, %c0_1, %c0_2] : memref<1x3x9x128xbf16, #tpu.memory_space<vmem>>, vector<1x2x8x128xbf16>
    %7 = vector.shape_cast %6 : vector<1x2x8x128xbf16> to vector<2x8x128xbf16>
    %c0_3 = arith.constant 0 : index
    %c0_4 = arith.constant 0 : index
    %c0_5 = arith.constant 0 : index
    %8 = vector.load %arg6[%c0_3, %c0_4, %c0_5] : memref<2x8x256xbf16, #tpu.memory_space<vmem>>, vector<2x8x128xbf16>
    tpu.vector_store %arg6[%c0_3, %c0_4, %c0_5], %7 {strides = array<i32>} : memref<2x8x256xbf16, #tpu.memory_space<vmem>>, vector<2x8x128xbf16>,
    %c0_i32_6 = arith.constant 0 : i32
    %9 = arith.addi %1, %c0_i32_6 : i32
    %c0_7 = arith.constant 0 : index
    %10 = arith.index_cast %9 : i32 to index
    %c1 = arith.constant 1 : index
    %c0_8 = arith.constant 0 : index
    %11 = vector.load %arg2[%c0_7, %10, %c1, %c0_8] : memref<1x3x9x128xbf16, #tpu.memory_space<vmem>>, vector<1x2x8x128xbf16>
    %12 = vector.shape_cast %11 : vector<1x2x8x128xbf16> to vector<2x8x128xbf16>
    %c0_9 = arith.constant 0 : index
    %c0_10 = arith.constant 0 : index
    %c128 = arith.constant 128 : index
    %13 = vector.load %arg6[%c0_9, %c0_10, %c128] : memref<2x8x256xbf16, #tpu.memory_space<vmem>>, vector<2x8x128xbf16>
    tpu.vector_store %arg6[%c0_9, %c0_10, %c128], %12 {strides = array<i32>} : memref<2x8x256xbf16, #tpu.memory_space<vmem>>, vector<2x8x128xbf16>,
    %c0_11 = arith.constant 0 : index
    %c0_12 = arith.constant 0 : index
    %c0_13 = arith.constant 0 : index
    %14 = vector.load %arg6[%c0_11, %c0_12, %c0_13] : memref<2x8x256xbf16, #tpu.memory_space<vmem>>, vector<2x8x256xbf16>
    %15 = vector.shape_cast %14 : vector<2x8x256xbf16> to vector<16x256xbf16>
    %c0_14 = arith.constant 0 : index
    %c0_15 = arith.constant 0 : index
    %c0_16 = arith.constant 0 : index
    %c0_17 = arith.constant 0 : index
    %16 = vector.load %arg3[%c0_14, %c0_15, %c0_16, %c0_17] : memref<2x2x256x128xbf16, #tpu.memory_space<vmem>>, vector<1x1x256x128xbf16>
    %17 = vector.shape_cast %16 : vector<1x1x256x128xbf16> to vector<256x128xbf16>
    %cst_18 = arith.constant dense<0.000000e+00> : vector<16x128xf32>
    %18 = tpu.matmul %15, %17, %cst_18 {dimension_numbers = #tpu.dot_dimension_numbers<[1], [0], [0], [1], [0, 0, 1, 1], [], []>} : vector<16x256xbf16>, vector<256x128xbf16>, vector<16x128xf32> -> vector<16x128xf32>
    %19 = arith.addf %2, %18 : vector<16x128xf32>
    %c0_19 = arith.constant 0 : index
    %c1_20 = arith.constant 1 : index
    %c0_21 = arith.constant 0 : index
    %c0_22 = arith.constant 0 : index
    %20 = vector.load %arg3[%c0_19, %c1_20, %c0_21, %c0_22] : memref<2x2x256x128xbf16, #tpu.memory_space<vmem>>, vector<1x1x256x128xbf16>
    %21 = vector.shape_cast %20 : vector<1x1x256x128xbf16> to vector<256x128xbf16>
    %cst_23 = arith.constant dense<0.000000e+00> : vector<16x128xf32>
    %22 = tpu.matmul %15, %21, %cst_23 {dimension_numbers = #tpu.dot_dimension_numbers<[1], [0], [0], [1], [0, 0, 1, 1], [], []>} : vector<16x256xbf16>, vector<256x128xbf16>, vector<16x128xf32> -> vector<16x128xf32>
    %23 = arith.addf %3, %22 : vector<16x128xf32>
    %c1_i32 = arith.constant 1 : i32
    %24 = arith.addi %1, %c1_i32 : i32
    %c0_24 = arith.constant 0 : index
    %25 = arith.index_cast %24 : i32 to index
    %c0_25 = arith.constant 0 : index
    %c0_26 = arith.constant 0 : index
    %26 = vector.load %arg2[%c0_24, %25, %c0_25, %c0_26] : memref<1x3x9x128xbf16, #tpu.memory_space<vmem>>, vector<1x2x8x128xbf16>
    %27 = vector.shape_cast %26 : vector<1x2x8x128xbf16> to vector<2x8x128xbf16>
    %c0_27 = arith.constant 0 : index
    %c0_28 = arith.constant 0 : index
    %c0_29 = arith.constant 0 : index
    %28 = vector.load %arg6[%c0_27, %c0_28, %c0_29] : memref<2x8x256xbf16, #tpu.memory_space<vmem>>, vector<2x8x128xbf16>
    tpu.vector_store %arg6[%c0_27, %c0_28, %c0_29], %27 {strides = array<i32>} : memref<2x8x256xbf16, #tpu.memory_space<vmem>>, vector<2x8x128xbf16>,
    %c1_i32_30 = arith.constant 1 : i32
    %29 = arith.addi %1, %c1_i32_30 : i32
    %c0_31 = arith.constant 0 : index
    %30 = arith.index_cast %29 : i32 to index
    %c1_32 = arith.constant 1 : index
    %c0_33 = arith.constant 0 : index
    %31 = vector.load %arg2[%c0_31, %30, %c1_32, %c0_33] : memref<1x3x9x128xbf16, #tpu.memory_space<vmem>>, vector<1x2x8x128xbf16>
    %32 = vector.shape_cast %31 : vector<1x2x8x128xbf16> to vector<2x8x128xbf16>
    %c0_34 = arith.constant 0 : index
    %c0_35 = arith.constant 0 : index
    %c128_36 = arith.constant 128 : index
    %33 = vector.load %arg6[%c0_34, %c0_35, %c128_36] : memref<2x8x256xbf16, #tpu.memory_space<vmem>>, vector<2x8x128xbf16>
    tpu.vector_store %arg6[%c0_34, %c0_35, %c128_36], %32 {strides = array<i32>} : memref<2x8x256xbf16, #tpu.memory_space<vmem>>, vector<2x8x128xbf16>,
    %c0_37 = arith.constant 0 : index
    %c0_38 = arith.constant 0 : index
    %c0_39 = arith.constant 0 : index
    %34 = vector.load %arg6[%c0_37, %c0_38, %c0_39] : memref<2x8x256xbf16, #tpu.memory_space<vmem>>, vector<2x8x256xbf16>
    %35 = vector.shape_cast %34 : vector<2x8x256xbf16> to vector<16x256xbf16>
    %c1_40 = arith.constant 1 : index
    %c0_41 = arith.constant 0 : index
    %c0_42 = arith.constant 0 : index
    %c0_43 = arith.constant 0 : index
    %36 = vector.load %arg3[%c1_40, %c0_41, %c0_42, %c0_43] : memref<2x2x256x128xbf16, #tpu.memory_space<vmem>>, vector<1x1x256x128xbf16>
    %37 = vector.shape_cast %36 : vector<1x1x256x128xbf16> to vector<256x128xbf16>
    %cst_44 = arith.constant dense<0.000000e+00> : vector<16x128xf32>
    %38 = tpu.matmul %35, %37, %cst_44 {dimension_numbers = #tpu.dot_dimension_numbers<[1], [0], [0], [1], [0, 0, 1, 1], [], []>} : vector<16x256xbf16>, vector<256x128xbf16>, vector<16x128xf32> -> vector<16x128xf32>
    %39 = arith.addf %19, %38 : vector<16x128xf32>
    %c1_45 = arith.constant 1 : index
    %c1_46 = arith.constant 1 : index
    %c0_47 = arith.constant 0 : index
    %c0_48 = arith.constant 0 : index
    %40 = vector.load %arg3[%c1_45, %c1_46, %c0_47, %c0_48] : memref<2x2x256x128xbf16, #tpu.memory_space<vmem>>, vector<1x1x256x128xbf16>
    %41 = vector.shape_cast %40 : vector<1x1x256x128xbf16> to vector<256x128xbf16>
    %cst_49 = arith.constant dense<0.000000e+00> : vector<16x128xf32>
    %42 = tpu.matmul %35, %41, %cst_49 {dimension_numbers = #tpu.dot_dimension_numbers<[1], [0], [0], [1], [0, 0, 1, 1], [], []>} : vector<16x256xbf16>, vector<256x128xbf16>, vector<16x128xf32> -> vector<16x128xf32>
    %43 = arith.addf %23, %42 : vector<16x128xf32>
    %c0_50 = arith.constant 0 : index
    %c0_51 = arith.constant 0 : index
    %44 = vector.load %arg4[%c0_50, %c0_51] : memref<1x128xf32, #tpu.memory_space<vmem>>, vector<1x128xf32>
    %45 = vector.broadcast %44 : vector<1x128xf32> to vector<16x128xf32>
    %46 = arith.addf %39, %45 : vector<16x128xf32>
    %47 = vector.broadcast %44 : vector<1x128xf32> to vector<16x128xf32>
    %48 = arith.addf %43, %47 : vector<16x128xf32>
    %cst_52 = arith.constant 0.000000e+00 : f32
    %49 = vector.broadcast %cst_52 : f32 to vector<16x128xf32>
    %50 = arith.maximumf %46, %49 : vector<16x128xf32>
    %cst_53 = arith.constant 0.000000e+00 : f32
    %51 = vector.broadcast %cst_53 : f32 to vector<16x128xf32>
    %52 = arith.maximumf %48, %51 : vector<16x128xf32>
    %53 = vector.shape_cast %50 : vector<16x128xf32> to vector<2x8x128xf32>
    %54 = vector.extract_strided_slice %53 {offsets = [0, 0, 0], sizes = [2, 2, 128], strides = [1, 1, 1]} : vector<2x8x128xf32> to vector<2x2x128xf32>
    %55 = arith.truncf %54 : vector<2x2x128xf32> to vector<2x2x128xbf16>
    %56 = vector.shape_cast %52 : vector<16x128xf32> to vector<2x8x128xf32>
    %57 = vector.extract_strided_slice %56 {offsets = [0, 0, 0], sizes = [2, 2, 128], strides = [1, 1, 1]} : vector<2x8x128xf32> to vector<2x2x128xf32>
    %58 = arith.truncf %57 : vector<2x2x128xf32> to vector<2x2x128xbf16>
    %c0_54 = arith.constant 0 : index
    %c0_55 = arith.constant 0 : index
    %c0_56 = arith.constant 0 : index
    %c0_57 = arith.constant 0 : index
    %c0_58 = arith.constant 0 : index
    %59 = vector.load %arg5[%c0_54, %c0_55, %c0_56, %c0_57, %c0_58] : memref<1x2x2x2x128xbf16, #tpu.memory_space<vmem>>, vector<1x2x1x2x128xbf16>
    %60 = vector.shape_cast %59 : vector<1x2x1x2x128xbf16> to vector<2x2x128xbf16>
    %61 = vector.shape_cast %55 : vector<2x2x128xbf16> to vector<1x2x1x2x128xbf16>
    tpu.vector_store %arg5[%c0_54, %c0_55, %c0_56, %c0_57, %c0_58], %61 {strides = array<i32>} : memref<1x2x2x2x128xbf16, #tpu.memory_space<vmem>>, vector<1x2x1x2x128xbf16>,
    %c0_59 = arith.constant 0 : index
    %c0_60 = arith.constant 0 : index
    %c1_61 = arith.constant 1 : index
    %c0_62 = arith.constant 0 : index
    %c0_63 = arith.constant 0 : index
    %62 = vector.load %arg5[%c0_59, %c0_60, %c1_61, %c0_62, %c0_63] : memref<1x2x2x2x128xbf16, #tpu.memory_space<vmem>>, vector<1x2x1x2x128xbf16>
    %63 = vector.shape_cast %62 : vector<1x2x1x2x128xbf16> to vector<2x2x128xbf16>
    %64 = vector.shape_cast %58 : vector<2x2x128xbf16> to vector<1x2x1x2x128xbf16>
    tpu.vector_store %arg5[%c0_59, %c0_60, %c1_61, %c0_62, %c0_63], %64 {strides = array<i32>} : memref<1x2x2x2x128xbf16, #tpu.memory_space<vmem>>, vector<1x2x1x2x128xbf16>,
    return
  }
  func.func @transform_0(%arg0: i32, %arg1: i32) -> (i32, i32, i32, i32) {
    %c0_i32 = arith.constant 0 : i32
    %c0_i32_0 = arith.constant 0 : i32
    %c0_i32_1 = arith.constant 0 : i32
    %c0_i32_2 = arith.constant 0 : i32
    return %arg0, %c0_i32, %c0_i32_0, %c0_i32_1 : i32, i32, i32, i32
  }
  func.func @transform_1(%arg0: i32, %arg1: i32) -> (i32, i32, i32, i32) {
    %c0_i32 = arith.constant 0 : i32
    %c0_i32_0 = arith.constant 0 : i32
    %c0_i32_1 = arith.constant 0 : i32
    %c0_i32_2 = arith.constant 0 : i32
    %c0_i32_3 = arith.constant 0 : i32
    return %c0_i32, %c0_i32_0, %c0_i32_1, %c0_i32_2 : i32, i32, i32, i32
  }
  func.func @transform_2(%arg0: i32, %arg1: i32) -> (i32, i32) {
    %c0_i32 = arith.constant 0 : i32
    %c0_i32_0 = arith.constant 0 : i32
    %c0_i32_1 = arith.constant 0 : i32
    return %c0_i32, %c0_i32_0 : i32, i32
  }
  func.func @transform_3(%arg0: i32, %arg1: i32) -> (i32, i32, i32, i32, i32) {
    %c0_i32 = arith.constant 0 : i32
    %c0_i32_0 = arith.constant 0 : i32
    %c0_i32_1 = arith.constant 0 : i32
    %c0_i32_2 = arith.constant 0 : i32
    return %arg0, %arg1, %c0_i32, %c0_i32_0, %c0_i32_1 : i32, i32, i32, i32, i32
  }
}

module attributes {stable_mosaic.version = 11 : i64} {
  func.func @_deconv_act_kernel(%arg0: i32, %arg1: i32, %arg2: memref<1x5x9x64xbf16, #tpu.memory_space<vmem>>, %arg3: memref<1x2x256x64xbf16, #tpu.memory_space<vmem>>, %arg4: memref<1x64xf32, #tpu.memory_space<vmem>>, %arg5: memref<1x4x2x4x64xbf16, #tpu.memory_space<vmem>>, %arg6: memref<4x8x256xbf16, #tpu.memory_space<vmem>>) attributes {dimension_semantics = [#tpu.dimension_semantics<parallel>, #tpu.dimension_semantics<parallel>], iteration_bounds = array<i64: 2, 1>, scalar_prefetch = 0 : i64, scratch_operands = 1 : i64, tpu.core_type = #tpu.core_type<tc>, window_params = [{transform_indices = @transform_0, window_bounds = array<i64: 1, 5, 9, 64>}, {pipeline_mode = #tpu.pipeline_mode<synchronous>, transform_indices = @transform_1, window_bounds = array<i64: 1, 2, 256, 64>}, {pipeline_mode = #tpu.pipeline_mode<synchronous>, transform_indices = @transform_2, window_bounds = array<i64: 1, 64>}, {transform_indices = @transform_3, window_bounds = array<i64: 1, 4, 2, 4, 64>}]} {
    %c4_i32 = arith.constant 4 : i32
    %0 = arith.muli %arg1, %c4_i32 : i32
    %1 = tpu.assume_multiple %0, 4 : i32
    %cst = arith.constant 0.000000e+00 : f32
    %2 = vector.broadcast %cst : f32 to vector<32x64xf32>
    %cst_0 = arith.constant 0.000000e+00 : f32
    %3 = vector.broadcast %cst_0 : f32 to vector<32x64xf32>
    %c0_i32 = arith.constant 0 : i32
    %4 = arith.addi %1, %c0_i32 : i32
    %c0 = arith.constant 0 : index
    %5 = arith.index_cast %4 : i32 to index
    %c0_1 = arith.constant 0 : index
    %c0_2 = arith.constant 0 : index
    %6 = vector.load %arg2[%c0, %5, %c0_1, %c0_2] : memref<1x5x9x64xbf16, #tpu.memory_space<vmem>>, vector<1x4x8x64xbf16>
    %7 = vector.shape_cast %6 : vector<1x4x8x64xbf16> to vector<4x8x64xbf16>
    %c0_3 = arith.constant 0 : index
    %c0_4 = arith.constant 0 : index
    %c0_5 = arith.constant 0 : index
    %8 = vector.load %arg6[%c0_3, %c0_4, %c0_5] : memref<4x8x256xbf16, #tpu.memory_space<vmem>>, vector<4x8x64xbf16>
    tpu.vector_store %arg6[%c0_3, %c0_4, %c0_5], %7 {strides = array<i32>} : memref<4x8x256xbf16, #tpu.memory_space<vmem>>, vector<4x8x64xbf16>,
    %c0_i32_6 = arith.constant 0 : i32
    %9 = arith.addi %1, %c0_i32_6 : i32
    %c0_7 = arith.constant 0 : index
    %10 = arith.index_cast %9 : i32 to index
    %c1 = arith.constant 1 : index
    %c0_8 = arith.constant 0 : index
    %11 = vector.load %arg2[%c0_7, %10, %c1, %c0_8] : memref<1x5x9x64xbf16, #tpu.memory_space<vmem>>, vector<1x4x8x64xbf16>
    %12 = vector.shape_cast %11 : vector<1x4x8x64xbf16> to vector<4x8x64xbf16>
    %c0_9 = arith.constant 0 : index
    %c0_10 = arith.constant 0 : index
    %c64 = arith.constant 64 : index
    %13 = vector.load %arg6[%c0_9, %c0_10, %c64] : memref<4x8x256xbf16, #tpu.memory_space<vmem>>, vector<4x8x64xbf16>
    tpu.vector_store %arg6[%c0_9, %c0_10, %c64], %12 {strides = array<i32>} : memref<4x8x256xbf16, #tpu.memory_space<vmem>>, vector<4x8x64xbf16>,
    %c1_i32 = arith.constant 1 : i32
    %14 = arith.addi %1, %c1_i32 : i32
    %c0_11 = arith.constant 0 : index
    %15 = arith.index_cast %14 : i32 to index
    %c0_12 = arith.constant 0 : index
    %c0_13 = arith.constant 0 : index
    %16 = vector.load %arg2[%c0_11, %15, %c0_12, %c0_13] : memref<1x5x9x64xbf16, #tpu.memory_space<vmem>>, vector<1x4x8x64xbf16>
    %17 = vector.shape_cast %16 : vector<1x4x8x64xbf16> to vector<4x8x64xbf16>
    %c0_14 = arith.constant 0 : index
    %c0_15 = arith.constant 0 : index
    %c128 = arith.constant 128 : index
    %18 = vector.load %arg6[%c0_14, %c0_15, %c128] : memref<4x8x256xbf16, #tpu.memory_space<vmem>>, vector<4x8x64xbf16>
    tpu.vector_store %arg6[%c0_14, %c0_15, %c128], %17 {strides = array<i32>} : memref<4x8x256xbf16, #tpu.memory_space<vmem>>, vector<4x8x64xbf16>,
    %c1_i32_16 = arith.constant 1 : i32
    %19 = arith.addi %1, %c1_i32_16 : i32
    %c0_17 = arith.constant 0 : index
    %20 = arith.index_cast %19 : i32 to index
    %c1_18 = arith.constant 1 : index
    %c0_19 = arith.constant 0 : index
    %21 = vector.load %arg2[%c0_17, %20, %c1_18, %c0_19] : memref<1x5x9x64xbf16, #tpu.memory_space<vmem>>, vector<1x4x8x64xbf16>
    %22 = vector.shape_cast %21 : vector<1x4x8x64xbf16> to vector<4x8x64xbf16>
    %c0_20 = arith.constant 0 : index
    %c0_21 = arith.constant 0 : index
    %c192 = arith.constant 192 : index
    %23 = vector.load %arg6[%c0_20, %c0_21, %c192] : memref<4x8x256xbf16, #tpu.memory_space<vmem>>, vector<4x8x64xbf16>
    tpu.vector_store %arg6[%c0_20, %c0_21, %c192], %22 {strides = array<i32>} : memref<4x8x256xbf16, #tpu.memory_space<vmem>>, vector<4x8x64xbf16>,
    %c0_22 = arith.constant 0 : index
    %c0_23 = arith.constant 0 : index
    %c0_24 = arith.constant 0 : index
    %24 = vector.load %arg6[%c0_22, %c0_23, %c0_24] : memref<4x8x256xbf16, #tpu.memory_space<vmem>>, vector<4x8x256xbf16>
    %25 = vector.shape_cast %24 : vector<4x8x256xbf16> to vector<32x256xbf16>
    %c0_25 = arith.constant 0 : index
    %c0_26 = arith.constant 0 : index
    %c0_27 = arith.constant 0 : index
    %c0_28 = arith.constant 0 : index
    %26 = vector.load %arg3[%c0_25, %c0_26, %c0_27, %c0_28] : memref<1x2x256x64xbf16, #tpu.memory_space<vmem>>, vector<1x1x256x64xbf16>
    %27 = vector.shape_cast %26 : vector<1x1x256x64xbf16> to vector<256x64xbf16>
    %cst_29 = arith.constant dense<0.000000e+00> : vector<32x64xf32>
    %28 = tpu.matmul %25, %27, %cst_29 {dimension_numbers = #tpu.dot_dimension_numbers<[1], [0], [0], [1], [0, 0, 1, 1], [], []>} : vector<32x256xbf16>, vector<256x64xbf16>, vector<32x64xf32> -> vector<32x64xf32>
    %29 = arith.addf %2, %28 : vector<32x64xf32>
    %c0_30 = arith.constant 0 : index
    %c1_31 = arith.constant 1 : index
    %c0_32 = arith.constant 0 : index
    %c0_33 = arith.constant 0 : index
    %30 = vector.load %arg3[%c0_30, %c1_31, %c0_32, %c0_33] : memref<1x2x256x64xbf16, #tpu.memory_space<vmem>>, vector<1x1x256x64xbf16>
    %31 = vector.shape_cast %30 : vector<1x1x256x64xbf16> to vector<256x64xbf16>
    %cst_34 = arith.constant dense<0.000000e+00> : vector<32x64xf32>
    %32 = tpu.matmul %25, %31, %cst_34 {dimension_numbers = #tpu.dot_dimension_numbers<[1], [0], [0], [1], [0, 0, 1, 1], [], []>} : vector<32x256xbf16>, vector<256x64xbf16>, vector<32x64xf32> -> vector<32x64xf32>
    %33 = arith.addf %3, %32 : vector<32x64xf32>
    %c0_35 = arith.constant 0 : index
    %c0_36 = arith.constant 0 : index
    %34 = vector.load %arg4[%c0_35, %c0_36] : memref<1x64xf32, #tpu.memory_space<vmem>>, vector<1x64xf32>
    %35 = vector.broadcast %34 : vector<1x64xf32> to vector<32x64xf32>
    %36 = arith.addf %29, %35 : vector<32x64xf32>
    %37 = vector.broadcast %34 : vector<1x64xf32> to vector<32x64xf32>
    %38 = arith.addf %33, %37 : vector<32x64xf32>
    %cst_37 = arith.constant 0.000000e+00 : f32
    %39 = vector.broadcast %cst_37 : f32 to vector<32x64xf32>
    %40 = arith.maximumf %36, %39 : vector<32x64xf32>
    %cst_38 = arith.constant 0.000000e+00 : f32
    %41 = vector.broadcast %cst_38 : f32 to vector<32x64xf32>
    %42 = arith.maximumf %38, %41 : vector<32x64xf32>
    %43 = vector.shape_cast %40 : vector<32x64xf32> to vector<4x8x64xf32>
    %44 = vector.extract_strided_slice %43 {offsets = [0, 0, 0], sizes = [4, 4, 64], strides = [1, 1, 1]} : vector<4x8x64xf32> to vector<4x4x64xf32>
    %45 = arith.truncf %44 : vector<4x4x64xf32> to vector<4x4x64xbf16>
    %46 = vector.shape_cast %42 : vector<32x64xf32> to vector<4x8x64xf32>
    %47 = vector.extract_strided_slice %46 {offsets = [0, 0, 0], sizes = [4, 4, 64], strides = [1, 1, 1]} : vector<4x8x64xf32> to vector<4x4x64xf32>
    %48 = arith.truncf %47 : vector<4x4x64xf32> to vector<4x4x64xbf16>
    %c0_39 = arith.constant 0 : index
    %c0_40 = arith.constant 0 : index
    %c0_41 = arith.constant 0 : index
    %c0_42 = arith.constant 0 : index
    %c0_43 = arith.constant 0 : index
    %49 = vector.load %arg5[%c0_39, %c0_40, %c0_41, %c0_42, %c0_43] : memref<1x4x2x4x64xbf16, #tpu.memory_space<vmem>>, vector<1x4x1x4x64xbf16>
    %50 = vector.shape_cast %49 : vector<1x4x1x4x64xbf16> to vector<4x4x64xbf16>
    %51 = vector.shape_cast %45 : vector<4x4x64xbf16> to vector<1x4x1x4x64xbf16>
    tpu.vector_store %arg5[%c0_39, %c0_40, %c0_41, %c0_42, %c0_43], %51 {strides = array<i32>} : memref<1x4x2x4x64xbf16, #tpu.memory_space<vmem>>, vector<1x4x1x4x64xbf16>,
    %c0_44 = arith.constant 0 : index
    %c0_45 = arith.constant 0 : index
    %c1_46 = arith.constant 1 : index
    %c0_47 = arith.constant 0 : index
    %c0_48 = arith.constant 0 : index
    %52 = vector.load %arg5[%c0_44, %c0_45, %c1_46, %c0_47, %c0_48] : memref<1x4x2x4x64xbf16, #tpu.memory_space<vmem>>, vector<1x4x1x4x64xbf16>
    %53 = vector.shape_cast %52 : vector<1x4x1x4x64xbf16> to vector<4x4x64xbf16>
    %54 = vector.shape_cast %48 : vector<4x4x64xbf16> to vector<1x4x1x4x64xbf16>
    tpu.vector_store %arg5[%c0_44, %c0_45, %c1_46, %c0_47, %c0_48], %54 {strides = array<i32>} : memref<1x4x2x4x64xbf16, #tpu.memory_space<vmem>>, vector<1x4x1x4x64xbf16>,
    return
  }
  func.func @transform_0(%arg0: i32, %arg1: i32) -> (i32, i32, i32, i32) {
    %c0_i32 = arith.constant 0 : i32
    %c0_i32_0 = arith.constant 0 : i32
    %c0_i32_1 = arith.constant 0 : i32
    %c0_i32_2 = arith.constant 0 : i32
    return %arg0, %c0_i32, %c0_i32_0, %c0_i32_1 : i32, i32, i32, i32
  }
  func.func @transform_1(%arg0: i32, %arg1: i32) -> (i32, i32, i32, i32) {
    %c0_i32 = arith.constant 0 : i32
    %c0_i32_0 = arith.constant 0 : i32
    %c0_i32_1 = arith.constant 0 : i32
    %c0_i32_2 = arith.constant 0 : i32
    %c0_i32_3 = arith.constant 0 : i32
    return %c0_i32, %c0_i32_0, %c0_i32_1, %c0_i32_2 : i32, i32, i32, i32
  }
  func.func @transform_2(%arg0: i32, %arg1: i32) -> (i32, i32) {
    %c0_i32 = arith.constant 0 : i32
    %c0_i32_0 = arith.constant 0 : i32
    %c0_i32_1 = arith.constant 0 : i32
    return %c0_i32, %c0_i32_0 : i32, i32
  }
  func.func @transform_3(%arg0: i32, %arg1: i32) -> (i32, i32, i32, i32, i32) {
    %c0_i32 = arith.constant 0 : i32
    %c0_i32_0 = arith.constant 0 : i32
    %c0_i32_1 = arith.constant 0 : i32
    %c0_i32_2 = arith.constant 0 : i32
    return %arg0, %arg1, %c0_i32, %c0_i32_0, %c0_i32_1 : i32, i32, i32, i32, i32
  }
}

module attributes {stable_mosaic.version = 11 : i64} {
  func.func @_deconv_act_kernel(%arg0: i32, %arg1: i32, %arg2: memref<1x9x9x32xbf16, #tpu.memory_space<vmem>>, %arg3: memref<1x2x128x6xbf16, #tpu.memory_space<vmem>>, %arg4: memref<1x6xf32, #tpu.memory_space<vmem>>, %arg5: memref<1x8x2x8x6xbf16, #tpu.memory_space<vmem>>, %arg6: memref<8x8x128xbf16, #tpu.memory_space<vmem>>) attributes {dimension_semantics = [#tpu.dimension_semantics<parallel>, #tpu.dimension_semantics<parallel>], iteration_bounds = array<i64: 2, 1>, scalar_prefetch = 0 : i64, scratch_operands = 1 : i64, tpu.core_type = #tpu.core_type<tc>, window_params = [{transform_indices = @transform_0, window_bounds = array<i64: 1, 9, 9, 32>}, {pipeline_mode = #tpu.pipeline_mode<synchronous>, transform_indices = @transform_1, window_bounds = array<i64: 1, 2, 128, 6>}, {pipeline_mode = #tpu.pipeline_mode<synchronous>, transform_indices = @transform_2, window_bounds = array<i64: 1, 6>}, {transform_indices = @transform_3, window_bounds = array<i64: 1, 8, 2, 8, 6>}]} {
    %c8_i32 = arith.constant 8 : i32
    %0 = arith.muli %arg1, %c8_i32 : i32
    %1 = tpu.assume_multiple %0, 8 : i32
    %cst = arith.constant 0.000000e+00 : f32
    %2 = vector.broadcast %cst : f32 to vector<64x6xf32>
    %cst_0 = arith.constant 0.000000e+00 : f32
    %3 = vector.broadcast %cst_0 : f32 to vector<64x6xf32>
    %c0_i32 = arith.constant 0 : i32
    %4 = arith.addi %1, %c0_i32 : i32
    %c0 = arith.constant 0 : index
    %5 = arith.index_cast %4 : i32 to index
    %c0_1 = arith.constant 0 : index
    %c0_2 = arith.constant 0 : index
    %6 = vector.load %arg2[%c0, %5, %c0_1, %c0_2] : memref<1x9x9x32xbf16, #tpu.memory_space<vmem>>, vector<1x8x8x32xbf16>
    %7 = vector.shape_cast %6 : vector<1x8x8x32xbf16> to vector<8x8x32xbf16>
    %c0_3 = arith.constant 0 : index
    %c0_4 = arith.constant 0 : index
    %c0_5 = arith.constant 0 : index
    %8 = vector.load %arg6[%c0_3, %c0_4, %c0_5] : memref<8x8x128xbf16, #tpu.memory_space<vmem>>, vector<8x8x32xbf16>
    tpu.vector_store %arg6[%c0_3, %c0_4, %c0_5], %7 {strides = array<i32>} : memref<8x8x128xbf16, #tpu.memory_space<vmem>>, vector<8x8x32xbf16>,
    %c0_i32_6 = arith.constant 0 : i32
    %9 = arith.addi %1, %c0_i32_6 : i32
    %c0_7 = arith.constant 0 : index
    %10 = arith.index_cast %9 : i32 to index
    %c1 = arith.constant 1 : index
    %c0_8 = arith.constant 0 : index
    %11 = vector.load %arg2[%c0_7, %10, %c1, %c0_8] : memref<1x9x9x32xbf16, #tpu.memory_space<vmem>>, vector<1x8x8x32xbf16>
    %12 = vector.shape_cast %11 : vector<1x8x8x32xbf16> to vector<8x8x32xbf16>
    %c0_9 = arith.constant 0 : index
    %c0_10 = arith.constant 0 : index
    %c32 = arith.constant 32 : index
    %13 = vector.load %arg6[%c0_9, %c0_10, %c32] : memref<8x8x128xbf16, #tpu.memory_space<vmem>>, vector<8x8x32xbf16>
    tpu.vector_store %arg6[%c0_9, %c0_10, %c32], %12 {strides = array<i32>} : memref<8x8x128xbf16, #tpu.memory_space<vmem>>, vector<8x8x32xbf16>,
    %c1_i32 = arith.constant 1 : i32
    %14 = arith.addi %1, %c1_i32 : i32
    %c0_11 = arith.constant 0 : index
    %15 = arith.index_cast %14 : i32 to index
    %c0_12 = arith.constant 0 : index
    %c0_13 = arith.constant 0 : index
    %16 = vector.load %arg2[%c0_11, %15, %c0_12, %c0_13] : memref<1x9x9x32xbf16, #tpu.memory_space<vmem>>, vector<1x8x8x32xbf16>
    %17 = vector.shape_cast %16 : vector<1x8x8x32xbf16> to vector<8x8x32xbf16>
    %c0_14 = arith.constant 0 : index
    %c0_15 = arith.constant 0 : index
    %c64 = arith.constant 64 : index
    %18 = vector.load %arg6[%c0_14, %c0_15, %c64] : memref<8x8x128xbf16, #tpu.memory_space<vmem>>, vector<8x8x32xbf16>
    tpu.vector_store %arg6[%c0_14, %c0_15, %c64], %17 {strides = array<i32>} : memref<8x8x128xbf16, #tpu.memory_space<vmem>>, vector<8x8x32xbf16>,
    %c1_i32_16 = arith.constant 1 : i32
    %19 = arith.addi %1, %c1_i32_16 : i32
    %c0_17 = arith.constant 0 : index
    %20 = arith.index_cast %19 : i32 to index
    %c1_18 = arith.constant 1 : index
    %c0_19 = arith.constant 0 : index
    %21 = vector.load %arg2[%c0_17, %20, %c1_18, %c0_19] : memref<1x9x9x32xbf16, #tpu.memory_space<vmem>>, vector<1x8x8x32xbf16>
    %22 = vector.shape_cast %21 : vector<1x8x8x32xbf16> to vector<8x8x32xbf16>
    %c0_20 = arith.constant 0 : index
    %c0_21 = arith.constant 0 : index
    %c96 = arith.constant 96 : index
    %23 = vector.load %arg6[%c0_20, %c0_21, %c96] : memref<8x8x128xbf16, #tpu.memory_space<vmem>>, vector<8x8x32xbf16>
    tpu.vector_store %arg6[%c0_20, %c0_21, %c96], %22 {strides = array<i32>} : memref<8x8x128xbf16, #tpu.memory_space<vmem>>, vector<8x8x32xbf16>,
    %c0_22 = arith.constant 0 : index
    %c0_23 = arith.constant 0 : index
    %c0_24 = arith.constant 0 : index
    %24 = vector.load %arg6[%c0_22, %c0_23, %c0_24] : memref<8x8x128xbf16, #tpu.memory_space<vmem>>, vector<8x8x128xbf16>
    %25 = vector.shape_cast %24 : vector<8x8x128xbf16> to vector<64x128xbf16>
    %c0_25 = arith.constant 0 : index
    %c0_26 = arith.constant 0 : index
    %c0_27 = arith.constant 0 : index
    %c0_28 = arith.constant 0 : index
    %26 = vector.load %arg3[%c0_25, %c0_26, %c0_27, %c0_28] : memref<1x2x128x6xbf16, #tpu.memory_space<vmem>>, vector<1x1x128x6xbf16>
    %27 = vector.shape_cast %26 : vector<1x1x128x6xbf16> to vector<128x6xbf16>
    %cst_29 = arith.constant dense<0.000000e+00> : vector<64x6xf32>
    %28 = tpu.matmul %25, %27, %cst_29 {dimension_numbers = #tpu.dot_dimension_numbers<[1], [0], [0], [1], [0, 0, 1, 1], [], []>} : vector<64x128xbf16>, vector<128x6xbf16>, vector<64x6xf32> -> vector<64x6xf32>
    %29 = arith.addf %2, %28 : vector<64x6xf32>
    %c0_30 = arith.constant 0 : index
    %c1_31 = arith.constant 1 : index
    %c0_32 = arith.constant 0 : index
    %c0_33 = arith.constant 0 : index
    %30 = vector.load %arg3[%c0_30, %c1_31, %c0_32, %c0_33] : memref<1x2x128x6xbf16, #tpu.memory_space<vmem>>, vector<1x1x128x6xbf16>
    %31 = vector.shape_cast %30 : vector<1x1x128x6xbf16> to vector<128x6xbf16>
    %cst_34 = arith.constant dense<0.000000e+00> : vector<64x6xf32>
    %32 = tpu.matmul %25, %31, %cst_34 {dimension_numbers = #tpu.dot_dimension_numbers<[1], [0], [0], [1], [0, 0, 1, 1], [], []>} : vector<64x128xbf16>, vector<128x6xbf16>, vector<64x6xf32> -> vector<64x6xf32>
    %33 = arith.addf %3, %32 : vector<64x6xf32>
    %c0_35 = arith.constant 0 : index
    %c0_36 = arith.constant 0 : index
    %34 = vector.load %arg4[%c0_35, %c0_36] : memref<1x6xf32, #tpu.memory_space<vmem>>, vector<1x6xf32>
    %35 = vector.broadcast %34 : vector<1x6xf32> to vector<64x6xf32>
    %36 = arith.addf %29, %35 : vector<64x6xf32>
    %37 = vector.broadcast %34 : vector<1x6xf32> to vector<64x6xf32>
    %38 = arith.addf %33, %37 : vector<64x6xf32>
    %cst_37 = arith.constant 5.000000e-01 : f32
    %39 = vector.broadcast %cst_37 : f32 to vector<64x6xf32>
    %40 = arith.mulf %39, %36 : vector<64x6xf32>
    %41 = math.tanh %40 : vector<64x6xf32>
    %cst_38 = arith.constant 1.000000e+00 : f32
    %42 = vector.broadcast %cst_38 : f32 to vector<64x6xf32>
    %43 = arith.addf %41, %42 : vector<64x6xf32>
    %cst_39 = arith.constant 5.000000e-01 : f32
    %44 = vector.broadcast %cst_39 : f32 to vector<64x6xf32>
    %45 = arith.mulf %44, %43 : vector<64x6xf32>
    %cst_40 = arith.constant 5.000000e-01 : f32
    %46 = vector.broadcast %cst_40 : f32 to vector<64x6xf32>
    %47 = arith.mulf %46, %38 : vector<64x6xf32>
    %48 = math.tanh %47 : vector<64x6xf32>
    %cst_41 = arith.constant 1.000000e+00 : f32
    %49 = vector.broadcast %cst_41 : f32 to vector<64x6xf32>
    %50 = arith.addf %48, %49 : vector<64x6xf32>
    %cst_42 = arith.constant 5.000000e-01 : f32
    %51 = vector.broadcast %cst_42 : f32 to vector<64x6xf32>
    %52 = arith.mulf %51, %50 : vector<64x6xf32>
    %53 = vector.shape_cast %45 : vector<64x6xf32> to vector<8x8x6xf32>
    %54 = arith.truncf %53 : vector<8x8x6xf32> to vector<8x8x6xbf16>
    %55 = vector.shape_cast %52 : vector<64x6xf32> to vector<8x8x6xf32>
    %56 = arith.truncf %55 : vector<8x8x6xf32> to vector<8x8x6xbf16>
    %c0_43 = arith.constant 0 : index
    %c0_44 = arith.constant 0 : index
    %c0_45 = arith.constant 0 : index
    %c0_46 = arith.constant 0 : index
    %c0_47 = arith.constant 0 : index
    %57 = vector.load %arg5[%c0_43, %c0_44, %c0_45, %c0_46, %c0_47] : memref<1x8x2x8x6xbf16, #tpu.memory_space<vmem>>, vector<1x8x1x8x6xbf16>
    %58 = vector.shape_cast %57 : vector<1x8x1x8x6xbf16> to vector<8x8x6xbf16>
    %59 = vector.shape_cast %54 : vector<8x8x6xbf16> to vector<1x8x1x8x6xbf16>
    tpu.vector_store %arg5[%c0_43, %c0_44, %c0_45, %c0_46, %c0_47], %59 {strides = array<i32>} : memref<1x8x2x8x6xbf16, #tpu.memory_space<vmem>>, vector<1x8x1x8x6xbf16>,
    %c0_48 = arith.constant 0 : index
    %c0_49 = arith.constant 0 : index
    %c1_50 = arith.constant 1 : index
    %c0_51 = arith.constant 0 : index
    %c0_52 = arith.constant 0 : index
    %60 = vector.load %arg5[%c0_48, %c0_49, %c1_50, %c0_51, %c0_52] : memref<1x8x2x8x6xbf16, #tpu.memory_space<vmem>>, vector<1x8x1x8x6xbf16>
    %61 = vector.shape_cast %60 : vector<1x8x1x8x6xbf16> to vector<8x8x6xbf16>
    %62 = vector.shape_cast %56 : vector<8x8x6xbf16> to vector<1x8x1x8x6xbf16>
    tpu.vector_store %arg5[%c0_48, %c0_49, %c1_50, %c0_51, %c0_52], %62 {strides = array<i32>} : memref<1x8x2x8x6xbf16, #tpu.memory_space<vmem>>, vector<1x8x1x8x6xbf16>,
    return
  }
  func.func @transform_0(%arg0: i32, %arg1: i32) -> (i32, i32, i32, i32) {
    %c0_i32 = arith.constant 0 : i32
    %c0_i32_0 = arith.constant 0 : i32
    %c0_i32_1 = arith.constant 0 : i32
    %c0_i32_2 = arith.constant 0 : i32
    return %arg0, %c0_i32, %c0_i32_0, %c0_i32_1 : i32, i32, i32, i32
  }
  func.func @transform_1(%arg0: i32, %arg1: i32) -> (i32, i32, i32, i32) {
    %c0_i32 = arith.constant 0 : i32
    %c0_i32_0 = arith.constant 0 : i32
    %c0_i32_1 = arith.constant 0 : i32
    %c0_i32_2 = arith.constant 0 : i32
    %c0_i32_3 = arith.constant 0 : i32
    return %c0_i32, %c0_i32_0, %c0_i32_1, %c0_i32_2 : i32, i32, i32, i32
  }
  func.func @transform_2(%arg0: i32, %arg1: i32) -> (i32, i32) {
    %c0_i32 = arith.constant 0 : i32
    %c0_i32_0 = arith.constant 0 : i32
    %c0_i32_1 = arith.constant 0 : i32
    return %c0_i32, %c0_i32_0 : i32, i32
  }
  func.func @transform_3(%arg0: i32, %arg1: i32) -> (i32, i32, i32, i32, i32) {
    %c0_i32 = arith.constant 0 : i32
    %c0_i32_0 = arith.constant 0 : i32
    %c0_i32_1 = arith.constant 0 : i32
    %c0_i32_2 = arith.constant 0 : i32
    return %arg0, %arg1, %c0_i32, %c0_i32_0, %c0_i32_1 : i32, i32, i32, i32, i32
  }
}

</mosaic_0001>

<bundles_post_ra>
// kernel: autoencoder_forward.7
= control target key start
LH: loop header
LB: loop body
LE: loop exit
PB: predicated region body
PF: predicated region fallthrough
CT: control target
= control target key end

     0   :  { %s2569_s12 = smov 0   ;;  %s2571_s13 = smov 0   ;;  %s3240_s0 = inlined_call_operand.vmem [shape: bf16[2,10,10,32], index: 0, kind: input, shape index: {}]   ;;  %s3241_s1 = inlined_call_operand.vmem [shape: bf16[2,256,64], index: 1, kind: input, shape index: {}]   ;;  %s3242_s2 = inlined_call_operand.vmem [shape: f32[1,64], index: 2, kind: input, shape index: {}]   ;;  %s3243_s3 = inlined_call_operand.vmem [shape: bf16[2,4,4,64], index: 3, kind: output, shape index: {}]  }
   0x1   :  { %s2573_s14 = smov 0  }
   0x2 LB: > { %s25_s15 = sadd.s32 1, %s2539_s13  ;;  %p2162_p0 = scmp.ge.s32.totalorder %s2543_s14, 1  ;;  %s2543_s14 = sphi %s2573_s14, %s13_s14   ;;  %s2539_s13 = sphi %s2571_s13, %s3249_s13   ;;  %s2535_s12 = sphi %s2569_s12, %s3248_s12  }
   0x3   : > { %p27_p1 = scmp.ge.s32.totalorder %s25_s15, 2  ;;  %p151_p2 = scmp.lt.s32.totalorder %s2543_s14, 3 }
   0x5   : > { %s3251_s15 = smov (%p27_p1, %s25_s15), 0  ;;  %p152_p3 = pnand %p2162_p0, %p151_p2 }
   0x6   : > { %p179_p4 = scmp.lt.s32.totalorder (!%p152_p3), %s2535_s12, 1  ;;  %s2545_s30 = smov (!%p152_p3), 64  }
   0x7   : > { %155 = sbr.rel (%p152_p3) target bundleno = 478 (0x1de), region = 32  ;;  %s2546_s4 = smov (!%p152_p3), 32  }
   0x8   : > { %s2547_s19 = smov (!%p152_p3), 96  }
   0xc   : > { %vm412_vm0 = vcmask 1042432   ;;  %vm413_vm1 = vcmask 1046532   ;;  %s3253_s12 = smov (!%p179_p4, %s2535_s12), 1  ;;  %v2479_v1 = vld [vmem:[%s3241_s1 + $0x78] sm:$0xff]   ;;  %v2481_v3 = vld [vmem:[%s3241_s1 + $0x70] sm:$0xff]   ;;  %v2484_v25 = vld [vmem:[%s3241_s1 + $0x68] sm:$0xff]  }
   0xd   : > { %vm2589_vm2 = vmor %vm412_vm0, %vm413_vm1  ;;  %v2480_v2 = vld [vmem:[%s3241_s1 + $0x38] sm:$0xff]   ;;  %s2450_s20 = smul.u32 80, %s3253_s12  ;;  %2410 = vmatprep.subr.bf16.mxu1 %v2479_v1  ;;  %v2482_v4 = vld [vmem:[%s3241_s1 + $0x30] sm:$0xff]   ;;  %vm232_vm3 = vsmask.f32 3328  ;;  %vm207_vm6 = vcmask 257024  }
   0xe   : > { %2411 = vmatpush3.bf16.msra.mxu1 %v2480_v2  ;;  %v2483_v5 = vld [vmem:[%s3241_s1 + $0xf8] sm:$0xff]   ;;  %vm233_vm4 = vsmask.f32 7440  ;;  %v2486_v35 = vld [vmem:[%s3241_s1 + $0x28] sm:$0xff]   ;;  %v2487_v40 = vld [vmem:[%s3241_s1 + $0xf0] sm:$0xff]   ;;  %vm371_vm7 = vcmask 519424  }
   0xf   : > { %s2609_s27 = scalar_lea.vmem %s3240_s0, %s2450_s20  ;;  %2412 = vmatprep.subr.bf16.mxu1 %v2481_v3  ;;  %2370 = vmatprep.subr.bf16.mxu0 %v2483_v5  ;;  %v2485_v31 = vld [vmem:[%s3241_s1 + $0xb8] sm:$0xff]   ;;  %v2488_v44 = vld [vmem:[%s3241_s1 + $0x60] sm:$0xff]   ;;  %v2489_v50 = vld [vmem:[%s3241_s1 + $0xb0] sm:$0xff]   ;;  %vm471_vm8 = vcmask 781824   ;;  %vm524_vm9 = vcmask 1044224   ;;  %vm2000_vm10 = vcmask 1041409  }
  0x10   : > { %v2222_v6 = vld [vmem:[%s2609_s27 + $0x10] sm:$0xf]  ;;  %v2198_v7 = vld [vmem:[%s2609_s27 + $0x8] sm:$0xe]  ;;  %v2199_v8 = vld [vmem:[%s2609_s27 + $0xc] sm:$0x1]  ;;  %2371 = vmatpush3.bf16.msra.mxu0 %v2485_v31 }
  0x11   : > { %793 = vrot.lane.b32.xlu0 %v2222_v6, %s2545_s30  ;;  %v2214_v9 = vrot.slane %v2198_v7, 9  ;;  %v711_v10 = vrot.slane %v2199_v8, 5  ;;  %v380_v11 = vld [vmem:[%s2609_s27] sm:$0xe]  ;;  %v381_v12 = vld [vmem:[%s2609_s27 + $0x4] sm:$0x1]  ;;  %2372 = vmatprep.subr.bf16.mxu0 %v2487_v40  ;;  %vm2663_vm5 = vmor %vm232_vm3, %vm233_vm4 }
  0x12   : > { %v2166_v13 = vrot.slane %v380_v11, 9  ;;  %v417_v14 = vrot.slane %v381_v12, 5  ;;  %v2200_v15 = vld [vmem:[%s2609_s27 + $0x10] sm:$0xe]  ;;  %v2201_v16 = vld [vmem:[%s2609_s27 + $0x14] sm:$0x1]  ;;  %2413 = vmatpush3.bf16.msra.mxu1 %v2482_v4 }
  0x13   : > { %v712_v17 = vsel %vm2589_vm2, %v2214_v9, %v711_v10  ;;  %v2215_v18 = vrot.slane %v2200_v15, 9  ;;  %v715_v19 = vrot.slane %v2201_v16, 5  ;;  %v382_v20 = vld [vmem:[%s2609_s27 + $0x8] sm:$0xe]  ;;  %v383_v22 = vld [vmem:[%s2609_s27 + $0xc] sm:$0x1]  ;;  %2414 = vmatprep.subr.bf16.mxu1 %v2484_v25 }
  0x14   : > { %741 = vrot.lane.b32.xlu1 %v712_v17, %s2546_s4  ;;  %v418_v21 = vsel %vm2589_vm2, %v2166_v13, %v417_v14  ;;  %v2167_v23 = vrot.slane %v382_v20, 9  ;;  %v216_v24 = vld [vmem:[%s2609_s27] sm:$0xf]  ;;  %v421_v27 = vrot.slane %v383_v22, 5  ;;  %v217_v28 = vld [vmem:[%s2609_s27 + $0x4] sm:$0x1]  ;;  %2373 = vmatpush3.bf16.msra.mxu0 %v2489_v50 }
  0x15   : > { %447 = vrot.lane.b32.xlu0 %v418_v21, %s2545_s30  ;;  %v716_v26 = vsel %vm2589_vm2, %v2215_v18, %v715_v19  ;;  %v236_v29 = vshrl.u32 %v216_v24, 16  ;;  %v239_v30 = vshll.u32 %v216_v24, 16  ;;  %v2174_v32 = vld [vmem:[%s2609_s27 + $0x8] sm:$0xf]  ;;  %v245_v33 = vshll.u32 %v217_v28, 16  ;;  %v2490_v4 = vld [vmem:[%s3241_s1 + $0x20] sm:$0xff]  }
  0x16   : > { %v218_v34 = vld [vmem:[%s2609_s27 + $0x8] sm:$0xf]  ;;  %v219_v38 = vld [vmem:[%s2609_s27 + $0xc] sm:$0x1]  ;;  %2415 = vmatpush3.bf16.msra.mxu1 %v2486_v35  ;;  %v422_v45 = vsel %vm2589_vm2, %v2167_v23, %v421_v27  ;;  %v2230_v48 = vld [vmem:[%s2609_s27 + $0x10] sm:$0xf] }
  0x17   : > { %v238_v36 = vrot.slane %v236_v29, 4  ;;  %v241_v37 = vrot.slane %v239_v30, 5  ;;  %v250_v39 = vshrl.u32 %v218_v34, 16  ;;  %v247_v41 = vrot.slane %v245_v33, 5  ;;  %v2231_v49 = vld [vmem:[%s2609_s27 + $0x14] sm:$0x1]  ;;  %2416 = vmatprep.subr.bf16.mxu1 %v2488_v44 }
  0x18   : > { %743 = vrot.lane.b32.xlu1 %v716_v26, %s2546_s4  ;;  %v253_v42 = vshll.u32 %v218_v34, 16  ;;  %v259_v43 = vshll.u32 %v219_v38, 16  ;;  %v842_v53 = vshrl.u32 %v2230_v48, 16  ;;  %v845_v54 = vshll.u32 %v2230_v48, 16  ;;  %v2232_v55 = vld [vmem:[%s2609_s27 + $0x18] sm:$0xf] }
  0x19   : > { %500 = vrot.lane.b32.xlu0 %v2174_v32, %s2547_s19  ;;  %v242_v46 = vor.u32 %v241_v37, %v238_v36  ;;  %v252_v47 = vrot.slane %v250_v39, 4  ;;  %v2223_v57 = vld [vmem:[%s2609_s27 + $0x18] sm:$0xf]  ;;  %v851_v58 = vshll.u32 %v2231_v49, 16  ;;  %v2233_v59 = vld [vmem:[%s2609_s27 + $0x1c] sm:$0x1] }
  0x1a   : > { %v255_v52 = vrot.slane %v253_v42, 5  ;;  %v856_v60 = vshrl.u32 %v2232_v55, 16  ;;  %v859_v61 = vshll.u32 %v2232_v55, 16  ;;  %v261_v63 = vrot.slane %v259_v43, 5  ;;  %v220_v3 = vld [vmem:[%s2609_s27 + $0x10] sm:$0xf]  ;;  %2417 = vmatpush3.bf16.msra.mxu1 %v2490_v4 }
  0x1b   : > { %v243_v56 = vrot.slane %v242_v46, 4  ;;  %v844_v1 = vrot.slane %v842_v53, 4  ;;  %v847_v2 = vrot.slane %v845_v54, 5  ;;  %v865_v8 = vshll.u32 %v2233_v59, 16  ;;  %v221_v9 = vld [vmem:[%s2609_s27 + $0x14] sm:$0x1] }
  0x1c   : > { %449 = vrot.lane.b32.xlu1 %v422_v45, %s2545_s30  ;;  %v256_v62 = vor.u32 %v255_v52, %v252_v47  ;;  %v858_v6 = vrot.slane %v856_v60, 4  ;;  %v861_v7 = vrot.slane %v859_v61, 5  ;;  %v2491_v10 = vld [vmem:[%s3241_s1 + $0xe8] sm:$0xff]   ;;  %v853_v13 = vrot.slane %v851_v58, 5  ;;  %v222_v15 = vld [vmem:[%s2609_s27 + $0x18] sm:$0xf] }
  0x1d   : > { %v248_v5 = vsel %vm2663_vm5, %v243_v56, %v247_v41  ;;  %v848_v12 = vor.u32 %v847_v2, %v844_v1  ;;  %v264_v14 = vshrl.u32 %v220_v3, 16  ;;  %v2492_v16 = vld [vmem:[%s3241_s1 + $0x58] sm:$0xff]   ;;  %v267_v18 = vshll.u32 %v220_v3, 16  ;;  %2374 = vmatprep.subr.bf16.mxu0 %v2491_v10  ;;  %v2493_v22 = vld [vmem:[%s3241_s1 + $0xa8] sm:$0xff]   ;;  %v2175_v28 = vld [vmem:[%s2609_s27 + $0x10] sm:$0xf] }
  0x1e   : > { %347 = vrot.lane.b32.xlu0 %v248_v5, %s2546_s4  ;;  %v257_v11 = vrot.slane %v256_v62, 4  ;;  %v862_v17 = vor.u32 %v861_v7, %v858_v6  ;;  %v273_v19 = vshll.u32 %v221_v9, 16  ;;  %v223_v20 = vld [vmem:[%s2609_s27 + $0x1c] sm:$0x1]  ;;  %v278_v21 = vshrl.u32 %v222_v15, 16  ;;  %2418 = vmatprep.subr.bf16.mxu1 %v2492_v16  ;;  %v2495_v36 = vld [vmem:[%s3241_s1 + $0xe0] sm:$0xff]  }
  0x1f   : > { %v849_v24 = vrot.slane %v848_v12, 4  ;;  %v266_v25 = vrot.slane %v264_v14, 4  ;;  %v281_v26 = vshll.u32 %v222_v15, 16  ;;  %v2494_v27 = vld [vmem:[%s3241_s1 + $0x18] sm:$0xff]   ;;  %v867_v30 = vrot.slane %v865_v8, 5  ;;  %2375 = vmatpush3.bf16.msra.mxu0 %v2493_v22  ;;  %v2496_v43 = vld [vmem:[%s3241_s1 + $0x50] sm:$0xff]  }
  0x20   : > { %795 = vrot.lane.b32.xlu1 %v2223_v57, %s2545_s30  ;;  %v262_v23 = vsel %vm2663_vm5, %v257_v11, %v261_v63  ;;  %v863_v29 = vrot.slane %v862_v17, 4  ;;  %v269_v31 = vrot.slane %v267_v18, 5  ;;  %v280_v32 = vrot.slane %v278_v21, 4  ;;  %v2202_v35 = vld [vmem:[%s2609_s27 + $0x18] sm:$0xe]  ;;  %2419 = vmatpush3.bf16.msra.mxu1 %v2494_v27  ;;  %v2497_v53 = vld [vmem:[%s3241_s1 + $0xa0] sm:$0xff]  }
  0x21   : > { %v283_v33 = vrot.slane %v281_v26, 5  ;;  %v287_v34 = vshll.u32 %v223_v20, 16  ;;  %v854_v37 = vsel %vm2663_vm5, %v849_v24, %v853_v13  ;;  %v275_v39 = vrot.slane %v273_v19, 5  ;;  %v2203_v40 = vld [vmem:[%s2609_s27 + $0x1c] sm:$0x1]  ;;  %2376 = vmatprep.subr.bf16.mxu0 %v2495_v36  ;;  %2420 = vmatprep.subr.bf16.mxu1 %v2496_v43  ;;  %v2498_v18 = vld [vmem:[%s3241_s1 + $0x10] sm:$0xff]  }
  0x22   : > { %349 = vrot.lane.b32.xlu0 %v262_v23, %s2546_s4  ;;  %v270_v38 = vor.u32 %v269_v31, %v266_v25  ;;  %v2204_v41 = vld [vmem:[%s2609_s27 + $0x20] sm:$0xe]  ;;  %v868_v44 = vsel %vm2663_vm5, %v863_v29, %v867_v30  ;;  %v2216_v47 = vrot.slane %v2202_v35, 9  ;;  %v719_v49 = vrot.slane %v2203_v40, 5  ;;  %v2205_v50 = vld [vmem:[%s2609_s27 + $0x24] sm:$0x1] }
  0x23   : > { %v284_v42 = vor.u32 %v283_v33, %v280_v32  ;;  %v289_v46 = vrot.slane %v287_v34, 5  ;;  %v2217_v52 = vrot.slane %v2204_v41, 9  ;;  %v384_v55 = vld [vmem:[%s2609_s27 + $0x10] sm:$0xe]  ;;  %v385_v56 = vld [vmem:[%s2609_s27 + $0x14] sm:$0x1]  ;;  %2377 = vmatpush3.bf16.msra.mxu0 %v2497_v53 }
  0x24   : > { %502 = vrot.lane.b32.xlu1 %v2175_v28, %s2547_s19  ;;  %v271_v45 = vrot.slane %v270_v38, 4  ;;  %v386_v57 = vld [vmem:[%s2609_s27 + $0x18] sm:$0xe]  ;;  %v387_v58 = vld [vmem:[%s2609_s27 + $0x1c] sm:$0x1]  ;;  %v723_v62 = vrot.slane %v2205_v50, 5  ;;  %v720_v6 = vsel %vm2589_vm2, %v2216_v47, %v719_v49  ;;  %2421 = vmatpush3.bf16.msra.mxu1 %v2498_v18 }
  0x25   : > { %v285_v48 = vrot.slane %v284_v42, 4  ;;  %v2234_v59 = vld [vmem:[%s2609_s27 + $0x20] sm:$0xf]  ;;  %v2236_v60 = vld [vmem:[%s2609_s27 + $0x28] sm:$0xf]  ;;  %v2168_v2 = vrot.slane %v384_v55, 9 }
  0x26   : > { %953 = vrot.lane.b32.xlu0 %v854_v37, %s2547_s19  ;;  %v276_v54 = vsel %vm2663_vm5, %v271_v45, %v275_v39  ;;  %v870_v63 = vshrl.u32 %v2234_v59, 16  ;;  %v873_v1 = vshll.u32 %v2234_v59, 16  ;;  %v884_v3 = vshrl.u32 %v2236_v60, 16  ;;  %v224_v5 = vld [vmem:[%s2609_s27 + $0x20] sm:$0xf]  ;;  %v2499_v22 = vld [vmem:[%s3241_s1 + $0xd8] sm:$0xff]  }
  0x27   : > { %v290_v61 = vsel %vm2663_vm5, %v285_v48, %v289_v46  ;;  %v887_v4 = vshll.u32 %v2236_v60, 16  ;;  %v425_v7 = vrot.slane %v385_v56, 5  ;;  %v2169_v8 = vrot.slane %v386_v57, 9  ;;  %v2235_v10 = vld [vmem:[%s2609_s27 + $0x24] sm:$0x1]  ;;  %2378 = vmatprep.subr.bf16.mxu0 %v2499_v22  ;;  %v2500_v30 = vld [vmem:[%s3241_s1 + $0x48] sm:$0xff]  }
  0x28   : > { %955 = vrot.lane.b32.xlu1 %v868_v44, %s2547_s19  ;;  %v429_v9 = vrot.slane %v387_v58, 5  ;;  %v872_v11 = vrot.slane %v870_v63, 4  ;;  %v875_v12 = vrot.slane %v873_v1, 5  ;;  %v2237_v13 = vld [vmem:[%s2609_s27 + $0x2c] sm:$0x1]  ;;  %v724_v14 = vsel %vm2589_vm2, %v2217_v52, %v723_v62  ;;  %2422 = vmatprep.subr.bf16.mxu1 %v2500_v30  ;;  %v2501_v38 = vld [vmem:[%s3241_s1 + $0x98] sm:$0xff]  }
  0x29   : > { %v225_v15 = vld [vmem:[%s2609_s27 + $0x24] sm:$0x1]  ;;  %v292_v16 = vshrl.u32 %v224_v5, 16  ;;  %v295_v17 = vshll.u32 %v224_v5, 16  ;;  %v886_v19 = vrot.slane %v884_v3, 4  ;;  %v889_v20 = vrot.slane %v887_v4, 5  ;;  %2379 = vmatpush3.bf16.msra.mxu0 %v2501_v38 }
  0x2a   : > { %351 = vrot.lane.b32.xlu0 %v276_v54, %s2546_s4  ;;  %v226_v21 = vld [vmem:[%s2609_s27 + $0x28] sm:$0xf]  ;;  %v426_v23 = vsel %vm2589_vm2, %v2168_v2, %v425_v7  ;;  %v879_v24 = vshll.u32 %v2235_v10, 16  ;;  %v893_v25 = vshll.u32 %v2237_v13, 16  ;;  %v227_v26 = vld [vmem:[%s2609_s27 + $0x2c] sm:$0x1]  ;;  %v430_v27 = vsel %vm2589_vm2, %v2169_v8, %v429_v9 }
  0x2b   : > { %v876_v28 = vor.u32 %v875_v12, %v872_v11  ;;  %v301_v29 = vshll.u32 %v225_v15, 16  ;;  %v294_v31 = vrot.slane %v292_v16, 4  ;;  %v297_v32 = vrot.slane %v295_v17, 5  ;;  %v2224_v35 = vld [vmem:[%s2609_s27 + $0x20] sm:$0xf]  ;;  %v2502_v42 = vld [vmem:[%s3241_s1 + $0x8] sm:$0xff]  }
  0x2c   : > { %353 = vrot.lane.b32.xlu1 %v290_v61, %s2546_s4  ;;  %v306_v33 = vshrl.u32 %v226_v21, 16  ;;  %v309_v34 = vshll.u32 %v226_v21, 16  ;;  %v890_v36 = vor.u32 %v889_v20, %v886_v19  ;;  %v315_v37 = vshll.u32 %v227_v26, 16  ;;  %v2225_v39 = vld [vmem:[%s2609_s27 + $0x28] sm:$0xf]  ;;  %v2503_v46 = vld [vmem:[%s3241_s1 + $0xd0] sm:$0xff]   ;;  %2423 = vmatpush3.bf16.msra.mxu1 %v2502_v42 }
  0x2d   : > { %v2761_v40 = vrot.slane %v879_v24, 5  ;;  %v2763_v41 = vrot.slane %v893_v25, 5  ;;  %v2769_v43 = vrot.slane %v876_v28, 4  ;;  %v2772_v44 = vld [vmem:[%s2609_s27 + $0x28] sm:$0xe]  ;;  %v298_v48 = vor.u32 %v297_v32, %v294_v31  ;;  %2380 = vmatprep.subr.bf16.mxu0 %v2503_v46  ;;  %v2504_v2 = vld [vmem:[%s3241_s1 + $0x40] sm:$0xff]  }
  0x2e   : > { %745 = vrot.lane.b32.xlu0 %v720_v6, %s2546_s4  ;;  %v2775_v45 = vld [vmem:[%s2609_s27 + $0x2c] sm:$0x1]  ;;  %v2176_v47 = vld [vmem:[%s2609_s27 + $0x18] sm:$0xf]  ;;  %v2781_v49 = vrot.slane %v301_v29, 5  ;;  %v308_v50 = vrot.slane %v306_v33, 4  ;;  %2424 = vmatprep.subr.bf16.mxu1 %v2504_v2 }
  0x2f   : > { %v311_v52 = vrot.slane %v309_v34, 5  ;;  %v2238_v53 = vld [vmem:[%s2609_s27 + $0x30] sm:$0xf]  ;;  %v891_v54 = vrot.slane %v890_v36, 4  ;;  %v2785_v55 = vrot.slane %v315_v37, 5  ;;  %v2218_v60 = vrot.slane %v2772_v44, 9 }
  0x30   : > { %747 = vrot.lane.b32.xlu1 %v724_v14, %s2546_s4  ;;  %v898_v56 = vshrl.u32 %v2238_v53, 16  ;;  %v901_v57 = vshll.u32 %v2238_v53, 16  ;;  %v2240_v58 = vld [vmem:[%s2609_s27 + $0x38] sm:$0xf]  ;;  %v2177_v59 = vld [vmem:[%s2609_s27 + $0x20] sm:$0xf]  ;;  %v882_v12 = vsel %vm2663_vm5, %v2769_v43, %v2761_v40 }
  0x31   : > { %v2791_v61 = vld [vmem:[%s2609_s27 + $0x30] sm:$0xe]  ;;  %v2794_v62 = vld [vmem:[%s2609_s27 + $0x34] sm:$0x1]  ;;  %v912_v63 = vshrl.u32 %v2240_v58, 16  ;;  %v915_v1 = vshll.u32 %v2240_v58, 16  ;;  %v312_v8 = vor.u32 %v311_v52, %v308_v50  ;;  %v896_v24 = vsel %vm2663_vm5, %v891_v54, %v2763_v41 }
  0x32   : > { %451 = vrot.lane.b32.xlu0 %v426_v23, %s2545_s30  ;;  %v727_v3 = vrot.slane %v2775_v45, 5  ;;  %v2802_v4 = vld [vmem:[%s2609_s27 + $0x20] sm:$0xe]  ;;  %v228_v5 = vld [vmem:[%s2609_s27 + $0x30] sm:$0xf]  ;;  %v299_v7 = vrot.slane %v298_v48, 4 }
  0x33   : > { %v2505_v6 = vld [vmem:[%s3241_s1 + $0x90] sm:$0xff]   ;;  %v2241_v10 = vld [vmem:[%s2609_s27 + $0x3c] sm:$0x1]  ;;  %v320_v11 = vshrl.u32 %v228_v5, 16  ;;  %v900_v13 = vrot.slane %v898_v56, 4  ;;  %v903_v14 = vrot.slane %v901_v57, 5 }
  0x34   : > { %453 = vrot.lane.b32.xlu1 %v430_v27, %s2545_s30  ;;  %v2239_v9 = vld [vmem:[%s2609_s27 + $0x34] sm:$0x1]  ;;  %v323_v15 = vshll.u32 %v228_v5, 16  ;;  %v230_v16 = vld [vmem:[%s2609_s27 + $0x38] sm:$0xf]  ;;  %2381 = vmatpush3.bf16.msra.mxu0 %v2505_v6  ;;  %v2506_v17 = vld [vmem:[%s3241_s1] sm:$0xff]   ;;  %v304_v38 = vsel %vm2663_vm5, %v299_v7, %v2781_v49  ;;  %v728_v49 = vsel %vm2589_vm2, %v2218_v60, %v727_v3 }
  0x35   : > { %v2820_v18 = vld [vmem:[%s2609_s27 + $0x24] sm:$0x1]  ;;  %v914_v19 = vrot.slane %v912_v63, 4  ;;  %v917_v20 = vrot.slane %v915_v1, 5  ;;  %v334_v21 = vshrl.u32 %v230_v16, 16  ;;  %v337_v22 = vshll.u32 %v230_v16, 16  ;;  %2425 = vmatpush3.bf16.msra.mxu1 %v2506_v17 }
  0x36   : > { %797 = vrot.lane.b32.xlu0 %v2224_v35, %s2545_s30  ;;  %v2507_v23 = vld [vmem:[%s3241_s1 + $0xc8] sm:$0xff]   ;;  %v2219_v25 = vrot.slane %v2791_v61, 9  ;;  %v731_v26 = vrot.slane %v2794_v62, 5  ;;  %v229_v28 = vld [vmem:[%s2609_s27 + $0x34] sm:$0x1]  ;;  %v313_v29 = vrot.slane %v312_v8, 4  ;;  %v904_v40 = vor.u32 %v903_v14, %v900_v13 }
  0x37   : > { %v2832_v27 = vld [vmem:[%s2609_s27 + $0x28] sm:$0xe]  ;;  %v2170_v30 = vrot.slane %v2802_v4, 9  ;;  %v322_v31 = vrot.slane %v320_v11, 4  ;;  %v325_v32 = vrot.slane %v323_v15, 5  ;;  %2382 = vmatprep.subr.bf16.mxu0 %v2507_v23  ;;  %v907_v34 = vshll.u32 %v2239_v9, 16 }
  0x38   : > { %799 = vrot.lane.b32.xlu1 %v2225_v39, %s2545_s30  ;;  %v231_v33 = vld [vmem:[%s2609_s27 + $0x3c] sm:$0x1]  ;;  %v921_v35 = vshll.u32 %v2241_v10, 16  ;;  %v336_v36 = vrot.slane %v334_v21, 4  ;;  %v339_v37 = vrot.slane %v337_v22, 5  ;;  %v918_v41 = vor.u32 %v917_v20, %v914_v19  ;;  %v2509_v60 = vld [vmem:[%s3241_s1 + $0xc0] sm:$0xff]  }
  0x39   : > { %v391_v39 = vld [vmem:[%s2609_s27 + $0x2c] sm:$0x1]  ;;  %v329_v42 = vshll.u32 %v229_v28, 16  ;;  %v433_v43 = vrot.slane %v2820_v18, 5  ;;  %v2171_v44 = vrot.slane %v2832_v27, 9  ;;  %v343_v45 = vshll.u32 %v231_v33, 16 }
  0x3a   : > { %504 = vrot.lane.b32.xlu0 %v2176_v47, %s2547_s19  ;;  %v2846_v46 = vld [vmem:[%s2609_s27 + $0x38] sm:$0xe]  ;;  %v2508_v47 = vld [vmem:[%s3241_s1 + $0x88] sm:$0xff]   ;;  %v318_v48 = vsel %vm2663_vm5, %v313_v29, %v2785_v55  ;;  %v326_v50 = vor.u32 %v325_v32, %v322_v31  ;;  %v2857_v52 = vld [vmem:[%s2609_s27 + $0x3c] sm:$0x1]  ;;  %v437_v56 = vrot.slane %v391_v39, 5  ;;  %v732_v8 = vsel %vm2589_vm2, %v2219_v25, %v731_v26 }
  0x3b   : > { %v2860_v53 = vld [vmem:[%s2609_s27 + $0x40] sm:$0xe]  ;;  %v2863_v54 = vld [vmem:[%s2609_s27 + $0x44] sm:$0x1]  ;;  %v2866_v57 = vrot.slane %v907_v34, 5  ;;  %v2868_v58 = vrot.slane %v921_v35, 5  ;;  %2383 = vmatpush3.bf16.msra.mxu0 %v2508_v47  ;;  %v434_v17 = vsel %vm2589_vm2, %v2170_v30, %v433_v43 }
  0x3c   : > { %506 = vrot.lane.b32.xlu1 %v2177_v59, %s2547_s19  ;;  %v340_v59 = vor.u32 %v339_v37, %v336_v36  ;;  %v2871_v55 = vld [vmem:[%s2609_s27 + $0x30] sm:$0xe]  ;;  %v2876_v61 = vrot.slane %v904_v40, 4  ;;  %v2878_v62 = vrot.slane %v918_v41, 4  ;;  %v2880_v63 = vrot.slane %v329_v42, 5  ;;  %2384 = vmatprep.subr.bf16.mxu0 %v2509_v60  ;;  %v2510_v7 = vld [vmem:[%s3241_s1 + $0x80] sm:$0xff]  }
  0x3d   : > { %v2220_v1 = vrot.slane %v2846_v46, 9  ;;  %v2884_v2 = vld [vmem:[%s2609_s27 + $0x34] sm:$0x1]  ;;  %v2887_v3 = vrot.slane %v343_v45, 5  ;;  %v735_v4 = vrot.slane %v2857_v52, 5  ;;  %v2221_v5 = vrot.slane %v2860_v53, 9 }
  0x3e   : > { %957 = vrot.lane.b32.xlu0 %v882_v12, %s2547_s19  ;;  %v739_v6 = vrot.slane %v2863_v54, 5  ;;  %v2897_v9 = vrot.slane %v326_v50, 4  ;;  %v2172_v10 = vrot.slane %v2871_v55, 9  ;;  %v2901_v11 = vld [vmem:[%s2609_s27 + $0x38] sm:$0xe]  ;;  %v2905_v13 = vrot.slane %v340_v59, 4 }
  0x3f   : > { %v2182_v12 = vld [vmem:[%s2609_s27 + $0x8] sm:$0xf]  ;;  %v441_v14 = vrot.slane %v2884_v2, 5  ;;  %v2909_v15 = vld [vmem:[%s2609_s27 + $0x3c] sm:$0x1]  ;;  %2385 = vmatpush3.bf16.msra.mxu0 %v2510_v7  ;;  %v438_v22 = vsel %vm2589_vm2, %v2171_v44, %v437_v56  ;;  %v2173_v28 = vrot.slane %v2901_v11, 9  ;;  %v910_v7 = vsel %vm2663_vm5, %v2876_v61, %v2866_v57 }
  0x40   : > { %959 = vrot.lane.b32.xlu1 %v896_v24, %s2547_s19  ;;  %v2183_v16 = vld [vmem:[%s2609_s27 + $0xc] sm:$0x1]  ;;  %v2915_v18 = vld [vmem:[%s2609_s27 + $0x40] sm:$0xf]  ;;  %v550_v19 = vshrl.u32 %v2182_v12, 16  ;;  %v553_v20 = vshll.u32 %v2182_v12, 16 }
  0x41   : > { %v2184_v21 = vld [vmem:[%s2609_s27 + $0x10] sm:$0xf]  ;;  %v2922_v23 = vld [vmem:[%s2609_s27 + $0x44] sm:$0x1]  ;;  %v559_v24 = vshll.u32 %v2183_v16, 16  ;;  %v445_v32 = vrot.slane %v2909_v15, 5  ;;  %v332_v16 = vsel %vm2663_vm5, %v2897_v9, %v2880_v63  ;;  %v442_v53 = vsel %vm2589_vm2, %v2172_v10, %v441_v14 }
  0x42   : > { %355 = vrot.lane.b32.xlu0 %v304_v38, %s2546_s4  ;;  %v2185_v25 = vld [vmem:[%s2609_s27 + $0x14] sm:$0x1]  ;;  %v564_v26 = vshrl.u32 %v2184_v21, 16  ;;  %v2226_v27 = vld [vmem:[%s2609_s27 + $0x30] sm:$0xf]  ;;  %v552_v29 = vrot.slane %v550_v19, 4 }
  0x43   : > { %v555_v30 = vrot.slane %v553_v20, 5  ;;  %v567_v31 = vshll.u32 %v2184_v21, 16  ;;  %v926_v33 = vshrl.u32 %v2915_v18, 16  ;;  %v573_v35 = vshll.u32 %v2185_v25, 16  ;;  %v2227_v36 = vld [vmem:[%s2609_s27 + $0x38] sm:$0xf] }
  0x44   : > { %357 = vrot.lane.b32.xlu1 %v318_v48, %s2546_s4  ;;  %v566_v34 = vrot.slane %v564_v26, 4  ;;  %v561_v38 = vrot.slane %v559_v24, 5  ;;  %v929_v40 = vshll.u32 %v2915_v18, 16  ;;  %v935_v41 = vshll.u32 %v2922_v23, 16  ;;  %v2178_v42 = vld [vmem:[%s2609_s27 + $0x28] sm:$0xf] }
  0x45   : > { %v556_v37 = vor.u32 %v555_v30, %v552_v29  ;;  %v569_v39 = vrot.slane %v567_v31, 5  ;;  %v575_v45 = vrot.slane %v573_v35, 5  ;;  %v199_v47 = vld [vmem:[%s2609_s27] sm:$0xf]  ;;  %v2179_v48 = vld [vmem:[%s2609_s27 + $0x30] sm:$0xf]  ;;  %v736_v18 = vsel %vm2589_vm2, %v2220_v1, %v735_v4 }
  0x46   : > { %749 = vrot.lane.b32.xlu0 %v728_v49, %s2546_s4  ;;  %208 = vst.msk [vmem:[#allocation2] sm:$0xf] %vm207_vm6, %v199_v47  ;;  %v928_v49 = vrot.slane %v926_v33, 4  ;;  %v200_v59 = vld [vmem:[%s2609_s27 + $0x8] sm:$0xf]  ;;  %v931_v19 = vrot.slane %v929_v40, 5  ;;  %v446_v30 = vsel %vm2589_vm2, %v2173_v28, %v445_v32 }
  0x47   : > { %v557_v43 = vrot.slane %v556_v37, 4  ;;  %v570_v44 = vor.u32 %v569_v39, %v566_v34  ;;  %209 = vst.msk [vmem:[#allocation2 + $0x8] sm:$0xf] %vm207_vm6, %v200_v59  ;;  %v201_v12 = vld [vmem:[%s2609_s27 + $0x10] sm:$0xf]  ;;  %v937_v34 = vrot.slane %v935_v41, 5 }
  0x48   : > { %751 = vrot.lane.b32.xlu1 %v732_v8, %s2546_s4  ;;  %v924_v8 = vsel %vm2663_vm5, %v2878_v62, %v2868_v58  ;;  %210 = vst.msk [vmem:[#allocation2 + $0x10] sm:$0xf] %vm207_vm6, %v201_v12  ;;  %v2244_v57 = vld [vmem:[%s2609_s27 + $0x48] sm:$0xf]  ;;  %v202_v61 = vld [vmem:[%s2609_s27 + $0x18] sm:$0xf]  ;;  %v346_v58 = vsel %vm2663_vm5, %v2905_v13, %v2887_v3  ;;  %v740_v3 = vsel %vm2589_vm2, %v2221_v5, %v739_v6 }
  0x49   : > { %v562_v50 = vsel %vm2663_vm5, %v557_v43, %v561_v38  ;;  %v571_v56 = vrot.slane %v570_v44, 4  ;;  %211 = vst.msk [vmem:[#allocation2 + $0x18] sm:$0xf] %vm207_vm6, %v202_v61  ;;  %v2186_v62 = vld [vmem:[%s2609_s27 + $0x18] sm:$0xf]  ;;  %v940_v24 = vshrl.u32 %v2244_v57, 16  ;;  %v932_v5 = vor.u32 %v931_v19, %v928_v49 }
  0x4a   : > { %455 = vrot.lane.b32.xlu0 %v434_v17, %s2545_s30  ;;  %669 = vst.msk [vmem:[#allocation2 + $0x4] sm:$0xf] %vm207_vm6, %v562_v50  ;;  %v2187_v63 = vld [vmem:[%s2609_s27 + $0x1c] sm:$0x1]  ;;  %v578_v9 = vshrl.u32 %v2186_v62, 16  ;;  %v581_v17 = vshll.u32 %v2186_v62, 16 }
  0x4b   : > { %v576_v60 = vsel %vm2663_vm5, %v571_v56, %v575_v45  ;;  %v587_v20 = vshll.u32 %v2187_v63, 16  ;;  %v2245_v52 = vld [vmem:[%s2609_s27 + $0x4c] sm:$0x1]  ;;  %v943_v46 = vshll.u32 %v2244_v57, 16  ;;  %v2189_v25 = vld [vmem:[%s2609_s27 + $0x24] sm:$0x1] }
  0x4c   : > { %457 = vrot.lane.b32.xlu1 %v438_v22, %s2545_s30  ;;  %670 = vst.msk [vmem:[#allocation2 + $0xc] sm:$0xf] %vm207_vm6, %v576_v60  ;;  %v580_v13 = vrot.slane %v578_v9, 4  ;;  %v583_v21 = vrot.slane %v581_v17, 5  ;;  %v2188_v22 = vld [vmem:[%s2609_s27 + $0x20] sm:$0xf] }
  0x4d   : > { %v592_v1 = vshrl.u32 %v2188_v22, 16  ;;  %v595_v4 = vshll.u32 %v2188_v22, 16  ;;  %v601_v54 = vshll.u32 %v2189_v25, 16  ;;  %v2228_v31 = vld [vmem:[%s2609_s27 + $0x40] sm:$0xf]  ;;  %v942_v55 = vrot.slane %v940_v24, 4 }
  0x4e   : > { %801 = vrot.lane.b32.xlu0 %v2226_v27, %s2545_s30  ;;  %v584_v26 = vor.u32 %v583_v21, %v580_v13  ;;  %v589_v27 = vrot.slane %v587_v20, 5  ;;  %v945_v33 = vrot.slane %v943_v46, 5  ;;  %v949_v15 = vshll.u32 %v2245_v52, 16  ;;  %v2229_v28 = vld [vmem:[%s2609_s27 + $0x48] sm:$0xf] }
  0x4f   : > { %v594_v6 = vrot.slane %v592_v1, 4  ;;  %v597_v29 = vrot.slane %v595_v4, 5  ;;  %v603_v14 = vrot.slane %v601_v54, 5  ;;  %v933_v32 = vrot.slane %v932_v5, 4  ;;  %v203_v38 = vld [vmem:[%s2609_s27 + $0x20] sm:$0xf] }
  0x50   : > { %803 = vrot.lane.b32.xlu1 %v2227_v36, %s2545_s30  ;;  %v585_v2 = vrot.slane %v584_v26, 4  ;;  %v2180_v36 = vld [vmem:[%s2609_s27 + $0x38] sm:$0xf]  ;;  %v946_v37 = vor.u32 %v945_v33, %v942_v55  ;;  %v204_v39 = vld [vmem:[%s2609_s27 + $0x28] sm:$0xf]  ;;  %v951_v49 = vrot.slane %v949_v15, 5 }
  0x51   : > { %v598_v10 = vor.u32 %v597_v29, %v594_v6  ;;  %212 = vst.msk [vmem:[#allocation2 + $0x20] sm:$0xf] %vm207_vm6, %v203_v38  ;;  %213 = vst.msk [vmem:[#allocation2 + $0x28] sm:$0xf] %vm207_vm6, %v204_v39  ;;  %v2190_v40 = vld [vmem:[%s2609_s27 + $0x28] sm:$0xf]  ;;  %v938_v57 = vsel %vm2663_vm5, %v933_v32, %v937_v34 }
  0x52   : > { %508 = vrot.lane.b32.xlu0 %v2178_v42, %s2547_s19  ;;  %v590_v11 = vsel %vm2663_vm5, %v585_v2, %v589_v27  ;;  %v2191_v41 = vld [vmem:[%s2609_s27 + $0x2c] sm:$0x1]  ;;  %v2192_v42 = vld [vmem:[%s2609_s27 + $0x30] sm:$0xf]  ;;  %v606_v43 = vshrl.u32 %v2190_v40, 16  ;;  %v609_v44 = vshll.u32 %v2190_v40, 16 }
  0x53   : > { %671 = vst.msk [vmem:[#allocation2 + $0x14] sm:$0xf] %vm207_vm6, %v590_v11  ;;  %v599_v35 = vrot.slane %v598_v10, 4  ;;  %v615_v45 = vshll.u32 %v2191_v41, 16  ;;  %v2193_v47 = vld [vmem:[%s2609_s27 + $0x34] sm:$0x1] }
  0x54   : > { %510 = vrot.lane.b32.xlu1 %v2179_v48, %s2547_s19  ;;  %v620_v48 = vshrl.u32 %v2192_v42, 16  ;;  %v623_v50 = vshll.u32 %v2192_v42, 16  ;;  %v629_v56 = vshll.u32 %v2193_v47, 16  ;;  %v2181_v59 = vld [vmem:[%s2609_s27 + $0x40] sm:$0xf]  ;;  %v947_v60 = vrot.slane %v946_v37, 4 }
  0x55   : > { %v604_v23 = vsel %vm2663_vm5, %v599_v35, %v603_v14  ;;  %v205_v63 = vld [vmem:[%s2609_s27 + $0x30] sm:$0xf]  ;;  %v206_v9 = vld [vmem:[%s2609_s27 + $0x38] sm:$0xf]  ;;  %v2195_v19 = vld [vmem:[%s2609_s27 + $0x3c] sm:$0x1] }
  0x56   : > { %961 = vrot.lane.b32.xlu0 %v910_v7, %s2547_s19  ;;  %672 = vst.msk [vmem:[#allocation2 + $0x1c] sm:$0xf] %vm207_vm6, %v604_v23  ;;  %v608_v7 = vrot.slane %v606_v43, 4  ;;  %v622_v12 = vrot.slane %v620_v48, 4  ;;  %v631_v62 = vrot.slane %v629_v56, 5  ;;  %v643_v46 = vshll.u32 %v2195_v19, 16 }
  0x57   : > { %214 = vst.msk [vmem:[#allocation2 + $0x30] sm:$0xf] %vm207_vm6, %v205_v63  ;;  %215 = vst.msk [vmem:[#allocation2 + $0x38] sm:$0xf] %vm207_vm6, %v206_v9  ;;  %v2196_v20 = vld [vmem:[%s2609_s27 + $0x40] sm:$0xf] }
  0x58   : > { %963 = vrot.lane.b32.xlu1 %v924_v8, %s2547_s19  ;;  %v611_v8 = vrot.slane %v609_v44, 5  ;;  %v2197_v52 = vld [vmem:[%s2609_s27 + $0x44] sm:$0x1]  ;;  %v648_v25 = vshrl.u32 %v2196_v20, 16  ;;  %v651_v1 = vshll.u32 %v2196_v20, 16  ;;  %vm2003_vm11 = vcmask 1042434  }
  0x59   : > { %v657_v54 = vshll.u32 %v2197_v52, 16  ;;  %v2246_v38 = vld [vmem:[%s2609_s27 + $0x10] sm:$0xe]  ;;  %v2247_v39 = vld [vmem:[%s2609_s27 + $0x14] sm:$0x1]  ;;  %vm2006_vm12 = vcmask 1043459  }
  0x5a   : > { %359 = vrot.lane.b32.xlu0 %v332_v16, %s2546_s4  ;;  %v625_v16 = vrot.slane %v623_v50, 5  ;;  %v612_v61 = vor.u32 %v611_v8, %v608_v7  ;;  %v650_v5 = vrot.slane %v648_v25, 4  ;;  %v653_v6 = vrot.slane %v651_v1, 5  ;;  %v2248_v41 = vld [vmem:[%s2609_s27 + $0x18] sm:$0xe] }
  0x5b   : > { %v2249_v42 = vld [vmem:[%s2609_s27 + $0x1c] sm:$0x1]  ;;  %v2262_v44 = vrot.slane %v2246_v38, 9  ;;  %v2263_v48 = vrot.slane %v2248_v41, 9  ;;  %v2250_v20 = vld [vmem:[%s2609_s27 + $0x20] sm:$0xe] }
  0x5c   : > { %361 = vrot.lane.b32.xlu1 %v346_v58, %s2546_s4  ;;  %v617_v58 = vrot.slane %v615_v45, 5  ;;  %v626_v17 = vor.u32 %v625_v16, %v622_v12  ;;  %v613_v13 = vrot.slane %v612_v61, 4  ;;  %v654_v2 = vor.u32 %v653_v6, %v650_v5 }
  0x5d   : > { %v1059_v45 = vrot.slane %v2247_v39, 5  ;;  %vm2062_vm13 = vcmask 517120  }
  0x5e   : > { %753 = vrot.lane.b32.xlu0 %v736_v18, %s2546_s4  ;;  %v2194_v18 = vld [vmem:[%s2609_s27 + $0x38] sm:$0xf]  ;;  %v627_v24 = vrot.slane %v626_v17, 4  ;;  %v618_v4 = vsel %vm2663_vm5, %v613_v13, %v617_v58  ;;  %v655_v33 = vrot.slane %v654_v2, 4 }
  0x5f   : > { %v634_v21 = vshrl.u32 %v2194_v18, 16  ;;  %v637_v22 = vshll.u32 %v2194_v18, 16  ;;  %673 = vst.msk [vmem:[#allocation2 + $0x24] sm:$0xf] %vm207_vm6, %v618_v4  ;;  %v1060_v56 = vsel %vm2589_vm2, %v2262_v44, %v1059_v45 }
  0x60   : > { %755 = vrot.lane.b32.xlu1 %v740_v3, %s2546_s4  ;;  %v952_v3 = vsel %vm2663_vm5, %v947_v60, %v951_v49  ;;  %v1063_v49 = vrot.slane %v2249_v42, 5  ;;  %s2369_s4 = sshll.u32 %s3253_s12, 3 }
  0x61   : > { %v636_v26 = vrot.slane %v634_v21, 4  ;;  %v639_v27 = vrot.slane %v637_v22, 5  ;;  %v2252_v21 = vld [vmem:[%s2609_s27 + $0x28] sm:$0xe]  ;;  %v2253_v22 = vld [vmem:[%s2609_s27 + $0x2c] sm:$0x1]  ;;  %s3174_s28 = scalar_lea.vmem %s3243_s3, %s2369_s4 }
  0x62   : > { %459 = vrot.lane.b32.xlu0 %v442_v53, %s2545_s30  ;;  %v632_v53 = vsel %vm2663_vm5, %v627_v24, %v631_v62  ;;  %v1064_v7 = vsel %vm2589_vm2, %v2263_v48, %v1063_v49  ;;  %v2264_v24 = vrot.slane %v2250_v20, 9  ;;  %v2265_v1 = vrot.slane %v2252_v21, 9  ;;  %v2260_v20 = vld [vmem:[%s2609_s27 + $0x48] sm:$0xe] }
  0x63   : > { %674 = vst.msk [vmem:[#allocation2 + $0x2c] sm:$0xf] %vm207_vm6, %v632_v53  ;;  %v640_v29 = vor.u32 %v639_v27, %v636_v26  ;;  %v1071_v4 = vrot.slane %v2253_v22, 5 }
  0x64   : > { %461 = vrot.lane.b32.xlu1 %v446_v30, %s2545_s30  ;;  %v645_v30 = vrot.slane %v643_v46, 5 }
  0x65   : > { %v641_v55 = vrot.slane %v640_v29, 4  ;;  %v1072_v5 = vsel %vm2589_vm2, %v2265_v1, %v1071_v4 }
  0x66   : > { %805 = vrot.lane.b32.xlu0 %v2228_v31, %s2545_s30  ;;  %v659_v31 = vrot.slane %v657_v54, 5 }
  0x67   : > { %v646_v10 = vsel %vm2663_vm5, %v641_v55, %v645_v30 }
  0x68   : > { %807 = vrot.lane.b32.xlu1 %v2229_v28, %s2545_s30  ;;  %675 = vst.msk [vmem:[#allocation2 + $0x34] sm:$0xf] %vm207_vm6, %v646_v10  ;;  %v660_v14 = vsel %vm2663_vm5, %v655_v33, %v659_v31 }
  0x69   : > { %676 = vst.msk [vmem:[#allocation2 + $0x3c] sm:$0xf] %vm207_vm6, %v660_v14 }
  0x6a   : > { %512 = vrot.lane.b32.xlu0 %v2180_v36, %s2547_s19 }
  0x6c   : > { %514 = vrot.lane.b32.xlu1 %v2181_v59, %s2547_s19 }
  0x6e   : > { %965 = vrot.lane.b32.xlu0 %v938_v57, %s2547_s19 }
  0x70   : > { %967 = vrot.lane.b32.xlu1 %v952_v3, %s2547_s19  ;;  %v2251_v3 = vld [vmem:[%s2609_s27 + $0x24] sm:$0x1] }
  0x71   : > { %v1067_v46 = vrot.slane %v2251_v3, 5  ;;  %v2261_v3 = vld [vmem:[%s2609_s27 + $0x4c] sm:$0x1] }
  0x73   : > { %v1068_v27 = vsel %vm2589_vm2, %v2264_v24, %v1067_v46  ;;  %v1087_v24 = vrot.slane %v2261_v3, 5 }
  0x83   : > { %v794_v34 = vpop.permute.xlu0 %793 }
  0x86   : > { %v742_v15 = vpop.permute.xlu1 %741 }
  0x87   : > { %765 = vst.msk [vmem:[#allocation2 + $0x4] sm:$0xf] %vm371_vm7, %v742_v15  ;;  %v448_v11 = vpop.permute.xlu0 %447 }
  0x88   : > { %817 = vst.msk [vmem:[#allocation2 + $0x4] sm:$0xf] %vm471_vm8, %v794_v34 }
  0x8a   : > { %v744_v28 = vpop.permute.xlu1 %743 }
  0x8b   : > { %766 = vst.msk [vmem:[#allocation2 + $0xc] sm:$0xf] %vm371_vm7, %v744_v28  ;;  %v501_v32 = vpop.permute.xlu0 %500 }
  0x8e   : > { %v450_v35 = vpop.permute.xlu1 %449 }
  0x90   : > { %v348_v51 = vpop.permute.xlu0 %347 }
  0x91   : > { %372 = vst.msk [vmem:[#allocation2] sm:$0xf] %vm371_vm7, %v348_v51  ;;  %v2255_v51 = vld [vmem:[%s2609_s27 + $0x34] sm:$0x1] }
  0x92   : > { %472 = vst.msk [vmem:[#allocation2] sm:$0xf] %vm471_vm8, %v448_v11  ;;  %v796_v36 = vpop.permute.xlu1 %795 }
  0x93   : > { %525 = vst.msk [vmem:[#allocation2] sm:$0xf] %vm524_vm9, %v501_v32 }
  0x94   : > { %818 = vst.msk [vmem:[#allocation2 + $0xc] sm:$0xf] %vm471_vm8, %v796_v36  ;;  %v350_v37 = vpop.permute.xlu0 %349 }
  0x95   : > { %373 = vst.msk [vmem:[#allocation2 + $0x8] sm:$0xf] %vm371_vm7, %v350_v37  ;;  %v2256_v37 = vld [vmem:[%s2609_s27 + $0x38] sm:$0xe] }
  0x96   : > { %473 = vst.msk [vmem:[#allocation2 + $0x8] sm:$0xf] %vm471_vm8, %v450_v35  ;;  %v503_v23 = vpop.permute.xlu1 %502  ;;  %v2254_v35 = vld [vmem:[%s2609_s27 + $0x30] sm:$0xe]  ;;  %v2267_v42 = vrot.slane %v2256_v37, 9 }
  0x97   : > { %526 = vst.msk [vmem:[#allocation2 + $0x8] sm:$0xf] %vm524_vm9, %v503_v23  ;;  %v2257_v23 = vld [vmem:[%s2609_s27 + $0x3c] sm:$0x1]  ;;  %v2266_v39 = vrot.slane %v2254_v35, 9 }
  0x98   : > { %v954_v40 = vpop.permute.xlu0 %953 }
  0x99   : > { %977 = vst.msk [vmem:[#allocation2 + $0x4] sm:$0xf] %vm524_vm9, %v954_v40  ;;  %v1075_v40 = vrot.slane %v2255_v51, 5 }
  0x9a   : > { %v956_v43 = vpop.permute.xlu1 %955 }
  0x9b   : > { %978 = vst.msk [vmem:[#allocation2 + $0xc] sm:$0xf] %vm524_vm9, %v956_v43  ;;  %v1079_v43 = vrot.slane %v2257_v23, 5  ;;  %v1076_v45 = vsel %vm2589_vm2, %v2266_v39, %v1075_v40 }
  0x9c   : > { %v352_v47 = vpop.permute.xlu0 %351 }
  0x9d   : > { %374 = vst.msk [vmem:[#allocation2 + $0x10] sm:$0xf] %vm371_vm7, %v352_v47  ;;  %v1080_v49 = vsel %vm2589_vm2, %v2267_v42, %v1079_v43 }
  0x9e   : > { %v354_v50 = vpop.permute.xlu1 %353 }
  0x9f   : > { %375 = vst.msk [vmem:[#allocation2 + $0x18] sm:$0xf] %vm371_vm7, %v354_v50 }
  0xa0   : > { %v746_v59 = vpop.permute.xlu0 %745  ;;  %v985_v60 = vld [vmem:[#allocation2] sm:$0xff] }
  0xa1   : > { %767 = vst.msk [vmem:[#allocation2 + $0x14] sm:$0xf] %vm371_vm7, %v746_v59 }
  0xa2   : > { %1097 = vst.msk [vmem:[#allocation2] sm:$0xf] %vm207_vm6, %v1060_v56  ;;  %v748_v8 = vpop.permute.xlu1 %747  ;;  %v986_v12 = vld [vmem:[#allocation2 + $0x8] sm:$0xff] }
  0xa3   : > { %768 = vst.msk [vmem:[#allocation2 + $0x1c] sm:$0xf] %vm371_vm7, %v748_v8  ;;  %v2327_v16 = vcombine.high %v985_v60, %v986_v12  ;;  %v2326_v57 = vcombine.low %v985_v60, %v986_v12  ;;  %v2513_v17 = vld [vmem:[#allocation2 + $0x4] ss:$8 sps:$4 sm:$0xff]  }
  0xa4   : > { %1098 = vst.msk [vmem:[#allocation2 + $0x8] sm:$0xf] %vm207_vm6, %v1064_v7  ;;  %v452_v61 = vpop.permute.xlu0 %451  ;;  %1314 = vmatprep.mubr.bf16.mxu0 %v2513_v17  ;;  %v2258_v17 = vld [vmem:[%s2609_s27 + $0x40] sm:$0xe] }
  0xa5   : > { %474 = vst.msk [vmem:[#allocation2 + $0x10] sm:$0xf] %vm471_vm8, %v452_v61  ;;  %1515 = vmatprep.mubr.bf16.mxu1 %v2327_v16  ;;  %v2268_v21 = vrot.slane %v2258_v17, 9 }
  0xa6   : > { %v454_v58 = vpop.permute.xlu1 %453  ;;  %1516 = vmatmul.mubr.bf16.vlgmr.msra.gmra.mxu1 %v2326_v57 }
  0xa7   : > { %475 = vst.msk [vmem:[#allocation2 + $0x18] sm:$0xf] %vm471_vm8, %v454_v58 }
  0xa8   : > { %v798_v62 = vpop.permute.xlu0 %797 }
  0xa9   : > { %819 = vst.msk [vmem:[#allocation2 + $0x14] sm:$0xf] %vm471_vm8, %v798_v62 }
  0xaa   : > { %v800_v63 = vpop.permute.xlu1 %799 }
  0xab   : > { %v2511_v9 = vld [vmem:[#allocation2] ss:$8 sps:$4 sm:$0xff]   ;;  %820 = vst.msk [vmem:[#allocation2 + $0x1c] sm:$0xf] %vm471_vm8, %v800_v63 }
  0xac   : > { %v505_v18 = vpop.permute.xlu0 %504  ;;  %1315 = vmatmul.mubr.bf16.vlgmr.msra.gmra.mxu0 %v2511_v9 }
  0xad   : > { %527 = vst.msk [vmem:[#allocation2 + $0x10] sm:$0xf] %vm524_vm9, %v505_v18  ;;  %v2259_v18 = vld [vmem:[%s2609_s27 + $0x44] sm:$0x1] }
  0xae   : > { %v507_v19 = vpop.permute.xlu1 %506  ;;  %v1083_v22 = vrot.slane %v2259_v18, 5 }
  0xaf   : > { %528 = vst.msk [vmem:[#allocation2 + $0x18] sm:$0xf] %vm524_vm9, %v507_v19 }
  0xb0   : > { %v958_v13 = vpop.permute.xlu0 %957  ;;  %v1084_v46 = vsel %vm2589_vm2, %v2268_v21, %v1083_v22 }
  0xb1   : > { %979 = vst.msk [vmem:[#allocation2 + $0x14] sm:$0xf] %vm524_vm9, %v958_v13 }
  0xb2   : > { %v960_v52 = vpop.permute.xlu1 %959 }
  0xb3   : > { %980 = vst.msk [vmem:[#allocation2 + $0x1c] sm:$0xf] %vm524_vm9, %v960_v52  ;;  %v2269_v52 = vrot.slane %v2260_v20, 9 }
  0xb4   : > { %v356_v25 = vpop.permute.xlu0 %355 }
  0xb5   : > { %376 = vst.msk [vmem:[#allocation2 + $0x20] sm:$0xf] %vm371_vm7, %v356_v25  ;;  %v1088_v1 = vsel %vm2589_vm2, %v2269_v52, %v1087_v24 }
  0xb6   : > { %v358_v26 = vpop.permute.xlu1 %357 }
  0xb7   : > { %377 = vst.msk [vmem:[#allocation2 + $0x28] sm:$0xf] %vm371_vm7, %v358_v26 }
  0xb8   : > { %v750_v54 = vpop.permute.xlu0 %749  ;;  %v987_v53 = vld [vmem:[#allocation2 + $0x10] sm:$0xff] }
  0xb9   : > { %769 = vst.msk [vmem:[#allocation2 + $0x24] sm:$0xf] %vm371_vm7, %v750_v54 }
  0xba   : > { %1099 = vst.msk [vmem:[#allocation2 + $0x10] sm:$0xf] %vm207_vm6, %v1068_v27  ;;  %v752_v6 = vpop.permute.xlu1 %751  ;;  %v988_v29 = vld [vmem:[#allocation2 + $0x18] sm:$0xff] }
  0xbb   : > { %770 = vst.msk [vmem:[#allocation2 + $0x2c] sm:$0xf] %vm371_vm7, %v752_v6  ;;  %v2329_v30 = vcombine.high %v987_v53, %v988_v29  ;;  %v2328_v2 = vcombine.low %v987_v53, %v988_v29  ;;  %v2514_v15 = vld [vmem:[#allocation2 + $0x14] ss:$8 sps:$4 sm:$0xff]  }
  0xbc   : > { %1100 = vst.msk [vmem:[#allocation2 + $0x18] sm:$0xf] %vm207_vm6, %v1072_v5  ;;  %v456_v31 = vpop.permute.xlu0 %455  ;;  %1322 = vmatprep.mubr.bf16.mxu0 %v2514_v15  ;;  %v1583_v15 = vlaneseq }
  0xbd   : > { %476 = vst.msk [vmem:[#allocation2 + $0x20] sm:$0xf] %vm471_vm8, %v456_v31  ;;  %1523 = vmatprep.mubr.bf16.mxu1 %v2329_v30 }
  0xbe   : > { %v458_v55 = vpop.permute.xlu1 %457  ;;  %1524 = vmatmul.mubr.bf16.gmra.mxu1 %v2328_v2  ;;  %v1584_v23 = vshrl.u32 %v1583_v15, 7 }
  0xbf   : > { %477 = vst.msk [vmem:[#allocation2 + $0x28] sm:$0xf] %vm471_vm8, %v458_v55 }
  0xc0   : > { %v802_v33 = vpop.permute.xlu0 %801 }
  0xc1   : > { %821 = vst.msk [vmem:[#allocation2 + $0x24] sm:$0xf] %vm471_vm8, %v802_v33  ;;  %v1107_v14 = vld [vmem:[#allocation2 + $0x10] sm:$0xff] }
  0xc2   : > { %v804_v10 = vpop.permute.xlu1 %803 }
  0xc3   : > { %v1108_v34 = vld [vmem:[#allocation2 + $0x18] sm:$0xff]  ;;  %822 = vst.msk [vmem:[#allocation2 + $0x2c] sm:$0xf] %vm471_vm8, %v804_v10 }
  0xc4   : > { %v2304_v11 = vcombine.low %v1107_v14, %v1108_v34  ;;  %v509_v28 = vpop.permute.xlu0 %508  ;;  %v2548_v14 = vmov 1983009808  }
  0xc5   : > { %529 = vst.msk [vmem:[#allocation2 + $0x20] sm:$0xf] %vm524_vm9, %v509_v28  ;;  %v1581_v34 = vunpack.c.l.s4 %v2548_v14 }
  0xc6   : > { %1323 = vmatmul.mubr.bf16.gmra.mxu0 %v2304_v11  ;;  %v511_v32 = vpop.permute.xlu1 %510  ;;  %v3149_v11 = vld [vmem:[%s3242_s2] ss:$0 sm:$0xff] }
  0xc7   : > { %530 = vst.msk [vmem:[#allocation2 + $0x28] sm:$0xf] %vm524_vm9, %v511_v32  ;;  %v1582_v37 = vunpack.c.0.s8 %v1581_v34 }
  0xc8   : > { %v962_v36 = vpop.permute.xlu0 %961 }
  0xc9   : > { %981 = vst.msk [vmem:[#allocation2 + $0x24] sm:$0xf] %vm524_vm9, %v962_v36 }
  0xca   : > { %v964_v38 = vpop.permute.xlu1 %963 }
  0xcb   : > { %982 = vst.msk [vmem:[#allocation2 + $0x2c] sm:$0xf] %vm524_vm9, %v964_v38 }
  0xcc   : > { %v360_v41 = vpop.permute.xlu0 %359 }
  0xcd   : > { %378 = vst.msk [vmem:[#allocation2 + $0x30] sm:$0xf] %vm371_vm7, %v360_v41  ;;  %v3153_v41 = vsub.s32 %v1582_v37, %v1584_v23 }
  0xce   : > { %v362_v44 = vpop.permute.xlu1 %361 }
  0xcf   : > { %379 = vst.msk [vmem:[#allocation2 + $0x38] sm:$0xf] %vm371_vm7, %v362_v44 }
  0xd0   : > { %v754_v47 = vpop.permute.xlu0 %753  ;;  %v989_v48 = vld [vmem:[#allocation2 + $0x20] sm:$0xff] }
  0xd1   : > { %771 = vst.msk [vmem:[#allocation2 + $0x34] sm:$0xf] %vm371_vm7, %v754_v47 }
  0xd2   : > { %1101 = vst.msk [vmem:[#allocation2 + $0x20] sm:$0xf] %vm207_vm6, %v1076_v45  ;;  %v756_v50 = vpop.permute.xlu1 %755  ;;  %v990_v56 = vld [vmem:[#allocation2 + $0x28] sm:$0xff] }
  0xd3   : > { %772 = vst.msk [vmem:[#allocation2 + $0x3c] sm:$0xf] %vm371_vm7, %v756_v50  ;;  %v2331_v59 = vcombine.high %v989_v48, %v990_v56  ;;  %v2330_v60 = vcombine.low %v989_v48, %v990_v56  ;;  %v2516_v58 = vld [vmem:[#allocation2 + $0x24] ss:$8 sps:$4 sm:$0xff]  }
  0xd4   : > { %1102 = vst.msk [vmem:[#allocation2 + $0x28] sm:$0xf] %vm207_vm6, %v1080_v49  ;;  %v460_v7 = vpop.permute.xlu0 %459  ;;  %1330 = vmatprep.mubr.bf16.mxu0 %v2516_v58 }
  0xd5   : > { %478 = vst.msk [vmem:[#allocation2 + $0x30] sm:$0xf] %vm471_vm8, %v460_v7  ;;  %1531 = vmatprep.mubr.bf16.mxu1 %v2331_v59 }
  0xd6   : > { %v462_v8 = vpop.permute.xlu1 %461  ;;  %1532 = vmatmul.mubr.bf16.gmra.mxu1 %v2330_v60 }
  0xd7   : > { %479 = vst.msk [vmem:[#allocation2 + $0x38] sm:$0xf] %vm471_vm8, %v462_v8 }
  0xd8   : > { %v806_v12 = vpop.permute.xlu0 %805 }
  0xd9   : > { %823 = vst.msk [vmem:[#allocation2 + $0x34] sm:$0xf] %vm471_vm8, %v806_v12  ;;  %v1109_v57 = vld [vmem:[#allocation2 + $0x20] sm:$0xff] }
  0xda   : > { %v808_v16 = vpop.permute.xlu1 %807 }
  0xdb   : > { %v1110_v61 = vld [vmem:[#allocation2 + $0x28] sm:$0xff]  ;;  %824 = vst.msk [vmem:[#allocation2 + $0x3c] sm:$0xf] %vm471_vm8, %v808_v16 }
  0xdc   : > { %v2306_v62 = vcombine.low %v1109_v57, %v1110_v61  ;;  %v513_v63 = vpop.permute.xlu0 %512 }
  0xdd   : > { %531 = vst.msk [vmem:[#allocation2 + $0x30] sm:$0xf] %vm524_vm9, %v513_v63 }
  0xde   : > { %1331 = vmatmul.mubr.bf16.gmra.mxu0 %v2306_v62  ;;  %v515_v9 = vpop.permute.xlu1 %514 }
  0xdf   : > { %532 = vst.msk [vmem:[#allocation2 + $0x38] sm:$0xf] %vm524_vm9, %v515_v9 }
  0xe0   : > { %v966_v19 = vpop.permute.xlu0 %965 }
  0xe1   : > { %983 = vst.msk [vmem:[#allocation2 + $0x34] sm:$0xf] %vm524_vm9, %v966_v19 }
  0xe2   : > { %v968_v13 = vpop.permute.xlu1 %967 }
  0xe3   : > { %984 = vst.msk [vmem:[#allocation2 + $0x3c] sm:$0xf] %vm524_vm9, %v968_v13 }
  0xe8   : > { %v991_v25 = vld [vmem:[#allocation2 + $0x30] sm:$0xff] }
  0xe9   : > { %1103 = vst.msk [vmem:[#allocation2 + $0x30] sm:$0xf] %vm207_vm6, %v1084_v46 }
  0xea   : > { %v992_v4 = vld [vmem:[#allocation2 + $0x38] sm:$0xff] }
  0xeb   : > { %1104 = vst.msk [vmem:[#allocation2 + $0x38] sm:$0xf] %vm207_vm6, %v1088_v1  ;;  %v2333_v26 = vcombine.high %v991_v25, %v992_v4  ;;  %v2332_v27 = vcombine.low %v991_v25, %v992_v4  ;;  %v2518_v54 = vld [vmem:[#allocation2 + $0x34] ss:$8 sps:$4 sm:$0xff]  }
  0xec   : > { %1338 = vmatprep.mubr.bf16.mxu0 %v2518_v54 }
  0xed   : > { %1539 = vmatprep.mubr.bf16.mxu1 %v2333_v26 }
  0xee   : > { %1540 = vmatmul.mubr.bf16.gmra.mxu1 %v2332_v27 }
  0xf2   : > { %v2520_v53 = vld [vmem:[#allocation2 + $0x30] ss:$8 sps:$4 sm:$0xff]  }
  0xf3   : > { %1339 = vmatmul.mubr.bf16.gmra.mxu0 %v2520_v53 }
 0x166   : > { %v2426_v5 = vpop.f32.mrf.mxu1 }
 0x168   : > { %v2427_v6 = vpop.f32.mrf.mxu1 }
 0x169   : > { %v2428_v0 = vadd.f32 %v2427_v6, %v2426_v5 }
 0x16a   : > { %v2429_v29 = vpop.f32.mrf.mxu1 }
 0x16c   : > { %v2386_v30 = vpop.f32.mrf.mxu0  ;;  %v2430_v55 = vpop.f32.mrf.mxu1 }
 0x16d   : > { %v2431_v32 = vadd.f32 %v2430_v55, %v2429_v29 }
 0x16e   : > { %v2387_v2 = vpop.f32.mrf.mxu0 }
 0x16f   : > { %v2388_v31 = vadd.f32 %v2387_v2, %v2386_v30 }
 0x170   : > { %v2389_v33 = vpop.f32.mrf.mxu0 }
 0x171   : > { %v1518_v10 = vadd.f32 %v2428_v0, %v2388_v31 }
 0x172   : > { %v2390_v28 = vpop.f32.mrf.mxu0 }
 0x173   : > { %v2391_v35 = vadd.f32 %v2390_v28, %v2389_v33  ;;  %v1555_v51 = vadd.f32 %v3149_v11, %v1518_v10 }
 0x175   : > { %v1521_v36 = vadd.f32 %v2431_v32, %v2391_v35  ;;  %v1563_v39 = vmax.f32 %v1555_v51, 0.0 }
 0x177   : > { %v1556_v38 = vadd.f32 %v3149_v11, %v1521_v36 }
 0x179   : > { %v1564_v40 = vmax.f32 %v1556_v38, 0.0 }
 0x17b   : > { %v1571_v42 = vmax.f32 %v1563_v39, %v1564_v40 }
 0x17d   : > { %v1579_v43 = vcombine.high %v1571_v42, %v1571_v42  ;;  %v1586_v44 = vrot.slane %v1571_v42, %v3153_v41 }
 0x17e   : > { %v2432_v45 = vpop.f32.mrf.mxu1 }
 0x17f   : > { %v1593_v47 = vrot.slane %v1579_v43, %v3153_v41  ;;  %v1594_v48 = vcombine.high %v1586_v44, %v1586_v44  ;;  %v2351_v49 = vrot.slane %v1586_v44, 9 }
 0x180   : > { %v2433_v50 = vpop.f32.mrf.mxu1 }
 0x181   : > { %v1595_v56 = vcombine.high %v1593_v47, %v1593_v47  ;;  %v2352_v59 = vrot.slane %v1594_v48, 9  ;;  %v2353_v60 = vrot.slane %v1593_v47, 9  ;;  %v1711_v7 = vmax.f32 %v1586_v44, %v2351_v49 }
 0x182   : > { %v2435_v61 = vpop.f32.mrf.mxu1  ;;  %v2434_v22 = vadd.f32 %v2433_v50, %v2432_v45 }
 0x183   : > { %v2354_v8 = vrot.slane %v1595_v56, 9  ;;  %v1712_v12 = vmax.f32 %v1594_v48, %v2352_v59  ;;  %v1713_v16 = vmax.f32 %v1593_v47, %v2353_v60  ;;  %v1727_v57 = vpack.c.bf16 %v1711_v7, %v1711_v7 }
 0x184   : > { %v2436_v13 = vpop.f32.mrf.mxu1 }
 0x185   : > { %v1714_v62 = vmax.f32 %v1595_v56, %v2354_v8  ;;  %v1728_v63 = vpack.c.bf16 %v1712_v12, %v1712_v12  ;;  %v1729_v9 = vpack.c.bf16 %v1713_v16, %v1713_v16  ;;  %v1765_v17 = vrot.slane %v1727_v57, %v3153_v41 }
 0x186   : > { %v2392_v58 = vpop.f32.mrf.mxu0  ;;  %v2437_v4 = vadd.f32 %v2436_v13, %v2435_v61 }
 0x187   : > { %v1730_v19 = vpack.c.bf16 %v1714_v62, %v1714_v62  ;;  %v1772_v20 = vrot.slane %v1728_v63, %v3153_v41  ;;  %v1779_v3 = vrot.slane %v1729_v9, %v3153_v41  ;;  %v1877_v21 = vrot.slane %v1765_v17, %v3153_v41 }
 0x188   : > { %v2393_v18 = vpop.f32.mrf.mxu0 }
 0x189   : > { %v2394_v52 = vadd.f32 %v2393_v18, %v2392_v58  ;;  %v1786_v46 = vrot.slane %v1730_v19, %v3153_v41  ;;  %v1884_v25 = vrot.slane %v1772_v20, %v3153_v41  ;;  %v1891_v1 = vrot.slane %v1779_v3, %v3153_v41 }
 0x18a   : > { %v2395_v24 = vpop.f32.mrf.mxu0  ;;  %v1983_v29 = vunpack.c.l.b16 %v1877_v21 }
 0x18b   : > { %v1526_v26 = vadd.f32 %v2434_v22, %v2394_v52  ;;  %v1898_v54 = vrot.slane %v1786_v46, %v3153_v41  ;;  %v1984_v53 = vunpack.c.l.b16 %v1884_v25  ;;  %v1985_v5 = vunpack.c.l.b16 %v1891_v1 }
 0x18c   : > { %v2396_v27 = vpop.f32.mrf.mxu0 }
 0x18d   : > { %v2397_v6 = vadd.f32 %v2396_v27, %v2395_v24  ;;  %v1557_v30 = vadd.f32 %v3149_v11, %v1526_v26  ;;  %v1986_v2 = vunpack.c.l.b16 %v1898_v54  ;;  %v1999_v0 = vrot.slane %v1984_v53, 7 }
 0x18e   : > { %v2002_v31 = vrot.slane %v1985_v5, 6 }
 0x18f   : > { %v1529_v55 = vadd.f32 %v2437_v4, %v2397_v6  ;;  %v2001_v33 = vsel %vm2000_vm10, %v1999_v0, %v1983_v29  ;;  %v2005_v10 = vrot.slane %v1986_v2, 5  ;;  %v1565_v28 = vmax.f32 %v1557_v30, 0.0 }
 0x190   : > { %v2004_v34 = vsel %vm2003_vm11, %v2002_v31, %v2001_v33 }
 0x191   : > { %v1558_v14 = vadd.f32 %v3149_v11, %v1529_v55  ;;  %v2007_v15 = vsel %vm2006_vm12, %v2005_v10, %v2004_v34 }
 0x192   : > { %v2026_v35 = vpack.c.b16 %v2007_v15, %v2007_v15 }
 0x193   : > { %v1566_v32 = vmax.f32 %v1558_v14, 0.0 }
 0x194   : > { %v2036_v36 = vrot.slane %v2026_v35, %v3153_v41 }
 0x195   : > { %v1572_v51 = vmax.f32 %v1565_v28, %v1566_v32 }
 0x196   : > { %v2438_v38 = vpop.f32.mrf.mxu1  ;;  %2063 = vst.msk [vmem:[%s3174_s28] sm:$0x3] %vm2062_vm13, %v2036_v36 }
 0x197   : > { %v1596_v37 = vcombine.high %v1572_v51, %v1572_v51  ;;  %v1603_v23 = vrot.slane %v1572_v51, %v3153_v41 }
 0x198   : > { %v2439_v43 = vpop.f32.mrf.mxu1 }
 0x199   : > { %v1610_v39 = vrot.slane %v1596_v37, %v3153_v41  ;;  %v1611_v40 = vcombine.high %v1603_v23, %v1603_v23  ;;  %v2355_v42 = vrot.slane %v1603_v23, 9  ;;  %v2440_v18 = vadd.f32 %v2439_v43, %v2438_v38 }
 0x19a   : > { %v2441_v60 = vpop.f32.mrf.mxu1 }
 0x19b   : > { %v1612_v44 = vcombine.high %v1610_v39, %v1610_v39  ;;  %v2356_v45 = vrot.slane %v1611_v40, 9  ;;  %v2357_v47 = vrot.slane %v1610_v39, 9  ;;  %v1715_v48 = vmax.f32 %v1603_v23, %v2355_v42 }
 0x19c   : > { %v2442_v9 = vpop.f32.mrf.mxu1 }
 0x19d   : > { %v2358_v49 = vrot.slane %v1612_v44, 9  ;;  %v1716_v50 = vmax.f32 %v1611_v40, %v2356_v45  ;;  %v1717_v56 = vmax.f32 %v1610_v39, %v2357_v47  ;;  %v1731_v59 = vpack.c.bf16 %v1715_v48, %v1715_v48 }
 0x19e   : > { %v2398_v7 = vpop.f32.mrf.mxu0  ;;  %v2443_v22 = vadd.f32 %v2442_v9, %v2441_v60 }
 0x19f   : > { %v1718_v8 = vmax.f32 %v1612_v44, %v2358_v49  ;;  %v1732_v12 = vpack.c.bf16 %v1716_v50, %v1716_v50  ;;  %v1733_v16 = vpack.c.bf16 %v1717_v56, %v1717_v56  ;;  %v1793_v57 = vrot.slane %v1731_v59, %v3153_v41 }
 0x1a0   : > { %v2399_v61 = vpop.f32.mrf.mxu0 }
 0x1a1   : > { %v1734_v58 = vpack.c.bf16 %v1718_v8, %v1718_v8  ;;  %v1800_v62 = vrot.slane %v1732_v12, %v3153_v41  ;;  %v1807_v63 = vrot.slane %v1733_v16, %v3153_v41  ;;  %v1905_v17 = vrot.slane %v1793_v57, %v3153_v41 }
 0x1a2   : > { %v2400_v19 = vadd.f32 %v2399_v61, %v2398_v7  ;;  %v2401_v20 = vpop.f32.mrf.mxu0 }
 0x1a3   : > { %v1814_v3 = vrot.slane %v1734_v58, %v3153_v41  ;;  %v1912_v13 = vrot.slane %v1800_v62, %v3153_v41  ;;  %v1919_v21 = vrot.slane %v1807_v63, %v3153_v41  ;;  %v1987_v26 = vunpack.c.l.b16 %v1905_v17 }
 0x1a4   : > { %v1534_v52 = vadd.f32 %v2440_v18, %v2400_v19  ;;  %v2402_v24 = vpop.f32.mrf.mxu0 }
 0x1a5   : > { %v1926_v46 = vrot.slane %v1814_v3, %v3153_v41  ;;  %v1988_v25 = vunpack.c.l.b16 %v1912_v13  ;;  %v1989_v1 = vunpack.c.l.b16 %v1919_v21  ;;  %v2403_v4 = vadd.f32 %v2402_v24, %v2401_v20 }
 0x1a6   : > { %v1559_v27 = vadd.f32 %v3149_v11, %v1534_v52 }
 0x1a7   : > { %v1990_v54 = vunpack.c.l.b16 %v1926_v46  ;;  %v2008_v53 = vrot.slane %v1988_v25, 7  ;;  %v2010_v5 = vrot.slane %v1989_v1, 6  ;;  %v1537_v6 = vadd.f32 %v2443_v22, %v2403_v4 }
 0x1a8   : > { %v1567_v55 = vmax.f32 %v1559_v27, 0.0 }
 0x1a9   : > { %v2009_v29 = vsel %vm2000_vm10, %v2008_v53, %v1987_v26  ;;  %v2012_v30 = vrot.slane %v1990_v54, 5  ;;  %v1560_v2 = vadd.f32 %v3149_v11, %v1537_v6 }
 0x1aa   : > { %v2011_v0 = vsel %vm2003_vm11, %v2010_v5, %v2009_v29 }
 0x1ab   : > { %v2013_v31 = vsel %vm2006_vm12, %v2012_v30, %v2011_v0  ;;  %v1568_v33 = vmax.f32 %v1560_v2, 0.0 }
 0x1ac   : > { %v2027_v10 = vpack.c.b16 %v2013_v31, %v2013_v31 }
 0x1ad   : > { %v1573_v14 = vmax.f32 %v1567_v55, %v1568_v33 }
 0x1ae   : > { %v2043_v34 = vrot.slane %v2027_v10, %v3153_v41  ;;  %v2444_v32 = vpop.f32.mrf.mxu1 }
 0x1af   : > { %v1613_v15 = vcombine.high %v1573_v14, %v1573_v14  ;;  %v1620_v28 = vrot.slane %v1573_v14, %v3153_v41 }
 0x1b0   : > { %2064 = vst.msk [vmem:[%s3174_s28 + $0x2] sm:$0x3] %vm2062_vm13, %v2043_v34  ;;  %v2445_v37 = vpop.f32.mrf.mxu1 }
 0x1b1   : > { %v1627_v35 = vrot.slane %v1613_v15, %v3153_v41  ;;  %v1628_v51 = vcombine.high %v1620_v28, %v1620_v28  ;;  %v2359_v36 = vrot.slane %v1620_v28, 9  ;;  %v2446_v61 = vadd.f32 %v2445_v37, %v2444_v32 }
 0x1b2   : > { %v2447_v47 = vpop.f32.mrf.mxu1 }
 0x1b3   : > { %v1629_v23 = vcombine.high %v1627_v35, %v1627_v35  ;;  %v2360_v38 = vrot.slane %v1628_v51, 9  ;;  %v2361_v39 = vrot.slane %v1627_v35, 9  ;;  %v1719_v40 = vmax.f32 %v1620_v28, %v2359_v36  ;;  %v2404_v48 = vpop.f32.mrf.mxu0 }
 0x1b4   : > { %v2448_v16 = vpop.f32.mrf.mxu1 }
 0x1b5   : > { %v2362_v42 = vrot.slane %v1629_v23, 9  ;;  %v1720_v43 = vmax.f32 %v1628_v51, %v2360_v38  ;;  %v1721_v44 = vmax.f32 %v1627_v35, %v2361_v39  ;;  %v1735_v45 = vpack.c.bf16 %v1719_v40, %v1719_v40  ;;  %v2405_v60 = vpop.f32.mrf.mxu0 }
 0x1b6   : > { %v2406_v58 = vadd.f32 %v2405_v60, %v2404_v48  ;;  %v2449_v18 = vadd.f32 %v2448_v16, %v2447_v47 }
 0x1b7   : > { %v1722_v49 = vmax.f32 %v1629_v23, %v2362_v42  ;;  %v1736_v50 = vpack.c.bf16 %v1720_v43, %v1720_v43  ;;  %v1737_v56 = vpack.c.bf16 %v1721_v44, %v1721_v44  ;;  %v1821_v59 = vrot.slane %v1735_v45, %v3153_v41  ;;  %v2407_v62 = vpop.f32.mrf.mxu0 }
 0x1b8   : > { %v1542_v19 = vadd.f32 %v2446_v61, %v2406_v58 }
 0x1b9   : > { %v1738_v7 = vpack.c.bf16 %v1722_v49, %v1722_v49  ;;  %v1828_v8 = vrot.slane %v1736_v50, %v3153_v41  ;;  %v1835_v12 = vrot.slane %v1737_v56, %v3153_v41  ;;  %v1933_v57 = vrot.slane %v1821_v59, %v3153_v41  ;;  %v2408_v20 = vpop.f32.mrf.mxu0 }
 0x1ba   : > { %v2409_v22 = vadd.f32 %v2408_v20, %v2407_v62  ;;  %v1561_v24 = vadd.f32 %v3149_v11, %v1542_v19 }
 0x1bb   : > { %v1842_v63 = vrot.slane %v1738_v7, %v3153_v41  ;;  %v1940_v9 = vrot.slane %v1828_v8, %v3153_v41  ;;  %v1947_v17 = vrot.slane %v1835_v12, %v3153_v41  ;;  %v1991_v52 = vunpack.c.l.b16 %v1933_v57 }
 0x1bc   : > { %v1545_v4 = vadd.f32 %v2449_v18, %v2409_v22  ;;  %v1569_v6 = vmax.f32 %v1561_v24, 0.0 }
 0x1bd   : > { %v1954_v3 = vrot.slane %v1842_v63, %v3153_v41  ;;  %v1992_v13 = vunpack.c.l.b16 %v1940_v9  ;;  %v1993_v21 = vunpack.c.l.b16 %v1947_v17 }
 0x1be   : > { %v1562_v54 = vadd.f32 %v3149_v11, %v1545_v4 }
 0x1bf   : > { %v1994_v46 = vunpack.c.l.b16 %v1954_v3  ;;  %v2014_v25 = vrot.slane %v1992_v13, 7  ;;  %v2016_v1 = vrot.slane %v1993_v21, 6 }
 0x1c0   : > { %v1570_v29 = vmax.f32 %v1562_v54, 0.0 }
 0x1c1   : > { %v2015_v26 = vsel %vm2000_vm10, %v2014_v25, %v1991_v52  ;;  %v2018_v27 = vrot.slane %v1994_v46, 5 }
 0x1c2   : > { %v2017_v53 = vsel %vm2003_vm11, %v2016_v1, %v2015_v26  ;;  %v1574_v2 = vmax.f32 %v1569_v6, %v1570_v29 }
 0x1c3   : > { %v2019_v5 = vsel %vm2006_vm12, %v2018_v27, %v2017_v53 }
 0x1c4   : > { %v2028_v30 = vpack.c.b16 %v2019_v5, %v2019_v5  ;;  %v1630_v31 = vcombine.high %v1574_v2, %v1574_v2  ;;  %v1637_v55 = vrot.slane %v1574_v2, %v3153_v41 }
 0x1c6   : > { %v2050_v0 = vrot.slane %v2028_v30, %v3153_v41  ;;  %v1644_v33 = vrot.slane %v1630_v31, %v3153_v41  ;;  %v1645_v10 = vcombine.high %v1637_v55, %v1637_v55  ;;  %v2363_v14 = vrot.slane %v1637_v55, 9 }
 0x1c8   : > { %2065 = vst.msk [vmem:[%s3174_s28 + $0x4] sm:$0x3] %vm2062_vm13, %v2050_v0  ;;  %v1646_v11 = vcombine.high %v1644_v33, %v1644_v33  ;;  %v2364_v34 = vrot.slane %v1645_v10, 9  ;;  %v2365_v15 = vrot.slane %v1644_v33, 9  ;;  %v1723_v28 = vmax.f32 %v1637_v55, %v2363_v14 }
 0x1ca   : > { %v2366_v32 = vrot.slane %v1646_v11, 9  ;;  %v1724_v35 = vmax.f32 %v1645_v10, %v2364_v34  ;;  %v1725_v51 = vmax.f32 %v1644_v33, %v2365_v15  ;;  %v1739_v36 = vpack.c.bf16 %v1723_v28, %v1723_v28 }
 0x1cc   : > { %v1726_v37 = vmax.f32 %v1646_v11, %v2366_v32  ;;  %v1740_v23 = vpack.c.bf16 %v1724_v35, %v1724_v35  ;;  %v1741_v38 = vpack.c.bf16 %v1725_v51, %v1725_v51  ;;  %v1849_v39 = vrot.slane %v1739_v36, %v3153_v41 }
 0x1ce   : > { %v1742_v40 = vpack.c.bf16 %v1726_v37, %v1726_v37  ;;  %v1856_v42 = vrot.slane %v1740_v23, %v3153_v41  ;;  %v1863_v43 = vrot.slane %v1741_v38, %v3153_v41  ;;  %v1961_v45 = vrot.slane %v1849_v39, %v3153_v41 }
 0x1d0   : > { %v1870_v44 = vrot.slane %v1742_v40, %v3153_v41  ;;  %v1968_v47 = vrot.slane %v1856_v42, %v3153_v41  ;;  %v1975_v48 = vrot.slane %v1863_v43, %v3153_v41  ;;  %v1995_v59 = vunpack.c.l.b16 %v1961_v45 }
 0x1d2   : > { %v1982_v49 = vrot.slane %v1870_v44, %v3153_v41  ;;  %v1996_v50 = vunpack.c.l.b16 %v1968_v47  ;;  %v1997_v56 = vunpack.c.l.b16 %v1975_v48 }
 0x1d4   : > { %v1998_v60 = vunpack.c.l.b16 %v1982_v49  ;;  %v2020_v7 = vrot.slane %v1996_v50, 7  ;;  %v2022_v8 = vrot.slane %v1997_v56, 6 }
 0x1d6   : > { %v2021_v12 = vsel %vm2000_vm10, %v2020_v7, %v1995_v59  ;;  %v2024_v16 = vrot.slane %v1998_v60, 5 }
 0x1d7   : > { %v2023_v57 = vsel %vm2003_vm11, %v2022_v8, %v2021_v12 }
 0x1d8   : > { %v2025_v61 = vsel %vm2006_vm12, %v2024_v16, %v2023_v57 }
 0x1d9   : > { %v2029_v58 = vpack.c.b16 %v2025_v61, %v2025_v61 }
 0x1db   : > { %v2057_v62 = vrot.slane %v2029_v58, %v3153_v41 }
 0x1dd   : > { %2066 = vst.msk [vmem:[%s3174_s28 + $0x6] sm:$0x3] %vm2062_vm13, %v2057_v62 }
 0x1de PF: > { %s13_s14 = sadd.s32 1, %s2543_s14   ;;  %s3248_s12 = smov %s2539_s13 }
 0x1df   : > { %p10_p5 = scmp.ge.s32.totalorder %s13_s14, 4   ;;  %s3249_s13 = smov %s3251_s15 }
 0x1e1   :  { %12 = sbr.rel (!%p10_p5) target bundleno = 2 (0x2), region = 66 }

// kernel: autoencoder_forward.8
= control target key start
LH: loop header
LB: loop body
LE: loop exit
PB: predicated region body
PF: predicated region fallthrough
CT: control target
= control target key end

     0   :  { %s1952_s12 = smov 0   ;;  %s1954_s13 = smov 0   ;;  %s2318_s0 = inlined_call_operand.vmem [shape: bf16[2,6,10,64], index: 0, kind: input, shape index: {}]   ;;  %s2319_s1 = inlined_call_operand.vmem [shape: bf16[3,256,128], index: 1, kind: input, shape index: {}]   ;;  %s2320_s2 = inlined_call_operand.vmem [shape: f32[1,128], index: 2, kind: input, shape index: {}]   ;;  %s2321_s3 = inlined_call_operand.vmem [shape: bf16[2,2,2,128], index: 3, kind: output, shape index: {}]  }
   0x1   :  { %s1956_s14 = smov 0  }
   0x2 LB: > { %s25_s15 = sadd.s32 1, %s1922_s13  ;;  %p1529_p0 = scmp.ge.s32.totalorder %s1926_s14, 1  ;;  %s1926_s14 = sphi %s1956_s14, %s13_s14   ;;  %s1922_s13 = sphi %s1954_s13, %s2327_s13   ;;  %s1918_s12 = sphi %s1952_s12, %s2326_s12  }
   0x3   : > { %p27_p1 = scmp.ge.s32.totalorder %s25_s15, 2  ;;  %p151_p2 = scmp.lt.s32.totalorder %s1926_s14, 3 }
   0x5   : > { %s2329_s15 = smov (%p27_p1, %s25_s15), 0  ;;  %p152_p3 = pnand %p1529_p0, %p151_p2 }
   0x6   : > { %p178_p4 = scmp.lt.s32.totalorder (!%p152_p3), %s1918_s12, 1  ;;  %s1928_s30 = smov (!%p152_p3), 64  }
   0x7   : > { %155 = sbr.rel (%p152_p3) target bundleno = 434 (0x1b2), region = 32 }
   0xc   : > { %s2331_s12 = smov (!%p178_p4, %s1918_s12), 1  ;;  %vm214_vm0 = vsmask.f32 3328  ;;  %vm215_vm1 = vsmask.f32 7440  ;;  %v1846_v0 = vld [vmem:[%s2319_s1 + $0x78] sm:$0xff]  }
   0xd   : > { %v1847_v1 = vld [vmem:[%s2319_s1 + $0x38] sm:$0xff]   ;;  %s1817_s20 = smul.u32 48, %s2331_s12  ;;  %1745 = vmatprep.subr.bf16.mxu1 %v1846_v0  ;;  %v1848_v2 = vld [vmem:[%s2319_s1 + $0x70] sm:$0xff]   ;;  %vm306_vm2 = vcmask 1042432   ;;  %vm307_vm3 = vcmask 1046532   ;;  %v1851_v12 = vld [vmem:[%s2319_s1 + $0x68] sm:$0xff]  }
   0xe   : > { %1746 = vmatpush3.bf16.msra.mxu1 %v1847_v1  ;;  %v1849_v3 = vld [vmem:[%s2319_s1 + $0x30] sm:$0xff]   ;;  %v1850_v4 = vld [vmem:[%s2319_s1 + $0xf8] sm:$0xff]   ;;  %vm2006_vm4 = vmor %vm306_vm2, %vm307_vm3  ;;  %vm201_vm6 = vcmask 519168   ;;  %vm285_vm7 = vcmask 1043968   ;;  %vm1402_vm8 = vcmask 1041409   ;;  %s1531_s4 = sshll.u32 %s2331_s12, 1 }
   0xf   : > { %s1988_s27 = scalar_lea.vmem %s2318_s0, %s1817_s20  ;;  %1747 = vmatprep.subr.bf16.mxu1 %v1848_v2  ;;  %1717 = vmatprep.subr.bf16.mxu0 %v1850_v4  ;;  %vm2017_vm5 = vmor %vm214_vm0, %vm215_vm1  ;;  %v1852_v38 = vld [vmem:[%s2319_s1 + $0xb8] sm:$0xff]   ;;  %v1853_v54 = vld [vmem:[%s2319_s1 + $0x28] sm:$0xff]   ;;  %s190_s7 = scalar_lea.vmem %s2321_s3, %s1531_s4 }
  0x10   : > { %v1536_v5 = vld [vmem:[%s1988_s27 + $0x8] sm:$0xf]  ;;  %v206_v6 = vld [vmem:[%s1988_s27] sm:$0xf]  ;;  %v207_v7 = vld [vmem:[%s1988_s27 + $0x4] sm:$0x1]  ;;  %1718 = vmatpush3.bf16.msra.mxu0 %v1852_v38 }
  0x11   : > { %345 = vrot.lane.b32.xlu1 %v1536_v5, %s1928_s30  ;;  %v218_v8 = vshrl.u32 %v206_v6, 16  ;;  %v221_v9 = vshll.u32 %v206_v6, 16  ;;  %v227_v10 = vshll.u32 %v207_v7, 16  ;;  %v1537_v11 = vld [vmem:[%s1988_s27 + $0x10] sm:$0xf]  ;;  %v1899_v20 = vld [vmem:[%s2319_s1 + $0x140] sm:$0xff]  }
  0x12   : > { %v208_v13 = vld [vmem:[%s1988_s27 + $0x8] sm:$0xf]  ;;  %v209_v14 = vld [vmem:[%s1988_s27 + $0xc] sm:$0x1]  ;;  %v1550_v15 = vld [vmem:[%s1988_s27 + $0x10] sm:$0xe]  ;;  %1748 = vmatpush3.bf16.msra.mxu1 %v1849_v3 }
  0x13   : > { %v220_v16 = vrot.slane %v218_v8, 4  ;;  %v223_v17 = vrot.slane %v221_v9, 5  ;;  %v229_v18 = vrot.slane %v227_v10, 5  ;;  %v232_v19 = vshrl.u32 %v208_v13, 16  ;;  %v1551_v21 = vld [vmem:[%s1988_s27 + $0x14] sm:$0x1]  ;;  %1749 = vmatprep.subr.bf16.mxu1 %v1851_v12 }
  0x14   : > { %v235_v22 = vshll.u32 %v208_v13, 16  ;;  %v241_v23 = vshll.u32 %v209_v14, 16  ;;  %v1557_v24 = vrot.slane %v1550_v15, 9  ;;  %v491_v25 = vrot.slane %v1551_v21, 5  ;;  %v1548_v26 = vld [vmem:[%s1988_s27 + $0x8] sm:$0xe] }
  0x15   : > { %v224_v27 = vor.u32 %v223_v17, %v220_v16  ;;  %347 = vrot.lane.b32.xlu1 %v1537_v11, %s1928_s30  ;;  %v234_v28 = vrot.slane %v232_v19, 4  ;;  %v1549_v29 = vld [vmem:[%s1988_s27 + $0xc] sm:$0x1]  ;;  %v1556_v30 = vrot.slane %v1548_v26, 9  ;;  %v1566_v31 = vld [vmem:[%s1988_s27 + $0x18] sm:$0xf] }
  0x16   : > { %v237_v33 = vrot.slane %v235_v22, 5  ;;  %v243_v34 = vrot.slane %v241_v23, 5  ;;  %v492_v35 = vsel %vm2006_vm4, %v1557_v24, %v491_v25  ;;  %v487_v36 = vrot.slane %v1549_v29, 5  ;;  %v1567_v37 = vld [vmem:[%s1988_s27 + $0x1c] sm:$0x1]  ;;  %1750 = vmatpush3.bf16.msra.mxu1 %v1853_v54  ;;  %v1854_v1 = vld [vmem:[%s2319_s1 + $0xf0] sm:$0xff]  }
  0x17   : > { %v225_v39 = vrot.slane %v224_v27, 4  ;;  %v552_v40 = vshrl.u32 %v1566_v31, 16  ;;  %v555_v41 = vshll.u32 %v1566_v31, 16  ;;  %v561_v42 = vshll.u32 %v1567_v37, 16  ;;  %v1564_v43 = vld [vmem:[%s1988_s27 + $0x10] sm:$0xf]  ;;  %1719 = vmatprep.subr.bf16.mxu0 %v1854_v1 }
  0x18   : > { %v238_v44 = vor.u32 %v237_v33, %v234_v28  ;;  %v1565_v45 = vld [vmem:[%s1988_s27 + $0x14] sm:$0x1]  ;;  %v538_v46 = vshrl.u32 %v1564_v43, 16  ;;  %v541_v47 = vshll.u32 %v1564_v43, 16  ;;  %v212_v48 = vld [vmem:[%s1988_s27 + $0x18] sm:$0xf]  ;;  %v488_v3 = vsel %vm2006_vm4, %v1556_v30, %v487_v36 }
  0x19   : > { %v230_v49 = vsel %vm2017_vm5, %v225_v39, %v229_v18  ;;  %503 = vrot.lane.b32.xlu1 %v492_v35, %s1928_s30  ;;  %v554_v50 = vrot.slane %v552_v40, 4  ;;  %v557_v51 = vrot.slane %v555_v41, 5  ;;  %v563_v52 = vrot.slane %v561_v42, 5  ;;  %v213_v53 = vld [vmem:[%s1988_s27 + $0x1c] sm:$0x1]  ;;  %v1855_v25 = vld [vmem:[%s2319_s1 + $0x60] sm:$0xff]  }
  0x1a   : > { %273 = vrot.lane.b32.xlu0 %v230_v49, %s1928_s30  ;;  %v239_v55 = vrot.slane %v238_v44, 4  ;;  %v540_v56 = vrot.slane %v538_v46, 4  ;;  %v543_v57 = vrot.slane %v541_v47, 5  ;;  %v547_v58 = vshll.u32 %v1565_v45, 16  ;;  %v210_v59 = vld [vmem:[%s1988_s27 + $0x10] sm:$0xf]  ;;  %1751 = vmatprep.subr.bf16.mxu1 %v1855_v25 }
  0x1b   : > { %v558_v60 = vor.u32 %v557_v51, %v554_v50  ;;  %v260_v61 = vshrl.u32 %v212_v48, 16  ;;  %v263_v62 = vshll.u32 %v212_v48, 16  ;;  %v269_v63 = vshll.u32 %v213_v53, 16  ;;  %v211_v0 = vld [vmem:[%s1988_s27 + $0x14] sm:$0x1]  ;;  %v1857_v51 = vld [vmem:[%s2319_s1 + $0x20] sm:$0xff]  }
  0x1c   : > { %v244_v2 = vsel %vm2017_vm5, %v239_v55, %v243_v34  ;;  %v544_v4 = vor.u32 %v543_v57, %v540_v56  ;;  %v246_v5 = vshrl.u32 %v210_v59, 16  ;;  %v549_v7 = vrot.slane %v547_v58, 5  ;;  %v1554_v10 = vld [vmem:[%s1988_s27 + $0x20] sm:$0xe]  ;;  %v1555_v15 = vld [vmem:[%s1988_s27 + $0x24] sm:$0x1]  ;;  %1752 = vmatpush3.bf16.msra.mxu1 %v1857_v51 }
  0x1d   : > { %v559_v6 = vrot.slane %v558_v60, 4  ;;  %v262_v8 = vrot.slane %v260_v61, 4  ;;  %v265_v9 = vrot.slane %v263_v62, 5  ;;  %v271_v11 = vrot.slane %v269_v63, 5  ;;  %v2053_v21 = vld [vmem:[%s1988_s27 + $0x18] sm:$0xe] }
  0x1e   : > { %275 = vrot.lane.b32.xlu0 %v244_v2, %s1928_s30  ;;  %v248_v12 = vrot.slane %v246_v5, 4  ;;  %v249_v13 = vshll.u32 %v210_v59, 16  ;;  %v255_v14 = vshll.u32 %v211_v0, 16  ;;  %v545_v17 = vrot.slane %v544_v4, 4  ;;  %v2057_v23 = vld [vmem:[%s1988_s27 + $0x1c] sm:$0x1] }
  0x1f   : > { %v564_v16 = vsel %vm2017_vm5, %v559_v6, %v563_v52  ;;  %v266_v18 = vor.u32 %v265_v9, %v262_v8  ;;  %v1559_v19 = vrot.slane %v1554_v10, 9  ;;  %v1570_v24 = vld [vmem:[%s1988_s27 + $0x28] sm:$0xf]  ;;  %v499_v27 = vrot.slane %v1555_v15, 5  ;;  %v1571_v28 = vld [vmem:[%s1988_s27 + $0x2c] sm:$0x1] }
  0x20   : > { %595 = vrot.lane.b32.xlu1 %v564_v16, %s1928_s30  ;;  %v251_v22 = vrot.slane %v249_v13, 5  ;;  %v580_v29 = vshrl.u32 %v1570_v24, 16  ;;  %v1856_v30 = vld [vmem:[%s2319_s1 + $0xb0] sm:$0xff]   ;;  %v257_v33 = vrot.slane %v255_v14, 5  ;;  %v583_v34 = vshll.u32 %v1570_v24, 16  ;;  %v1858_v54 = vld [vmem:[%s2319_s1 + $0xe8] sm:$0xff]  }
  0x21   : > { %v267_v26 = vrot.slane %v266_v18, 4  ;;  %v589_v35 = vshll.u32 %v1571_v28, 16  ;;  %v1568_v36 = vld [vmem:[%s1988_s27 + $0x20] sm:$0xf]  ;;  %v550_v37 = vsel %vm2017_vm5, %v545_v17, %v549_v7  ;;  %1720 = vmatpush3.bf16.msra.mxu0 %v1856_v30  ;;  %v1558_v43 = vrot.slane %v2053_v21, 9  ;;  %v1859_v56 = vld [vmem:[%s2319_s1 + $0x58] sm:$0xff]  }
  0x22   : > { %501 = vrot.lane.b32.xlu0 %v488_v3, %s1928_s30  ;;  %v252_v31 = vor.u32 %v251_v22, %v248_v12  ;;  %v1539_v39 = vld [vmem:[%s1988_s27 + $0x20] sm:$0xf]  ;;  %v582_v40 = vrot.slane %v580_v29, 4  ;;  %v566_v41 = vshrl.u32 %v1568_v36, 16  ;;  %v585_v44 = vrot.slane %v583_v34, 5  ;;  %1721 = vmatprep.subr.bf16.mxu0 %v1858_v54  ;;  %v1860_v1 = vld [vmem:[%s2319_s1 + $0xa8] sm:$0xff]  }
  0x23   : > { %v272_v38 = vsel %vm2017_vm5, %v267_v26, %v271_v11  ;;  %v569_v45 = vshll.u32 %v1568_v36, 16  ;;  %v495_v46 = vrot.slane %v2057_v23, 5  ;;  %v591_v47 = vrot.slane %v589_v35, 5  ;;  %v1569_v48 = vld [vmem:[%s1988_s27 + $0x24] sm:$0x1]  ;;  %1753 = vmatprep.subr.bf16.mxu1 %v1859_v56  ;;  %v1861_v5 = vld [vmem:[%s2319_s1 + $0x18] sm:$0xff]  }
  0x24   : > { %279 = vrot.lane.b32.xlu1 %v272_v38, %s1928_s30  ;;  %v253_v42 = vrot.slane %v252_v31, 4  ;;  %v586_v49 = vor.u32 %v585_v44, %v582_v40  ;;  %v568_v50 = vrot.slane %v566_v41, 4  ;;  %v1538_v57 = vld [vmem:[%s1988_s27 + $0x18] sm:$0xf]  ;;  %v500_v58 = vsel %vm2006_vm4, %v1559_v19, %v499_v27  ;;  %v290_v59 = vld [vmem:[%s1988_s27] sm:$0xe]  ;;  %1754 = vmatpush3.bf16.msra.mxu1 %v1861_v5 }
  0x25   : > { %v571_v53 = vrot.slane %v569_v45, 5  ;;  %v575_v60 = vshll.u32 %v1569_v48, 16  ;;  %v291_v61 = vld [vmem:[%s1988_s27 + $0x4] sm:$0x1]  ;;  %v1532_v62 = vrot.slane %v290_v59, 9  ;;  %1722 = vmatpush3.bf16.msra.mxu0 %v1860_v1  ;;  %v496_v6 = vsel %vm2006_vm4, %v1558_v43, %v495_v46  ;;  %v1863_v14 = vld [vmem:[%s2319_s1 + $0x50] sm:$0xff]  }
  0x26   : > { %593 = vrot.lane.b32.xlu0 %v550_v37, %s1928_s30  ;;  %v258_v52 = vsel %vm2017_vm5, %v253_v42, %v257_v33  ;;  %v587_v55 = vrot.slane %v586_v49, 4  ;;  %v311_v0 = vrot.slane %v291_v61, 5  ;;  %v197_v4 = vld [vmem:[%s1988_s27] sm:$0xf]  ;;  %v292_v10 = vld [vmem:[%s1988_s27 + $0x8] sm:$0xe]  ;;  %1755 = vmatprep.subr.bf16.mxu1 %v1863_v14 }
  0x27   : > { %v572_v63 = vor.u32 %v571_v53, %v568_v50  ;;  %202 = vst.msk [vmem:[#allocation2] sm:$0xf] %vm201_vm6, %v197_v4  ;;  %v577_v8 = vrot.slane %v575_v60, 5  ;;  %v1862_v9 = vld [vmem:[%s2319_s1 + $0xe0] sm:$0xff]   ;;  %v293_v11 = vld [vmem:[%s1988_s27 + $0xc] sm:$0x1] }
  0x28   : > { %351 = vrot.lane.b32.xlu1 %v1539_v39, %s1928_s30  ;;  %v592_v2 = vsel %vm2017_vm5, %v587_v55, %v591_v47  ;;  %v312_v3 = vsel %vm2006_vm4, %v1532_v62, %v311_v0  ;;  %v1533_v12 = vrot.slane %v292_v10, 9  ;;  %v315_v13 = vrot.slane %v293_v11, 5  ;;  %1723 = vmatprep.subr.bf16.mxu0 %v1862_v9  ;;  %v1864_v17 = vld [vmem:[%s2319_s1 + $0xa0] sm:$0xff]   ;;  %v198_v18 = vld [vmem:[%s1988_s27 + $0x8] sm:$0xf]  ;;  %v1865_v19 = vld [vmem:[%s2319_s1 + $0x10] sm:$0xff]  }
  0x29   : > { %329 = vst.msk [vmem:[#allocation2 + $0x4] sm:$0xf] %vm201_vm6, %v312_v3  ;;  %v573_v7 = vrot.slane %v572_v63, 4  ;;  %203 = vst.msk [vmem:[#allocation2 + $0x8] sm:$0xf] %vm201_vm6, %v198_v18  ;;  %1724 = vmatpush3.bf16.msra.mxu0 %v1864_v17  ;;  %1756 = vmatpush3.bf16.msra.mxu1 %v1865_v19  ;;  %v1866_v21 = vld [vmem:[%s2319_s1 + $0xd8] sm:$0xff]  }
  0x2a   : > { %277 = vrot.lane.b32.xlu0 %v258_v52, %s1928_s30  ;;  %v316_v16 = vsel %vm2006_vm4, %v1533_v12, %v315_v13  ;;  %1725 = vmatprep.subr.bf16.mxu0 %v1866_v21  ;;  %v1867_v22 = vld [vmem:[%s2319_s1 + $0x48] sm:$0xff]   ;;  %v1868_v23 = vld [vmem:[%s2319_s1 + $0x98] sm:$0xff]   ;;  %v1870_v25 = vld [vmem:[%s2319_s1 + $0xd0] sm:$0xff]  }
  0x2b   : > { %v578_v15 = vsel %vm2017_vm5, %v573_v7, %v577_v8  ;;  %330 = vst.msk [vmem:[#allocation2 + $0xc] sm:$0xf] %vm201_vm6, %v316_v16  ;;  %1757 = vmatprep.subr.bf16.mxu1 %v1867_v22  ;;  %v1869_v24 = vld [vmem:[%s2319_s1 + $0x8] sm:$0xff]   ;;  %v1871_v26 = vld [vmem:[%s2319_s1 + $0x40] sm:$0xff]   ;;  %v1872_v27 = vld [vmem:[%s2319_s1 + $0x90] sm:$0xff]  }
  0x2c   : > { %507 = vrot.lane.b32.xlu1 %v500_v58, %s1928_s30  ;;  %v1873_v28 = vld [vmem:[%s2319_s1] sm:$0xff]   ;;  %v200_v29 = vld [vmem:[%s1988_s27 + $0x18] sm:$0xf]  ;;  %v1874_v30 = vld [vmem:[%s2319_s1 + $0xc8] sm:$0xff]  }
  0x2d   : > { %1726 = vmatpush3.bf16.msra.mxu0 %v1868_v23  ;;  %1758 = vmatpush3.bf16.msra.mxu1 %v1869_v24  ;;  %205 = vst.msk [vmem:[#allocation2 + $0x18] sm:$0xf] %vm201_vm6, %v200_v29  ;;  %v199_v31 = vld [vmem:[%s1988_s27 + $0x10] sm:$0xf]  ;;  %v1875_v33 = vld [vmem:[%s2319_s1 + $0x88] sm:$0xff]   ;;  %v1876_v34 = vld [vmem:[%s2319_s1 + $0x178] sm:$0xff]  }
  0x2e   : > { %349 = vrot.lane.b32.xlu0 %v1538_v57, %s1928_s30  ;;  %1727 = vmatprep.subr.bf16.mxu0 %v1870_v25  ;;  %204 = vst.msk [vmem:[#allocation2 + $0x10] sm:$0xf] %vm201_vm6, %v199_v31  ;;  %v296_v35 = vld [vmem:[%s1988_s27 + $0x18] sm:$0xe]  ;;  %v297_v36 = vld [vmem:[%s1988_s27 + $0x1c] sm:$0x1] }
  0x2f   : > { %1759 = vmatprep.subr.bf16.mxu1 %v1871_v26  ;;  %v1535_v37 = vrot.slane %v296_v35, 9  ;;  %v1878_v38 = vld [vmem:[%s2319_s1 + $0xc0] sm:$0xff]   ;;  %v323_v39 = vrot.slane %v297_v36, 5  ;;  %v294_v41 = vld [vmem:[%s1988_s27 + $0x10] sm:$0xe] }
  0x30   : > { %599 = vrot.lane.b32.xlu1 %v592_v2, %s1928_s30  ;;  %v1879_v40 = vld [vmem:[%s2319_s1 + $0x80] sm:$0xff]   ;;  %v295_v42 = vld [vmem:[%s1988_s27 + $0x14] sm:$0x1]  ;;  %v1534_v44 = vrot.slane %v294_v41, 9  ;;  %v1540_v47 = vld [vmem:[%s1988_s27 + $0x8] sm:$0xf] }
  0x31   : > { %1728 = vmatpush3.bf16.msra.mxu0 %v1872_v27  ;;  %1760 = vmatpush3.bf16.msra.mxu1 %v1873_v28  ;;  %v324_v43 = vsel %vm2006_vm4, %v1535_v37, %v323_v39  ;;  %v319_v45 = vrot.slane %v295_v42, 5  ;;  %v406_v48 = vshrl.u32 %v1540_v47, 16  ;;  %v409_v49 = vshll.u32 %v1540_v47, 16  ;;  %v1542_v51 = vld [vmem:[%s1988_s27 + $0x10] sm:$0xf]  ;;  %v1877_v37 = vld [vmem:[%s2319_s1 + $0x138] sm:$0xff]  }
  0x32   : > { %505 = vrot.lane.b32.xlu0 %v496_v6, %s1928_s30  ;;  %1729 = vmatprep.subr.bf16.mxu0 %v1874_v30  ;;  %332 = vst.msk [vmem:[#allocation2 + $0x1c] sm:$0xf] %vm201_vm6, %v324_v43  ;;  %v420_v54 = vshrl.u32 %v1542_v51, 16  ;;  %v423_v55 = vshll.u32 %v1542_v51, 16  ;;  %v1541_v56 = vld [vmem:[%s1988_s27 + $0xc] sm:$0x1] }
  0x33   : > { %1801 = vmatprep.subr.bf16.mxu1 %v1876_v34  ;;  %v320_v46 = vsel %vm2006_vm4, %v1534_v44, %v319_v45  ;;  %v408_v52 = vrot.slane %v406_v48, 4  ;;  %v411_v53 = vrot.slane %v409_v49, 5  ;;  %v415_v59 = vshll.u32 %v1541_v56, 16  ;;  %v1543_v62 = vld [vmem:[%s1988_s27 + $0x14] sm:$0x1] }
  0x34   : > { %331 = vst.msk [vmem:[#allocation2 + $0x14] sm:$0xf] %vm201_vm6, %v320_v46  ;;  %v422_v60 = vrot.slane %v420_v54, 4  ;;  %v425_v61 = vrot.slane %v423_v55, 5  ;;  %v1546_v1 = vld [vmem:[%s1988_s27 + $0x20] sm:$0xf] }
  0x35   : > { %1730 = vmatpush3.bf16.msra.mxu0 %v1875_v33  ;;  %v412_v58 = vor.u32 %v411_v53, %v408_v52  ;;  %v417_v3 = vrot.slane %v415_v59, 5  ;;  %v429_v5 = vshll.u32 %v1543_v62, 16  ;;  %v448_v7 = vshrl.u32 %v1546_v1, 16  ;;  %v1560_v13 = vld [vmem:[%s1988_s27 + $0x10] sm:$0xf]  ;;  %v1884_v54 = vld [vmem:[%s2319_s1 + $0x168] sm:$0xff]  }
  0x36   : > { %597 = vrot.lane.b32.xlu0 %v578_v15, %s1928_s30  ;;  %1731 = vmatprep.subr.bf16.mxu0 %v1878_v38  ;;  %v426_v4 = vor.u32 %v425_v61, %v422_v60  ;;  %v451_v8 = vshll.u32 %v1546_v1, 16  ;;  %v1544_v14 = vld [vmem:[%s1988_s27 + $0x18] sm:$0xf]  ;;  %v1547_v19 = vld [vmem:[%s1988_s27 + $0x24] sm:$0x1]  ;;  %v1880_v39 = vld [vmem:[%s2319_s1 + $0x170] sm:$0xff]  }
  0x37   : > { %v413_v2 = vrot.slane %v412_v58, 4  ;;  %v431_v11 = vrot.slane %v429_v5, 5  ;;  %v450_v17 = vrot.slane %v448_v7, 4  ;;  %v1561_v22 = vld [vmem:[%s1988_s27 + $0x18] sm:$0xf]  ;;  %v434_v24 = vshrl.u32 %v1544_v14, 16 }
  0x38   : > { %v427_v10 = vrot.slane %v426_v4, 4  ;;  %v453_v18 = vrot.slane %v451_v8, 5  ;;  %v437_v25 = vshll.u32 %v1544_v14, 16  ;;  %v1644_v26 = vld [vmem:[%s1988_s27 + $0x10] sm:$0xe]  ;;  %v457_v31 = vshll.u32 %v1547_v19, 16 }
  0x39   : > { %1732 = vmatpush3.bf16.msra.mxu0 %v1879_v40  ;;  %v418_v9 = vsel %vm2017_vm5, %v413_v2, %v417_v3  ;;  %v1645_v27 = vld [vmem:[%s1988_s27 + $0x14] sm:$0x1]  ;;  %v1646_v33 = vld [vmem:[%s1988_s27 + $0x18] sm:$0xe]  ;;  %v436_v40 = vrot.slane %v434_v24, 4  ;;  %v1652_v42 = vrot.slane %v1644_v26, 9 }
  0x3a   : > { %1773 = vmatprep.subr.bf16.mxu0 %v1876_v34  ;;  %v432_v21 = vsel %vm2017_vm5, %v427_v10, %v431_v11  ;;  %v454_v30 = vor.u32 %v453_v18, %v450_v17  ;;  %v1647_v34 = vld [vmem:[%s1988_s27 + $0x1c] sm:$0x1]  ;;  %v439_v41 = vrot.slane %v437_v25, 5  ;;  %v994_v43 = vrot.slane %v1645_v27, 5  ;;  %v1886_v5 = vld [vmem:[%s2319_s1 + $0x160] sm:$0xff]   ;;  %v1890_v19 = vld [vmem:[%s2319_s1 + $0x150] sm:$0xff]  }
  0x3b   : > { %v1653_v44 = vrot.slane %v1646_v33, 9  ;;  %v998_v45 = vrot.slane %v1647_v34, 5  ;;  %v1545_v46 = vld [vmem:[%s1988_s27 + $0x1c] sm:$0x1]  ;;  %v459_v49 = vrot.slane %v457_v31, 5  ;;  %v1887_v7 = vld [vmem:[%s2319_s1 + $0x120] sm:$0xff]  }
  0x3c   : > { %v455_v48 = vrot.slane %v454_v30, 4  ;;  %v440_v52 = vor.u32 %v439_v41, %v436_v40  ;;  %v443_v53 = vshll.u32 %v1545_v46, 16  ;;  %v995_v55 = vsel %vm2006_vm4, %v1652_v42, %v994_v43  ;;  %v1562_v8 = vld [vmem:[%s1988_s27 + $0x20] sm:$0xf]  ;;  %v1888_v10 = vld [vmem:[%s2319_s1 + $0x158] sm:$0xff]   ;;  %v1891_v25 = vld [vmem:[%s2319_s1 + $0x110] sm:$0xff]  }
  0x3d   : > { %v999_v56 = vsel %vm2006_vm4, %v1653_v44, %v998_v45  ;;  %v1648_v11 = vld [vmem:[%s1988_s27 + $0x20] sm:$0xe]  ;;  %v1889_v18 = vld [vmem:[%s2319_s1 + $0x118] sm:$0xff]   ;;  %v1894_v26 = vld [vmem:[%s2319_s1 + $0x148] sm:$0xff]  }
  0x3e   : > { %v460_v59 = vsel %vm2017_vm5, %v455_v48, %v459_v49  ;;  %v441_v1 = vrot.slane %v440_v52, 4  ;;  %v445_v2 = vrot.slane %v443_v53, 5  ;;  %v1895_v33 = vld [vmem:[%s2319_s1 + $0x108] sm:$0xff]  }
  0x83   : > { %v346_v50 = vpop.permute.xlu1 %345 }
  0x84   : > { %357 = vst.msk [vmem:[#allocation2 + $0x4] sm:$0xf] %vm285_vm7, %v346_v50  ;;  %v1881_v50 = vld [vmem:[%s2319_s1 + $0x130] sm:$0xff]  }
  0x87   : > { %v348_v57 = vpop.permute.xlu1 %347 }
  0x88   : > { %358 = vst.msk [vmem:[#allocation2 + $0xc] sm:$0xf] %vm285_vm7, %v348_v57  ;;  %v1563_v57 = vld [vmem:[%s1988_s27 + $0x28] sm:$0xf] }
  0x8b   : > { %v504_v0 = vpop.permute.xlu1 %503 }
  0x8c   : > { %v274_v63 = vpop.permute.xlu0 %273 }
  0x8d   : > { %286 = vst.msk [vmem:[#allocation2] sm:$0xf] %vm285_vm7, %v274_v63  ;;  %v1885_v63 = vld [vmem:[%s2319_s1 + $0x128] sm:$0xff]  }
  0x90   : > { %v276_v6 = vpop.permute.xlu0 %275 }
  0x91   : > { %287 = vst.msk [vmem:[#allocation2 + $0x8] sm:$0xf] %vm285_vm7, %v276_v6 }
  0x92   : > { %v596_v12 = vpop.permute.xlu1 %595 }
  0x94   : > { %v361_v15 = vld [vmem:[#allocation2] sm:$0xff]  ;;  %v502_v16 = vpop.permute.xlu0 %501 }
  0x95   : > { %465 = vst.msk [vmem:[#allocation2] sm:$0xf] %vm201_vm6, %v418_v9  ;;  %525 = vst.msk [vmem:[#allocation2 + $0x4] sm:$0xf] %vm201_vm6, %v1560_v13  ;;  %v446_v9 = vsel %vm2017_vm5, %v441_v1, %v445_v2  ;;  %v1929_v2 = vmov 1983009808  }
  0x96   : > { %513 = vst.msk [vmem:[#allocation2] sm:$0xf] %vm285_vm7, %v502_v16  ;;  %v280_v23 = vpop.permute.xlu1 %279  ;;  %v1651_v16 = vld [vmem:[%s1988_s27 + $0x2c] sm:$0x1] }
  0x97   : > { %289 = vst.msk [vmem:[#allocation2 + $0x18] sm:$0xf] %vm285_vm7, %v280_v23  ;;  %v1006_v24 = vrot.slane %v1651_v16, 5 }
  0x98   : > { %v362_v28 = vld [vmem:[#allocation2 + $0x8] sm:$0xff]  ;;  %v594_v29 = vpop.permute.xlu0 %593 }
  0x99   : > { %466 = vst.msk [vmem:[#allocation2 + $0x8] sm:$0xf] %vm201_vm6, %v432_v21  ;;  %526 = vst.msk [vmem:[#allocation2 + $0xc] sm:$0xf] %vm201_vm6, %v1561_v22  ;;  %v1625_v35 = vcombine.high %v361_v15, %v362_v28  ;;  %v1624_v36 = vcombine.low %v361_v15, %v362_v28  ;;  %v1650_v15 = vld [vmem:[%s1988_s27 + $0x28] sm:$0xe] }
  0x9a   : > { %605 = vst.msk [vmem:[#allocation2 + $0x4] sm:$0xf] %vm285_vm7, %v594_v29  ;;  %514 = vst.msk [vmem:[#allocation2 + $0x8] sm:$0xf] %vm285_vm7, %v504_v0  ;;  %v352_v38 = vpop.permute.xlu1 %351  ;;  %v1654_v21 = vrot.slane %v1648_v11, 9  ;;  %v1655_v23 = vrot.slane %v1650_v15, 9 }
  0x9b   : > { %606 = vst.msk [vmem:[#allocation2 + $0xc] sm:$0xf] %vm285_vm7, %v596_v12  ;;  %959 = vmatprep.mubr.bf16.mxu1 %v1625_v35  ;;  %360 = vst.msk [vmem:[#allocation2 + $0x1c] sm:$0xf] %vm285_vm7, %v352_v38  ;;  %v1649_v12 = vld [vmem:[%s1988_s27 + $0x24] sm:$0x1] }
  0x9c   : > { %v278_v47 = vpop.permute.xlu0 %277  ;;  %960 = vmatmul.mubr.bf16.vlgmr.msra.gmra.mxu1 %v1624_v36  ;;  %v1002_v22 = vrot.slane %v1649_v12, 5  ;;  %v1007_v29 = vsel %vm2006_vm4, %v1655_v23, %v1006_v24  ;;  %v1900_v36 = vld [vmem:[%s2319_s1 + $0x100] sm:$0xff]  }
  0x9d   : > { %288 = vst.msk [vmem:[#allocation2 + $0x10] sm:$0xf] %vm285_vm7, %v278_v47  ;;  %1809 = vmatpush3.bf16.msra.mxu1 %v1877_v37 }
  0x9e   : > { %1802 = vmatprep.subr.bf16.mxu1 %v1880_v39  ;;  %v508_v51 = vpop.permute.xlu1 %507  ;;  %v1003_v28 = vsel %vm2006_vm4, %v1654_v21, %v1002_v22 }
  0xa0   : > { %v350_v58 = vpop.permute.xlu0 %349 }
  0xa1   : > { %v609_v60 = vld [vmem:[#allocation2] sm:$0xff]  ;;  %359 = vst.msk [vmem:[#allocation2 + $0x14] sm:$0xf] %vm285_vm7, %v350_v58  ;;  %1810 = vmatpush3.bf16.msra.mxu1 %v1881_v50 }
  0xa2   : > { %v610_v61 = vld [vmem:[#allocation2 + $0x8] sm:$0xff]  ;;  %v364_v0 = vld [vmem:[#allocation2 + $0x18] sm:$0xff]  ;;  %1012 = vst.msk [vmem:[#allocation2] sm:$0xf] %vm201_vm6, %v995_v55  ;;  %1803 = vmatprep.subr.bf16.mxu1 %v1884_v54  ;;  %v600_v4 = vpop.permute.xlu1 %599 }
  0xa3   : > { %v1882_v62 = vld [vmem:[#allocation2 + $0x4] ss:$8 sps:$4 sm:$0xff]   ;;  %1013 = vst.msk [vmem:[#allocation2 + $0x8] sm:$0xf] %vm201_vm6, %v999_v56  ;;  %v1604_v3 = vcombine.low %v609_v60, %v610_v61  ;;  %528 = vst.msk [vmem:[#allocation2 + $0x1c] sm:$0xf] %vm201_vm6, %v1563_v57 }
  0xa4   : > { %468 = vst.msk [vmem:[#allocation2 + $0x18] sm:$0xf] %vm201_vm6, %v460_v59  ;;  %794 = vmatprep.mubr.bf16.mxu0 %v1882_v62  ;;  %v506_v6 = vpop.permute.xlu0 %505  ;;  %v1898_v35 = vld [vmem:[#allocation2 + $0x4] ss:$8 sps:$4 sm:$0xff]  }
  0xa5   : > { %516 = vst.msk [vmem:[#allocation2 + $0x18] sm:$0xf] %vm285_vm7, %v508_v51  ;;  %795 = vmatmul.mubr.bf16.vlgmr.msra.gmra.mxu0 %v1604_v3  ;;  %608 = vst.msk [vmem:[#allocation2 + $0x1c] sm:$0xf] %vm285_vm7, %v600_v4  ;;  %1811 = vmatpush3.bf16.msra.mxu1 %v1885_v63  ;;  %v1242_v3 = vunpack.c.l.s4 %v1929_v2  ;;  %v1244_v4 = vlaneseq }
  0xa6   : > { %1774 = vmatpush3.bf16.msra.mxu0 %v1877_v37  ;;  %1804 = vmatprep.subr.bf16.mxu1 %v1886_v5 }
  0xa7   : > { %1775 = vmatprep.subr.bf16.mxu0 %v1880_v39  ;;  %v1245_v15 = vshrl.u32 %v1244_v4, 7 }
  0xa8   : > { %v363_v13 = vld [vmem:[#allocation2 + $0x10] sm:$0xff]  ;;  %v598_v14 = vpop.permute.xlu0 %597 }
  0xa9   : > { %527 = vst.msk [vmem:[#allocation2 + $0x14] sm:$0xf] %vm201_vm6, %v1562_v8  ;;  %467 = vst.msk [vmem:[#allocation2 + $0x10] sm:$0xf] %vm201_vm6, %v446_v9  ;;  %1812 = vmatpush3.bf16.msra.mxu1 %v1887_v7  ;;  %v1627_v32 = vcombine.high %v363_v13, %v364_v0  ;;  %v1626_v17 = vcombine.low %v363_v13, %v364_v0 }
  0xaa   : > { %1776 = vmatpush3.bf16.msra.mxu0 %v1881_v50  ;;  %515 = vst.msk [vmem:[#allocation2 + $0x10] sm:$0xf] %vm285_vm7, %v506_v6  ;;  %607 = vst.msk [vmem:[#allocation2 + $0x14] sm:$0xf] %vm285_vm7, %v598_v14  ;;  %1805 = vmatprep.subr.bf16.mxu1 %v1888_v10  ;;  %v1896_v39 = vld [vmem:[#allocation2] ss:$8 sps:$4 sm:$0xff]   ;;  %v1243_v14 = vunpack.c.0.s8 %v1242_v3 }
  0xab   : > { %1777 = vmatprep.subr.bf16.mxu0 %v1884_v54  ;;  %967 = vmatprep.mubr.bf16.mxu1 %v1627_v32  ;;  %v1708_v6 = vld [vmem:[%s2320_s2] ss:$0 sm:$0xff] }
  0xac   : > { %968 = vmatmul.mubr.bf16.gmra.mxu1 %v1626_v17  ;;  %v612_v27 = vld [vmem:[#allocation2 + $0x18] sm:$0xff] }
  0xad   : > { %1813 = vmatpush3.bf16.msra.mxu1 %v1889_v18  ;;  %1015 = vst.msk [vmem:[#allocation2 + $0x18] sm:$0xf] %vm201_vm6, %v1007_v29 }
  0xae   : > { %1778 = vmatpush3.bf16.msra.mxu0 %v1885_v63  ;;  %1806 = vmatprep.subr.bf16.mxu1 %v1890_v19 }
  0xaf   : > { %1779 = vmatprep.subr.bf16.mxu0 %v1886_v5 }
  0xb1   : > { %1814 = vmatpush3.bf16.msra.mxu1 %v1891_v25  ;;  %v611_v30 = vld [vmem:[#allocation2 + $0x10] sm:$0xff] }
  0xb2   : > { %1780 = vmatpush3.bf16.msra.mxu0 %v1887_v7  ;;  %v1892_v31 = vld [vmem:[#allocation2 + $0x14] ss:$8 sps:$4 sm:$0xff]   ;;  %1014 = vst.msk [vmem:[#allocation2 + $0x10] sm:$0xf] %vm201_vm6, %v1003_v28  ;;  %v1606_v34 = vcombine.low %v611_v30, %v612_v27  ;;  %1807 = vmatprep.subr.bf16.mxu1 %v1894_v26  ;;  %v1930_v27 = vmov 1966171168  }
  0xb3   : > { %1781 = vmatprep.subr.bf16.mxu0 %v1888_v10  ;;  %802 = vmatprep.mubr.bf16.mxu0 %v1892_v31  ;;  %v1903_v38 = vld [vmem:[#allocation2 + $0x14] ss:$8 sps:$4 sm:$0xff]   ;;  %v1286_v28 = vunpack.c.l.s4 %v1930_v27 }
  0xb4   : > { %803 = vmatmul.mubr.bf16.gmra.mxu0 %v1606_v34  ;;  %1209 = vmatprep.mubr.bf16.mxu1 %v1903_v38 }
  0xb5   : > { %1815 = vmatpush3.bf16.msra.mxu1 %v1895_v33  ;;  %1201 = vmatprep.mubr.bf16.mxu0 %v1898_v35 }
  0xb6   : > { %1782 = vmatpush3.bf16.msra.mxu0 %v1889_v18  ;;  %1808 = vmatprep.subr.bf16.mxu1 %v1899_v20 }
  0xb7   : > { %1783 = vmatprep.subr.bf16.mxu0 %v1890_v19 }
  0xb9   : > { %1816 = vmatpush3.bf16.msra.mxu1 %v1900_v36  ;;  %v1901_v37 = vld [vmem:[#allocation2 + $0x10] ss:$8 sps:$4 sm:$0xff]  }
  0xba   : > { %1784 = vmatpush3.bf16.msra.mxu0 %v1891_v25 }
  0xbb   : > { %1785 = vmatprep.subr.bf16.mxu0 %v1894_v26  ;;  %v1246_v26 = vsub.s32 %v1243_v14, %v1245_v15 }
  0xbc   : > { %1210 = vmatmul.mubr.bf16.vlgmr.msra.gmra.mxu1 %v1901_v37  ;;  %v1931_v37 = vmov 1935823168  }
  0xbd   : > { %v1342_v38 = vunpack.c.l.s4 %v1931_v37 }
  0xbe   : > { %1786 = vmatpush3.bf16.msra.mxu0 %v1895_v33 }
  0xbf   : > { %1787 = vmatprep.subr.bf16.mxu0 %v1899_v20 }
  0xc2   : > { %1788 = vmatpush3.bf16.msra.mxu0 %v1900_v36  ;;  %v1287_v36 = vunpack.c.0.s8 %v1286_v28 }
  0xc5   : > { %1202 = vmatmul.mubr.bf16.vlgmr.msra.gmra.mxu0 %v1896_v39 }
 0x15c   : > { %v1761_v40 = vpop.f32.mrf.mxu1 }
 0x15e   : > { %v1762_v41 = vpop.f32.mrf.mxu1 }
 0x15f   : > { %v1763_v11 = vadd.f32 %v1762_v41, %v1761_v40 }
 0x160   : > { %v1764_v43 = vpop.f32.mrf.mxu1 }
 0x162   : > { %v1765_v45 = vpop.f32.mrf.mxu1 }
 0x163   : > { %v1766_v22 = vadd.f32 %v1765_v45, %v1764_v43 }
 0x165   : > { %v1733_v42 = vpop.f32.mrf.mxu0 }
 0x167   : > { %v1734_v44 = vpop.f32.mrf.mxu0 }
 0x168   : > { %v1735_v5 = vadd.f32 %v1734_v44, %v1733_v42 }
 0x169   : > { %v1736_v46 = vpop.f32.mrf.mxu0 }
 0x16a   : > { %v962_v32 = vadd.f32 %v1763_v11, %v1735_v5 }
 0x16b   : > { %v1737_v48 = vpop.f32.mrf.mxu0 }
 0x16c   : > { %v1767_v47 = vpop.f32.mrf.mxu1  ;;  %v1738_v17 = vadd.f32 %v1737_v48, %v1736_v46  ;;  %v1290_v46 = vsub.s32 %v1287_v36, %v1245_v15 }
 0x16e   : > { %v1768_v49 = vpop.f32.mrf.mxu1  ;;  %v965_v30 = vadd.f32 %v1766_v22, %v1738_v17 }
 0x16f   : > { %v1769_v58 = vadd.f32 %v1768_v49, %v1767_v47  ;;  %v1343_v47 = vunpack.c.0.s8 %v1342_v38 }
 0x170   : > { %v1770_v52 = vpop.f32.mrf.mxu1 }
 0x172   : > { %v1771_v54 = vpop.f32.mrf.mxu1 }
 0x173   : > { %v1772_v0 = vadd.f32 %v1771_v54, %v1770_v52  ;;  %v1346_v54 = vsub.s32 %v1343_v47, %v1245_v15 }
 0x174   : > { %v1739_v50 = vpop.f32.mrf.mxu0 }
 0x176   : > { %v1740_v51 = vpop.f32.mrf.mxu0 }
 0x177   : > { %v1741_v55 = vadd.f32 %v1740_v51, %v1739_v50 }
 0x178   : > { %v1742_v53 = vpop.f32.mrf.mxu0 }
 0x179   : > { %v970_v60 = vadd.f32 %v1769_v58, %v1741_v55 }
 0x17a   : > { %v1743_v56 = vpop.f32.mrf.mxu0 }
 0x17b   : > { %v1744_v61 = vadd.f32 %v1743_v56, %v1742_v53 }
 0x17c   : > { %v1795_v57 = vpop.f32.mrf.mxu1 }
 0x17d   : > { %v973_v8 = vadd.f32 %v1772_v0, %v1744_v61 }
 0x17e   : > { %v1796_v59 = vpop.f32.mrf.mxu1 }
 0x17f   : > { %v1797_v62 = vadd.f32 %v1796_v59, %v1795_v57 }
 0x180   : > { %v1798_v63 = vpop.f32.mrf.mxu1 }
 0x181   : > { %v1220_v1 = vadd.f32 %v1797_v62, %v970_v60 }
 0x182   : > { %v1799_v7 = vpop.f32.mrf.mxu1 }
 0x183   : > { %v1800_v9 = vadd.f32 %v1799_v7, %v1798_v63  ;;  %v1231_v12 = vadd.f32 %v1708_v6, %v1220_v1 }
 0x185   : > { %v1789_v10 = vpop.f32.mrf.mxu0  ;;  %v1221_v13 = vadd.f32 %v1800_v9, %v973_v8  ;;  %v1235_v24 = vmax.f32 %v1231_v12, 0.0 }
 0x187   : > { %v1790_v16 = vpop.f32.mrf.mxu0  ;;  %v1232_v19 = vadd.f32 %v1708_v6, %v1221_v13 }
 0x188   : > { %v1791_v18 = vadd.f32 %v1790_v16, %v1789_v10 }
 0x189   : > { %v1792_v21 = vpop.f32.mrf.mxu0  ;;  %v1236_v25 = vmax.f32 %v1232_v19, 0.0 }
 0x18a   : > { %v1218_v23 = vadd.f32 %v1791_v18, %v962_v32 }
 0x18b   : > { %v1793_v29 = vpop.f32.mrf.mxu0  ;;  %v1238_v33 = vmax.f32 %v1235_v24, %v1236_v25 }
 0x18c   : > { %v1794_v31 = vadd.f32 %v1793_v29, %v1792_v21  ;;  %v1229_v34 = vadd.f32 %v1708_v6, %v1218_v23 }
 0x18d   : > { %v1255_v35 = vrot.slane %v1238_v33, %v1246_v26 }
 0x18e   : > { %v1219_v20 = vadd.f32 %v1794_v31, %v965_v30  ;;  %v1233_v42 = vmax.f32 %v1229_v34, 0.0 }
 0x18f   : > { %v1256_v40 = vcombine.high %v1255_v35, %v1255_v35  ;;  %v1711_v41 = vrot.slane %v1255_v35, 9 }
 0x190   : > { %v1230_v39 = vadd.f32 %v1708_v6, %v1219_v20 }
 0x191   : > { %v1712_v44 = vrot.slane %v1256_v40, 9  ;;  %v1275_v45 = vmax.f32 %v1255_v35, %v1711_v41 }
 0x192   : > { %v1234_v43 = vmax.f32 %v1230_v39, 0.0 }
 0x193   : > { %v1276_v49 = vmax.f32 %v1256_v40, %v1712_v44  ;;  %v1279_v50 = vpack.c.bf16 %v1275_v45, %v1275_v45 }
 0x194   : > { %v1237_v48 = vmax.f32 %v1233_v42, %v1234_v43 }
 0x195   : > { %v1280_v52 = vpack.c.bf16 %v1276_v49, %v1276_v49  ;;  %v1319_v53 = vrot.slane %v1279_v50, %v1290_v46 }
 0x196   : > { %v1247_v51 = vrot.slane %v1237_v48, %v1246_v26 }
 0x197   : > { %v1326_v57 = vrot.slane %v1319_v53, %v1290_v46  ;;  %v1333_v58 = vrot.slane %v1280_v52, %v1290_v46 }
 0x198   : > { %v1248_v55 = vcombine.high %v1247_v51, %v1247_v51  ;;  %v1709_v56 = vrot.slane %v1247_v51, 9 }
 0x199   : > { %v1340_v61 = vrot.slane %v1333_v58, %v1290_v46  ;;  %v1375_v62 = vrot.slane %v1326_v57, %v1346_v54 }
 0x19a   : > { %v1710_v59 = vrot.slane %v1248_v55, 9  ;;  %v1273_v60 = vmax.f32 %v1247_v51, %v1709_v56 }
 0x19b   : > { %v1389_v1 = vrot.slane %v1340_v61, %v1346_v54  ;;  %v1382_v4 = vrot.slane %v1375_v62, %v1346_v54 }
 0x19c   : > { %v1274_v63 = vmax.f32 %v1248_v55, %v1710_v59  ;;  %v1277_v0 = vpack.c.bf16 %v1273_v60, %v1273_v60 }
 0x19d   : > { %v1396_v5 = vrot.slane %v1389_v1, %v1346_v54  ;;  %v1399_v11 = vunpack.c.l.b16 %v1382_v4 }
 0x19e   : > { %v1278_v2 = vpack.c.bf16 %v1274_v63, %v1274_v63  ;;  %v1291_v3 = vrot.slane %v1277_v0, %v1290_v46 }
 0x19f   : > { %v1400_v8 = vunpack.c.l.b16 %v1396_v5 }
 0x1a0   : > { %v1298_v6 = vrot.slane %v1291_v3, %v1290_v46  ;;  %v1305_v7 = vrot.slane %v1278_v2, %v1290_v46 }
 0x1a1   : > { %v1404_v12 = vrot.slane %v1400_v8, 7 }
 0x1a2   : > { %v1312_v9 = vrot.slane %v1305_v7, %v1290_v46  ;;  %v1347_v10 = vrot.slane %v1298_v6, %v1346_v54 }
 0x1a3   : > { %v1405_v14 = vsel %vm1402_vm8, %v1404_v12, %v1399_v11 }
 0x1a4   : > { %v1361_v13 = vrot.slane %v1312_v9, %v1346_v54  ;;  %v1407_v15 = vpack.c.b16 %v1405_v14, %v1405_v14  ;;  %v1354_v16 = vrot.slane %v1347_v10, %v1346_v54 }
 0x1a6   : > { %v1368_v32 = vrot.slane %v1361_v13, %v1346_v54  ;;  %v1428_v17 = vrot.slane %v1407_v15, %v1290_v46  ;;  %v1397_v19 = vunpack.c.l.b16 %v1354_v16 }
 0x1a8   : > { %v1398_v18 = vunpack.c.l.b16 %v1368_v32  ;;  %1714 = vst.sshfl [vmem:[%s190_s7 + $0x1] sm:$0x1 pattern:$0x73625140] %v1428_v17 }
 0x1aa   : > { %v1401_v21 = vrot.slane %v1398_v18, 7 }
 0x1ac   : > { %v1403_v22 = vsel %vm1402_vm8, %v1401_v21, %v1397_v19 }
 0x1ad   : > { %v1406_v23 = vpack.c.b16 %v1403_v22, %v1403_v22 }
 0x1af   : > { %v1414_v24 = vrot.slane %v1406_v23, %v1290_v46 }
 0x1b1   : > { %1713 = vst.sshfl [vmem:[%s190_s7] sm:$0x1 pattern:$0x73625140] %v1414_v24 }
 0x1b2 PF: > { %s13_s14 = sadd.s32 1, %s1926_s14   ;;  %s2326_s12 = smov %s1922_s13 }
 0x1b3   : > { %p10_p5 = scmp.ge.s32.totalorder %s13_s14, 4   ;;  %s2327_s13 = smov %s2329_s15 }
 0x1b5   :  { %12 = sbr.rel (!%p10_p5) target bundleno = 2 (0x2), region = 67 }

// kernel: tile.18
= control target key start
LH: loop header
LB: loop body
LE: loop exit
PB: predicated region body
PF: predicated region fallthrough
CT: control target
= control target key end

     0   :  { %s22_s0 = inlined_call_operand.vmem [shape: f32[64], index: 0, kind: input, shape index: {}]   ;;  %s23_s1 = inlined_call_operand.vmem [shape: f32[2,64], index: 1, kind: output, shape index: {}]  }
   0x1   :  { %v4_v0 = vld [vmem:[%s22_s0] ss:$0 sm:$0xff] }
   0x2   :  { %5 = vst [vmem:[%s23_s1] sm:$0x3] %v4_v0 }

// kernel: tile.19
= control target key start
LH: loop header
LB: loop body
LE: loop exit
PB: predicated region body
PF: predicated region fallthrough
CT: control target
= control target key end

     0   :  { %vm8_vm0 = vcmask 523264   ;;  %vm14_vm1 = vcmask 1048064   ;;  %s42_s0 = inlined_call_operand.vmem [shape: f32[2,64], index: 0, kind: input, shape index: {}]   ;;  %s43_s1 = inlined_call_operand.vmem [shape: f32[1,128], index: 1, kind: output, shape index: {}]  }
   0x1   :  { %v5_v0 = vld [vmem:[%s42_s0] sm:$0x3]  ;;  %s25_s0 = smov 64  }
   0x2   :  { %6 = vst [vmem:[#allocation1] sm:$0x3] %v5_v0 }
   0x9   :  { %v11_v1 = vld [vmem:[#allocation1 + $0x1] sm:$0x1]   ;;  %v7_v2 = vld [vmem:[#allocation1] sm:$0x1]  }
   0xa   :  { %12 = vrot.lane.b32.xlu0 %v11_v1, %s25_s0  ;;  %9 = vst.msk [vmem:[#allocation0] sm:$0x1] %vm8_vm0, %v7_v2  }
  0x7c   :  { %v13_v3 = vpop.permute.xlu0 %12  }
  0x7d   :  { %15 = vst.msk [vmem:[#allocation0] sm:$0x1] %vm14_vm1, %v13_v3  }
  0x84   :  { %v20_v4 = vld [vmem:[#allocation0] sm:$0x1] }
  0x85   :  { %23 = vst [vmem:[%s43_s1] sm:$0x1] %v20_v4 }

// kernel: tile.23
= control target key start
LH: loop header
LB: loop body
LE: loop exit
PB: predicated region body
PF: predicated region fallthrough
CT: control target
= control target key end

     0   :  { %s22_s0 = inlined_call_operand.vmem [shape: f32[32], index: 0, kind: input, shape index: {}]   ;;  %s23_s1 = inlined_call_operand.vmem [shape: f32[2,32], index: 1, kind: output, shape index: {}]  }
   0x1   :  { %v4_v0 = vld [vmem:[%s22_s0] ss:$0 sm:$0xff] }
   0x2   :  { %5 = vst [vmem:[%s23_s1] sm:$0x3] %v4_v0 }

// kernel: tile.24
= control target key start
LH: loop header
LB: loop body
LE: loop exit
PB: predicated region body
PF: predicated region fallthrough
CT: control target
= control target key end

     0   :  { %vm8_vm0 = vcmask 261120   ;;  %vm14_vm1 = vcmask 523520   ;;  %s42_s0 = inlined_call_operand.vmem [shape: f32[2,32], index: 0, kind: input, shape index: {}]   ;;  %s43_s1 = inlined_call_operand.vmem [shape: f32[1,64], index: 1, kind: output, shape index: {}]  }
   0x1   :  { %v5_v0 = vld [vmem:[%s42_s0] sm:$0x3]  ;;  %s25_s0 = smov 32  }
   0x2   :  { %6 = vst [vmem:[#allocation1] sm:$0x3] %v5_v0 }
   0x9   :  { %v11_v1 = vld [vmem:[#allocation1 + $0x1] sm:$0x1]   ;;  %v7_v2 = vld [vmem:[#allocation1] sm:$0x1]  }
   0xa   :  { %12 = vrot.lane.b32.xlu0 %v11_v1, %s25_s0  ;;  %9 = vst.msk [vmem:[#allocation0] sm:$0x1] %vm8_vm0, %v7_v2  }
  0x7c   :  { %v13_v3 = vpop.permute.xlu0 %12  }
  0x7d   :  { %15 = vst.msk [vmem:[#allocation0] sm:$0x1] %vm14_vm1, %v13_v3  }
  0x84   :  { %v20_v4 = vld [vmem:[#allocation0] sm:$0x1] }
  0x85   :  { %23 = vst [vmem:[%s43_s1] sm:$0x1] %v20_v4 }

// kernel: autoencoder_forward.6
= control target key start
LH: loop header
LB: loop body
LE: loop exit
PB: predicated region body
PF: predicated region fallthrough
CT: control target
= control target key end

     0   :  { %s5628_s12 = smov 0   ;;  %s5630_s13 = smov 0   ;;  %s7339_s0 = inlined_call_operand.vmem [shape: bf16[2,18,18,3], index: 0, kind: input, shape index: {}]   ;;  %s7340_s1 = inlined_call_operand.vmem [shape: bf16[1,27,32], index: 1, kind: input, shape index: {}]   ;;  %s7341_s2 = inlined_call_operand.vmem [shape: f32[1,32], index: 2, kind: input, shape index: {}]   ;;  %s7342_s3 = inlined_call_operand.vmem [shape: bf16[2,8,8,32], index: 3, kind: output, shape index: {}]  }
   0x1   :  { %s5632_s14 = smov 0  }
   0x2 LB: > { %s25_s15 = sadd.s32 1, %s5592_s13  ;;  %p4924_p0 = scmp.ge.s32.totalorder %s5596_s14, 1  ;;  %s5596_s14 = sphi %s5632_s14, %s13_s14   ;;  %s5592_s13 = sphi %s5630_s13, %s7348_s13   ;;  %s5588_s12 = sphi %s5628_s12, %s7347_s12  }
   0x3   : > { %p27_p1 = scmp.ge.s32.totalorder %s25_s15, 2  ;;  %p151_p2 = scmp.lt.s32.totalorder %s5596_s14, 3 }
   0x5   : > { %s7350_s15 = smov (%p27_p1, %s25_s15), 0  ;;  %p152_p3 = pnand %p4924_p0, %p151_p2 }
   0x6   : > { %p179_p4 = scmp.lt.s32.totalorder (!%p152_p3), %s5588_s12, 1  ;;  %s5598_s20 = smov (!%p152_p3), 3  }
   0x7   : > { %155 = sbr.rel (%p152_p3) target bundleno = 898 (0x382), region = 32  ;;  %s5599_s21 = smov (!%p152_p3), 6  }
   0x8   : > { %s5600_s22 = smov (!%p152_p3), 9   ;;  %s5601_s23 = smov (!%p152_p3), 12  }
   0x9   : > { %s5602_s24 = smov (!%p152_p3), 15   ;;  %s5603_s25 = smov (!%p152_p3), 18  }
   0xa   : > { %s5604_s26 = smov (!%p152_p3), 21   ;;  %s5606_s4 = smov (!%p152_p3), 24  }
   0xc   : > { %s7352_s12 = smov (!%p179_p4, %s5588_s12), 1  ;;  %vm312_vm0 = vsmask.f32 3328  ;;  %vm313_vm1 = vsmask.f32 7440  ;;  %vm231_vm3 = vcmask 19456  }
   0xd   : > { %s5520_s16 = smul.u32 216, %s7352_s12  ;;  %vm5663_vm2 = vmor %vm312_vm0, %vm313_vm1  ;;  %vm924_vm4 = vcmask 1042432   ;;  %vm925_vm5 = vcmask 1046532   ;;  %vm795_vm7 = vcmask 44056   ;;  %vm1135_vm8 = vcmask 68656   ;;  %s5397_s7 = sshll.u32 %s7352_s12, 5 }
   0xe   : > { %vm5807_vm6 = vmor %vm924_vm4, %vm925_vm5  ;;  %vm1332_vm9 = vcmask 93256   ;;  %vm3541_vm10 = vcmask 1044480   ;;  %vm3542_vm11 = vcmask 1045504   ;;  %vm1893_vm12 = vcmask 117856   ;;  %s7185_s10 = scalar_lea.vmem %s7342_s3, %s5397_s7 }
   0xf   : > { %s5652_s19 = scalar_lea.vmem %s7339_s0, %s5520_s16  ;;  %vm2230_vm13 = vcmask 142456   ;;  %vm2427_vm14 = vcmask 167056   ;;  %vm2988_vm15 = vcmask 191656   ;;  %vm3325_vm0 = vcmask 216256  }
  0x10   : > { %v267_v0 = vld [vmem:[%s5652_s19 + $0xc] sm:$0xf]  ;;  %v268_v1 = vld [vmem:[%s5652_s19 + $0x10] sm:$0xf]  ;;  %v264_v2 = vld [vmem:[%s5652_s19] sm:$0xf] }
  0x11   : > { %v340_v3 = vshrl.u32 %v267_v0, 16  ;;  %v343_v4 = vshll.u32 %v267_v0, 16  ;;  %v349_v5 = vshll.u32 %v268_v1, 16  ;;  %v353_v6 = vshrl.u32 %v268_v1, 16  ;;  %v265_v7 = vld [vmem:[%s5652_s19 + $0x4] sm:$0xf] }
  0x12   : > { %v316_v8 = vshrl.u32 %v264_v2, 16  ;;  %v319_v9 = vshll.u32 %v264_v2, 16  ;;  %v325_v10 = vshll.u32 %v265_v7, 16  ;;  %v329_v11 = vshrl.u32 %v265_v7, 16  ;;  %v269_v12 = vld [vmem:[%s5652_s19 + $0x14] sm:$0x1] }
  0x13   : > { %v342_v13 = vrot.slane %v340_v3, 4  ;;  %v345_v14 = vrot.slane %v343_v4, 5  ;;  %v351_v15 = vrot.slane %v349_v5, 5  ;;  %v355_v16 = vrot.slane %v353_v6, 4  ;;  %v266_v17 = vld [vmem:[%s5652_s19 + $0x8] sm:$0x1] }
  0x14   : > { %v318_v18 = vrot.slane %v316_v8, 4  ;;  %v321_v19 = vrot.slane %v319_v9, 5  ;;  %v327_v20 = vrot.slane %v325_v10, 5  ;;  %v331_v21 = vrot.slane %v329_v11, 4  ;;  %v271_v22 = vld [vmem:[%s5652_s19 + $0x1c] sm:$0xf] }
  0x15   : > { %v346_v23 = vor.u32 %v345_v14, %v342_v13  ;;  %v356_v24 = vor.u32 %v355_v16, %v351_v15  ;;  %v359_v25 = vshll.u32 %v269_v12, 16  ;;  %v335_v26 = vshll.u32 %v266_v17, 16  ;;  %v272_v30 = vld [vmem:[%s5652_s19 + $0x20] sm:$0x1]  ;;  %v270_v33 = vld [vmem:[%s5652_s19 + $0x18] sm:$0xf] }
  0x16   : > { %v322_v28 = vor.u32 %v321_v19, %v318_v18  ;;  %v332_v29 = vor.u32 %v331_v21, %v327_v20  ;;  %v373_v31 = vshll.u32 %v271_v22, 16  ;;  %v377_v32 = vshrl.u32 %v271_v22, 16  ;;  %v274_v42 = vld [vmem:[%s5652_s19 + $0x28] sm:$0xf]  ;;  %v275_v47 = vld [vmem:[%s5652_s19 + $0x2c] sm:$0x1] }
  0x17   : > { %v347_v34 = vrot.slane %v346_v23, 4  ;;  %v357_v35 = vrot.slane %v356_v24, 4  ;;  %v361_v36 = vrot.slane %v359_v25, 5  ;;  %v337_v37 = vrot.slane %v335_v26, 5  ;;  %v273_v48 = vld [vmem:[%s5652_s19 + $0x24] sm:$0xf] }
  0x18   : > { %v323_v38 = vrot.slane %v322_v28, 4  ;;  %v333_v39 = vrot.slane %v332_v29, 4  ;;  %v375_v40 = vrot.slane %v373_v31, 5  ;;  %v379_v41 = vrot.slane %v377_v32, 4  ;;  %v277_v53 = vld [vmem:[%s5652_s19 + $0x34] sm:$0xf] }
  0x19   : > { %v352_v43 = vsel %vm5663_vm2, %v347_v34, %v351_v15  ;;  %v362_v44 = vsel %vm5663_vm2, %v357_v35, %v361_v36  ;;  %v383_v45 = vshll.u32 %v272_v30, 16  ;;  %v364_v46 = vshrl.u32 %v270_v33, 16  ;;  %v278_v62 = vld [vmem:[%s5652_s19 + $0x38] sm:$0x1]  ;;  %v276_v3 = vld [vmem:[%s5652_s19 + $0x30] sm:$0xf] }
  0x1a   : > { %703 = vrot.lane.b32.xlu1 %v352_v43, %s5598_s20  ;;  %v328_v49 = vsel %vm5663_vm2, %v323_v38, %v327_v20  ;;  %v338_v50 = vsel %vm5663_vm2, %v333_v39, %v337_v37  ;;  %v380_v51 = vor.u32 %v379_v41, %v375_v40  ;;  %v367_v52 = vshll.u32 %v270_v33, 16  ;;  %v280_v8 = vld [vmem:[%s5652_s19 + $0x40] sm:$0xf]  ;;  %v281_v17 = vld [vmem:[%s5652_s19 + $0x44] sm:$0x1] }
  0x1b   : > { %699 = vrot.lane.b32.xlu0 %v328_v49, %s5598_s20  ;;  %v385_v54 = vrot.slane %v383_v45, 5  ;;  %v366_v55 = vrot.slane %v364_v46, 4  ;;  %v397_v56 = vshll.u32 %v274_v42, 16  ;;  %v401_v57 = vshrl.u32 %v274_v42, 16  ;;  %v279_v22 = vld [vmem:[%s5652_s19 + $0x3c] sm:$0xf] }
  0x1c   : > { %v381_v58 = vrot.slane %v380_v51, 4  ;;  %v369_v59 = vrot.slane %v367_v52, 5  ;;  %v407_v60 = vshll.u32 %v275_v47, 16  ;;  %v388_v61 = vshrl.u32 %v273_v48, 16  ;;  %v283_v28 = vld [vmem:[%s5652_s19 + $0x4c] sm:$0xf] }
  0x1d   : > { %v399_v63 = vrot.slane %v397_v56, 5  ;;  %v403_v0 = vrot.slane %v401_v57, 4  ;;  %v391_v1 = vshll.u32 %v273_v48, 16  ;;  %v421_v2 = vshll.u32 %v277_v53, 16  ;;  %v284_v37 = vld [vmem:[%s5652_s19 + $0x50] sm:$0x1] }
  0x1e   : > { %705 = vrot.lane.b32.xlu1 %v362_v44, %s5598_s20  ;;  %v386_v4 = vsel %vm5663_vm2, %v381_v58, %v385_v54  ;;  %v370_v5 = vor.u32 %v369_v59, %v366_v55  ;;  %v409_v6 = vrot.slane %v407_v60, 5  ;;  %v390_v7 = vrot.slane %v388_v61, 4  ;;  %v282_v42 = vld [vmem:[%s5652_s19 + $0x48] sm:$0xf]  ;;  %v286_v47 = vld [vmem:[%s5652_s19 + $0x58] sm:$0xf] }
  0x1f   : > { %701 = vrot.lane.b32.xlu0 %v338_v50, %s5598_s20  ;;  %v404_v9 = vor.u32 %v403_v0, %v399_v63  ;;  %v393_v10 = vrot.slane %v391_v1, 5  ;;  %v423_v11 = vrot.slane %v421_v2, 5  ;;  %v425_v12 = vshrl.u32 %v277_v53, 16  ;;  %v287_v56 = vld [vmem:[%s5652_s19 + $0x5c] sm:$0x1] }
  0x20   : > { %v371_v13 = vrot.slane %v370_v5, 4  ;;  %v431_v14 = vshll.u32 %v278_v62, 16  ;;  %v412_v15 = vshrl.u32 %v276_v3, 16  ;;  %v415_v16 = vshll.u32 %v276_v3, 16  ;;  %v285_v61 = vld [vmem:[%s5652_s19 + $0x54] sm:$0xf] }
  0x21   : > { %v405_v18 = vrot.slane %v404_v9, 4  ;;  %v394_v19 = vor.u32 %v393_v10, %v390_v7  ;;  %v427_v20 = vrot.slane %v425_v12, 4  ;;  %v445_v21 = vshll.u32 %v280_v8, 16 }
  0x22   : > { %709 = vrot.lane.b32.xlu1 %v386_v4, %s5598_s20  ;;  %v376_v23 = vsel %vm5663_vm2, %v371_v13, %v375_v40  ;;  %v433_v24 = vrot.slane %v431_v14, 5  ;;  %v414_v25 = vrot.slane %v412_v15, 4  ;;  %v417_v26 = vrot.slane %v415_v16, 5  ;;  %v290_v15 = vld [vmem:[%s5652_s19 + $0x68] sm:$0x1] }
  0x23   : > { %707 = vrot.lane.b32.xlu0 %v376_v23, %s5598_s20  ;;  %v410_v29 = vsel %vm5663_vm2, %v405_v18, %v409_v6  ;;  %v395_v30 = vrot.slane %v394_v19, 4  ;;  %v428_v31 = vor.u32 %v427_v20, %v423_v11  ;;  %v447_v32 = vrot.slane %v445_v21, 5  ;;  %v289_v6 = vld [vmem:[%s5652_s19 + $0x64] sm:$0xf]  ;;  %v288_v16 = vld [vmem:[%s5652_s19 + $0x60] sm:$0xf] }
  0x24   : > { %v418_v33 = vor.u32 %v417_v26, %v414_v25  ;;  %v449_v34 = vshrl.u32 %v280_v8, 16  ;;  %v455_v35 = vshll.u32 %v281_v17, 16  ;;  %v436_v36 = vshrl.u32 %v279_v22, 16  ;;  %v292_v25 = vld [vmem:[%s5652_s19 + $0x70] sm:$0xf] }
  0x25   : > { %v400_v38 = vsel %vm5663_vm2, %v395_v30, %v399_v63  ;;  %v429_v39 = vrot.slane %v428_v31, 4  ;;  %v439_v40 = vshll.u32 %v279_v22, 16  ;;  %v469_v41 = vshll.u32 %v283_v28, 16 }
  0x26   : > { %713 = vrot.lane.b32.xlu1 %v410_v29, %s5598_s20  ;;  %v419_v43 = vrot.slane %v418_v33, 4  ;;  %v451_v44 = vrot.slane %v449_v34, 4  ;;  %v457_v45 = vrot.slane %v455_v35, 5  ;;  %v438_v46 = vrot.slane %v436_v36, 4  ;;  %v293_v35 = vld [vmem:[%s5652_s19 + $0x74] sm:$0x1] }
  0x27   : > { %711 = vrot.lane.b32.xlu0 %v400_v38, %s5598_s20  ;;  %v434_v48 = vsel %vm5663_vm2, %v429_v39, %v433_v24  ;;  %v441_v49 = vrot.slane %v439_v40, 5  ;;  %v471_v50 = vrot.slane %v469_v41, 5  ;;  %v473_v51 = vshrl.u32 %v283_v28, 16  ;;  %v291_v36 = vld [vmem:[%s5652_s19 + $0x6c] sm:$0xf] }
  0x28   : > { %v424_v52 = vsel %vm5663_vm2, %v419_v43, %v423_v11  ;;  %v452_v53 = vor.u32 %v451_v44, %v447_v32  ;;  %v479_v54 = vshll.u32 %v284_v37, 16  ;;  %v460_v55 = vshrl.u32 %v282_v42, 16 }
  0x29   : > { %v442_v57 = vor.u32 %v441_v49, %v438_v46  ;;  %v475_v58 = vrot.slane %v473_v51, 4  ;;  %v463_v59 = vshll.u32 %v282_v42, 16  ;;  %v493_v60 = vshll.u32 %v286_v47, 16 }
  0x2a   : > { %717 = vrot.lane.b32.xlu1 %v434_v48, %s5598_s20  ;;  %v453_v62 = vrot.slane %v452_v53, 4  ;;  %v481_v63 = vrot.slane %v479_v54, 5  ;;  %v462_v0 = vrot.slane %v460_v55, 4  ;;  %v497_v1 = vshrl.u32 %v286_v47, 16  ;;  %v296_v54 = vld [vmem:[%s5652_s19 + $0x80] sm:$0x1] }
  0x2b   : > { %715 = vrot.lane.b32.xlu0 %v424_v52, %s5598_s20  ;;  %v443_v2 = vrot.slane %v442_v57, 4  ;;  %v476_v3 = vor.u32 %v475_v58, %v471_v50  ;;  %v465_v4 = vrot.slane %v463_v59, 5  ;;  %v495_v5 = vrot.slane %v493_v60, 5  ;;  %v294_v55 = vld [vmem:[%s5652_s19 + $0x78] sm:$0xf] }
  0x2c   : > { %v458_v7 = vsel %vm5663_vm2, %v453_v62, %v457_v45  ;;  %v499_v8 = vrot.slane %v497_v1, 4  ;;  %v503_v9 = vshll.u32 %v287_v56, 16  ;;  %v484_v10 = vshrl.u32 %v285_v61, 16  ;;  %v295_v45 = vld [vmem:[%s5652_s19 + $0x7c] sm:$0xf] }
  0x2d   : > { %v448_v11 = vsel %vm5663_vm2, %v443_v2, %v447_v32  ;;  %v477_v12 = vrot.slane %v476_v3, 4  ;;  %v466_v13 = vor.u32 %v465_v4, %v462_v0  ;;  %v487_v14 = vshll.u32 %v285_v61, 16  ;;  %v298_v0 = vld [vmem:[%s5652_s19 + $0x88] sm:$0xf] }
  0x2e   : > { %721 = vrot.lane.b32.xlu1 %v458_v7, %s5598_s20  ;;  %v500_v17 = vor.u32 %v499_v8, %v495_v5  ;;  %v505_v18 = vrot.slane %v503_v9, 5  ;;  %v486_v19 = vrot.slane %v484_v10, 4  ;;  %v517_v20 = vshll.u32 %v289_v6, 16  ;;  %v297_v10 = vld [vmem:[%s5652_s19 + $0x84] sm:$0xf] }
  0x2f   : > { %719 = vrot.lane.b32.xlu0 %v448_v11, %s5598_s20  ;;  %v482_v21 = vsel %vm5663_vm2, %v477_v12, %v481_v63  ;;  %v467_v22 = vrot.slane %v466_v13, 4  ;;  %v489_v23 = vrot.slane %v487_v14, 5  ;;  %v521_v24 = vshrl.u32 %v289_v6, 16 }
  0x30   : > { %v501_v26 = vrot.slane %v500_v17, 4  ;;  %v519_v28 = vrot.slane %v517_v20, 5  ;;  %v527_v29 = vshll.u32 %v290_v15, 16  ;;  %v508_v30 = vshrl.u32 %v288_v16, 16 }
  0x31   : > { %v472_v31 = vsel %vm5663_vm2, %v467_v22, %v471_v50  ;;  %v490_v32 = vor.u32 %v489_v23, %v486_v19  ;;  %v523_v33 = vrot.slane %v521_v24, 4  ;;  %v511_v34 = vshll.u32 %v288_v16, 16  ;;  %v301_v19 = vld [vmem:[%s5652_s19 + $0x94] sm:$0xf]  ;;  %v302_v24 = vld [vmem:[%s5652_s19 + $0x98] sm:$0x1] }
  0x32   : > { %725 = vrot.lane.b32.xlu1 %v482_v21, %s5598_s20  ;;  %v506_v37 = vsel %vm5663_vm2, %v501_v26, %v505_v18  ;;  %v529_v38 = vrot.slane %v527_v29, 5  ;;  %v510_v39 = vrot.slane %v508_v30, 4  ;;  %v541_v40 = vshll.u32 %v292_v25, 16  ;;  %v300_v30 = vld [vmem:[%s5652_s19 + $0x90] sm:$0xf] }
  0x33   : > { %723 = vrot.lane.b32.xlu0 %v472_v31, %s5598_s20  ;;  %v491_v41 = vrot.slane %v490_v32, 4  ;;  %v524_v42 = vor.u32 %v523_v33, %v519_v28  ;;  %v513_v43 = vrot.slane %v511_v34, 5  ;;  %v545_v44 = vshrl.u32 %v292_v25, 16 }
  0x34   : > { %v543_v46 = vrot.slane %v541_v40, 5  ;;  %v551_v47 = vshll.u32 %v293_v35, 16  ;;  %v532_v48 = vshrl.u32 %v291_v36, 16  ;;  %v535_v49 = vshll.u32 %v291_v36, 16 }
  0x35   : > { %v496_v50 = vsel %vm5663_vm2, %v491_v41, %v495_v5  ;;  %v525_v51 = vrot.slane %v524_v42, 4  ;;  %v514_v52 = vor.u32 %v513_v43, %v510_v39  ;;  %v547_v53 = vrot.slane %v545_v44, 4  ;;  %v299_v5 = vld [vmem:[%s5652_s19 + $0x8c] sm:$0x1]  ;;  %v304_v39 = vld [vmem:[%s5652_s19 + $0xa0] sm:$0xf] }
  0x36   : > { %729 = vrot.lane.b32.xlu1 %v506_v37, %s5598_s20  ;;  %v553_v56 = vrot.slane %v551_v47, 5  ;;  %v534_v57 = vrot.slane %v532_v48, 4  ;;  %v537_v58 = vrot.slane %v535_v49, 5  ;;  %v565_v59 = vshll.u32 %v295_v45, 16  ;;  %v305_v48 = vld [vmem:[%s5652_s19 + $0xa4] sm:$0x1] }
  0x37   : > { %727 = vrot.lane.b32.xlu0 %v496_v50, %s5598_s20  ;;  %v530_v60 = vsel %vm5663_vm2, %v525_v51, %v529_v38  ;;  %v515_v61 = vrot.slane %v514_v52, 4  ;;  %v548_v62 = vor.u32 %v547_v53, %v543_v46  ;;  %v569_v63 = vshrl.u32 %v295_v45, 16  ;;  %v303_v49 = vld [vmem:[%s5652_s19 + $0x9c] sm:$0xf] }
  0x38   : > { %v538_v1 = vor.u32 %v537_v58, %v534_v57  ;;  %v567_v2 = vrot.slane %v565_v59, 5  ;;  %v575_v3 = vshll.u32 %v296_v54, 16  ;;  %v556_v4 = vshrl.u32 %v294_v55, 16  ;;  %v307_v58 = vld [vmem:[%s5652_s19 + $0xac] sm:$0xf] }
  0x39   : > { %v520_v6 = vsel %vm5663_vm2, %v515_v61, %v519_v28  ;;  %v549_v7 = vrot.slane %v548_v62, 4  ;;  %v571_v8 = vrot.slane %v569_v63, 4  ;;  %v559_v9 = vshll.u32 %v294_v55, 16 }
  0x3a   : > { %733 = vrot.lane.b32.xlu1 %v530_v60, %s5598_s20  ;;  %v539_v11 = vrot.slane %v538_v1, 4  ;;  %v577_v12 = vrot.slane %v575_v3, 5  ;;  %v558_v13 = vrot.slane %v556_v4, 4  ;;  %v589_v14 = vshll.u32 %v298_v0, 16  ;;  %v308_v3 = vld [vmem:[%s5652_s19 + $0xb0] sm:$0x1] }
  0x3b   : > { %731 = vrot.lane.b32.xlu0 %v520_v6, %s5598_s20  ;;  %v554_v15 = vsel %vm5663_vm2, %v549_v7, %v553_v56  ;;  %v572_v16 = vor.u32 %v571_v8, %v567_v2  ;;  %v561_v17 = vrot.slane %v559_v9, 5  ;;  %v593_v18 = vshrl.u32 %v298_v0, 16  ;;  %v306_v4 = vld [vmem:[%s5652_s19 + $0xa8] sm:$0xf] }
  0x3c   : > { %v544_v20 = vsel %vm5663_vm2, %v539_v11, %v543_v46  ;;  %v591_v21 = vrot.slane %v589_v14, 5  ;;  %v599_v22 = vshll.u32 %v299_v5, 16  ;;  %v580_v23 = vshrl.u32 %v297_v10, 16 }
  0x3d   : > { %v573_v25 = vrot.slane %v572_v16, 4  ;;  %v562_v26 = vor.u32 %v561_v17, %v558_v13  ;;  %v595_v28 = vrot.slane %v593_v18, 4  ;;  %v583_v29 = vshll.u32 %v297_v10, 16  ;;  %v310_v13 = vld [vmem:[%s5652_s19 + $0xb8] sm:$0xf] }
  0x3e   : > { %737 = vrot.lane.b32.xlu1 %v554_v15, %s5598_s20  ;;  %v601_v31 = vrot.slane %v599_v22, 5  ;;  %v582_v32 = vrot.slane %v580_v23, 4  ;;  %v613_v33 = vshll.u32 %v301_v19, 16  ;;  %v617_v34 = vshrl.u32 %v301_v19, 16  ;;  %v311_v22 = vld [vmem:[%s5652_s19 + $0xbc] sm:$0x1] }
  0x3f   : > { %735 = vrot.lane.b32.xlu0 %v544_v20, %s5598_s20  ;;  %v578_v35 = vsel %vm5663_vm2, %v573_v25, %v577_v12  ;;  %v563_v36 = vrot.slane %v562_v26, 4  ;;  %v596_v37 = vor.u32 %v595_v28, %v591_v21  ;;  %v585_v38 = vrot.slane %v583_v29, 5  ;;  %v309_v23 = vld [vmem:[%s5652_s19 + $0xb4] sm:$0xf] }
  0x40   : > { %v615_v40 = vrot.slane %v613_v33, 5  ;;  %v619_v41 = vrot.slane %v617_v34, 4  ;;  %v623_v42 = vshll.u32 %v302_v24, 16  ;;  %v604_v43 = vshrl.u32 %v300_v30, 16 }
  0x41   : > { %v568_v44 = vsel %vm5663_vm2, %v563_v36, %v567_v2  ;;  %v597_v45 = vrot.slane %v596_v37, 4  ;;  %v586_v46 = vor.u32 %v585_v38, %v582_v32  ;;  %v607_v47 = vshll.u32 %v300_v30, 16  ;;  %v829_v37 = vld [vmem:[%s5652_s19 + $0x4] sm:$0xf] }
  0x42   : > { %741 = vrot.lane.b32.xlu1 %v578_v35, %s5598_s20  ;;  %v620_v50 = vor.u32 %v619_v41, %v615_v40  ;;  %v625_v51 = vrot.slane %v623_v42, 5  ;;  %v606_v52 = vrot.slane %v604_v43, 4  ;;  %v637_v53 = vshll.u32 %v304_v39, 16 }
  0x43   : > { %739 = vrot.lane.b32.xlu0 %v568_v44, %s5598_s20  ;;  %v602_v54 = vsel %vm5663_vm2, %v597_v45, %v601_v31  ;;  %v587_v55 = vrot.slane %v586_v46, 4  ;;  %v609_v56 = vrot.slane %v607_v47, 5  ;;  %v641_v57 = vshrl.u32 %v304_v39, 16 }
  0x44   : > { %v621_v59 = vrot.slane %v620_v50, 4  ;;  %v639_v60 = vrot.slane %v637_v53, 5  ;;  %v647_v61 = vshll.u32 %v305_v48, 16  ;;  %v628_v62 = vshrl.u32 %v303_v49, 16  ;;  %v830_v48 = vld [vmem:[%s5652_s19 + $0x8] sm:$0x1] }
  0x45   : > { %v592_v63 = vsel %vm5663_vm2, %v587_v55, %v591_v21  ;;  %v610_v0 = vor.u32 %v609_v56, %v606_v52  ;;  %v643_v1 = vrot.slane %v641_v57, 4  ;;  %v631_v2 = vshll.u32 %v303_v49, 16  ;;  %v201_v56 = vld [vmem:[%s5652_s19 + $0xc] sm:$0xf] }
  0x46   : > { %745 = vrot.lane.b32.xlu1 %v602_v54, %s5598_s20  ;;  %v626_v5 = vsel %vm5663_vm2, %v621_v59, %v625_v51  ;;  %v649_v6 = vrot.slane %v647_v61, 5  ;;  %v630_v7 = vrot.slane %v628_v62, 4  ;;  %v661_v8 = vshll.u32 %v307_v58, 16  ;;  %v832_v51 = vld [vmem:[%s5652_s19 + $0x10] sm:$0xf] }
  0x47   : > { %743 = vrot.lane.b32.xlu0 %v592_v63, %s5598_s20  ;;  %v611_v9 = vrot.slane %v610_v0, 4  ;;  %v644_v10 = vor.u32 %v643_v1, %v639_v60  ;;  %v633_v11 = vrot.slane %v631_v2, 5  ;;  %v665_v12 = vshrl.u32 %v307_v58, 16  ;;  %v828_v54 = vld [vmem:[%s5652_s19] sm:$0xe] }
  0x48   : > { %v663_v14 = vrot.slane %v661_v8, 5  ;;  %v671_v15 = vshll.u32 %v308_v3, 16  ;;  %v652_v16 = vshrl.u32 %v306_v4, 16  ;;  %v655_v17 = vshll.u32 %v306_v4, 16  ;;  %234 = vst.msk [vmem:[#allocation2 + $0x8] sm:$0xf] %vm231_vm3, %v201_v56 }
  0x49   : > { %v616_v18 = vsel %vm5663_vm2, %v611_v9, %v615_v40  ;;  %v645_v19 = vrot.slane %v644_v10, 4  ;;  %v634_v20 = vor.u32 %v633_v11, %v630_v7  ;;  %v667_v21 = vrot.slane %v665_v12, 4  ;;  %v199_v61 = vld [vmem:[%s5652_s19] sm:$0xf]  ;;  %v833_v0 = vld [vmem:[%s5652_s19 + $0x14] sm:$0x1] }
  0x4a   : > { %749 = vrot.lane.b32.xlu1 %v626_v5, %s5598_s20  ;;  %v673_v24 = vrot.slane %v671_v15, 5  ;;  %v654_v25 = vrot.slane %v652_v16, 4  ;;  %v657_v26 = vrot.slane %v655_v17, 5  ;;  %v685_v28 = vshll.u32 %v310_v13, 16  ;;  %v835_v1 = vld [vmem:[%s5652_s19 + $0x1c] sm:$0xf] }
  0x4b   : > { %747 = vrot.lane.b32.xlu0 %v616_v18, %s5598_s20  ;;  %v650_v29 = vsel %vm5663_vm2, %v645_v19, %v649_v6  ;;  %v635_v30 = vrot.slane %v634_v20, 4  ;;  %v668_v31 = vor.u32 %v667_v21, %v663_v14  ;;  %v689_v32 = vshrl.u32 %v310_v13, 16  ;;  %232 = vst.msk [vmem:[#allocation2] sm:$0xf] %vm231_vm3, %v199_v61  ;;  %v831_v3 = vld [vmem:[%s5652_s19 + $0xc] sm:$0xe] }
  0x4c   : > { %v658_v33 = vor.u32 %v657_v26, %v654_v25  ;;  %v687_v34 = vrot.slane %v685_v28, 5  ;;  %v695_v35 = vshll.u32 %v311_v22, 16  ;;  %v676_v36 = vshrl.u32 %v309_v23, 16  ;;  %v202_v4 = vld [vmem:[%s5652_s19 + $0x10] sm:$0xf] }
  0x4d   : > { %v640_v38 = vsel %vm5663_vm2, %v635_v30, %v639_v60  ;;  %v669_v39 = vrot.slane %v668_v31, 4  ;;  %v691_v40 = vrot.slane %v689_v32, 4  ;;  %v679_v41 = vshll.u32 %v309_v23, 16  ;;  %v200_v5 = vld [vmem:[%s5652_s19 + $0x4] sm:$0xf] }
  0x4e   : > { %753 = vrot.lane.b32.xlu1 %v650_v29, %s5598_s20  ;;  %v659_v42 = vrot.slane %v658_v33, 4  ;;  %v697_v43 = vrot.slane %v695_v35, 5  ;;  %v678_v44 = vrot.slane %v676_v36, 4  ;;  %v929_v49 = vrot.slane %v829_v37, 5  ;;  %235 = vst.msk [vmem:[#allocation2 + $0xc] sm:$0xf] %vm231_vm3, %v202_v4 }
  0x4f   : > { %751 = vrot.lane.b32.xlu0 %v640_v38, %s5598_s20  ;;  %v674_v45 = vsel %vm5663_vm2, %v669_v39, %v673_v24  ;;  %v692_v46 = vor.u32 %v691_v40, %v687_v34  ;;  %v681_v47 = vrot.slane %v679_v41, 5  ;;  %v932_v55 = vrot.slane %v830_v48, 5  ;;  %233 = vst.msk [vmem:[#allocation2 + $0x4] sm:$0xf] %vm231_vm3, %v200_v5  ;;  %v836_v12 = vld [vmem:[%s5652_s19 + $0x20] sm:$0x1] }
  0x50   : > { %v664_v50 = vsel %vm5663_vm2, %v659_v42, %v663_v14  ;;  %v931_v59 = vrot.slane %v929_v49, 4  ;;  %v936_v60 = vrot.slane %v832_v51, 5  ;;  %v4928_v63 = vrot.slane %v828_v54, 9  ;;  %v838_v13 = vld [vmem:[%s5652_s19 + $0x28] sm:$0xf] }
  0x51   : > { %v693_v52 = vrot.slane %v692_v46, 4  ;;  %v682_v53 = vor.u32 %v681_v47, %v678_v44  ;;  %v939_v8 = vrot.slane %v833_v0, 5  ;;  %v943_v9 = vrot.slane %v835_v1, 5  ;;  %v834_v14 = vld [vmem:[%s5652_s19 + $0x18] sm:$0xe] }
  0x52   : > { %757 = vrot.lane.b32.xlu1 %v674_v45, %s5598_s20  ;;  %v933_v6 = vsel %vm5807_vm6, %v931_v59, %v932_v55  ;;  %v938_v7 = vrot.slane %v936_v60, 4  ;;  %v930_v10 = vsel %vm5807_vm6, %v4928_v63, %v929_v49  ;;  %v4929_v11 = vrot.slane %v831_v3, 9  ;;  %v204_v15 = vld [vmem:[%s5652_s19 + $0x1c] sm:$0xf]  ;;  %v203_v16 = vld [vmem:[%s5652_s19 + $0x18] sm:$0xf] }
  0x53   : > { %755 = vrot.lane.b32.xlu0 %v664_v50, %s5598_s20  ;;  %v698_v57 = vsel %vm5663_vm2, %v693_v52, %v697_v43  ;;  %v683_v58 = vrot.slane %v682_v53, 4  ;;  %237 = vst.msk [vmem:[#allocation2 + $0x14] sm:$0xf] %vm231_vm3, %v204_v15  ;;  %v945_v18 = vrot.slane %v943_v9, 4  ;;  %v946_v19 = vrot.slane %v836_v12, 5 }
  0x54   : > { %v940_v17 = vsel %vm5807_vm6, %v938_v7, %v939_v8  ;;  %v950_v20 = vrot.slane %v838_v13, 5  ;;  %236 = vst.msk [vmem:[#allocation2 + $0x10] sm:$0xf] %vm231_vm3, %v203_v16  ;;  %v937_v21 = vsel %vm5807_vm6, %v4929_v11, %v936_v60  ;;  %v4930_v22 = vrot.slane %v834_v14, 9  ;;  %v839_v23 = vld [vmem:[%s5652_s19 + $0x2c] sm:$0x1] }
  0x55   : > { %v688_v2 = vsel %vm5663_vm2, %v683_v58, %v687_v34  ;;  %v841_v24 = vld [vmem:[%s5652_s19 + $0x34] sm:$0xf]  ;;  %v837_v25 = vld [vmem:[%s5652_s19 + $0x24] sm:$0xe]  ;;  %v206_v26 = vld [vmem:[%s5652_s19 + $0x28] sm:$0xf]  ;;  %v947_v29 = vsel %vm5807_vm6, %v945_v18, %v946_v19 }
  0x56   : > { %761 = vrot.lane.b32.xlu1 %v698_v57, %s5598_s20  ;;  %239 = vst.msk [vmem:[#allocation2 + $0x1c] sm:$0xf] %vm231_vm3, %v206_v26  ;;  %v205_v28 = vld [vmem:[%s5652_s19 + $0x24] sm:$0xf]  ;;  %v952_v30 = vrot.slane %v950_v20, 4  ;;  %v953_v31 = vrot.slane %v839_v23, 5  ;;  %v944_v34 = vsel %vm5807_vm6, %v4930_v22, %v943_v9 }
  0x57   : > { %759 = vrot.lane.b32.xlu0 %v688_v2, %s5598_s20  ;;  %v842_v32 = vld [vmem:[%s5652_s19 + $0x38] sm:$0x1]  ;;  %v957_v33 = vrot.slane %v841_v24, 5  ;;  %238 = vst.msk [vmem:[#allocation2 + $0x18] sm:$0xf] %vm231_vm3, %v205_v28  ;;  %v4931_v35 = vrot.slane %v837_v25, 9 }
  0x58   : > { %v844_v36 = vld [vmem:[%s5652_s19 + $0x40] sm:$0xf]  ;;  %v208_v37 = vld [vmem:[%s5652_s19 + $0x34] sm:$0xf]  ;;  %v840_v38 = vld [vmem:[%s5652_s19 + $0x30] sm:$0xe]  ;;  %v954_v41 = vsel %vm5807_vm6, %v952_v30, %v953_v31 }
  0x59   : > { %241 = vst.msk [vmem:[#allocation2 + $0x24] sm:$0xf] %vm231_vm3, %v208_v37  ;;  %v207_v39 = vld [vmem:[%s5652_s19 + $0x30] sm:$0xf]  ;;  %v845_v40 = vld [vmem:[%s5652_s19 + $0x44] sm:$0x1]  ;;  %v951_v46 = vsel %vm5807_vm6, %v4931_v35, %v950_v20 }
  0x5a   : > { %1041 = vrot.lane.b32.xlu1 %v933_v6, %s5599_s21  ;;  %240 = vst.msk [vmem:[#allocation2 + $0x20] sm:$0xf] %vm231_vm3, %v207_v39  ;;  %v959_v42 = vrot.slane %v957_v33, 4  ;;  %v960_v43 = vrot.slane %v842_v32, 5  ;;  %v964_v44 = vrot.slane %v844_v36, 5  ;;  %v4932_v47 = vrot.slane %v840_v38, 9 }
  0x5b   : > { %1039 = vrot.lane.b32.xlu0 %v930_v10, %s5599_s21  ;;  %v210_v45 = vld [vmem:[%s5652_s19 + $0x40] sm:$0xf]  ;;  %v847_v48 = vld [vmem:[%s5652_s19 + $0x4c] sm:$0xf]  ;;  %v209_v49 = vld [vmem:[%s5652_s19 + $0x3c] sm:$0xf] }
  0x5c   : > { %243 = vst.msk [vmem:[#allocation2 + $0x2c] sm:$0xf] %vm231_vm3, %v210_v45  ;;  %v843_v50 = vld [vmem:[%s5652_s19 + $0x3c] sm:$0xe]  ;;  %242 = vst.msk [vmem:[#allocation2 + $0x28] sm:$0xf] %vm231_vm3, %v209_v49  ;;  %v961_v53 = vsel %vm5807_vm6, %v959_v42, %v960_v43  ;;  %v958_v58 = vsel %vm5807_vm6, %v4932_v47, %v957_v33 }
  0x5d   : > { %v848_v51 = vld [vmem:[%s5652_s19 + $0x50] sm:$0x1]  ;;  %v212_v52 = vld [vmem:[%s5652_s19 + $0x4c] sm:$0xf]  ;;  %v966_v54 = vrot.slane %v964_v44, 4  ;;  %v967_v55 = vrot.slane %v845_v40, 5 }
  0x5e   : > { %1045 = vrot.lane.b32.xlu1 %v940_v17, %s5599_s21  ;;  %v971_v56 = vrot.slane %v847_v48, 5  ;;  %245 = vst.msk [vmem:[#allocation2 + $0x34] sm:$0xf] %vm231_vm3, %v212_v52  ;;  %v211_v57 = vld [vmem:[%s5652_s19 + $0x48] sm:$0xf]  ;;  %v4933_v59 = vrot.slane %v843_v50, 9 }
  0x5f   : > { %1043 = vrot.lane.b32.xlu0 %v937_v21, %s5599_s21  ;;  %v5884_v60 = vld [vmem:[%s5652_s19 + $0x58] sm:$0xf]  ;;  %244 = vst.msk [vmem:[#allocation2 + $0x30] sm:$0xf] %vm231_vm3, %v211_v57  ;;  %v846_v63 = vld [vmem:[%s5652_s19 + $0x48] sm:$0xe]  ;;  %v968_v5 = vsel %vm5807_vm6, %v966_v54, %v967_v55 }
  0x60   : > { %v214_v61 = vld [vmem:[%s5652_s19 + $0x58] sm:$0xf]  ;;  %v851_v0 = vld [vmem:[%s5652_s19 + $0x5c] sm:$0x1]  ;;  %v213_v1 = vld [vmem:[%s5652_s19 + $0x54] sm:$0xf]  ;;  %v965_v10 = vsel %vm5807_vm6, %v4933_v59, %v964_v44 }
  0x61   : > { %247 = vst.msk [vmem:[#allocation2 + $0x3c] sm:$0xf] %vm231_vm3, %v214_v61  ;;  %v974_v2 = vrot.slane %v848_v51, 5  ;;  %246 = vst.msk [vmem:[#allocation2 + $0x38] sm:$0xf] %vm231_vm3, %v213_v1  ;;  %v973_v6 = vrot.slane %v971_v56, 4 }
  0x62   : > { %1049 = vrot.lane.b32.xlu1 %v947_v29, %s5599_s21  ;;  %v216_v3 = vld [vmem:[%s5652_s19 + $0x64] sm:$0xf]  ;;  %v215_v4 = vld [vmem:[%s5652_s19 + $0x60] sm:$0xf]  ;;  %v978_v7 = vrot.slane %v5884_v60, 5  ;;  %v4934_v11 = vrot.slane %v846_v63, 9 }
  0x63   : > { %1047 = vrot.lane.b32.xlu0 %v944_v34, %s5599_s21  ;;  %249 = vst.msk [vmem:[#allocation2 + $0x44] sm:$0xf] %vm231_vm3, %v216_v3  ;;  %248 = vst.msk [vmem:[#allocation2 + $0x40] sm:$0xf] %vm231_vm3, %v215_v4  ;;  %v218_v8 = vld [vmem:[%s5652_s19 + $0x70] sm:$0xf]  ;;  %v975_v20 = vsel %vm5807_vm6, %v973_v6, %v974_v2 }
  0x64   : > { %v217_v9 = vld [vmem:[%s5652_s19 + $0x6c] sm:$0xf]  ;;  %v853_v12 = vld [vmem:[%s5652_s19 + $0x64] sm:$0xf]  ;;  %251 = vst.msk [vmem:[#allocation2 + $0x4c] sm:$0xf] %vm231_vm3, %v218_v8  ;;  %v972_v25 = vsel %vm5807_vm6, %v4934_v11, %v971_v56 }
  0x65   : > { %250 = vst.msk [vmem:[#allocation2 + $0x48] sm:$0xf] %vm231_vm3, %v217_v9  ;;  %v220_v13 = vld [vmem:[%s5652_s19 + $0x7c] sm:$0xf]  ;;  %v849_v14 = vld [vmem:[%s5652_s19 + $0x54] sm:$0xe] }
  0x66   : > { %1053 = vrot.lane.b32.xlu1 %v954_v41, %s5599_s21  ;;  %v854_v15 = vld [vmem:[%s5652_s19 + $0x68] sm:$0x1]  ;;  %253 = vst.msk [vmem:[#allocation2 + $0x54] sm:$0xf] %vm231_vm3, %v220_v13  ;;  %v219_v16 = vld [vmem:[%s5652_s19 + $0x78] sm:$0xf] }
  0x67   : > { %1051 = vrot.lane.b32.xlu0 %v951_v46, %s5599_s21  ;;  %v981_v17 = vrot.slane %v851_v0, 5  ;;  %252 = vst.msk [vmem:[#allocation2 + $0x50] sm:$0xf] %vm231_vm3, %v219_v16  ;;  %v222_v18 = vld [vmem:[%s5652_s19 + $0x88] sm:$0xf]  ;;  %v980_v21 = vrot.slane %v978_v7, 4 }
  0x68   : > { %v221_v19 = vld [vmem:[%s5652_s19 + $0x84] sm:$0xf]  ;;  %v985_v22 = vrot.slane %v853_v12, 5  ;;  %255 = vst.msk [vmem:[#allocation2 + $0x5c] sm:$0xf] %vm231_vm3, %v222_v18  ;;  %v4935_v26 = vrot.slane %v849_v14, 9 }
  0x69   : > { %254 = vst.msk [vmem:[#allocation2 + $0x58] sm:$0xf] %vm231_vm3, %v221_v19  ;;  %v224_v23 = vld [vmem:[%s5652_s19 + $0x94] sm:$0xf]  ;;  %v223_v24 = vld [vmem:[%s5652_s19 + $0x90] sm:$0xf]  ;;  %v982_v35 = vsel %vm5807_vm6, %v980_v21, %v981_v17 }
  0x6a   : > { %1057 = vrot.lane.b32.xlu1 %v961_v53, %s5599_s21  ;;  %v856_v28 = vld [vmem:[%s5652_s19 + $0x70] sm:$0xf]  ;;  %257 = vst.msk [vmem:[#allocation2 + $0x64] sm:$0xf] %vm231_vm3, %v224_v23  ;;  %256 = vst.msk [vmem:[#allocation2 + $0x60] sm:$0xf] %vm231_vm3, %v223_v24  ;;  %v979_v40 = vsel %vm5807_vm6, %v4935_v26, %v978_v7 }
  0x6b   : > { %1055 = vrot.lane.b32.xlu0 %v958_v58, %s5599_s21  ;;  %v226_v29 = vld [vmem:[%s5652_s19 + $0xa0] sm:$0xf]  ;;  %v225_v31 = vld [vmem:[%s5652_s19 + $0x9c] sm:$0xf]  ;;  %v988_v32 = vrot.slane %v854_v15, 5  ;;  %v987_v36 = vrot.slane %v985_v22, 4 }
  0x6c   : > { %v852_v30 = vld [vmem:[%s5652_s19 + $0x60] sm:$0xe]  ;;  %259 = vst.msk [vmem:[#allocation2 + $0x6c] sm:$0xf] %vm231_vm3, %v226_v29  ;;  %258 = vst.msk [vmem:[#allocation2 + $0x68] sm:$0xf] %vm231_vm3, %v225_v31 }
  0x6d   : > { %v228_v33 = vld [vmem:[%s5652_s19 + $0xac] sm:$0xf]  ;;  %v227_v34 = vld [vmem:[%s5652_s19 + $0xa8] sm:$0xf]  ;;  %v992_v37 = vrot.slane %v856_v28, 5  ;;  %v4936_v41 = vrot.slane %v852_v30, 9  ;;  %v989_v45 = vsel %vm5807_vm6, %v987_v36, %v988_v32 }
  0x6e   : > { %1061 = vrot.lane.b32.xlu1 %v968_v5, %s5599_s21  ;;  %261 = vst.msk [vmem:[#allocation2 + $0x74] sm:$0xf] %vm231_vm3, %v228_v33  ;;  %260 = vst.msk [vmem:[#allocation2 + $0x70] sm:$0xf] %vm231_vm3, %v227_v34  ;;  %v230_v38 = vld [vmem:[%s5652_s19 + $0xb8] sm:$0xf] }
  0x6f   : > { %1059 = vrot.lane.b32.xlu0 %v965_v10, %s5599_s21  ;;  %v229_v39 = vld [vmem:[%s5652_s19 + $0xb4] sm:$0xf]  ;;  %v859_v43 = vld [vmem:[%s5652_s19 + $0x7c] sm:$0xf]  ;;  %263 = vst.msk [vmem:[#allocation2 + $0x7c] sm:$0xf] %vm231_vm3, %v230_v38  ;;  %v986_v49 = vsel %vm5807_vm6, %v4936_v41, %v985_v22 }
  0x70   : > { %v857_v42 = vld [vmem:[%s5652_s19 + $0x74] sm:$0x1]  ;;  %262 = vst.msk [vmem:[#allocation2 + $0x78] sm:$0xf] %vm231_vm3, %v229_v39  ;;  %v855_v44 = vld [vmem:[%s5652_s19 + $0x6c] sm:$0xe] }
  0x71   : > { %v994_v46 = vrot.slane %v992_v37, 4  ;;  %v995_v47 = vrot.slane %v857_v42, 5  ;;  %v999_v48 = vrot.slane %v859_v43, 5  ;;  %v4937_v50 = vrot.slane %v855_v44, 9  ;;  %v860_v51 = vld [vmem:[%s5652_s19 + $0x80] sm:$0x1] }
  0x72   : > { %1065 = vrot.lane.b32.xlu1 %v975_v20, %s5599_s21  ;;  %v862_v52 = vld [vmem:[%s5652_s19 + $0x88] sm:$0xf]  ;;  %v858_v53 = vld [vmem:[%s5652_s19 + $0x78] sm:$0xe]  ;;  %v1002_v56 = vrot.slane %v860_v51, 5  ;;  %vm3492_vm1 = vcmask 220160  }
  0x73   : > { %1063 = vrot.lane.b32.xlu0 %v972_v25, %s5599_s21  ;;  %v996_v54 = vsel %vm5807_vm6, %v994_v46, %v995_v47  ;;  %v1001_v55 = vrot.slane %v999_v48, 4  ;;  %v1006_v57 = vrot.slane %v862_v52, 5  ;;  %v993_v58 = vsel %vm5807_vm6, %v4937_v50, %v992_v37  ;;  %v863_v60 = vld [vmem:[%s5652_s19 + $0x8c] sm:$0x1]  ;;  %v865_v61 = vld [vmem:[%s5652_s19 + $0x94] sm:$0xf] }
  0x74   : > { %v4938_v59 = vrot.slane %v858_v53, 9  ;;  %v861_v63 = vld [vmem:[%s5652_s19 + $0x84] sm:$0xe]  ;;  %v1009_v2 = vrot.slane %v863_v60, 5  ;;  %v1013_v3 = vrot.slane %v865_v61, 5  ;;  %vm4689_vm3 = vcmask 1042434  }
  0x75   : > { %v1003_v0 = vsel %vm5807_vm6, %v1001_v55, %v1002_v56  ;;  %v1008_v1 = vrot.slane %v1006_v57, 4  ;;  %v4939_v5 = vrot.slane %v861_v63, 9  ;;  %v866_v6 = vld [vmem:[%s5652_s19 + $0x98] sm:$0x1]  ;;  %v868_v7 = vld [vmem:[%s5652_s19 + $0xa0] sm:$0xf] }
  0x76   : > { %1069 = vrot.lane.b32.xlu1 %v982_v35, %s5599_s21  ;;  %v1000_v4 = vsel %vm5807_vm6, %v4938_v59, %v999_v48  ;;  %v864_v8 = vld [vmem:[%s5652_s19 + $0x90] sm:$0xe]  ;;  %v1015_v10 = vrot.slane %v1013_v3, 4  ;;  %v1016_v11 = vrot.slane %v866_v6, 5  ;;  %v1020_v12 = vrot.slane %v868_v7, 5 }
  0x77   : > { %1067 = vrot.lane.b32.xlu0 %v979_v40, %s5599_s21  ;;  %v1010_v9 = vsel %vm5807_vm6, %v1008_v1, %v1009_v2  ;;  %v1007_v13 = vsel %vm5807_vm6, %v4939_v5, %v1006_v57  ;;  %v4940_v14 = vrot.slane %v864_v8, 9  ;;  %v869_v15 = vld [vmem:[%s5652_s19 + $0xa4] sm:$0x1]  ;;  %v871_v16 = vld [vmem:[%s5652_s19 + $0xac] sm:$0xf]  ;;  %vm4692_vm4 = vcmask 1043459  }
  0x78   : > { %v867_v17 = vld [vmem:[%s5652_s19 + $0x9c] sm:$0xe]  ;;  %v1017_v18 = vsel %vm5807_vm6, %v1015_v10, %v1016_v11  ;;  %v1022_v19 = vrot.slane %v1020_v12, 4  ;;  %v1023_v20 = vrot.slane %v869_v15, 5  ;;  %v1027_v21 = vrot.slane %v871_v16, 5 }
  0x79   : > { %v1014_v22 = vsel %vm5807_vm6, %v4940_v14, %v1013_v3  ;;  %v4941_v23 = vrot.slane %v867_v17, 9  ;;  %v872_v24 = vld [vmem:[%s5652_s19 + $0xb0] sm:$0x1]  ;;  %v874_v25 = vld [vmem:[%s5652_s19 + $0xb8] sm:$0xf]  ;;  %vm4695_vm5 = vcmask 1044484  }
  0x7a   : > { %1073 = vrot.lane.b32.xlu1 %v989_v45, %s5599_s21  ;;  %v870_v26 = vld [vmem:[%s5652_s19 + $0xa8] sm:$0xe]  ;;  %v1024_v28 = vsel %vm5807_vm6, %v1022_v19, %v1023_v20  ;;  %v1029_v29 = vrot.slane %v1027_v21, 4  ;;  %v1030_v30 = vrot.slane %v872_v24, 5  ;;  %v1034_v31 = vrot.slane %v874_v25, 5 }
  0x7b   : > { %1071 = vrot.lane.b32.xlu0 %v986_v49, %s5599_s21  ;;  %v1021_v33 = vsel %vm5807_vm6, %v4941_v23, %v1020_v12  ;;  %v4942_v34 = vrot.slane %v870_v26, 9  ;;  %v875_v35 = vld [vmem:[%s5652_s19 + $0xbc] sm:$0x1]  ;;  %v873_v37 = vld [vmem:[%s5652_s19 + $0xb4] sm:$0xe] }
  0x7c   : > { %v1031_v38 = vsel %vm5807_vm6, %v1029_v29, %v1030_v30  ;;  %v1036_v39 = vrot.slane %v1034_v31, 4  ;;  %v1037_v40 = vrot.slane %v875_v35, 5  ;;  %v4943_v43 = vrot.slane %v873_v37, 9  ;;  %v4945_v49 = vld [vmem:[%s5652_s19 + $0x10] sm:$0xf] }
  0x7d   : > { %v1028_v42 = vsel %vm5807_vm6, %v4942_v34, %v1027_v21  ;;  %v4944_v51 = vld [vmem:[%s5652_s19 + $0xc] sm:$0xf]  ;;  %v4947_v53 = vld [vmem:[%s5652_s19 + $0x1c] sm:$0xf]  ;;  %v4946_v55 = vld [vmem:[%s5652_s19 + $0x18] sm:$0xf] }
  0x7e   : > { %1077 = vrot.lane.b32.xlu1 %v996_v54, %s5599_s21  ;;  %v1038_v45 = vsel %vm5807_vm6, %v1036_v39, %v1037_v40  ;;  %v1035_v47 = vsel %vm5807_vm6, %v4943_v43, %v1034_v31  ;;  %v4949_v57 = vld [vmem:[%s5652_s19 + $0x28] sm:$0xf]  ;;  %v4948_v59 = vld [vmem:[%s5652_s19 + $0x24] sm:$0xf]  ;;  %v4951_v61 = vld [vmem:[%s5652_s19 + $0x34] sm:$0xf] }
  0x7f   : > { %1075 = vrot.lane.b32.xlu0 %v993_v58, %s5599_s21  ;;  %v4953_v2 = vld [vmem:[%s5652_s19 + $0x40] sm:$0xf]  ;;  %v4955_v6 = vld [vmem:[%s5652_s19 + $0x4c] sm:$0xf]  ;;  %v4954_v8 = vld [vmem:[%s5652_s19 + $0x48] sm:$0xf] }
  0x80   : > { %v4957_v10 = vld [vmem:[%s5652_s19 + $0x58] sm:$0xf]  ;;  %v4956_v12 = vld [vmem:[%s5652_s19 + $0x54] sm:$0xf]  ;;  %v4959_v14 = vld [vmem:[%s5652_s19 + $0x64] sm:$0xf] }
  0x81   : > { %v4958_v16 = vld [vmem:[%s5652_s19 + $0x60] sm:$0xf]  ;;  %v4960_v20 = vld [vmem:[%s5652_s19 + $0x6c] sm:$0xf]  ;;  %v4962_v24 = vld [vmem:[%s5652_s19 + $0x78] sm:$0xf] }
  0x82   : > { %1081 = vrot.lane.b32.xlu1 %v1003_v0, %s5599_s21  ;;  %v4950_v0 = vld [vmem:[%s5652_s19 + $0x30] sm:$0xf]  ;;  %v4965_v26 = vld [vmem:[%s5652_s19 + $0x88] sm:$0xf]  ;;  %v4964_v29 = vld [vmem:[%s5652_s19 + $0x84] sm:$0xf] }
  0x83   : > { %1079 = vrot.lane.b32.xlu0 %v1000_v4, %s5599_s21  ;;  %v4952_v4 = vld [vmem:[%s5652_s19 + $0x3c] sm:$0xf]  ;;  %v4977_v31 = vld [vmem:[%s5652_s19 + $0x10] sm:$0xf] }
  0x84   : > { %v4966_v35 = vld [vmem:[%s5652_s19 + $0x90] sm:$0xf]  ;;  %v1423_v37 = vshll.u32 %v4977_v31, 16 }
  0x86   : > { %1085 = vrot.lane.b32.xlu1 %v1010_v9, %s5599_s21 }
  0x87   : > { %1083 = vrot.lane.b32.xlu0 %v1007_v13, %s5599_s21 }
  0x8a   : > { %1089 = vrot.lane.b32.xlu1 %v1017_v18, %s5599_s21  ;;  %v4961_v18 = vld [vmem:[%s5652_s19 + $0x70] sm:$0xf] }
  0x8b   : > { %1087 = vrot.lane.b32.xlu0 %v1014_v22, %s5599_s21  ;;  %v4963_v22 = vld [vmem:[%s5652_s19 + $0x7c] sm:$0xf] }
  0x8c   : > { %v704_v32 = vpop.permute.xlu1 %703 }
  0x8d   : > { %798 = vst.msk [vmem:[#allocation2 + $0x8] sm:$0xf] %vm795_vm7, %v704_v32  ;;  %v700_v36 = vpop.permute.xlu0 %699  ;;  %v4967_v32 = vld [vmem:[%s5652_s19 + $0x94] sm:$0xf] }
  0x8e   : > { %796 = vst.msk [vmem:[#allocation2] sm:$0xf] %vm795_vm7, %v700_v36  ;;  %1093 = vrot.lane.b32.xlu1 %v1024_v28, %s5599_s21 }
  0x8f   : > { %1091 = vrot.lane.b32.xlu0 %v1021_v33, %s5599_s21  ;;  %v4976_v33 = vld [vmem:[%s5652_s19 + $0xc] sm:$0xf] }
  0x90   : > { %v706_v41 = vpop.permute.xlu1 %705  ;;  %v1414_v39 = vshrl.u32 %v4976_v33, 16  ;;  %v1417_v40 = vshll.u32 %v4976_v33, 16 }
  0x91   : > { %799 = vst.msk [vmem:[#allocation2 + $0xc] sm:$0xf] %vm795_vm7, %v706_v41  ;;  %v702_v44 = vpop.permute.xlu0 %701  ;;  %v4969_v41 = vld [vmem:[%s5652_s19 + $0xa0] sm:$0xf] }
  0x92   : > { %797 = vst.msk [vmem:[#allocation2 + $0x4] sm:$0xf] %vm795_vm7, %v702_v44  ;;  %1097 = vrot.lane.b32.xlu1 %v1031_v38, %s5599_s21  ;;  %v1427_v38 = vshrl.u32 %v4977_v31, 16  ;;  %v4968_v44 = vld [vmem:[%s5652_s19 + $0x9c] sm:$0xf] }
  0x93   : > { %1095 = vrot.lane.b32.xlu0 %v1028_v42, %s5599_s21  ;;  %v5001_v42 = vld [vmem:[%s5652_s19 + $0x70] sm:$0xf]  ;;  %v4974_v31 = vld [vmem:[%s5652_s19 + $0xc0] sm:$0xf] }
  0x94   : > { %v710_v46 = vpop.permute.xlu1 %709 }
  0x95   : > { %801 = vst.msk [vmem:[#allocation2 + $0x14] sm:$0xf] %vm795_vm7, %v710_v46  ;;  %v708_v48 = vpop.permute.xlu0 %707 }
  0x96   : > { %800 = vst.msk [vmem:[#allocation2 + $0x10] sm:$0xf] %vm795_vm7, %v708_v48  ;;  %1101 = vrot.lane.b32.xlu1 %v1038_v45, %s5599_s21  ;;  %v5000_v45 = vld [vmem:[%s5652_s19 + $0x6c] sm:$0xf]  ;;  %v1429_v48 = vrot.slane %v1427_v38, 4 }
  0x97   : > { %1099 = vrot.lane.b32.xlu0 %v1035_v47, %s5599_s21  ;;  %v6104_v47 = vrot.slane %v1423_v37, 5 }
  0x98   : > { %v714_v50 = vpop.permute.xlu1 %713 }
  0x99   : > { %803 = vst.msk [vmem:[#allocation2 + $0x1c] sm:$0xf] %vm795_vm7, %v714_v50  ;;  %v712_v52 = vpop.permute.xlu0 %711  ;;  %v1416_v50 = vrot.slane %v1414_v39, 4 }
  0x9a   : > { %802 = vst.msk [vmem:[#allocation2 + $0x18] sm:$0xf] %vm795_vm7, %v712_v52  ;;  %1238 = vrot.lane.b32.xlu1 %v4945_v49, %s5600_s22  ;;  %v4978_v49 = vld [vmem:[%s5652_s19 + $0x14] sm:$0x1]  ;;  %v1615_v52 = vshll.u32 %v5001_v42, 16 }
  0x9b   : > { %1236 = vrot.lane.b32.xlu0 %v4944_v51, %s5600_s22  ;;  %v1419_v51 = vrot.slane %v1417_v40, 5 }
  0x9c   : > { %v718_v54 = vpop.permute.xlu1 %717 }
  0x9d   : > { %805 = vst.msk [vmem:[#allocation2 + $0x24] sm:$0xf] %vm795_vm7, %v718_v54  ;;  %v716_v56 = vpop.permute.xlu0 %715  ;;  %v4971_v54 = vld [vmem:[%s5652_s19 + $0xac] sm:$0xf] }
  0x9e   : > { %804 = vst.msk [vmem:[#allocation2 + $0x20] sm:$0xf] %vm795_vm7, %v716_v56  ;;  %1242 = vrot.lane.b32.xlu1 %v4947_v53, %s5600_s22  ;;  %v1619_v53 = vshrl.u32 %v5001_v42, 16  ;;  %v1609_v56 = vshll.u32 %v5000_v45, 16 }
  0x9f   : > { %1240 = vrot.lane.b32.xlu0 %v4946_v55, %s5600_s22  ;;  %v1606_v55 = vshrl.u32 %v5000_v45, 16 }
  0xa0   : > { %v722_v58 = vpop.permute.xlu1 %721 }
  0xa1   : > { %807 = vst.msk [vmem:[#allocation2 + $0x2c] sm:$0xf] %vm795_vm7, %v722_v58  ;;  %v720_v60 = vpop.permute.xlu0 %719 }
  0xa2   : > { %806 = vst.msk [vmem:[#allocation2 + $0x28] sm:$0xf] %vm795_vm7, %v720_v60  ;;  %1246 = vrot.lane.b32.xlu1 %v4949_v57, %s5600_s22  ;;  %v4980_v57 = vld [vmem:[%s5652_s19 + $0x1c] sm:$0xf] }
  0xa3   : > { %1244 = vrot.lane.b32.xlu0 %v4948_v59, %s5600_s22  ;;  %v4970_v59 = vld [vmem:[%s5652_s19 + $0xa8] sm:$0xf] }
  0xa4   : > { %v726_v63 = vpop.permute.xlu1 %725 }
  0xa5   : > { %809 = vst.msk [vmem:[#allocation2 + $0x34] sm:$0xf] %vm795_vm7, %v726_v63  ;;  %v724_v1 = vpop.permute.xlu0 %723  ;;  %v1433_v63 = vshll.u32 %v4978_v49, 16  ;;  %v5005_v49 = vld [vmem:[%s5652_s19 + $0x80] sm:$0x1] }
  0xa6   : > { %808 = vst.msk [vmem:[#allocation2 + $0x30] sm:$0xf] %vm795_vm7, %v724_v1  ;;  %1250 = vrot.lane.b32.xlu1 %v4951_v61, %s5600_s22  ;;  %v1430_v61 = vor.u32 %v1429_v48, %v6104_v47  ;;  %v1420_v1 = vor.u32 %v1419_v51, %v1416_v50 }
  0xa7   : > { %1248 = vrot.lane.b32.xlu0 %v4950_v0, %s5600_s22  ;;  %v4979_v0 = vld [vmem:[%s5652_s19 + $0x18] sm:$0xf] }
  0xa8   : > { %v730_v3 = vpop.permute.xlu1 %729 }
  0xa9   : > { %811 = vst.msk [vmem:[#allocation2 + $0x3c] sm:$0xf] %vm795_vm7, %v730_v3  ;;  %v728_v5 = vpop.permute.xlu0 %727  ;;  %v6119_v3 = vrot.slane %v1615_v52, 5 }
  0xaa   : > { %810 = vst.msk [vmem:[#allocation2 + $0x38] sm:$0xf] %vm795_vm7, %v728_v5  ;;  %1254 = vrot.lane.b32.xlu1 %v4953_v2, %s5600_s22  ;;  %v5002_v2 = vld [vmem:[%s5652_s19 + $0x74] sm:$0x1]  ;;  %v1447_v5 = vshll.u32 %v4980_v57, 16 }
  0xab   : > { %1252 = vrot.lane.b32.xlu0 %v4952_v4, %s5600_s22  ;;  %v1621_v4 = vrot.slane %v1619_v53, 4 }
  0xac   : > { %v734_v7 = vpop.permute.xlu1 %733 }
  0xad   : > { %813 = vst.msk [vmem:[#allocation2 + $0x44] sm:$0xf] %vm795_vm7, %v734_v7  ;;  %v732_v9 = vpop.permute.xlu0 %731  ;;  %v1608_v7 = vrot.slane %v1606_v55, 4 }
  0xae   : > { %812 = vst.msk [vmem:[#allocation2 + $0x40] sm:$0xf] %vm795_vm7, %v732_v9  ;;  %1258 = vrot.lane.b32.xlu1 %v4955_v6, %s5600_s22  ;;  %v4973_v6 = vld [vmem:[%s5652_s19 + $0xb8] sm:$0xf]  ;;  %v1451_v9 = vshrl.u32 %v4980_v57, 16 }
  0xaf   : > { %1256 = vrot.lane.b32.xlu0 %v4954_v8, %s5600_s22  ;;  %v1611_v8 = vrot.slane %v1609_v56, 5  ;;  %v1649_v56 = vshll.u32 %v5005_v49, 16 }
  0xb0   : > { %v738_v11 = vpop.permute.xlu1 %737 }
  0xb1   : > { %815 = vst.msk [vmem:[#allocation2 + $0x4c] sm:$0xf] %vm795_vm7, %v738_v11  ;;  %v736_v13 = vpop.permute.xlu0 %735  ;;  %v4972_v11 = vld [vmem:[%s5652_s19 + $0xb4] sm:$0xf] }
  0xb2   : > { %814 = vst.msk [vmem:[#allocation2 + $0x48] sm:$0xf] %vm795_vm7, %v736_v13  ;;  %1262 = vrot.lane.b32.xlu1 %v4957_v10, %s5600_s22  ;;  %v1441_v13 = vshll.u32 %v4979_v0, 16 }
  0xb3   : > { %1260 = vrot.lane.b32.xlu0 %v4956_v12, %s5600_s22  ;;  %v1438_v12 = vshrl.u32 %v4979_v0, 16 }
  0xb4   : > { %v742_v15 = vpop.permute.xlu1 %741  ;;  %v1443_v33 = vrot.slane %v1441_v13, 5 }
  0xb5   : > { %817 = vst.msk [vmem:[#allocation2 + $0x54] sm:$0xf] %vm795_vm7, %v742_v15  ;;  %v740_v17 = vpop.permute.xlu0 %739 }
  0xb6   : > { %816 = vst.msk [vmem:[#allocation2 + $0x50] sm:$0xf] %vm795_vm7, %v740_v17  ;;  %1266 = vrot.lane.b32.xlu1 %v4959_v14, %s5600_s22  ;;  %v5004_v14 = vld [vmem:[%s5652_s19 + $0x7c] sm:$0xf]  ;;  %v1625_v17 = vshll.u32 %v5002_v2, 16  ;;  %v1651_v2 = vrot.slane %v1649_v56, 5 }
  0xb7   : > { %1264 = vrot.lane.b32.xlu0 %v4958_v16, %s5600_s22  ;;  %v1435_v16 = vrot.slane %v1433_v63, 5 }
  0xb8   : > { %v746_v19 = vpop.permute.xlu1 %745  ;;  %v1627_v39 = vrot.slane %v1625_v17, 5 }
  0xb9   : > { %819 = vst.msk [vmem:[#allocation2 + $0x5c] sm:$0xf] %vm795_vm7, %v746_v19  ;;  %v744_v21 = vpop.permute.xlu0 %743  ;;  %v4975_v19 = vld [vmem:[%s5652_s19 + $0xc4] sm:$0xf] }
  0xba   : > { %818 = vst.msk [vmem:[#allocation2 + $0x58] sm:$0xf] %vm795_vm7, %v744_v21  ;;  %1270 = vrot.lane.b32.xlu1 %v4961_v18, %s5600_s22  ;;  %v5003_v18 = vld [vmem:[%s5652_s19 + $0x78] sm:$0xf]  ;;  %v1421_v21 = vrot.slane %v1420_v1, 4 }
  0xbb   : > { %1268 = vrot.lane.b32.xlu0 %v4960_v20, %s5600_s22  ;;  %v1431_v20 = vrot.slane %v1430_v61, 4  ;;  %v5025_v61 = vld [vmem:[%s5652_s19 + $0x10] sm:$0xf] }
  0xbc   : > { %v750_v23 = vpop.permute.xlu1 %749 }
  0xbd   : > { %821 = vst.msk [vmem:[#allocation2 + $0x64] sm:$0xf] %vm795_vm7, %v750_v23  ;;  %v748_v25 = vpop.permute.xlu0 %747  ;;  %v6131_v23 = vrot.slane %v1447_v5, 5  ;;  %v1436_v37 = vsel %vm5663_vm2, %v1431_v20, %v1435_v16 }
  0xbe   : > { %820 = vst.msk [vmem:[#allocation2 + $0x60] sm:$0xf] %vm795_vm7, %v748_v25  ;;  %1274 = vrot.lane.b32.xlu1 %v4963_v22, %s5600_s22  ;;  %v1622_v22 = vor.u32 %v1621_v4, %v6119_v3  ;;  %v4981_v25 = vld [vmem:[%s5652_s19 + $0x20] sm:$0x1] }
  0xbf   : > { %1272 = vrot.lane.b32.xlu0 %v4962_v24, %s5600_s22  ;;  %v1612_v24 = vor.u32 %v1611_v8, %v1608_v7  ;;  %v1457_v40 = vshll.u32 %v4981_v25, 16  ;;  %v5026_v7 = vld [vmem:[%s5652_s19 + $0x14] sm:$0x1]  ;;  %v5049_v8 = vld [vmem:[%s5652_s19 + $0x70] sm:$0xf] }
  0xc0   : > { %v754_v28 = vpop.permute.xlu1 %753  ;;  %v1623_v38 = vrot.slane %v1622_v22, 4  ;;  %v2027_v13 = vrot.slane %v5026_v7, 5 }
  0xc1   : > { %823 = vst.msk [vmem:[#allocation2 + $0x6c] sm:$0xf] %vm795_vm7, %v754_v28  ;;  %v752_v30 = vpop.permute.xlu0 %751  ;;  %v1639_v28 = vshll.u32 %v5004_v14, 16 }
  0xc2   : > { %822 = vst.msk [vmem:[#allocation2 + $0x68] sm:$0xf] %vm795_vm7, %v752_v30  ;;  %1278 = vrot.lane.b32.xlu1 %v4965_v26, %s5600_s22  ;;  %v1453_v26 = vrot.slane %v1451_v9, 4  ;;  %v1628_v53 = vsel %vm5663_vm2, %v1623_v38, %v1627_v39 }
  0xc3   : > { %1276 = vrot.lane.b32.xlu0 %v4964_v29, %s5600_s22  ;;  %v1643_v29 = vshrl.u32 %v5004_v14, 16  ;;  %v2080_v14 = vrot.slane %v5049_v8, 5 }
  0xc4   : > { %v758_v34 = vpop.permute.xlu1 %757  ;;  %v1454_v42 = vor.u32 %v1453_v26, %v6131_v23 }
  0xc5   : > { %825 = vst.msk [vmem:[#allocation2 + $0x74] sm:$0xf] %vm795_vm7, %v758_v34  ;;  %v756_v36 = vpop.permute.xlu0 %755  ;;  %v1630_v34 = vshrl.u32 %v5003_v18, 16 }
  0xc6   : > { %824 = vst.msk [vmem:[#allocation2 + $0x70] sm:$0xf] %vm795_vm7, %v756_v36  ;;  %1282 = vrot.lane.b32.xlu1 %v4967_v32, %s5600_s22  ;;  %v1440_v32 = vrot.slane %v1438_v12, 4 }
  0xc7   : > { %1280 = vrot.lane.b32.xlu0 %v4966_v35, %s5600_s22  ;;  %v1633_v35 = vshll.u32 %v5003_v18, 16  ;;  %v1632_v50 = vrot.slane %v1630_v34, 4  ;;  %v5050_v18 = vld [vmem:[%s5652_s19 + $0x74] sm:$0x1] }
  0xc8   : > { %v762_v43 = vpop.permute.xlu1 %761  ;;  %v1444_v48 = vor.u32 %v1443_v33, %v1440_v32  ;;  %v5027_v33 = vld [vmem:[%s5652_s19 + $0x18] sm:$0xe] }
  0xc9   : > { %827 = vst.msk [vmem:[#allocation2 + $0x7c] sm:$0xf] %vm795_vm7, %v762_v43  ;;  %v760_v46 = vpop.permute.xlu0 %759  ;;  %v1641_v43 = vrot.slane %v1639_v28, 5  ;;  %v1635_v51 = vrot.slane %v1633_v35, 5 }
  0xca   : > { %826 = vst.msk [vmem:[#allocation2 + $0x78] sm:$0xf] %vm795_vm7, %v760_v46  ;;  %1286 = vrot.lane.b32.xlu1 %v4969_v41, %s5600_s22  ;;  %v1426_v41 = vsel %vm5663_vm2, %v1421_v21, %v6104_v47  ;;  %v1613_v46 = vrot.slane %v1612_v24, 4  ;;  %v1459_v47 = vrot.slane %v1457_v40, 5  ;;  %v5048_v21 = vld [vmem:[%s5652_s19 + $0x6c] sm:$0xe] }
  0xcb   : > { %1284 = vrot.lane.b32.xlu0 %v4968_v44, %s5600_s22  ;;  %v1645_v44 = vrot.slane %v1643_v29, 4  ;;  %v2083_v24 = vrot.slane %v5050_v18, 5  ;;  %v5080_v29 = vrot.slane %v5048_v21, 9  ;;  %v5073_v40 = vrot.slane %v5027_v33, 9 }
  0xcc   : > { %v1042_v58 = vpop.permute.xlu1 %1041  ;;  %vm4701_vm7 = vcmask 1046534  }
  0xcd   : > { %1137 = vst.msk [vmem:[#allocation2 + $0x4] sm:$0xf] %vm1135_vm8, %v1042_v58  ;;  %v1040_v60 = vpop.permute.xlu0 %1039  ;;  %v1646_v55 = vor.u32 %v1645_v44, %v1641_v43  ;;  %v1618_v58 = vsel %vm5663_vm2, %v1613_v46, %v6119_v3  ;;  %v2024_v3 = vrot.slane %v5025_v61, 5  ;;  %v2081_v39 = vsel %vm5807_vm6, %v5080_v29, %v2080_v14  ;;  %v5089_v61 = vld [vmem:[%s5652_s19 + $0x1c] sm:$0xf] }
  0xce   : > { %1136 = vst.msk [vmem:[#allocation2] sm:$0xf] %vm1135_vm8, %v1040_v60  ;;  %1290 = vrot.lane.b32.xlu1 %v4971_v54, %s5600_s22  ;;  %v1455_v54 = vrot.slane %v1454_v42, 4  ;;  %v1636_v60 = vor.u32 %v1635_v51, %v1632_v50 }
  0xcf   : > { %1288 = vrot.lane.b32.xlu0 %v4970_v59, %s5600_s22  ;;  %v1445_v59 = vrot.slane %v1444_v48, 4  ;;  %v1647_v1 = vrot.slane %v1646_v55, 4  ;;  %v2026_v12 = vrot.slane %v2024_v3, 4 }
  0xd0   : > { %v1046_v10 = vpop.permute.xlu1 %1045  ;;  %v1460_v0 = vsel %vm5663_vm2, %v1455_v54, %v1459_v47 }
  0xd1   : > { %1139 = vst.msk [vmem:[#allocation2 + $0xc] sm:$0xf] %vm1135_vm8, %v1046_v10  ;;  %v1044_v15 = vpop.permute.xlu0 %1043  ;;  %v1450_v5 = vsel %vm5663_vm2, %v1445_v59, %v6131_v23  ;;  %v5024_v10 = vld [vmem:[%s5652_s19 + $0xc] sm:$0xe]  ;;  %v2028_v22 = vsel %vm5807_vm6, %v2026_v12, %v2027_v13  ;;  %v2082_v23 = vrot.slane %v2080_v14, 4 }
  0xd2   : > { %1138 = vst.msk [vmem:[#allocation2 + $0x8] sm:$0xf] %vm1135_vm8, %v1044_v15  ;;  %1294 = vrot.lane.b32.xlu1 %v4973_v6, %s5600_s22  ;;  %v1637_v6 = vrot.slane %v1636_v60, 4  ;;  %v5072_v17 = vrot.slane %v5024_v10, 9  ;;  %v5124_v14 = vld [vmem:[%s5652_s19 + $0x28] sm:$0xf] }
  0xd3   : > { %1292 = vrot.lane.b32.xlu0 %v4972_v11, %s5600_s22  ;;  %v1652_v11 = vsel %vm5663_vm2, %v1647_v1, %v1651_v2  ;;  %v2084_v34 = vsel %vm5807_vm6, %v2082_v23, %v2083_v24  ;;  %v5088_v1 = vld [vmem:[%s5652_s19 + $0x18] sm:$0xf] }
  0xd4   : > { %v1050_v30 = vpop.permute.xlu1 %1049  ;;  %v1642_v16 = vsel %vm5663_vm2, %v1637_v6, %v1641_v43  ;;  %v2025_v28 = vsel %vm5807_vm6, %v5072_v17, %v2024_v3  ;;  %v5051_v43 = vld [vmem:[%s5652_s19 + $0x78] sm:$0xe]  ;;  %v5122_v6 = vld [vmem:[%s5652_s19 + $0x20] sm:$0x1] }
  0xd5   : > { %1141 = vst.msk [vmem:[#allocation2 + $0x14] sm:$0xf] %vm1135_vm8, %v1050_v30  ;;  %v1048_v36 = vpop.permute.xlu0 %1047  ;;  %v5029_v30 = vld [vmem:[%s5652_s19 + $0x20] sm:$0x1]  ;;  %v5081_v50 = vrot.slane %v5051_v43, 9 }
  0xd6   : > { %1140 = vst.msk [vmem:[#allocation2 + $0x10] sm:$0xf] %vm1135_vm8, %v1048_v36  ;;  %1298 = vrot.lane.b32.xlu1 %v4975_v19, %s5600_s22  ;;  %v5028_v19 = vld [vmem:[%s5652_s19 + $0x1c] sm:$0xf]  ;;  %v2034_v36 = vrot.slane %v5029_v30, 5  ;;  %v2546_v30 = vshrl.u32 %v5124_v14, 16 }
  0xd7   : > { %1296 = vrot.lane.b32.xlu0 %v4974_v31, %s5600_s22  ;;  %v2031_v25 = vrot.slane %v5028_v19, 5  ;;  %v5052_v31 = vld [vmem:[%s5652_s19 + $0x7c] sm:$0xf]  ;;  %v5144_v2 = vld [vmem:[%s5652_s19 + $0x78] sm:$0xf]  ;;  %v2528_v19 = vshll.u32 %v5122_v6, 16 }
  0xd8   : > { %v1054_v45 = vpop.permute.xlu1 %1053  ;;  %v2701_v12 = vshrl.u32 %v5144_v2, 16  ;;  %v2704_v13 = vshll.u32 %v5144_v2, 16  ;;  %v5149_v6 = vld [vmem:[%s5652_s19 + $0x8c] sm:$0x1] }
  0xd9   : > { %1143 = vst.msk [vmem:[#allocation2 + $0x1c] sm:$0xf] %vm1135_vm8, %v1054_v45  ;;  %v1052_v52 = vpop.permute.xlu0 %1051  ;;  %v2033_v35 = vrot.slane %v2031_v25, 4  ;;  %v2032_v49 = vsel %vm5807_vm6, %v5073_v40, %v2031_v25  ;;  %v2542_v25 = vshll.u32 %v5124_v14, 16  ;;  %v5107_v40 = vld [vmem:[%s5652_s19 + $0x88] sm:$0xf] }
  0xda   : > { %1142 = vst.msk [vmem:[#allocation2 + $0x18] sm:$0xf] %vm1135_vm8, %v1052_v52  ;;  %1799 = vrot.lane.b32.xlu1 %v1436_v37, %s5601_s23  ;;  %v2087_v37 = vrot.slane %v5052_v31, 5  ;;  %v5121_v52 = vld [vmem:[%s5652_s19 + $0x1c] sm:$0xf]  ;;  %v2706_v29 = vrot.slane %v2704_v13, 5 }
  0xdb   : > { %1797 = vrot.lane.b32.xlu0 %v1426_v41, %s5601_s23  ;;  %v5053_v41 = vld [vmem:[%s5652_s19 + $0x80] sm:$0x1]  ;;  %v2035_v44 = vsel %vm5807_vm6, %v2033_v35, %v2034_v36  ;;  %v5148_v35 = vld [vmem:[%s5652_s19 + $0x88] sm:$0xf]  ;;  %v2744_v13 = vshll.u32 %v5149_v6, 16 }
  0xdc   : > { %v1058_v57 = vpop.permute.xlu1 %1057  ;;  %v2089_v45 = vrot.slane %v2087_v37, 4  ;;  %v2090_v46 = vrot.slane %v5053_v41, 5  ;;  %v2088_v55 = vsel %vm5807_vm6, %v5081_v50, %v2087_v37  ;;  %v2530_v37 = vrot.slane %v2528_v19, 5 }
  0xdd   : > { %1145 = vst.msk [vmem:[#allocation2 + $0x24] sm:$0xf] %vm1135_vm8, %v1058_v57  ;;  %v1056_v63 = vpop.permute.xlu0 %1055  ;;  %v2518_v57 = vshll.u32 %v5121_v52, 16  ;;  %v2738_v50 = vshrl.u32 %v5148_v35, 16 }
  0xde   : > { %1144 = vst.msk [vmem:[#allocation2 + $0x20] sm:$0xf] %vm1135_vm8, %v1056_v63  ;;  %1831 = vrot.lane.b32.xlu1 %v1628_v53, %s5601_s23  ;;  %v2091_v47 = vsel %vm5807_vm6, %v2089_v45, %v2090_v46  ;;  %v5120_v53 = vld [vmem:[%s5652_s19 + $0x18] sm:$0xf]  ;;  %v5145_v63 = vld [vmem:[%s5652_s19 + $0x7c] sm:$0xf] }
  0xdf   : > { %1829 = vrot.lane.b32.xlu0 %v1618_v58, %s5601_s23  ;;  %v2522_v58 = vshrl.u32 %v5121_v52, 16  ;;  %v2509_v59 = vshrl.u32 %v5120_v53, 16  ;;  %v2512_v60 = vshll.u32 %v5120_v53, 16  ;;  %v2714_v10 = vshrl.u32 %v5145_v63, 16  ;;  %v5125_v46 = vld [vmem:[%s5652_s19 + $0x2c] sm:$0x1] }
  0xe0   : > { %v1062_v4 = vpop.permute.xlu1 %1061  ;;  %v5106_v52 = vld [vmem:[%s5652_s19 + $0x84] sm:$0xf] }
  0xe1   : > { %1147 = vst.msk [vmem:[#allocation2 + $0x2c] sm:$0xf] %vm1135_vm8, %v1062_v4  ;;  %v1060_v9 = vpop.permute.xlu0 %1059  ;;  %v6228_v4 = vrot.slane %v2518_v57, 5  ;;  %v2511_v7 = vrot.slane %v2509_v59, 4  ;;  %v2514_v8 = vrot.slane %v2512_v60, 5  ;;  %v2716_v24 = vrot.slane %v2714_v10, 4 }
  0xe2   : > { %1146 = vst.msk [vmem:[#allocation2 + $0x28] sm:$0xf] %vm1135_vm8, %v1060_v9  ;;  %1803 = vrot.lane.b32.xlu1 %v1460_v0, %s5601_s23  ;;  %v2710_v9 = vshll.u32 %v5145_v63, 16  ;;  %v2552_v60 = vshll.u32 %v5125_v46, 16 }
  0xe3   : > { %1801 = vrot.lane.b32.xlu0 %v1450_v5, %s5601_s23  ;;  %v2524_v5 = vrot.slane %v2522_v58, 4  ;;  %v2515_v21 = vor.u32 %v2514_v8, %v2511_v7 }
  0xe4   : > { %v1066_v15 = vpop.permute.xlu1 %1065  ;;  %v6243_v23 = vrot.slane %v2710_v9, 5  ;;  %v2554_v9 = vrot.slane %v2552_v60, 5  ;;  %v5006_v60 = vld [vmem:[%s5652_s19 + $0x84] sm:$0xf] }
  0xe5   : > { %1149 = vst.msk [vmem:[#allocation2 + $0x34] sm:$0xf] %vm1135_vm8, %v1066_v15  ;;  %v1064_v20 = vpop.permute.xlu0 %1063  ;;  %v2525_v18 = vor.u32 %v2524_v5, %v6228_v4 }
  0xe6   : > { %1148 = vst.msk [vmem:[#allocation2 + $0x30] sm:$0xf] %vm1135_vm8, %v1064_v20  ;;  %1835 = vrot.lane.b32.xlu1 %v1652_v11, %s5601_s23  ;;  %v5105_v11 = vld [vmem:[%s5652_s19 + $0x7c] sm:$0xf]  ;;  %v5123_v20 = vld [vmem:[%s5652_s19 + $0x24] sm:$0xf]  ;;  %v2717_v43 = vor.u32 %v2716_v24, %v6243_v23 }
  0xe7   : > { %1833 = vrot.lane.b32.xlu0 %v1642_v16, %s5601_s23  ;;  %v5104_v16 = vld [vmem:[%s5652_s19 + $0x78] sm:$0xf]  ;;  %v2533_v33 = vshrl.u32 %v5123_v20, 16  ;;  %v2526_v41 = vrot.slane %v2525_v18, 4  ;;  %v5169_v18 = vld [vmem:[%s5652_s19 + $0x1c] sm:$0xf] }
  0xe8   : > { %v1070_v26 = vpop.permute.xlu1 %1069  ;;  %v3119_v24 = vrot.slane %v5169_v18, 5 }
  0xe9   : > { %1151 = vst.msk [vmem:[#allocation2 + $0x3c] sm:$0xf] %vm1135_vm8, %v1070_v26  ;;  %v1068_v32 = vpop.permute.xlu0 %1067  ;;  %v5091_v26 = vld [vmem:[%s5652_s19 + $0x28] sm:$0xf]  ;;  %v2531_v57 = vsel %vm5663_vm2, %v2526_v41, %v2530_v37 }
  0xea   : > { %1150 = vst.msk [vmem:[#allocation2 + $0x38] sm:$0xf] %vm1135_vm8, %v1068_v32  ;;  %2136 = vrot.lane.b32.xlu1 %v2028_v22, %s5602_s24  ;;  %v5146_v22 = vld [vmem:[%s5652_s19 + $0x80] sm:$0x1]  ;;  %v5090_v32 = vld [vmem:[%s5652_s19 + $0x24] sm:$0xf] }
  0xeb   : > { %2134 = vrot.lane.b32.xlu0 %v2025_v28, %s5602_s24  ;;  %v2703_v28 = vrot.slane %v2701_v12, 4  ;;  %v3121_v37 = vrot.slane %v3119_v24, 4 }
  0xec   : > { %v1074_v38 = vpop.permute.xlu1 %1073 }
  0xed   : > { %1153 = vst.msk [vmem:[#allocation2 + $0x44] sm:$0xf] %vm1135_vm8, %v1074_v38  ;;  %v1072_v42 = vpop.permute.xlu0 %1071  ;;  %v2720_v38 = vshll.u32 %v5146_v22, 16  ;;  %v2707_v45 = vor.u32 %v2706_v29, %v2703_v28  ;;  %v2746_v22 = vrot.slane %v2744_v13, 5  ;;  %v6295_v29 = vld [vmem:[%s5652_s19 + $0x7c] sm:$0xf] }
  0xee   : > { %1152 = vst.msk [vmem:[#allocation2 + $0x40] sm:$0xf] %vm1135_vm8, %v1072_v42  ;;  %2168 = vrot.lane.b32.xlu1 %v2084_v34, %s5602_s24  ;;  %v2536_v34 = vshll.u32 %v5123_v20, 16  ;;  %v2516_v42 = vrot.slane %v2515_v21, 4 }
  0xef   : > { %2166 = vrot.lane.b32.xlu0 %v2081_v39, %s5602_s24  ;;  %v5147_v39 = vld [vmem:[%s5652_s19 + $0x84] sm:$0xf]  ;;  %v2722_v59 = vrot.slane %v2720_v38, 5  ;;  %v3175_v38 = vrot.slane %v6295_v29, 5 }
  0xf0   : > { %v1078_v48 = vpop.permute.xlu1 %1077  ;;  %v2538_v53 = vrot.slane %v2536_v34, 5  ;;  %v2521_v58 = vsel %vm5663_vm2, %v2516_v42, %v6228_v4  ;;  %v4983_v34 = vld [vmem:[%s5652_s19 + $0x28] sm:$0xf] }
  0xf1   : > { %1155 = vst.msk [vmem:[#allocation2 + $0x4c] sm:$0xf] %vm1135_vm8, %v1078_v48  ;;  %v1076_v51 = vpop.permute.xlu0 %1075  ;;  %v2548_v48 = vrot.slane %v2546_v30, 4 }
  0xf2   : > { %1154 = vst.msk [vmem:[#allocation2 + $0x48] sm:$0xf] %vm1135_vm8, %v1076_v51  ;;  %2140 = vrot.lane.b32.xlu1 %v2035_v44, %s5602_s24  ;;  %v6255_v44 = vrot.slane %v2542_v25, 5 }
  0xf3   : > { %2138 = vrot.lane.b32.xlu0 %v2032_v49, %s5602_s24  ;;  %v2734_v49 = vshll.u32 %v5148_v35, 16  ;;  %v4982_v35 = vld [vmem:[%s5652_s19 + $0x24] sm:$0xf] }
  0xf4   : > { %v1082_v54 = vpop.permute.xlu1 %1081  ;;  %v2549_v63 = vor.u32 %v2548_v48, %v6255_v44  ;;  %v6323_v48 = vld [vmem:[%s5652_s19 + $0x88] sm:$0xf] }
  0xf5   : > { %1157 = vst.msk [vmem:[#allocation2 + $0x54] sm:$0xf] %vm1135_vm8, %v1082_v54  ;;  %v1080_v56 = vpop.permute.xlu0 %1079  ;;  %v2725_v54 = vshrl.u32 %v5147_v39, 16 }
  0xf6   : > { %1156 = vst.msk [vmem:[#allocation2 + $0x50] sm:$0xf] %vm1135_vm8, %v1080_v56  ;;  %2172 = vrot.lane.b32.xlu1 %v2091_v47, %s5602_s24  ;;  %v2535_v47 = vrot.slane %v2533_v33, 4 }
  0xf7   : > { %2170 = vrot.lane.b32.xlu0 %v2088_v55, %s5602_s24  ;;  %v2728_v55 = vshll.u32 %v5147_v39, 16  ;;  %v2727_v7 = vrot.slane %v2725_v54, 4  ;;  %v5192_v39 = vld [vmem:[%s5652_s19 + $0x78] sm:$0xe]  ;;  %v5605_v54 = vmov 65535  }
  0xf8   : > { %v1086_v0 = vpop.permute.xlu1 %1085  ;;  %v2539_v5 = vor.u32 %v2538_v53, %v2535_v47  ;;  %v1465_v47 = vshll.u32 %v4982_v35, 16  ;;  %v5007_v53 = vld [vmem:[%s5652_s19 + $0x88] sm:$0xf] }
  0xf9   : > { %1159 = vst.msk [vmem:[#allocation2 + $0x5c] sm:$0xf] %vm1135_vm8, %v1086_v0  ;;  %v1084_v3 = vpop.permute.xlu0 %1083  ;;  %v6270_v0 = vrot.slane %v2734_v49, 5  ;;  %v2730_v8 = vrot.slane %v2728_v55, 5  ;;  %v1471_v49 = vshll.u32 %v4983_v34, 16  ;;  %v3543_v55 = vsel %vm3541_vm10, 4294967295, %v5605_v54 }
  0xfa   : > { %1158 = vst.msk [vmem:[#allocation2 + $0x58] sm:$0xf] %vm1135_vm8, %v1084_v3  ;;  %2333 = vrot.lane.b32.xlu1 %v5089_v61, %s5603_s25  ;;  %v2718_v61 = vrot.slane %v2717_v43, 4  ;;  %v2708_v3 = vrot.slane %v2707_v45, 4  ;;  %v5555_v45 = vld [vmem:[%s7340_s1 + $0x8] sm:$0x3f]  }
  0xfb   : > { %2331 = vrot.lane.b32.xlu0 %v5088_v1, %s5603_s25  ;;  %v2740_v1 = vrot.slane %v2738_v50, 4  ;;  %v1475_v50 = vshrl.u32 %v4983_v34, 16  ;;  %v1467_v13 = vrot.slane %v1465_v47, 5  ;;  %v5009_v47 = vld [vmem:[%s5652_s19 + $0x90] sm:$0xf] }
  0xfc   : > { %v1090_v15 = vpop.permute.xlu1 %1089  ;;  %v2723_v10 = vsel %vm5663_vm2, %v2718_v61, %v2722_v59  ;;  %v6337_v59 = vld [vmem:[%s5652_s19 + $0x24] sm:$0xe]  ;;  %v3544_v61 = vsel %vm3542_vm11, %v3543_v55, 0 }
  0xfd   : > { %1161 = vst.msk [vmem:[#allocation2 + $0x64] sm:$0xf] %vm1135_vm8, %v1090_v15  ;;  %v1088_v17 = vpop.permute.xlu0 %1087  ;;  %v2741_v12 = vor.u32 %v2740_v1, %v6270_v0  ;;  %v2713_v15 = vsel %vm5663_vm2, %v2708_v3, %v6243_v23  ;;  %v5170_v23 = vld [vmem:[%s5652_s19 + $0x20] sm:$0x1]  ;;  %v5224_v1 = vrot.slane %v5192_v39, 9  ;;  %v3182_v3 = vrot.slane %v6323_v48, 5 }
  0xfe   : > { %1160 = vst.msk [vmem:[#allocation2 + $0x60] sm:$0xf] %vm1135_vm8, %v1088_v17  ;;  %2365 = vrot.lane.b32.xlu1 %v5105_v11, %s5603_s25  ;;  %v2550_v11 = vrot.slane %v2549_v63, 4  ;;  %v2731_v17 = vor.u32 %v2730_v8, %v2727_v7  ;;  %v3122_v33 = vrot.slane %v5170_v23, 5  ;;  %v3546_v6 = vand.u32 %v5555_v45, %v3544_v61  ;;  %v4987_v61 = vld [vmem:[%s5652_s19 + $0x38] sm:$0x1] }
  0xff   : > { %2363 = vrot.lane.b32.xlu0 %v5104_v16, %s5603_s25  ;;  %v2540_v16 = vrot.slane %v2539_v5, 4  ;;  %v2742_v21 = vrot.slane %v2741_v12, 4  ;;  %v5195_v5 = vld [vmem:[%s5652_s19 + $0x84] sm:$0xe]  ;;  %v6349_v8 = vrot.slane %v1471_v49, 5  ;;  %v3184_v23 = vrot.slane %v3182_v3, 4 }
 0x100   : > { %v1094_v31 = vpop.permute.xlu1 %1093  ;;  %v2555_v20 = vsel %vm5663_vm2, %v2550_v11, %v2554_v9  ;;  %v2732_v28 = vrot.slane %v2731_v17, 4  ;;  %v5557_v11 = vld [vmem:[%s7340_s1] sm:$0xff]   ;;  %v4984_v12 = vld [vmem:[%s5652_s19 + $0x2c] sm:$0x1]  ;;  %5480 = vmatprep.subr.bf16.mxu0 %v3546_v6  ;;  %5516 = vmatprep.subr.bf16.mxu1 %v3546_v6 }
 0x101   : > { %1163 = vst.msk [vmem:[#allocation2 + $0x6c] sm:$0xf] %vm1135_vm8, %v1094_v31  ;;  %v1092_v36 = vpop.permute.xlu0 %1091  ;;  %v5168_v31 = vld [vmem:[%s5652_s19 + $0x18] sm:$0xe]  ;;  %5481 = vmatpush3.bf16.msra.mxu0 %v3546_v6  ;;  %5518 = vmatpush3.bf16.msra.mxu1 %v3546_v6 }
 0x102   : > { %1162 = vst.msk [vmem:[#allocation2 + $0x68] sm:$0xf] %vm1135_vm8, %v1092_v36  ;;  %2337 = vrot.lane.b32.xlu1 %v5091_v26, %s5603_s25  ;;  %v2545_v26 = vsel %vm5663_vm2, %v2540_v16, %v6255_v44  ;;  %v2747_v36 = vsel %vm5663_vm2, %v2742_v21, %v2746_v22  ;;  %v2737_v42 = vsel %vm5663_vm2, %v2732_v28, %v6270_v0  ;;  %v5216_v43 = vrot.slane %v5168_v31, 9 }
 0x103   : > { %2335 = vrot.lane.b32.xlu0 %v5090_v32, %s5603_s25  ;;  %v6300_v32 = vld [vmem:[%s5652_s19 + $0x80] sm:$0x1]  ;;  %v1657_v16 = vshll.u32 %v5006_v60, 16  ;;  %v3176_v21 = vsel %vm5807_vm6, %v5224_v1, %v3175_v38  ;;  %v5217_v22 = vrot.slane %v6337_v59, 9  ;;  %5482 = vmatprep.subr.bf16.mxu0 %v5557_v11  ;;  %v5225_v28 = vrot.slane %v5195_v5, 9 }
 0x104   : > { %v1098_v51 = vpop.permute.xlu1 %1097  ;;  %v3178_v44 = vrot.slane %v6300_v32, 5  ;;  %v3120_v0 = vsel %vm5807_vm6, %v5216_v43, %v3119_v24  ;;  %v4985_v32 = vld [vmem:[%s5652_s19 + $0x30] sm:$0xf]  ;;  %5517 = vmatprep.subr.bf16.mxu1 %v5557_v11  ;;  %v1678_v1 = vshrl.u32 %v5009_v47, 16 }
 0x105   : > { %1165 = vst.msk [vmem:[#allocation2 + $0x74] sm:$0xf] %vm1135_vm8, %v1098_v51  ;;  %v1096_v56 = vpop.permute.xlu0 %1095  ;;  %v1462_v51 = vshrl.u32 %v4982_v35, 16  ;;  %5483 = vmatpush3.bf16.msra.mxu0 %v5557_v11  ;;  %v1489_v45 = vshll.u32 %v4985_v32, 16  ;;  %5519 = vmatpush3.bf16.msra.mxu1 %v5557_v11 }
 0x106   : > { %1164 = vst.msk [vmem:[#allocation2 + $0x70] sm:$0xf] %vm1135_vm8, %v1096_v56  ;;  %2369 = vrot.lane.b32.xlu1 %v5107_v40, %s5603_s25  ;;  %v6312_v40 = vld [vmem:[%s5652_s19 + $0x28] sm:$0xf]  ;;  %v3123_v56 = vsel %vm5807_vm6, %v3121_v37, %v3122_v33 }
 0x107   : > { %2367 = vrot.lane.b32.xlu0 %v5106_v52, %s5603_s25  ;;  %v6328_v52 = vld [vmem:[%s5652_s19 + $0x2c] sm:$0x1]  ;;  %v1464_v9 = vrot.slane %v1462_v51, 4 }
 0x108   : > { %v1102_v2 = vpop.permute.xlu1 %1101 }
 0x109   : > { %1167 = vst.msk [vmem:[#allocation2 + $0x7c] sm:$0xf] %vm1135_vm8, %v1102_v2  ;;  %v1100_v4 = vpop.permute.xlu0 %1099  ;;  %v6344_v2 = vld [vmem:[%s5652_s19 + $0x8c] sm:$0x1]  ;;  %v1468_v33 = vor.u32 %v1467_v13, %v1464_v9 }
 0x10a   : > { %1166 = vst.msk [vmem:[#allocation2 + $0x78] sm:$0xf] %vm1135_vm8, %v1100_v4  ;;  %2894 = vrot.lane.b32.xlu1 %v2531_v57, %s5604_s26  ;;  %v3177_v57 = vrot.slane %v3175_v38, 4  ;;  %v1477_v4 = vrot.slane %v1475_v50, 4  ;;  %v3185_v24 = vrot.slane %v6344_v2, 5  ;;  %v3183_v50 = vsel %vm5807_vm6, %v5225_v28, %v3182_v3 }
 0x10b   : > { %2892 = vrot.lane.b32.xlu0 %v2521_v58, %s5604_s26  ;;  %v3126_v58 = vrot.slane %v6312_v40, 5  ;;  %v5008_v38 = vld [vmem:[%s5652_s19 + $0x8c] sm:$0x1]  ;;  %v1469_v40 = vrot.slane %v1468_v33, 4  ;;  %v1681_v2 = vshll.u32 %v5009_v47, 16  ;;  %vm4704_vm8 = vcmask 1047559  }
 0x10c   : > { %v1239_v14 = vpop.permute.xlu1 %1238  ;;  %v3179_v17 = vsel %vm5807_vm6, %v3177_v57, %v3178_v44  ;;  %v1478_v29 = vor.u32 %v1477_v4, %v6349_v8  ;;  %v1486_v44 = vshrl.u32 %v4985_v32, 16  ;;  %v3186_v49 = vsel %vm5807_vm6, %v3184_v23, %v3185_v24 }
 0x10d   : > { %1334 = vst.msk [vmem:[#allocation2 + $0x4] sm:$0xf] %vm1332_vm9, %v1239_v14  ;;  %v1237_v19 = vpop.permute.xlu0 %1236  ;;  %v1667_v14 = vshrl.u32 %v5007_v53, 16  ;;  %v3128_v18 = vrot.slane %v3126_v58, 4  ;;  %v3127_v43 = vsel %vm5807_vm6, %v5217_v22, %v3126_v58  ;;  %v1673_v54 = vshll.u32 %v5008_v38, 16 }
 0x10e   : > { %1333 = vst.msk [vmem:[#allocation2] sm:$0xf] %vm1332_vm9, %v1237_v19  ;;  %2926 = vrot.lane.b32.xlu1 %v2723_v10, %s5604_s26  ;;  %v1663_v10 = vshll.u32 %v5007_v53, 16  ;;  %v3129_v19 = vrot.slane %v6328_v52, 5  ;;  %v1479_v51 = vrot.slane %v1478_v29, 4  ;;  %v1474_v6 = vsel %vm5663_vm2, %v1469_v40, %v6349_v8 }
 0x10f   : > { %2924 = vrot.lane.b32.xlu0 %v2713_v15, %s5604_s26  ;;  %v1654_v15 = vshrl.u32 %v5006_v60, 16  ;;  %v1669_v34 = vrot.slane %v1667_v14, 4  ;;  %v1675_v4 = vrot.slane %v1673_v54, 5  ;;  %v5031_v29 = vld [vmem:[%s5652_s19 + $0x28] sm:$0xf] }
 0x110   : > { %v1243_v25 = vpop.permute.xlu1 %1242  ;;  %v6370_v31 = vrot.slane %v1663_v10, 5  ;;  %v3130_v37 = vsel %vm5807_vm6, %v3128_v18, %v3129_v19  ;;  %v1505_v10 = vshll.u32 %v4987_v61, 16  ;;  %v1683_v18 = vrot.slane %v1681_v2, 5  ;;  %v5032_v38 = vld [vmem:[%s5652_s19 + $0x2c] sm:$0x1] }
 0x111   : > { %1336 = vst.msk [vmem:[#allocation2 + $0xc] sm:$0xf] %vm1332_vm9, %v1243_v25  ;;  %v1241_v30 = vpop.permute.xlu0 %1240  ;;  %v4986_v25 = vld [vmem:[%s5652_s19 + $0x34] sm:$0xf]  ;;  %v1656_v35 = vrot.slane %v1654_v15, 4 }
 0x112   : > { %1335 = vst.msk [vmem:[#allocation2 + $0x8] sm:$0xf] %vm1332_vm9, %v1241_v30  ;;  %2898 = vrot.lane.b32.xlu1 %v2555_v20, %s5604_s26  ;;  %v1481_v30 = vshll.u32 %v4984_v12, 16  ;;  %v1495_v39 = vshll.u32 %v4986_v25, 16  ;;  %v1670_v53 = vor.u32 %v1669_v34, %v6370_v31  ;;  %v2038_v34 = vrot.slane %v5031_v29, 5 }
 0x113   : > { %2896 = vrot.lane.b32.xlu0 %v2545_v26, %s5604_s26  ;;  %v5054_v40 = vld [vmem:[%s5652_s19 + $0x84] sm:$0xe]  ;;  %v5058_v61 = vld [vmem:[%s5652_s19 + $0x94] sm:$0xf] }
 0x114   : > { %v1247_v41 = vpop.permute.xlu1 %1246  ;;  %v1483_v52 = vrot.slane %v1481_v30, 5  ;;  %v5093_v29 = vld [vmem:[%s5652_s19 + $0x34] sm:$0xf] }
 0x115   : > { %1338 = vst.msk [vmem:[#allocation2 + $0x14] sm:$0xf] %vm1332_vm9, %v1247_v41  ;;  %v1245_v46 = vpop.permute.xlu0 %1244  ;;  %v1499_v41 = vshrl.u32 %v4986_v25, 16 }
 0x116   : > { %1337 = vst.msk [vmem:[#allocation2 + $0x10] sm:$0xf] %vm1332_vm9, %v1245_v46  ;;  %2930 = vrot.lane.b32.xlu1 %v2747_v36, %s5604_s26  ;;  %v1659_v36 = vrot.slane %v1657_v16, 5  ;;  %v5010_v46 = vld [vmem:[%s5652_s19 + $0x94] sm:$0xf]  ;;  %v1484_v5 = vsel %vm5663_vm2, %v1479_v51, %v1483_v52 }
 0x117   : > { %2928 = vrot.lane.b32.xlu0 %v2737_v42, %s5604_s26  ;;  %v1501_v57 = vrot.slane %v1499_v41, 4  ;;  %v1687_v58 = vshll.u32 %v5010_v46, 16  ;;  %v1691_v59 = vshrl.u32 %v5010_v46, 16  ;;  %v5011_v16 = vld [vmem:[%s5652_s19 + $0x98] sm:$0x1] }
 0x118   : > { %v1251_v63 = vpop.permute.xlu1 %1250  ;;  %v1660_v55 = vor.u32 %v1659_v36, %v1656_v35  ;;  %v1697_v23 = vshll.u32 %v5011_v16, 16  ;;  %v5056_v51 = vld [vmem:[%s5652_s19 + $0x8c] sm:$0x1]  ;;  %v5034_v52 = vld [vmem:[%s5652_s19 + $0x34] sm:$0xf] }
 0x119   : > { %1340 = vst.msk [vmem:[#allocation2 + $0x1c] sm:$0xf] %vm1332_vm9, %v1251_v63  ;;  %v1249_v7 = vpop.permute.xlu0 %1248  ;;  %v1488_v63 = vrot.slane %v1486_v44, 4  ;;  %v1689_v11 = vrot.slane %v1687_v58, 5  ;;  %v1693_v12 = vrot.slane %v1691_v59, 4  ;;  %v2040_v44 = vrot.slane %v2038_v34, 4 }
 0x11a   : > { %1339 = vst.msk [vmem:[#allocation2 + $0x18] sm:$0xf] %vm1332_vm9, %v1249_v7  ;;  %3231 = vrot.lane.b32.xlu1 %v3123_v56, %s5606_s4  ;;  %v6394_v56 = vrot.slane %v1495_v39, 5  ;;  %v1671_v7 = vrot.slane %v1670_v53, 4  ;;  %v1661_v14 = vrot.slane %v1660_v55, 4  ;;  %v2097_v55 = vrot.slane %v5056_v51, 5 }
 0x11b   : > { %3229 = vrot.lane.b32.xlu0 %v3120_v0, %s5606_s4  ;;  %v1491_v0 = vrot.slane %v1489_v45, 5  ;;  %v1694_v22 = vor.u32 %v1693_v12, %v1689_v11  ;;  %v5055_v39 = vld [vmem:[%s5652_s19 + $0x88] sm:$0xf]  ;;  %v2041_v45 = vrot.slane %v5032_v38, 5  ;;  %v5082_v59 = vrot.slane %v5054_v40, 9 }
 0x11c   : > { %v1255_v20 = vpop.permute.xlu1 %1254  ;;  %v1502_v9 = vor.u32 %v1501_v57, %v6394_v56  ;;  %v1676_v8 = vsel %vm5663_vm2, %v1671_v7, %v1675_v4  ;;  %v1666_v25 = vsel %vm5663_vm2, %v1661_v14, %v6370_v31  ;;  %v1699_v31 = vrot.slane %v1697_v23, 5  ;;  %v5129_v40 = vld [vmem:[%s5652_s19 + $0x3c] sm:$0xf] }
 0x11d   : > { %1342 = vst.msk [vmem:[#allocation2 + $0x24] sm:$0xf] %vm1332_vm9, %v1255_v20  ;;  %v1253_v26 = vpop.permute.xlu0 %1252  ;;  %v1492_v15 = vor.u32 %v1491_v0, %v1488_v63  ;;  %v1695_v33 = vrot.slane %v1694_v22, 4  ;;  %v2094_v46 = vrot.slane %v5055_v39, 5  ;;  %v2042_v53 = vsel %vm5807_vm6, %v2040_v44, %v2041_v45  ;;  %v5033_v0 = vld [vmem:[%s5652_s19 + $0x30] sm:$0xe] }
 0x11e   : > { %1341 = vst.msk [vmem:[#allocation2 + $0x20] sm:$0xf] %vm1332_vm9, %v1253_v26  ;;  %3263 = vrot.lane.b32.xlu1 %v3179_v17, %s5606_s4  ;;  %v1680_v17 = vrot.slane %v1678_v1, 4  ;;  %v1503_v20 = vrot.slane %v1502_v9, 4  ;;  %v5075_v4 = vrot.slane %v5033_v0, 9  ;;  %v2581_v0 = vshrl.u32 %v5129_v40, 16 }
 0x11f   : > { %3261 = vrot.lane.b32.xlu0 %v3176_v21, %s5606_s4  ;;  %v1507_v21 = vrot.slane %v1505_v10, 5  ;;  %v1493_v26 = vrot.slane %v1492_v15, 4  ;;  %v2096_v54 = vrot.slane %v2094_v46, 4  ;;  %v2095_v7 = vsel %vm5807_vm6, %v5082_v59, %v2094_v46  ;;  %v5059_v9 = vld [vmem:[%s5652_s19 + $0x98] sm:$0x1] }
 0x120   : > { %v1259_v42 = vpop.permute.xlu1 %1258  ;;  %v1684_v28 = vor.u32 %v1683_v18, %v1680_v17  ;;  %v2104_v14 = vrot.slane %v5059_v9, 5  ;;  %v5128_v39 = vld [vmem:[%s5652_s19 + $0x38] sm:$0x1]  ;;  %v5109_v45 = vld [vmem:[%s5652_s19 + $0x94] sm:$0xf] }
 0x121   : > { %1344 = vst.msk [vmem:[#allocation2 + $0x2c] sm:$0xf] %vm1332_vm9, %v1259_v42  ;;  %v1257_v48 = vpop.permute.xlu0 %1256  ;;  %v1508_v32 = vsel %vm5663_vm2, %v1503_v20, %v1507_v21  ;;  %v1498_v36 = vsel %vm5663_vm2, %v1493_v26, %v6394_v56  ;;  %v5030_v42 = vld [vmem:[%s5652_s19 + $0x24] sm:$0xe]  ;;  %v2045_v56 = vrot.slane %v5034_v52, 5  ;;  %v2098_v1 = vsel %vm5807_vm6, %v2096_v54, %v2097_v55 }
 0x122   : > { %1343 = vst.msk [vmem:[#allocation2 + $0x28] sm:$0xf] %vm1332_vm9, %v1257_v48  ;;  %3235 = vrot.lane.b32.xlu1 %v3130_v37, %s5606_s4  ;;  %v1685_v37 = vrot.slane %v1684_v28, 4  ;;  %v2576_v52 = vshll.u32 %v5128_v39, 16 }
 0x123   : > { %3233 = vrot.lane.b32.xlu0 %v3127_v43, %s5606_s4  ;;  %v1700_v43 = vsel %vm5663_vm2, %v1695_v33, %v1699_v31  ;;  %v2047_v2 = vrot.slane %v2045_v56, 4  ;;  %v2046_v16 = vsel %vm5807_vm6, %v5075_v4, %v2045_v56  ;;  %v5092_v31 = vld [vmem:[%s5652_s19 + $0x30] sm:$0xf]  ;;  %v5111_v4 = vld [vmem:[%s5652_s19 + $0xa0] sm:$0xf] }
 0x124   : > { %v1263_v60 = vpop.permute.xlu1 %1262 }
 0x125   : > { %1346 = vst.msk [vmem:[#allocation2 + $0x34] sm:$0xf] %vm1332_vm9, %v1263_v60  ;;  %v1261_v3 = vpop.permute.xlu0 %1260  ;;  %v5035_v60 = vld [vmem:[%s5652_s19 + $0x38] sm:$0x1] }
 0x126   : > { %1345 = vst.msk [vmem:[#allocation2 + $0x30] sm:$0xf] %vm1332_vm9, %v1261_v3  ;;  %3267 = vrot.lane.b32.xlu1 %v3186_v49, %s5606_s4  ;;  %v1690_v49 = vsel %vm5663_vm2, %v1685_v37, %v1689_v11  ;;  %v2048_v3 = vrot.slane %v5035_v60, 5  ;;  %v5057_v11 = vld [vmem:[%s5652_s19 + $0x90] sm:$0xe] }
 0x127   : > { %3265 = vrot.lane.b32.xlu0 %v3183_v50, %s5606_s4  ;;  %v5074_v50 = vrot.slane %v5030_v42, 9  ;;  %v5083_v17 = vrot.slane %v5057_v11, 9 }
 0x128   : > { %v1267_v13 = vpop.permute.xlu1 %1266  ;;  %v2049_v12 = vsel %vm5807_vm6, %v2047_v2, %v2048_v3  ;;  %v5154_v2 = vld [vmem:[%s5652_s19 + $0xa0] sm:$0xf] }
 0x129   : > { %1348 = vst.msk [vmem:[#allocation2 + $0x3c] sm:$0xf] %vm1332_vm9, %v1267_v13  ;;  %v1265_v19 = vpop.permute.xlu0 %1264  ;;  %v2039_v58 = vsel %vm5807_vm6, %v5074_v50, %v2038_v34 }
 0x12a   : > { %1347 = vst.msk [vmem:[#allocation2 + $0x38] sm:$0xf] %vm1332_vm9, %v1265_v19  ;;  %1807 = vrot.lane.b32.xlu1 %v1484_v5, %s5601_s23  ;;  %v2101_v5 = vrot.slane %v5058_v61, 5  ;;  %v5127_v19 = vld [vmem:[%s5652_s19 + $0x34] sm:$0xf] }
 0x12b   : > { %1805 = vrot.lane.b32.xlu0 %v1474_v6, %s5601_s23 }
 0x12c   : > { %v1271_v24 = vpop.permute.xlu1 %1270  ;;  %v2103_v13 = vrot.slane %v2101_v5, 4  ;;  %v2102_v22 = vsel %vm5807_vm6, %v5083_v17, %v2101_v5  ;;  %v2786_v17 = vshrl.u32 %v5154_v2, 16 }
 0x12d   : > { %1350 = vst.msk [vmem:[#allocation2 + $0x44] sm:$0xf] %vm1332_vm9, %v1271_v24  ;;  %v1269_v30 = vpop.permute.xlu0 %1268  ;;  %v2566_v24 = vshll.u32 %v5127_v19, 16 }
 0x12e   : > { %1349 = vst.msk [vmem:[#allocation2 + $0x40] sm:$0xf] %vm1332_vm9, %v1269_v30  ;;  %1839 = vrot.lane.b32.xlu1 %v1676_v8, %s5601_s23  ;;  %v5126_v8 = vld [vmem:[%s5652_s19 + $0x30] sm:$0xf]  ;;  %v2105_v20 = vsel %vm5807_vm6, %v2103_v13, %v2104_v14  ;;  %v5151_v30 = vld [vmem:[%s5652_s19 + $0x94] sm:$0xf] }
 0x12f   : > { %1837 = vrot.lane.b32.xlu0 %v1666_v25, %s5601_s23  ;;  %v2570_v25 = vshrl.u32 %v5127_v19, 16  ;;  %v2557_v26 = vshrl.u32 %v5126_v8, 16  ;;  %v2560_v28 = vshll.u32 %v5126_v8, 16  ;;  %v2762_v42 = vshrl.u32 %v5151_v30, 16  ;;  %v5110_v13 = vld [vmem:[%s5652_s19 + $0x9c] sm:$0xf] }
 0x130   : > { %v1275_v35 = vpop.permute.xlu1 %1274  ;;  %v5131_v19 = vld [vmem:[%s5652_s19 + $0x44] sm:$0x1]  ;;  %v2583_v8 = vrot.slane %v2581_v0, 4  ;;  %v4989_v0 = vld [vmem:[%s5652_s19 + $0x40] sm:$0xf] }
 0x131   : > { %1352 = vst.msk [vmem:[#allocation2 + $0x4c] sm:$0xf] %vm1332_vm9, %v1275_v35  ;;  %v1273_v41 = vpop.permute.xlu0 %1272  ;;  %v6489_v35 = vrot.slane %v2566_v24, 5  ;;  %v2559_v37 = vrot.slane %v2557_v26, 4  ;;  %v2562_v38 = vrot.slane %v2560_v28, 5  ;;  %v2764_v54 = vrot.slane %v2762_v42, 4 }
 0x132   : > { %1351 = vst.msk [vmem:[#allocation2 + $0x48] sm:$0xf] %vm1332_vm9, %v1273_v41  ;;  %1811 = vrot.lane.b32.xlu1 %v1508_v32, %s5601_s23  ;;  %v5150_v32 = vld [vmem:[%s5652_s19 + $0x90] sm:$0xf]  ;;  %v2758_v41 = vshll.u32 %v5151_v30, 16  ;;  %v2600_v30 = vshll.u32 %v5131_v19, 16 }
 0x133   : > { %1809 = vrot.lane.b32.xlu0 %v1498_v36, %s5601_s23  ;;  %v2572_v36 = vrot.slane %v2570_v25, 4  ;;  %v2752_v44 = vshll.u32 %v5150_v32, 16 }
 0x134   : > { %v1279_v48 = vpop.permute.xlu1 %1278 }
 0x135   : > { %1354 = vst.msk [vmem:[#allocation2 + $0x54] sm:$0xf] %vm1332_vm9, %v1279_v48  ;;  %v1277_v47 = vpop.permute.xlu0 %1276  ;;  %v5108_v48 = vld [vmem:[%s5652_s19 + $0x90] sm:$0xf]  ;;  %v2573_v51 = vor.u32 %v2572_v36, %v6489_v35  ;;  %v2754_v56 = vrot.slane %v2752_v44, 5 }
 0x136   : > { %1353 = vst.msk [vmem:[#allocation2 + $0x50] sm:$0xf] %vm1332_vm9, %v1277_v47  ;;  %1843 = vrot.lane.b32.xlu1 %v1700_v43, %s5601_s23  ;;  %v2749_v43 = vshrl.u32 %v5150_v32, 16  ;;  %v2563_v47 = vor.u32 %v2562_v38, %v2559_v37  ;;  %v5155_v37 = vld [vmem:[%s5652_s19 + $0xa4] sm:$0x1] }
 0x137   : > { %1841 = vrot.lane.b32.xlu0 %v1690_v49, %s5601_s23  ;;  %v5130_v49 = vld [vmem:[%s5652_s19 + $0x40] sm:$0xf]  ;;  %v2574_v5 = vrot.slane %v2573_v51, 4  ;;  %v5175_v51 = vld [vmem:[%s5652_s19 + $0x34] sm:$0xf] }
 0x138   : > { %v1283_v57 = vpop.permute.xlu1 %1282  ;;  %v2751_v55 = vrot.slane %v2749_v43, 4  ;;  %v2590_v59 = vshll.u32 %v5130_v49, 16  ;;  %v2594_v60 = vshrl.u32 %v5130_v49, 16  ;;  %v2564_v9 = vrot.slane %v2563_v47, 4 }
 0x139   : > { %1356 = vst.msk [vmem:[#allocation2 + $0x5c] sm:$0xf] %vm1332_vm9, %v1283_v57  ;;  %v1281_v63 = vpop.permute.xlu0 %1280  ;;  %v5095_v57 = vld [vmem:[%s5652_s19 + $0x40] sm:$0xf]  ;;  %v2602_v43 = vrot.slane %v2600_v30, 5 }
 0x13a   : > { %1355 = vst.msk [vmem:[#allocation2 + $0x58] sm:$0xf] %vm1332_vm9, %v1281_v63  ;;  %2144 = vrot.lane.b32.xlu1 %v2042_v53, %s5602_s24  ;;  %v6503_v53 = vrot.slane %v2758_v41, 5  ;;  %v5094_v63 = vld [vmem:[%s5652_s19 + $0x3c] sm:$0xf]  ;;  %v6518_v14 = vrot.slane %v2590_v59, 5  ;;  %v2569_v25 = vsel %vm5663_vm2, %v2564_v9, %v6489_v35 }
 0x13b   : > { %2142 = vrot.lane.b32.xlu0 %v2039_v58, %s5602_s24  ;;  %v5152_v58 = vld [vmem:[%s5652_s19 + $0x98] sm:$0x1] }
 0x13c   : > { %v1287_v6 = vpop.permute.xlu1 %1286  ;;  %v2768_v11 = vshll.u32 %v5152_v58, 16  ;;  %v5176_v59 = vld [vmem:[%s5652_s19 + $0x38] sm:$0x1] }
 0x13d   : > { %1358 = vst.msk [vmem:[#allocation2 + $0x64] sm:$0xf] %vm1332_vm9, %v1287_v6  ;;  %v1285_v10 = vpop.permute.xlu0 %1284  ;;  %v2578_v6 = vrot.slane %v2576_v52, 5 }
 0x13e   : > { %1357 = vst.msk [vmem:[#allocation2 + $0x60] sm:$0xf] %vm1332_vm9, %v1285_v10  ;;  %2176 = vrot.lane.b32.xlu1 %v2098_v1, %s5602_s24  ;;  %v2584_v1 = vshll.u32 %v5129_v40, 16  ;;  %v2765_v10 = vor.u32 %v2764_v54, %v6503_v53  ;;  %v2770_v28 = vrot.slane %v2768_v11, 5  ;;  %v3133_v54 = vrot.slane %v5175_v51, 5 }
 0x13f   : > { %2174 = vrot.lane.b32.xlu0 %v2095_v7, %s5602_s24  ;;  %v5153_v7 = vld [vmem:[%s5652_s19 + $0x9c] sm:$0xf]  ;;  %v2579_v24 = vsel %vm5663_vm2, %v2574_v5, %v2578_v6  ;;  %v3136_v5 = vrot.slane %v5176_v59, 5  ;;  %v5200_v6 = vld [vmem:[%s5652_s19 + $0x98] sm:$0x1] }
 0x140   : > { %v1291_v15 = vpop.permute.xlu1 %1290  ;;  %v2766_v26 = vrot.slane %v2765_v10, 4  ;;  %v5198_v11 = vld [vmem:[%s5652_s19 + $0x90] sm:$0xe]  ;;  %v3192_v19 = vrot.slane %v5200_v6, 5 }
 0x141   : > { %1360 = vst.msk [vmem:[#allocation2 + $0x6c] sm:$0xf] %vm1332_vm9, %v1291_v15  ;;  %v1289_v18 = vpop.permute.xlu0 %1288  ;;  %v2596_v15 = vrot.slane %v2594_v60, 4 }
 0x142   : > { %1359 = vst.msk [vmem:[#allocation2 + $0x68] sm:$0xf] %vm1332_vm9, %v1289_v18  ;;  %2148 = vrot.lane.b32.xlu1 %v2049_v12, %s5602_s24  ;;  %v2755_v12 = vor.u32 %v2754_v56, %v2751_v55  ;;  %v2771_v41 = vsel %vm5663_vm2, %v2766_v26, %v2770_v28  ;;  %v6552_v55 = vld [vmem:[%s5652_s19 + $0x94] sm:$0xf]  ;;  %v5226_v26 = vrot.slane %v5198_v11, 9 }
 0x143   : > { %2146 = vrot.lane.b32.xlu0 %v2046_v16, %s5602_s24  ;;  %v2782_v16 = vshll.u32 %v5154_v2, 16  ;;  %v5177_v28 = vld [vmem:[%s5652_s19 + $0x3c] sm:$0xe] }
 0x144   : > { %v1295_v21 = vpop.permute.xlu1 %1294 }
 0x145   : > { %1362 = vst.msk [vmem:[#allocation2 + $0x74] sm:$0xf] %vm1332_vm9, %v1295_v21  ;;  %v1293_v23 = vpop.permute.xlu0 %1292  ;;  %v2773_v21 = vshrl.u32 %v5153_v7, 16  ;;  %v6531_v32 = vrot.slane %v2782_v16, 5 }
 0x146   : > { %1361 = vst.msk [vmem:[#allocation2 + $0x70] sm:$0xf] %vm1332_vm9, %v1293_v23  ;;  %2180 = vrot.lane.b32.xlu1 %v2105_v20, %s5602_s24  ;;  %v2586_v20 = vrot.slane %v2584_v1, 5  ;;  %v4988_v1 = vld [vmem:[%s5652_s19 + $0x3c] sm:$0xf] }
 0x147   : > { %2178 = vrot.lane.b32.xlu0 %v2102_v22, %s5602_s24  ;;  %v2776_v22 = vshll.u32 %v5153_v7, 16  ;;  %v2775_v38 = vrot.slane %v2773_v21, 4  ;;  %v6570_v7 = vld [vmem:[%s5652_s19 + $0x40] sm:$0xf]  ;;  %v1510_v16 = vshrl.u32 %v4988_v1, 16 }
 0x148   : > { %v1299_v33 = vpop.permute.xlu1 %1298  ;;  %v2587_v36 = vor.u32 %v2586_v20, %v2583_v8  ;;  %v3140_v8 = vrot.slane %v6570_v7, 5  ;;  %v5179_v21 = vld [vmem:[%s5652_s19 + $0x44] sm:$0x1]  ;;  %v5016_v7 = vld [vmem:[%s5652_s19 + $0xac] sm:$0xf] }
 0x149   : > { %1364 = vst.msk [vmem:[#allocation2 + $0x7c] sm:$0xf] %vm1332_vm9, %v1299_v33  ;;  %v1297_v34 = vpop.permute.xlu0 %1296  ;;  %v2788_v33 = vrot.slane %v2786_v17, 4  ;;  %v2778_v39 = vrot.slane %v2776_v22, 5  ;;  %v1513_v17 = vshll.u32 %v4988_v1, 16 }
 0x14a   : > { %1363 = vst.msk [vmem:[#allocation2 + $0x78] sm:$0xf] %vm1332_vm9, %v1297_v34  ;;  %2341 = vrot.lane.b32.xlu1 %v5093_v29, %s5603_s25  ;;  %v2597_v29 = vor.u32 %v2596_v15, %v6518_v14  ;;  %v2756_v34 = vrot.slane %v2755_v12, 4  ;;  %v2588_v49 = vrot.slane %v2587_v36, 4  ;;  %v1523_v15 = vshrl.u32 %v4989_v0, 16 }
 0x14b   : > { %2339 = vrot.lane.b32.xlu0 %v5092_v31, %s5603_s25  ;;  %v2789_v44 = vor.u32 %v2788_v33, %v6531_v32  ;;  %v5013_v22 = vld [vmem:[%s5652_s19 + $0xa0] sm:$0xf]  ;;  %v5201_v33 = vld [vmem:[%s5652_s19 + $0x9c] sm:$0xe]  ;;  %v1512_v36 = vrot.slane %v1510_v16, 4  ;;  %vm4820_vm9 = vcmask 257024  }
 0x14c   : > { %v1800_v46 = vpop.permute.xlu1 %1799  ;;  %v2598_v42 = vrot.slane %v2597_v29, 4  ;;  %v5203_v29 = vld [vmem:[%s5652_s19 + $0xa4] sm:$0x1] }
 0x14d   : > { %1895 = vst.msk [vmem:[#allocation2 + $0x4] sm:$0xf] %vm1893_vm12, %v1800_v46  ;;  %v1798_v50 = vpop.permute.xlu0 %1797  ;;  %v2790_v40 = vrot.slane %v2789_v44, 4  ;;  %v3142_v44 = vrot.slane %v3140_v8, 4  ;;  %v3199_v51 = vrot.slane %v5203_v29, 5 }
 0x14e   : > { %1894 = vst.msk [vmem:[#allocation2] sm:$0xf] %vm1893_vm12, %v1798_v50  ;;  %2373 = vrot.lane.b32.xlu1 %v5109_v45, %s5603_s25  ;;  %v2792_v45 = vshll.u32 %v5155_v37, 16  ;;  %v2779_v50 = vor.u32 %v2778_v39, %v2775_v38  ;;  %v2603_v47 = vsel %vm5663_vm2, %v2598_v42, %v2602_v43  ;;  %v1515_v37 = vrot.slane %v1513_v17, 5  ;;  %v4990_v38 = vld [vmem:[%s5652_s19 + $0x44] sm:$0x1] }
 0x14f   : > { %2371 = vrot.lane.b32.xlu0 %v5108_v48, %s5603_s25  ;;  %v2761_v48 = vsel %vm5663_vm2, %v2756_v34, %v6503_v53  ;;  %v1525_v34 = vrot.slane %v1523_v15, 4  ;;  %v1711_v39 = vshll.u32 %v5013_v22, 16 }
 0x150   : > { %v1832_v61 = vpop.permute.xlu1 %1831  ;;  %v2794_v53 = vrot.slane %v2792_v45, 5  ;;  %v2780_v58 = vrot.slane %v2779_v50, 4  ;;  %v3143_v45 = vrot.slane %v5179_v21, 5 }
 0x151   : > { %1911 = vst.msk [vmem:[#allocation2 + $0x44] sm:$0xf] %vm1893_vm12, %v1832_v61  ;;  %v1830_v3 = vpop.permute.xlu0 %1829  ;;  %v5174_v61 = vld [vmem:[%s5652_s19 + $0x30] sm:$0xe] }
 0x152   : > { %1910 = vst.msk [vmem:[#allocation2 + $0x40] sm:$0xf] %vm1893_vm12, %v1830_v3  ;;  %2345 = vrot.lane.b32.xlu1 %v5095_v57, %s5603_s25  ;;  %v2593_v57 = vsel %vm5663_vm2, %v2588_v49, %v6518_v14  ;;  %v2795_v2 = vsel %vm5663_vm2, %v2790_v40, %v2794_v53  ;;  %v3135_v3 = vrot.slane %v3133_v54, 4  ;;  %v2785_v9 = vsel %vm5663_vm2, %v2780_v58, %v6531_v32 }
 0x153   : > { %2343 = vrot.lane.b32.xlu0 %v5094_v63, %s5603_s25  ;;  %v3189_v63 = vrot.slane %v6552_v55, 5  ;;  %v5218_v10 = vrot.slane %v5174_v61, 9  ;;  %v1519_v14 = vshll.u32 %v4989_v0, 16  ;;  %v5219_v49 = vrot.slane %v5177_v28, 9 }
 0x154   : > { %v1804_v18 = vpop.permute.xlu1 %1803  ;;  %v3137_v20 = vsel %vm5807_vm6, %v3135_v3, %v3136_v5  ;;  %v5227_v40 = vrot.slane %v5201_v33, 9  ;;  %v1516_v55 = vor.u32 %v1515_v37, %v1512_v36  ;;  %v3144_v61 = vsel %vm5807_vm6, %v3142_v44, %v3143_v45 }
 0x155   : > { %1897 = vst.msk [vmem:[#allocation2 + $0xc] sm:$0xf] %vm1893_vm12, %v1804_v18  ;;  %v1802_v23 = vpop.permute.xlu0 %1801  ;;  %v3191_v18 = vrot.slane %v3189_v63, 4  ;;  %v3141_v3 = vsel %vm5807_vm6, %v5219_v49, %v3140_v8  ;;  %v1735_v8 = vshll.u32 %v5016_v7, 16 }
 0x156   : > { %1896 = vst.msk [vmem:[#allocation2 + $0x8] sm:$0xf] %vm1893_vm12, %v1802_v23  ;;  %2377 = vrot.lane.b32.xlu1 %v5111_v4, %s5603_s25  ;;  %v5012_v23 = vld [vmem:[%s5652_s19 + $0x9c] sm:$0xf] }
 0x157   : > { %2375 = vrot.lane.b32.xlu0 %v5110_v13, %s5603_s25  ;;  %v6578_v13 = vld [vmem:[%s5652_s19 + $0xa0] sm:$0xf]  ;;  %v1705_v42 = vshll.u32 %v5012_v23, 16  ;;  %v3193_v43 = vsel %vm5807_vm6, %v3191_v18, %v3192_v19  ;;  %v1737_v37 = vrot.slane %v1735_v8, 5 }
 0x158   : > { %v1836_v31 = vpop.permute.xlu1 %1835  ;;  %v3196_v30 = vrot.slane %v6578_v13, 5  ;;  %v5015_v13 = vld [vmem:[%s5652_s19 + $0xa8] sm:$0xf] }
 0x159   : > { %1913 = vst.msk [vmem:[#allocation2 + $0x4c] sm:$0xf] %vm1893_vm12, %v1836_v31  ;;  %v1834_v35 = vpop.permute.xlu0 %1833  ;;  %v6596_v31 = vrot.slane %v1519_v14, 5  ;;  %v1517_v14 = vrot.slane %v1516_v55, 4 }
 0x15a   : > { %1912 = vst.msk [vmem:[#allocation2 + $0x48] sm:$0xf] %vm1893_vm12, %v1834_v35  ;;  %2902 = vrot.lane.b32.xlu1 %v2579_v24, %s5604_s26  ;;  %v1715_v35 = vshrl.u32 %v5013_v22, 16  ;;  %v3198_v50 = vrot.slane %v3196_v30, 4  ;;  %v4993_v22 = vld [vmem:[%s5652_s19 + $0x50] sm:$0x1] }
 0x15b   : > { %2900 = vrot.lane.b32.xlu0 %v2569_v25, %s5604_s26  ;;  %v3134_v25 = vsel %vm5807_vm6, %v5218_v10, %v3133_v54  ;;  %v1526_v53 = vor.u32 %v1525_v34, %v6596_v31  ;;  %v1529_v54 = vshll.u32 %v4990_v38, 16  ;;  %v3197_v10 = vsel %vm5807_vm6, %v5227_v40, %v3196_v30 }
 0x15c   : > { %v2137_v46 = vpop.permute.xlu1 %2136  ;;  %v1717_v58 = vrot.slane %v1715_v35, 4  ;;  %v1522_v30 = vsel %vm5663_vm2, %v1517_v14, %v6596_v31  ;;  %v1553_v36 = vshll.u32 %v4993_v22, 16  ;;  %v5060_v14 = vld [vmem:[%s5652_s19 + $0x9c] sm:$0xe]  ;;  %v5064_v22 = vld [vmem:[%s5652_s19 + $0xac] sm:$0xf] }
 0x15d   : > { %2232 = vst.msk [vmem:[#allocation2 + $0x4] sm:$0xf] %vm2230_vm13, %v2137_v46  ;;  %v2135_v52 = vpop.permute.xlu0 %2134  ;;  %v1527_v11 = vrot.slane %v1526_v53, 4  ;;  %v5037_v53 = vld [vmem:[%s5652_s19 + $0x40] sm:$0xf] }
 0x15e   : > { %2231 = vst.msk [vmem:[#allocation2] sm:$0xf] %vm2230_vm13, %v2135_v52  ;;  %2934 = vrot.lane.b32.xlu1 %v2771_v41, %s5604_s26  ;;  %v1702_v41 = vshrl.u32 %v5012_v23, 16  ;;  %v4992_v52 = vld [vmem:[%s5652_s19 + $0x4c] sm:$0xf] }
 0x15f   : > { %2932 = vrot.lane.b32.xlu0 %v2761_v48, %s5604_s26  ;;  %v3190_v48 = vsel %vm5807_vm6, %v5226_v26, %v3189_v63  ;;  %v5014_v63 = vld [vmem:[%s5652_s19 + $0xa4] sm:$0x1]  ;;  %v1543_v0 = vshll.u32 %v4992_v52, 16  ;;  %v1547_v1 = vshrl.u32 %v4992_v52, 16  ;;  %v1729_v26 = vshll.u32 %v5015_v13, 16 }
 0x160   : > { %v2169_v56 = vpop.permute.xlu1 %2168  ;;  %v1704_v59 = vrot.slane %v1702_v41, 4  ;;  %v1721_v16 = vshll.u32 %v5014_v63, 16  ;;  %v5038_v63 = vld [vmem:[%s5652_s19 + $0x44] sm:$0x1] }
 0x161   : > { %2248 = vst.msk [vmem:[#allocation2 + $0x44] sm:$0xf] %vm2230_vm13, %v2169_v56  ;;  %v2167_v60 = vpop.permute.xlu0 %2166  ;;  %v4991_v56 = vld [vmem:[%s5652_s19 + $0x48] sm:$0xf]  ;;  %v6631_v18 = vrot.slane %v1543_v0, 5  ;;  %v1549_v19 = vrot.slane %v1547_v1, 4 }
 0x162   : > { %2247 = vst.msk [vmem:[#allocation2 + $0x40] sm:$0xf] %vm2230_vm13, %v2167_v60  ;;  %2906 = vrot.lane.b32.xlu1 %v2603_v47, %s5604_s26  ;;  %v1707_v60 = vrot.slane %v1705_v42, 5  ;;  %v1534_v5 = vshrl.u32 %v4991_v56, 16  ;;  %v1537_v6 = vshll.u32 %v4991_v56, 16  ;;  %v1723_v33 = vrot.slane %v1721_v16, 5 }
 0x163   : > { %2904 = vrot.lane.b32.xlu0 %v2593_v57, %s5604_s26  ;;  %v6612_v57 = vrot.slane %v1711_v39, 5  ;;  %v1550_v34 = vor.u32 %v1549_v19, %v6631_v18  ;;  %v5017_v42 = vld [vmem:[%s5652_s19 + $0xb0] sm:$0x1]  ;;  %v1731_v44 = vrot.slane %v1729_v26, 5  ;;  %v5061_v0 = vld [vmem:[%s5652_s19 + $0xa0] sm:$0xf] }
 0x164   : > { %v2141_v4 = vpop.permute.xlu1 %2140  ;;  %v1708_v17 = vor.u32 %v1707_v60, %v1704_v59  ;;  %v1536_v23 = vrot.slane %v1534_v5, 4 }
 0x165   : > { %2234 = vst.msk [vmem:[#allocation2 + $0xc] sm:$0xf] %vm2230_vm13, %v2141_v4  ;;  %v2139_v12 = vpop.permute.xlu0 %2138  ;;  %v1718_v15 = vor.u32 %v1717_v58, %v6612_v57  ;;  %v2052_v58 = vrot.slane %v5037_v53, 5 }
 0x166   : > { %2233 = vst.msk [vmem:[#allocation2 + $0x8] sm:$0xf] %vm2230_vm13, %v2139_v12  ;;  %2938 = vrot.lane.b32.xlu1 %v2795_v2, %s5604_s26  ;;  %v1531_v12 = vrot.slane %v1529_v54, 5  ;;  %v1709_v35 = vrot.slane %v1708_v17, 4 }
 0x167   : > { %2936 = vrot.lane.b32.xlu0 %v2785_v9, %s5604_s26  ;;  %v3200_v9 = vsel %vm5807_vm6, %v3198_v50, %v3199_v51  ;;  %v1745_v50 = vshll.u32 %v5017_v42, 16  ;;  %v2054_v5 = vrot.slane %v2052_v58, 4 }
 0x168   : > { %v2173_v24 = vpop.permute.xlu1 %2172  ;;  %v1532_v29 = vsel %vm5663_vm2, %v1527_v11, %v1531_v12  ;;  %v1714_v52 = vsel %vm5663_vm2, %v1709_v35, %v6612_v57  ;;  %v5062_v11 = vld [vmem:[%s5652_s19 + $0xa4] sm:$0x1]  ;;  %v5040_v12 = vld [vmem:[%s5652_s19 + $0x4c] sm:$0xf] }
 0x169   : > { %2250 = vst.msk [vmem:[#allocation2 + $0x4c] sm:$0xf] %vm2230_vm13, %v2173_v24  ;;  %v2171_v32 = vpop.permute.xlu0 %2170  ;;  %v1539_v24 = vrot.slane %v1537_v6, 5  ;;  %v1747_v57 = vrot.slane %v1745_v50, 5  ;;  %v2055_v6 = vrot.slane %v5038_v63, 5  ;;  %v2111_v17 = vrot.slane %v5062_v11, 5 }
 0x16a   : > { %2249 = vst.msk [vmem:[#allocation2 + $0x48] sm:$0xf] %vm2230_vm13, %v2171_v32  ;;  %3239 = vrot.lane.b32.xlu1 %v3137_v20, %s5606_s4  ;;  %v1739_v20 = vshrl.u32 %v5016_v7, 16  ;;  %v1719_v32 = vrot.slane %v1718_v15, 4  ;;  %v2108_v7 = vrot.slane %v5061_v0, 5 }
 0x16b   : > { %3237 = vrot.lane.b32.xlu0 %v3134_v25, %s5606_s4  ;;  %v1726_v25 = vshrl.u32 %v5015_v13, 16  ;;  %v1540_v41 = vor.u32 %v1539_v24, %v1536_v23  ;;  %v2056_v15 = vsel %vm5807_vm6, %v2054_v5, %v2055_v6  ;;  %v5039_v24 = vld [vmem:[%s5652_s19 + $0x48] sm:$0xe] }
 0x16c   : > { %v2334_v46 = vpop.permute.xlu1 %2333  ;;  %v1741_v38 = vrot.slane %v1739_v20, 4  ;;  %v1724_v31 = vsel %vm5663_vm2, %v1719_v32, %v1723_v33  ;;  %v2110_v16 = vrot.slane %v2108_v7, 4  ;;  %v5084_v20 = vrot.slane %v5060_v14, 9  ;;  %v5112_v11 = vld [vmem:[%s5652_s19 + $0xa8] sm:$0xf] }
 0x16d   : > { %2429 = vst.msk [vmem:[#allocation2 + $0x4] sm:$0xf] %vm2427_vm14, %v2334_v46  ;;  %v2332_v47 = vpop.permute.xlu0 %2331  ;;  %v1551_v46 = vrot.slane %v1550_v34, 4  ;;  %v5077_v33 = vrot.slane %v5039_v24, 9  ;;  %v5065_v34 = vld [vmem:[%s5652_s19 + $0xb0] sm:$0x1] }
 0x16e   : > { %2428 = vst.msk [vmem:[#allocation2] sm:$0xf] %vm2427_vm14, %v2332_v47  ;;  %3271 = vrot.lane.b32.xlu1 %v3193_v43, %s5606_s4  ;;  %v1728_v43 = vrot.slane %v1726_v25, 4  ;;  %v1742_v49 = vor.u32 %v1741_v38, %v1737_v37  ;;  %v1541_v47 = vrot.slane %v1540_v41, 4  ;;  %v2112_v25 = vsel %vm5807_vm6, %v2110_v16, %v2111_v17  ;;  %v5158_v24 = vld [vmem:[%s5652_s19 + $0xb0] sm:$0x1] }
 0x16f   : > { %3269 = vrot.lane.b32.xlu0 %v3190_v48, %s5606_s4  ;;  %v1555_v48 = vrot.slane %v1553_v36, 5  ;;  %v2109_v32 = vsel %vm5807_vm6, %v5084_v20, %v2108_v7  ;;  %v2118_v35 = vrot.slane %v5065_v34, 5 }
 0x170   : > { %v2366_v2 = vpop.permute.xlu1 %2365  ;;  %v1732_v40 = vor.u32 %v1731_v44, %v1728_v43  ;;  %v1743_v56 = vrot.slane %v1742_v49, 4  ;;  %v1546_v60 = vsel %vm5663_vm2, %v1541_v47, %v6631_v18  ;;  %v2059_v18 = vrot.slane %v5040_v12, 5  ;;  %v5133_v44 = vld [vmem:[%s5652_s19 + $0x4c] sm:$0xf]  ;;  %v5136_v12 = vld [vmem:[%s5652_s19 + $0x58] sm:$0xf] }
 0x171   : > { %2445 = vst.msk [vmem:[#allocation2 + $0x44] sm:$0xf] %vm2427_vm14, %v2366_v2  ;;  %v2364_v4 = vpop.permute.xlu0 %2363  ;;  %v1556_v55 = vsel %vm5663_vm2, %v1551_v46, %v1555_v48  ;;  %v5036_v2 = vld [vmem:[%s5652_s19 + $0x3c] sm:$0xe]  ;;  %v2614_v48 = vshll.u32 %v5133_v44, 16  ;;  %v2618_v49 = vshrl.u32 %v5133_v44, 16 }
 0x172   : > { %2444 = vst.msk [vmem:[#allocation2 + $0x40] sm:$0xf] %vm2427_vm14, %v2364_v4  ;;  %3243 = vrot.lane.b32.xlu1 %v3144_v61, %s5606_s4  ;;  %v1733_v61 = vrot.slane %v1732_v40, 4  ;;  %v2061_v26 = vrot.slane %v2059_v18, 4  ;;  %v2060_v42 = vsel %vm5807_vm6, %v5077_v33, %v2059_v18  ;;  %v5135_v18 = vld [vmem:[%s5652_s19 + $0x54] sm:$0xf] }
 0x173   : > { %3241 = vrot.lane.b32.xlu0 %v3141_v3, %s5606_s4  ;;  %v1748_v3 = vsel %vm5663_vm2, %v1743_v56, %v1747_v57  ;;  %v2620_v56 = vrot.slane %v2618_v49, 4  ;;  %v5157_v57 = vld [vmem:[%s5652_s19 + $0xac] sm:$0xf]  ;;  %v5137_v49 = vld [vmem:[%s5652_s19 + $0x5c] sm:$0x1] }
 0x174   : > { %v2338_v21 = vpop.permute.xlu1 %2337  ;;  %v2810_v5 = vshrl.u32 %v5157_v57, 16 }
 0x175   : > { %2431 = vst.msk [vmem:[#allocation2 + $0xc] sm:$0xf] %vm2427_vm14, %v2338_v21  ;;  %v2336_v28 = vpop.permute.xlu0 %2335  ;;  %v5041_v21 = vld [vmem:[%s5652_s19 + $0x50] sm:$0x1] }
 0x176   : > { %2430 = vst.msk [vmem:[#allocation2 + $0x8] sm:$0xf] %vm2427_vm14, %v2336_v28  ;;  %3275 = vrot.lane.b32.xlu1 %v3200_v9, %s5606_s4  ;;  %v1738_v9 = vsel %vm5663_vm2, %v1733_v61, %v1737_v37  ;;  %v2062_v28 = vrot.slane %v5041_v21, 5  ;;  %v5063_v37 = vld [vmem:[%s5652_s19 + $0xa8] sm:$0xe]  ;;  %v2812_v20 = vrot.slane %v2810_v5, 4 }
 0x177   : > { %3273 = vrot.lane.b32.xlu0 %v3197_v10, %s5606_s4  ;;  %v5076_v10 = vrot.slane %v5036_v2, 9  ;;  %v5085_v43 = vrot.slane %v5063_v37, 9  ;;  %v5134_v2 = vld [vmem:[%s5652_s19 + $0x50] sm:$0x1]  ;;  %v5159_v37 = vld [vmem:[%s5652_s19 + $0xb4] sm:$0xf] }
 0x178   : > { %v2370_v39 = vpop.permute.xlu1 %2369  ;;  %v2063_v38 = vsel %vm5807_vm6, %v2061_v26, %v2062_v28  ;;  %v2624_v16 = vshll.u32 %v5134_v2, 16  ;;  %v2642_v26 = vshrl.u32 %v5136_v12, 16  ;;  %v5161_v2 = vld [vmem:[%s5652_s19 + $0xbc] sm:$0x1] }
 0x179   : > { %2447 = vst.msk [vmem:[#allocation2 + $0x4c] sm:$0xf] %vm2427_vm14, %v2370_v39  ;;  %v2368_v45 = vpop.permute.xlu0 %2367  ;;  %v2053_v8 = vsel %vm5807_vm6, %v5076_v10, %v2052_v58  ;;  %v5156_v58 = vld [vmem:[%s5652_s19 + $0xa8] sm:$0xf] }
 0x17a   : > { %2446 = vst.msk [vmem:[#allocation2 + $0x48] sm:$0xf] %vm2427_vm14, %v2368_v45  ;;  %1815 = vrot.lane.b32.xlu1 %v1532_v29, %s5601_s23  ;;  %v2115_v29 = vrot.slane %v5064_v22, 5  ;;  %v2797_v6 = vshrl.u32 %v5156_v58, 16  ;;  %v2800_v7 = vshll.u32 %v5156_v58, 16 }
 0x17b   : > { %1813 = vrot.lane.b32.xlu0 %v1522_v30, %s5601_s23 }
 0x17c   : > { %v2895_v51 = vpop.permute.xlu1 %2894  ;;  %v2117_v39 = vrot.slane %v2115_v29, 4  ;;  %v2799_v21 = vrot.slane %v2797_v6, 4  ;;  %v2802_v22 = vrot.slane %v2800_v7, 5 }
 0x17d   : > { %2990 = vst.msk [vmem:[#allocation2 + $0x4] sm:$0xf] %vm2988_vm15, %v2895_v51  ;;  %v2893_v54 = vpop.permute.xlu0 %2892  ;;  %v2116_v51 = vsel %vm5807_vm6, %v5085_v43, %v2115_v29  ;;  %v2629_v29 = vshrl.u32 %v5135_v18, 16  ;;  %v5114_v43 = vld [vmem:[%s5652_s19 + $0xb4] sm:$0xf] }
 0x17e   : > { %2989 = vst.msk [vmem:[#allocation2] sm:$0xf] %vm2988_vm15, %v2893_v54  ;;  %1847 = vrot.lane.b32.xlu1 %v1724_v31, %s5601_s23  ;;  %v5132_v31 = vld [vmem:[%s5652_s19 + $0x48] sm:$0xf]  ;;  %v2119_v46 = vsel %vm5807_vm6, %v2117_v39, %v2118_v35  ;;  %v5097_v54 = vld [vmem:[%s5652_s19 + $0x4c] sm:$0xf] }
 0x17f   : > { %1845 = vrot.lane.b32.xlu0 %v1714_v52, %s5601_s23  ;;  %v2605_v40 = vshrl.u32 %v5132_v31, 16  ;;  %v2608_v53 = vshll.u32 %v5132_v31, 16 }
 0x180   : > { %v2927_v59 = vpop.permute.xlu1 %2926 }
 0x181   : > { %3006 = vst.msk [vmem:[#allocation2 + $0x44] sm:$0xf] %vm2988_vm15, %v2927_v59  ;;  %v2925_v1 = vpop.permute.xlu0 %2924  ;;  %v2607_v0 = vrot.slane %v2605_v40, 4 }
 0x182   : > { %3005 = vst.msk [vmem:[#allocation2 + $0x40] sm:$0xf] %vm2988_vm15, %v2925_v1  ;;  %1819 = vrot.lane.b32.xlu1 %v1556_v55, %s5601_s23  ;;  %v6723_v55 = vrot.slane %v2614_v48, 5  ;;  %v2610_v1 = vrot.slane %v2608_v53, 5 }
 0x183   : > { %1817 = vrot.lane.b32.xlu0 %v1546_v60, %s5601_s23  ;;  %v5096_v60 = vld [vmem:[%s5652_s19 + $0x48] sm:$0xf] }
 0x184   : > { %v2899_v4 = vpop.permute.xlu1 %2898  ;;  %v2611_v17 = vor.u32 %v2610_v1, %v2607_v0 }
 0x185   : > { %2992 = vst.msk [vmem:[#allocation2 + $0xc] sm:$0xf] %vm2988_vm15, %v2899_v4  ;;  %v2897_v13 = vpop.permute.xlu0 %2896  ;;  %v5113_v4 = vld [vmem:[%s5652_s19 + $0xac] sm:$0xf] }
 0x186   : > { %2991 = vst.msk [vmem:[#allocation2 + $0x8] sm:$0xf] %vm2988_vm15, %v2897_v13  ;;  %1851 = vrot.lane.b32.xlu1 %v1748_v3, %s5601_s23  ;;  %v2806_v3 = vshll.u32 %v5157_v57, 16  ;;  %v2612_v39 = vrot.slane %v2611_v17, 4 }
 0x187   : > { %1849 = vrot.lane.b32.xlu0 %v1738_v9, %s5601_s23  ;;  %v2621_v9 = vor.u32 %v2620_v56, %v6723_v55 }
 0x188   : > { %v2931_v19 = vpop.permute.xlu1 %2930 }
 0x189   : > { %3008 = vst.msk [vmem:[#allocation2 + $0x4c] sm:$0xf] %vm2988_vm15, %v2931_v19  ;;  %v2929_v23 = vpop.permute.xlu0 %2928  ;;  %v5098_v19 = vld [vmem:[%s5652_s19 + $0x54] sm:$0xf] }
 0x18a   : > { %3007 = vst.msk [vmem:[#allocation2 + $0x48] sm:$0xf] %vm2988_vm15, %v2929_v23  ;;  %2152 = vrot.lane.b32.xlu1 %v2056_v15, %s5602_s24  ;;  %v5099_v15 = vld [vmem:[%s5652_s19 + $0x58] sm:$0xf]  ;;  %v2622_v23 = vrot.slane %v2621_v9, 4 }
 0x18b   : > { %2150 = vrot.lane.b32.xlu0 %v2053_v8, %s5602_s24  ;;  %v6744_v8 = vrot.slane %v2806_v3, 5 }
 0x18c   : > { %v3232_v30 = vpop.permute.xlu1 %3231 }
 0x18d   : > { %3327 = vst.msk [vmem:[#allocation2 + $0x4] sm:$0xf] %vm3325_vm0, %v3232_v30  ;;  %v3230_v36 = vpop.permute.xlu0 %3229  ;;  %v2632_v30 = vshll.u32 %v5135_v18, 16  ;;  %v2813_v35 = vor.u32 %v2812_v20, %v6744_v8  ;;  %v6793_v20 = vld [vmem:[%s5652_s19 + $0xac] sm:$0xf] }
 0x18e   : > { %3326 = vst.msk [vmem:[#allocation2] sm:$0xf] %vm3325_vm0, %v3230_v36  ;;  %2184 = vrot.lane.b32.xlu1 %v2112_v25, %s5602_s24  ;;  %v2638_v25 = vshll.u32 %v5136_v12, 16  ;;  %v2626_v36 = vrot.slane %v2624_v16, 5 }
 0x18f   : > { %2182 = vrot.lane.b32.xlu0 %v2109_v32, %s5602_s24  ;;  %v5160_v32 = vld [vmem:[%s5652_s19 + $0xb8] sm:$0xf]  ;;  %v2814_v56 = vrot.slane %v2813_v35, 4 }
 0x190   : > { %v3264_v41 = vpop.permute.xlu1 %3263  ;;  %v6759_v44 = vrot.slane %v2638_v25, 5  ;;  %v2830_v31 = vshll.u32 %v5160_v32, 16  ;;  %v2627_v53 = vsel %vm5663_vm2, %v2622_v23, %v2626_v36  ;;  %v5206_v36 = vld [vmem:[%s5652_s19 + $0xb0] sm:$0x1] }
 0x191   : > { %3343 = vst.msk [vmem:[#allocation2 + $0x44] sm:$0xf] %vm3325_vm0, %v3264_v41  ;;  %v3262_v45 = vpop.permute.xlu0 %3261  ;;  %v2816_v41 = vshll.u32 %v5158_v24, 16  ;;  %v5182_v24 = vld [vmem:[%s5652_s19 + $0x50] sm:$0x1] }
 0x192   : > { %3342 = vst.msk [vmem:[#allocation2 + $0x40] sm:$0xf] %vm3325_vm0, %v3262_v45  ;;  %2156 = vrot.lane.b32.xlu1 %v2063_v38, %s5602_s24  ;;  %v5115_v38 = vld [vmem:[%s5652_s19 + $0xb8] sm:$0xf]  ;;  %v2644_v45 = vrot.slane %v2642_v26, 4 }
 0x193   : > { %2154 = vrot.lane.b32.xlu0 %v2060_v42, %s5602_s24  ;;  %v2803_v42 = vor.u32 %v2802_v22, %v2799_v21  ;;  %v2818_v57 = vrot.slane %v2816_v41, 5  ;;  %v5180_v26 = vld [vmem:[%s5652_s19 + $0x48] sm:$0xe] }
 0x194   : > { %v3236_v50 = vpop.permute.xlu1 %3235  ;;  %v2645_v58 = vor.u32 %v2644_v45, %v6759_v44  ;;  %v5220_v35 = vrot.slane %v5180_v26, 9  ;;  %v5204_v41 = vld [vmem:[%s5652_s19 + $0xa8] sm:$0xe] }
 0x195   : > { %3329 = vst.msk [vmem:[#allocation2 + $0xc] sm:$0xf] %vm3325_vm0, %v3236_v50  ;;  %v3234_v52 = vpop.permute.xlu0 %3233  ;;  %v5556_v47 = vld [vmem:[#allocation2] sm:$0xff]   ;;  %v2631_v50 = vrot.slane %v2629_v29, 4  ;;  %v2804_v0 = vrot.slane %v2803_v42, 4  ;;  %v2819_v6 = vsel %vm5663_vm2, %v2814_v56, %v2818_v57  ;;  %v5228_v56 = vrot.slane %v5204_v41, 9 }
 0x196   : > { %3328 = vst.msk [vmem:[#allocation2 + $0x8] sm:$0xf] %vm3325_vm0, %v3234_v52  ;;  %2188 = vrot.lane.b32.xlu1 %v2119_v46, %s5602_s24  ;;  %5484 = vmatprep.mubr.msk.bf16.mxu0 %vm3492_vm1, %v5556_v47  ;;  %v2834_v46 = vshrl.u32 %v5160_v32, 16  ;;  %v2821_v52 = vshrl.u32 %v5159_v37, 16  ;;  %v2824_v47 = vshll.u32 %v5159_v37, 16  ;;  %v2646_v7 = vrot.slane %v2645_v58, 4 }
 0x197   : > { %2186 = vrot.lane.b32.xlu0 %v2116_v51, %s5602_s24  ;;  %v2634_v51 = vrot.slane %v2632_v30, 5  ;;  %v2809_v12 = vsel %vm5663_vm2, %v2804_v0, %v6744_v8  ;;  %v4995_v29 = vld [vmem:[%s5652_s19 + $0x58] sm:$0xf]  ;;  %v4994_v30 = vld [vmem:[%s5652_s19 + $0x54] sm:$0xf] }
 0x198   : > { %v3268_v59 = vpop.permute.xlu1 %3267  ;;  %v2823_v3 = vrot.slane %v2821_v52, 4  ;;  %v2826_v5 = vrot.slane %v2824_v47, 5  ;;  %v6811_v37 = vld [vmem:[%s5652_s19 + $0x58] sm:$0xf]  ;;  %v1571_v45 = vshrl.u32 %v4995_v29, 16 }
 0x199   : > { %3345 = vst.msk [vmem:[#allocation2 + $0x4c] sm:$0xf] %vm3325_vm0, %v3268_v59  ;;  %v3266_v61 = vpop.permute.xlu0 %3265  ;;  %v5558_v63 = vld [vmem:[#allocation2 + $0x40] sm:$0xff]   ;;  %v2648_v59 = vshll.u32 %v5137_v49, 16  ;;  %v2635_v1 = vor.u32 %v2634_v51, %v2631_v50  ;;  %v3206_v49 = vrot.slane %v5206_v36, 5  ;;  %v3154_v50 = vrot.slane %v6811_v37, 5 }
 0x19a   : > { %3344 = vst.msk [vmem:[#allocation2 + $0x48] sm:$0xf] %vm3325_vm0, %v3266_v61  ;;  %2349 = vrot.lane.b32.xlu1 %v5097_v54, %s5603_s25  ;;  %5500 = vmatprep.mubr.msk.bf16.mxu1 %vm3492_vm1, %v5558_v63  ;;  %v2617_v54 = vsel %vm5663_vm2, %v2612_v39, %v6723_v55  ;;  %v2836_v61 = vrot.slane %v2834_v46, 4  ;;  %v1561_v46 = vshll.u32 %v4994_v30, 16  ;;  %v5185_v52 = vld [vmem:[%s5652_s19 + $0x5c] sm:$0x1] }
 0x19b   : > { %2347 = vrot.lane.b32.xlu0 %v5096_v60, %s5603_s25  ;;  %v6772_v60 = vrot.slane %v2830_v31, 5  ;;  %v1558_v31 = vshrl.u32 %v4994_v30, 16  ;;  %v5019_v47 = vld [vmem:[%s5652_s19 + $0xb8] sm:$0xf]  ;;  %v5183_v57 = vld [vmem:[%s5652_s19 + $0x54] sm:$0xe] }
 0x19c   : > { %v1808_v10 = vpop.permute.xlu1 %1807  ;;  %v5209_v58 = vld [vmem:[%s5652_s19 + $0xbc] sm:$0x1]  ;;  %v1573_v0 = vrot.slane %v1571_v45, 4  ;;  %v5022_v37 = vld [vmem:[%s5652_s19 + $0xc4] sm:$0xf] }
 0x19d   : > { %1899 = vst.msk [vmem:[#allocation2 + $0x14] sm:$0xf] %vm1893_vm12, %v1808_v10  ;;  %v1806_v13 = vpop.permute.xlu0 %1805  ;;  %v5559_v14 = vld [vmem:[#allocation2 + $0x8] sm:$0xff]   ;;  %v2837_v9 = vor.u32 %v2836_v61, %v6772_v60  ;;  %v2840_v10 = vshll.u32 %v5161_v2, 16  ;;  %v5207_v61 = vld [vmem:[%s5652_s19 + $0xb4] sm:$0xe] }
 0x19e   : > { %1898 = vst.msk [vmem:[#allocation2 + $0x10] sm:$0xf] %vm1893_vm12, %v1806_v13  ;;  %2381 = vrot.lane.b32.xlu1 %v5113_v4, %s5603_s25  ;;  %5485 = vmatmul.mubr.msk.bf16.vlgmr.msra.gmra.mxu0 %vm3492_vm1, %v5559_v14  ;;  %v2650_v4 = vrot.slane %v2648_v59, 5  ;;  %v2636_v13 = vrot.slane %v2635_v1, 4  ;;  %v2827_v14 = vor.u32 %v2826_v5, %v2823_v3  ;;  %v1560_v1 = vrot.slane %v1558_v31, 4 }
 0x19f   : > { %2379 = vrot.lane.b32.xlu0 %v5112_v11, %s5603_s25  ;;  %v2838_v18 = vrot.slane %v2837_v9, 4  ;;  %v1563_v2 = vrot.slane %v1561_v46, 5  ;;  %v4996_v3 = vld [vmem:[%s5652_s19 + $0x5c] sm:$0x1]  ;;  %v1759_v5 = vshll.u32 %v5019_v47, 16  ;;  %v3156_v9 = vrot.slane %v3154_v50, 4 }
 0x1a0   : > { %v1840_v28 = vpop.permute.xlu1 %1839  ;;  %v2651_v17 = vsel %vm5663_vm2, %v2646_v7, %v2650_v4  ;;  %v2641_v22 = vsel %vm5663_vm2, %v2636_v13, %v6759_v44  ;;  %v2828_v23 = vrot.slane %v2827_v14, 4  ;;  %v1567_v44 = vshll.u32 %v4995_v29, 16 }
 0x1a1   : > { %1915 = vst.msk [vmem:[#allocation2 + $0x54] sm:$0xf] %vm1893_vm12, %v1840_v28  ;;  %v1838_v33 = vpop.permute.xlu0 %1837  ;;  %v5560_v34 = vld [vmem:[#allocation2 + $0x48] sm:$0xff]   ;;  %v3203_v28 = vrot.slane %v6793_v20, 5  ;;  %v5221_v13 = vrot.slane %v5183_v57, 9  ;;  %v1564_v20 = vor.u32 %v1563_v2, %v1560_v1 }
 0x1a2   : > { %1914 = vst.msk [vmem:[#allocation2 + $0x50] sm:$0xf] %vm1893_vm12, %v1838_v33  ;;  %2353 = vrot.lane.b32.xlu1 %v5099_v15, %s5603_s25  ;;  %5501 = vmatmul.mubr.msk.bf16.vlgmr.msra.gmra.mxu1 %vm3492_vm1, %v5560_v34  ;;  %v5181_v15 = vld [vmem:[%s5652_s19 + $0x4c] sm:$0xf]  ;;  %v3150_v34 = vrot.slane %v5182_v24, 5  ;;  %v2833_v39 = vsel %vm5663_vm2, %v2828_v23, %v6772_v60 }
 0x1a3   : > { %2351 = vrot.lane.b32.xlu0 %v5098_v19, %s5603_s25  ;;  %v2842_v19 = vrot.slane %v2840_v10, 5  ;;  %v3147_v8 = vrot.slane %v5181_v15, 5  ;;  %v3157_v10 = vrot.slane %v5185_v52, 5  ;;  %v3213_v15 = vrot.slane %v5209_v58, 5 }
 0x1a4   : > { %v1812_v48 = vpop.permute.xlu1 %1811 }
 0x1a5   : > { %1901 = vst.msk [vmem:[#allocation2 + $0x1c] sm:$0xf] %vm1893_vm12, %v1812_v48  ;;  %v1810_v40 = vpop.permute.xlu0 %1809  ;;  %v2843_v32 = vsel %vm5663_vm2, %v2838_v18, %v2842_v19  ;;  %v3149_v33 = vrot.slane %v3147_v8, 4  ;;  %v3205_v48 = vrot.slane %v3203_v28, 4  ;;  %v5229_v18 = vrot.slane %v5207_v61, 9 }
 0x1a6   : > { %1900 = vst.msk [vmem:[#allocation2 + $0x18] sm:$0xf] %vm1893_vm12, %v1810_v40  ;;  %2385 = vrot.lane.b32.xlu1 %v5115_v38, %s5603_s25  ;;  %v5018_v40 = vld [vmem:[%s5652_s19 + $0xb4] sm:$0xf]  ;;  %v3158_v26 = vsel %vm5807_vm6, %v3156_v9, %v3157_v10 }
 0x1a7   : > { %2383 = vrot.lane.b32.xlu0 %v5114_v43, %s5603_s25  ;;  %v6819_v43 = vld [vmem:[%s5652_s19 + $0xb8] sm:$0xf]  ;;  %v3151_v51 = vsel %vm5807_vm6, %v3149_v33, %v3150_v34  ;;  %v1753_v7 = vshll.u32 %v5018_v40, 16  ;;  %v3207_v4 = vsel %vm5807_vm6, %v3205_v48, %v3206_v49  ;;  %v3155_v33 = vsel %vm5807_vm6, %v5221_v13, %v3154_v50 }
 0x1a8   : > { %v1844_v63 = vpop.permute.xlu1 %1843  ;;  %v3210_v59 = vrot.slane %v6819_v43, 5  ;;  %v5021_v43 = vld [vmem:[%s5652_s19 + $0xc0] sm:$0xf]  ;;  %v1783_v50 = vshll.u32 %v5022_v37, 16 }
 0x1a9   : > { %1917 = vst.msk [vmem:[#allocation2 + $0x5c] sm:$0xf] %vm1893_vm12, %v1844_v63  ;;  %v1842_v55 = vpop.permute.xlu0 %1841  ;;  %v6837_v63 = vrot.slane %v1567_v44, 5  ;;  %v1565_v44 = vrot.slane %v1564_v20, 4 }
 0x1aa   : > { %1916 = vst.msk [vmem:[#allocation2 + $0x58] sm:$0xf] %vm1893_vm12, %v1842_v55  ;;  %2910 = vrot.lane.b32.xlu1 %v2627_v53, %s5604_s26  ;;  %v1763_v55 = vshrl.u32 %v5019_v47, 16  ;;  %v3212_v14 = vrot.slane %v3210_v59, 4  ;;  %v4999_v47 = vld [vmem:[%s5652_s19 + $0x68] sm:$0x1] }
 0x1ab   : > { %2908 = vrot.lane.b32.xlu0 %v2617_v54, %s5604_s26  ;;  %v3148_v54 = vsel %vm5807_vm6, %v5220_v35, %v3147_v8  ;;  %v1574_v19 = vor.u32 %v1573_v0, %v6837_v63  ;;  %v1577_v8 = vshll.u32 %v4996_v3, 16  ;;  %v3211_v35 = vsel %vm5807_vm6, %v5229_v18, %v3210_v59 }
 0x1ac   : > { %v2145_v11 = vpop.permute.xlu1 %2144  ;;  %v1765_v23 = vrot.slane %v1763_v55, 4  ;;  %v1570_v59 = vsel %vm5663_vm2, %v1565_v44, %v6837_v63  ;;  %v1601_v1 = vshll.u32 %v4999_v47, 16  ;;  %v1785_v2 = vrot.slane %v1783_v50, 5  ;;  %v5066_v44 = vld [vmem:[%s5652_s19 + $0xb4] sm:$0xe] }
 0x1ad   : > { %2236 = vst.msk [vmem:[#allocation2 + $0x14] sm:$0xf] %vm2230_vm13, %v2145_v11  ;;  %v2143_v16 = vpop.permute.xlu0 %2142  ;;  %v1575_v41 = vrot.slane %v1574_v19, 4  ;;  %v5043_v19 = vld [vmem:[%s5652_s19 + $0x58] sm:$0xf] }
 0x1ae   : > { %2235 = vst.msk [vmem:[#allocation2 + $0x10] sm:$0xf] %vm2230_vm13, %v2143_v16  ;;  %2942 = vrot.lane.b32.xlu1 %v2819_v6, %s5604_s26  ;;  %v1750_v6 = vshrl.u32 %v5018_v40, 16  ;;  %v4998_v16 = vld [vmem:[%s5652_s19 + $0x64] sm:$0xf] }
 0x1af   : > { %2940 = vrot.lane.b32.xlu0 %v2809_v12, %s5604_s26  ;;  %v3204_v12 = vsel %vm5807_vm6, %v5228_v56, %v3203_v28  ;;  %v5020_v28 = vld [vmem:[%s5652_s19 + $0xbc] sm:$0x1]  ;;  %v1591_v29 = vshll.u32 %v4998_v16, 16  ;;  %v1595_v30 = vshrl.u32 %v4998_v16, 16  ;;  %v1777_v56 = vshll.u32 %v5021_v43, 16 }
 0x1b0   : > { %v2177_v21 = vpop.permute.xlu1 %2176  ;;  %v1752_v24 = vrot.slane %v1750_v6, 4  ;;  %v1769_v31 = vshll.u32 %v5020_v28, 16  ;;  %v5044_v28 = vld [vmem:[%s5652_s19 + $0x5c] sm:$0x1]  ;;  %v5070_v47 = vld [vmem:[%s5652_s19 + $0xc4] sm:$0xf] }
 0x1b1   : > { %2252 = vst.msk [vmem:[#allocation2 + $0x54] sm:$0xf] %vm2230_vm13, %v2177_v21  ;;  %v2175_v25 = vpop.permute.xlu0 %2174  ;;  %v4997_v21 = vld [vmem:[%s5652_s19 + $0x60] sm:$0xf]  ;;  %v6872_v48 = vrot.slane %v1591_v29, 5  ;;  %v1597_v49 = vrot.slane %v1595_v30, 4 }
 0x1b2   : > { %2251 = vst.msk [vmem:[#allocation2 + $0x50] sm:$0xf] %vm2230_vm13, %v2175_v25  ;;  %2914 = vrot.lane.b32.xlu1 %v2651_v17, %s5604_s26  ;;  %v1755_v25 = vrot.slane %v1753_v7, 5  ;;  %v1582_v34 = vshrl.u32 %v4997_v21, 16  ;;  %v1585_v36 = vshll.u32 %v4997_v21, 16  ;;  %v1771_v61 = vrot.slane %v1769_v31, 5 }
 0x1b3   : > { %2912 = vrot.lane.b32.xlu0 %v2641_v22, %s5604_s26  ;;  %v6853_v22 = vrot.slane %v1759_v5, 5  ;;  %v1598_v0 = vor.u32 %v1597_v49, %v6872_v48  ;;  %v5023_v7 = vld [vmem:[%s5652_s19 + $0xc8] sm:$0x1]  ;;  %v1779_v9 = vrot.slane %v1777_v56, 5  ;;  %v5067_v29 = vld [vmem:[%s5652_s19 + $0xb8] sm:$0xf] }
 0x1b4   : > { %v2149_v38 = vpop.permute.xlu1 %2148  ;;  %v1756_v46 = vor.u32 %v1755_v25, %v1752_v24  ;;  %v1584_v40 = vrot.slane %v1582_v34, 4 }
 0x1b5   : > { %2238 = vst.msk [vmem:[#allocation2 + $0x1c] sm:$0xf] %vm2230_vm13, %v2149_v38  ;;  %v2147_v42 = vpop.permute.xlu0 %2146  ;;  %v1766_v45 = vor.u32 %v1765_v23, %v6853_v22  ;;  %v2066_v23 = vrot.slane %v5043_v19, 5 }
 0x1b6   : > { %2237 = vst.msk [vmem:[#allocation2 + $0x18] sm:$0xf] %vm2230_vm13, %v2147_v42  ;;  %2946 = vrot.lane.b32.xlu1 %v2843_v32, %s5604_s26  ;;  %v1579_v42 = vrot.slane %v1577_v8, 5  ;;  %v1757_v55 = vrot.slane %v1756_v46, 4 }
 0x1b7   : > { %2944 = vrot.lane.b32.xlu0 %v2833_v39, %s5604_s26  ;;  %v3214_v39 = vsel %vm5807_vm6, %v3212_v14, %v3213_v15  ;;  %v1793_v14 = vshll.u32 %v5023_v7, 16  ;;  %v2068_v34 = vrot.slane %v2066_v23, 4 }
 0x1b8   : > { %v2181_v53 = vpop.permute.xlu1 %2180  ;;  %v1580_v58 = vsel %vm5663_vm2, %v1575_v41, %v1579_v42  ;;  %v1762_v16 = vsel %vm5663_vm2, %v1757_v55, %v6853_v22  ;;  %v5068_v41 = vld [vmem:[%s5652_s19 + $0xbc] sm:$0x1]  ;;  %v5046_v42 = vld [vmem:[%s5652_s19 + $0x64] sm:$0xf] }
 0x1b9   : > { %2254 = vst.msk [vmem:[#allocation2 + $0x5c] sm:$0xf] %vm2230_vm13, %v2181_v53  ;;  %v2179_v60 = vpop.permute.xlu0 %2178  ;;  %v1587_v53 = vrot.slane %v1585_v36, 5  ;;  %v1795_v22 = vrot.slane %v1793_v14, 5  ;;  %v2069_v36 = vrot.slane %v5044_v28, 5  ;;  %v2125_v46 = vrot.slane %v5068_v41, 5 }
 0x1ba   : > { %2253 = vst.msk [vmem:[#allocation2 + $0x58] sm:$0xf] %vm2230_vm13, %v2179_v60  ;;  %3247 = vrot.lane.b32.xlu1 %v3151_v51, %s5606_s4  ;;  %v1787_v51 = vshrl.u32 %v5022_v37, 16  ;;  %v1767_v60 = vrot.slane %v1766_v45, 4  ;;  %v2122_v37 = vrot.slane %v5067_v29, 5 }
 0x1bb   : > { %3245 = vrot.lane.b32.xlu0 %v3148_v54, %s5606_s4  ;;  %v1774_v54 = vshrl.u32 %v5021_v43, 16  ;;  %v1588_v6 = vor.u32 %v1587_v53, %v1584_v40  ;;  %v2070_v45 = vsel %vm5807_vm6, %v2068_v34, %v2069_v36  ;;  %v5045_v53 = vld [vmem:[%s5652_s19 + $0x60] sm:$0xe] }
 0x1bc   : > { %v2342_v11 = vpop.permute.xlu1 %2341  ;;  %v1789_v3 = vrot.slane %v1787_v51, 4  ;;  %v1772_v63 = vsel %vm5663_vm2, %v1767_v60, %v1771_v61  ;;  %v2124_v31 = vrot.slane %v2122_v37, 4  ;;  %v5086_v51 = vrot.slane %v5066_v44, 9  ;;  %v5116_v41 = vld [vmem:[%s5652_s19 + $0xc0] sm:$0xf] }
 0x1bd   : > { %2433 = vst.msk [vmem:[#allocation2 + $0x14] sm:$0xf] %vm2427_vm14, %v2342_v11  ;;  %v2340_v17 = vpop.permute.xlu0 %2339  ;;  %v1599_v11 = vrot.slane %v1598_v0, 4  ;;  %v5079_v61 = vrot.slane %v5045_v53, 9  ;;  %v5071_v0 = vld [vmem:[%s5652_s19 + $0xc8] sm:$0x1] }
 0x1be   : > { %2432 = vst.msk [vmem:[#allocation2 + $0x10] sm:$0xf] %vm2427_vm14, %v2340_v17  ;;  %3279 = vrot.lane.b32.xlu1 %v3207_v4, %s5606_s4  ;;  %v1776_v4 = vrot.slane %v1774_v54, 4  ;;  %v1790_v13 = vor.u32 %v1789_v3, %v1785_v2  ;;  %v1589_v17 = vrot.slane %v1588_v6, 4  ;;  %v2126_v54 = vsel %vm5807_vm6, %v2124_v31, %v2125_v46  ;;  %v5164_v53 = vld [vmem:[%s5652_s19 + $0xc8] sm:$0x1] }
 0x1bf   : > { %3277 = vrot.lane.b32.xlu0 %v3204_v12, %s5606_s4  ;;  %v1603_v12 = vrot.slane %v1601_v1, 5  ;;  %v2123_v60 = vsel %vm5807_vm6, %v5086_v51, %v2122_v37  ;;  %v2132_v55 = vrot.slane %v5071_v0, 5 }
 0x1c0   : > { %v2374_v32 = vpop.permute.xlu1 %2373  ;;  %v1780_v18 = vor.u32 %v1779_v9, %v1776_v4  ;;  %v1791_v21 = vrot.slane %v1790_v13, 4  ;;  %v1594_v25 = vsel %vm5663_vm2, %v1589_v17, %v6872_v48  ;;  %v2073_v48 = vrot.slane %v5046_v42, 5  ;;  %v5139_v9 = vld [vmem:[%s5652_s19 + $0x64] sm:$0xf]  ;;  %v5142_v42 = vld [vmem:[%s5652_s19 + $0x70] sm:$0xf] }
 0x1c1   : > { %2449 = vst.msk [vmem:[#allocation2 + $0x54] sm:$0xf] %vm2427_vm14, %v2374_v32  ;;  %v2372_v38 = vpop.permute.xlu0 %2371  ;;  %v1604_v20 = vsel %vm5663_vm2, %v1599_v11, %v1603_v12  ;;  %v5042_v32 = vld [vmem:[%s5652_s19 + $0x54] sm:$0xe]  ;;  %v2662_v12 = vshll.u32 %v5139_v9, 16  ;;  %v2666_v13 = vshrl.u32 %v5139_v9, 16 }
 0x1c2   : > { %2448 = vst.msk [vmem:[#allocation2 + $0x50] sm:$0xf] %vm2427_vm14, %v2372_v38  ;;  %3251 = vrot.lane.b32.xlu1 %v3158_v26, %s5606_s4  ;;  %v1781_v26 = vrot.slane %v1780_v18, 4  ;;  %v2075_v56 = vrot.slane %v2073_v48, 4  ;;  %v2074_v7 = vsel %vm5807_vm6, %v5079_v61, %v2073_v48  ;;  %v5141_v48 = vld [vmem:[%s5652_s19 + $0x6c] sm:$0xf] }
 0x1c3   : > { %3249 = vrot.lane.b32.xlu0 %v3155_v33, %s5606_s4  ;;  %v1796_v33 = vsel %vm5663_vm2, %v1791_v21, %v1795_v22  ;;  %v2668_v21 = vrot.slane %v2666_v13, 4  ;;  %v5163_v22 = vld [vmem:[%s5652_s19 + $0xc4] sm:$0xf]  ;;  %v5143_v13 = vld [vmem:[%s5652_s19 + $0x74] sm:$0x1] }
 0x1c4   : > { %v2346_v52 = vpop.permute.xlu1 %2345  ;;  %v2858_v34 = vshrl.u32 %v5163_v22, 16 }
 0x1c5   : > { %2435 = vst.msk [vmem:[#allocation2 + $0x1c] sm:$0xf] %vm2427_vm14, %v2346_v52  ;;  %v2344_v57 = vpop.permute.xlu0 %2343  ;;  %v5047_v52 = vld [vmem:[%s5652_s19 + $0x68] sm:$0x1] }
 0x1c6   : > { %2434 = vst.msk [vmem:[#allocation2 + $0x18] sm:$0xf] %vm2427_vm14, %v2344_v57  ;;  %3283 = vrot.lane.b32.xlu1 %v3214_v39, %s5606_s4  ;;  %v1786_v39 = vsel %vm5663_vm2, %v1781_v26, %v1785_v2  ;;  %v2076_v57 = vrot.slane %v5047_v52, 5  ;;  %v5069_v2 = vld [vmem:[%s5652_s19 + $0xc0] sm:$0xe]  ;;  %v2860_v51 = vrot.slane %v2858_v34, 4 }
 0x1c7   : > { %3281 = vrot.lane.b32.xlu0 %v3211_v35, %s5606_s4  ;;  %v5078_v35 = vrot.slane %v5042_v32, 9  ;;  %v5087_v4 = vrot.slane %v5069_v2, 9  ;;  %v5140_v32 = vld [vmem:[%s5652_s19 + $0x68] sm:$0x1]  ;;  %v5165_v2 = vld [vmem:[%s5652_s19 + $0xcc] sm:$0xf] }
 0x1c8   : > { %v2378_v5 = vpop.permute.xlu1 %2377  ;;  %v2077_v3 = vsel %vm5807_vm6, %v2075_v56, %v2076_v57  ;;  %v2672_v31 = vshll.u32 %v5140_v32, 16  ;;  %v2690_v56 = vshrl.u32 %v5142_v42, 16  ;;  %v5167_v32 = vld [vmem:[%s5652_s19 + $0xd4] sm:$0x1] }
 0x1c9   : > { %2451 = vst.msk [vmem:[#allocation2 + $0x5c] sm:$0xf] %vm2427_vm14, %v2378_v5  ;;  %v2376_v10 = vpop.permute.xlu0 %2375  ;;  %v2067_v50 = vsel %vm5807_vm6, %v5078_v35, %v2066_v23  ;;  %v5162_v23 = vld [vmem:[%s5652_s19 + $0xc0] sm:$0xf] }
 0x1ca   : > { %2450 = vst.msk [vmem:[#allocation2 + $0x58] sm:$0xf] %vm2427_vm14, %v2376_v10  ;;  %1823 = vrot.lane.b32.xlu1 %v1580_v58, %s5601_s23  ;;  %v2129_v58 = vrot.slane %v5070_v47, 5  ;;  %v2845_v36 = vshrl.u32 %v5162_v23, 16  ;;  %v2848_v37 = vshll.u32 %v5162_v23, 16 }
 0x1cb   : > { %1821 = vrot.lane.b32.xlu0 %v1570_v59, %s5601_s23 }
 0x1cc   : > { %v2903_v15 = vpop.permute.xlu1 %2902  ;;  %v2131_v5 = vrot.slane %v2129_v58, 4  ;;  %v2847_v52 = vrot.slane %v2845_v36, 4  ;;  %v2850_v47 = vrot.slane %v2848_v37, 5 }
 0x1cd   : > { %2994 = vst.msk [vmem:[#allocation2 + $0x14] sm:$0xf] %vm2988_vm15, %v2903_v15  ;;  %v2901_v8 = vpop.permute.xlu0 %2900  ;;  %v2130_v15 = vsel %vm5807_vm6, %v5087_v4, %v2129_v58  ;;  %v2677_v58 = vshrl.u32 %v5141_v48, 16  ;;  %v5118_v4 = vld [vmem:[%s5652_s19 + $0xcc] sm:$0xf] }
 0x1ce   : > { %2993 = vst.msk [vmem:[#allocation2 + $0x10] sm:$0xf] %vm2988_vm15, %v2901_v8  ;;  %1855 = vrot.lane.b32.xlu1 %v1772_v63, %s5601_s23  ;;  %v5138_v63 = vld [vmem:[%s5652_s19 + $0x60] sm:$0xf]  ;;  %v2133_v11 = vsel %vm5807_vm6, %v2131_v5, %v2132_v55  ;;  %v5101_v8 = vld [vmem:[%s5652_s19 + $0x64] sm:$0xf] }
 0x1cf   : > { %1853 = vrot.lane.b32.xlu0 %v1762_v16, %s5601_s23  ;;  %v2653_v18 = vshrl.u32 %v5138_v63, 16  ;;  %v2656_v19 = vshll.u32 %v5138_v63, 16 }
 0x1d0   : > { %v2935_v24 = vpop.permute.xlu1 %2934 }
 0x1d1   : > { %3010 = vst.msk [vmem:[#allocation2 + $0x54] sm:$0xf] %vm2988_vm15, %v2935_v24  ;;  %v2933_v30 = vpop.permute.xlu0 %2932  ;;  %v2655_v29 = vrot.slane %v2653_v18, 4 }
 0x1d2   : > { %3009 = vst.msk [vmem:[#allocation2 + $0x50] sm:$0xf] %vm2988_vm15, %v2933_v30  ;;  %1827 = vrot.lane.b32.xlu1 %v1604_v20, %s5601_s23  ;;  %v6964_v20 = vrot.slane %v2662_v12, 5  ;;  %v2658_v30 = vrot.slane %v2656_v19, 5 }
 0x1d3   : > { %1825 = vrot.lane.b32.xlu0 %v1594_v25, %s5601_s23  ;;  %v5100_v25 = vld [vmem:[%s5652_s19 + $0x60] sm:$0xf] }
 0x1d4   : > { %v2907_v38 = vpop.permute.xlu1 %2906  ;;  %v2659_v46 = vor.u32 %v2658_v30, %v2655_v29 }
 0x1d5   : > { %2996 = vst.msk [vmem:[#allocation2 + $0x1c] sm:$0xf] %vm2988_vm15, %v2907_v38  ;;  %v2905_v43 = vpop.permute.xlu0 %2904  ;;  %v5117_v38 = vld [vmem:[%s5652_s19 + $0xc4] sm:$0xf] }
 0x1d6   : > { %2995 = vst.msk [vmem:[#allocation2 + $0x18] sm:$0xf] %vm2988_vm15, %v2905_v43  ;;  %1859 = vrot.lane.b32.xlu1 %v1796_v33, %s5601_s23  ;;  %v2854_v33 = vshll.u32 %v5163_v22, 16  ;;  %v2660_v5 = vrot.slane %v2659_v46, 4 }
 0x1d7   : > { %1857 = vrot.lane.b32.xlu0 %v1786_v39, %s5601_s23  ;;  %v2669_v39 = vor.u32 %v2668_v21, %v6964_v20 }
 0x1d8   : > { %v2939_v49 = vpop.permute.xlu1 %2938 }
 0x1d9   : > { %3012 = vst.msk [vmem:[#allocation2 + $0x5c] sm:$0xf] %vm2988_vm15, %v2939_v49  ;;  %v2937_v40 = vpop.permute.xlu0 %2936  ;;  %v5102_v49 = vld [vmem:[%s5652_s19 + $0x6c] sm:$0xf] }
 0x1da   : > { %3011 = vst.msk [vmem:[#allocation2 + $0x58] sm:$0xf] %vm2988_vm15, %v2937_v40  ;;  %2160 = vrot.lane.b32.xlu1 %v2070_v45, %s5602_s24  ;;  %v5103_v45 = vld [vmem:[%s5652_s19 + $0x70] sm:$0xf]  ;;  %v2670_v40 = vrot.slane %v2669_v39, 4 }
 0x1db   : > { %2158 = vrot.lane.b32.xlu0 %v2067_v50, %s5602_s24  ;;  %v6985_v50 = vrot.slane %v2854_v33, 5 }
 0x1dc   : > { %v3240_v59 = vpop.permute.xlu1 %3239 }
 0x1dd   : > { %3331 = vst.msk [vmem:[#allocation2 + $0x14] sm:$0xf] %vm3325_vm0, %v3240_v59  ;;  %v3238_v1 = vpop.permute.xlu0 %3237  ;;  %v2680_v59 = vshll.u32 %v5141_v48, 16  ;;  %v2861_v55 = vor.u32 %v2860_v51, %v6985_v50 }
 0x1de   : > { %3330 = vst.msk [vmem:[#allocation2 + $0x10] sm:$0xf] %vm3325_vm0, %v3238_v1  ;;  %2192 = vrot.lane.b32.xlu1 %v2126_v54, %s5602_s24  ;;  %v2686_v54 = vshll.u32 %v5142_v42, 16  ;;  %v2674_v1 = vrot.slane %v2672_v31, 5 }
 0x1df   : > { %2190 = vrot.lane.b32.xlu0 %v2123_v60, %s5602_s24  ;;  %v5166_v60 = vld [vmem:[%s5652_s19 + $0xd0] sm:$0xf]  ;;  %v2862_v21 = vrot.slane %v2861_v55, 4  ;;  %v5210_v55 = vld [vmem:[%s5652_s19 + $0xc0] sm:$0xe] }
 0x1e0   : > { %v3272_v6 = vpop.permute.xlu1 %3271  ;;  %v7000_v9 = vrot.slane %v2686_v54, 5  ;;  %v2878_v63 = vshll.u32 %v5166_v60, 16  ;;  %v2675_v19 = vsel %vm5663_vm2, %v2670_v40, %v2674_v1  ;;  %v5188_v40 = vld [vmem:[%s5652_s19 + $0x68] sm:$0x1] }
 0x1e1   : > { %3347 = vst.msk [vmem:[#allocation2 + $0x54] sm:$0xf] %vm3325_vm0, %v3272_v6  ;;  %v3270_v10 = vpop.permute.xlu0 %3269  ;;  %v2864_v6 = vshll.u32 %v5164_v53, 16  ;;  %v5211_v53 = vld [vmem:[%s5652_s19 + $0xc4] sm:$0xf] }
 0x1e2   : > { %3346 = vst.msk [vmem:[#allocation2 + $0x50] sm:$0xf] %vm3325_vm0, %v3270_v10  ;;  %2164 = vrot.lane.b32.xlu1 %v2077_v3, %s5602_s24  ;;  %v5119_v3 = vld [vmem:[%s5652_s19 + $0xd0] sm:$0xf]  ;;  %v2692_v10 = vrot.slane %v2690_v56, 4 }
 0x1e3   : > { %2162 = vrot.lane.b32.xlu0 %v2074_v7, %s5602_s24  ;;  %v2851_v7 = vor.u32 %v2850_v47, %v2847_v52  ;;  %v2866_v22 = vrot.slane %v2864_v6, 5  ;;  %v5186_v56 = vld [vmem:[%s5652_s19 + $0x60] sm:$0xe] }
 0x1e4   : > { %v3244_v14 = vpop.permute.xlu1 %3243  ;;  %v2693_v23 = vor.u32 %v2692_v10, %v7000_v9  ;;  %v5222_v1 = vrot.slane %v5186_v56, 9 }
 0x1e5   : > { %3333 = vst.msk [vmem:[#allocation2 + $0x1c] sm:$0xf] %vm3325_vm0, %v3244_v14  ;;  %v3242_v16 = vpop.permute.xlu0 %3241  ;;  %v5561_v17 = vld [vmem:[#allocation2 + $0x10] sm:$0xff]   ;;  %v2679_v14 = vrot.slane %v2677_v58, 4  ;;  %v2852_v29 = vrot.slane %v2851_v7, 4 }
 0x1e6   : > { %3332 = vst.msk [vmem:[#allocation2 + $0x18] sm:$0xf] %vm3325_vm0, %v3242_v16  ;;  %2196 = vrot.lane.b32.xlu1 %v2133_v11, %s5602_s24  ;;  %5488 = vmatprep.mubr.msk.bf16.mxu0 %vm3492_vm1, %v5561_v17  ;;  %v2882_v11 = vshrl.u32 %v5166_v60, 16  ;;  %v2869_v16 = vshrl.u32 %v5165_v2, 16  ;;  %v2872_v17 = vshll.u32 %v5165_v2, 16  ;;  %v2694_v37 = vrot.slane %v2693_v23, 4 }
 0x1e7   : > { %2194 = vrot.lane.b32.xlu0 %v2130_v15, %s5602_s24  ;;  %v2682_v15 = vrot.slane %v2680_v59, 5  ;;  %v2857_v42 = vsel %vm5663_vm2, %v2852_v29, %v6985_v50  ;;  %v3164_v59 = vrot.slane %v5188_v40, 5  ;;  %v3217_v60 = vrot.slane %v5211_v53, 5  ;;  %v5212_v2 = vld [vmem:[%s5652_s19 + $0xc8] sm:$0x1] }
 0x1e8   : > { %v3276_v24 = vpop.permute.xlu1 %3275  ;;  %v2871_v33 = vrot.slane %v2869_v16, 4  ;;  %v2874_v34 = vrot.slane %v2872_v17, 5  ;;  %v3220_v7 = vrot.slane %v5212_v2, 5 }
 0x1e9   : > { %3349 = vst.msk [vmem:[#allocation2 + $0x5c] sm:$0xf] %vm3325_vm0, %v3276_v24  ;;  %v3274_v26 = vpop.permute.xlu0 %3273  ;;  %v5562_v28 = vld [vmem:[#allocation2 + $0x50] sm:$0xff]   ;;  %v2696_v24 = vshll.u32 %v5143_v13, 16  ;;  %v2683_v30 = vor.u32 %v2682_v15, %v2679_v14  ;;  %v3219_v6 = vrot.slane %v3217_v60, 4 }
 0x1ea   : > { %3348 = vst.msk [vmem:[#allocation2 + $0x58] sm:$0xf] %vm3325_vm0, %v3274_v26  ;;  %2357 = vrot.lane.b32.xlu1 %v5101_v8, %s5603_s25  ;;  %5504 = vmatprep.mubr.msk.bf16.mxu1 %vm3492_vm1, %v5562_v28  ;;  %v2665_v8 = vsel %vm5663_vm2, %v2660_v5, %v6964_v20  ;;  %v2884_v26 = vrot.slane %v2882_v11, 4  ;;  %v2867_v20 = vsel %vm5663_vm2, %v2862_v21, %v2866_v22  ;;  %v5191_v11 = vld [vmem:[%s5652_s19 + $0x74] sm:$0x1] }
 0x1eb   : > { %2355 = vrot.lane.b32.xlu0 %v5100_v25, %s5603_s25  ;;  %v2880_v25 = vrot.slane %v2878_v63, 5  ;;  %v5230_v63 = vrot.slane %v5210_v55, 9  ;;  %v5189_v14 = vld [vmem:[%s5652_s19 + $0x6c] sm:$0xe]  ;;  %v3221_v15 = vsel %vm5807_vm6, %v3219_v6, %v3220_v7  ;;  %v3171_v17 = vrot.slane %v5191_v11, 5 }
 0x1ec   : > { %v1816_v35 = vpop.permute.xlu1 %1815  ;;  %v5223_v21 = vrot.slane %v5189_v14, 9  ;;  %v5215_v22 = vld [vmem:[%s5652_s19 + $0xd4] sm:$0x1]  ;;  %v5607_v11 = vmov 1983009808  }
 0x1ed   : > { %1903 = vst.msk [vmem:[#allocation2 + $0x24] sm:$0xf] %vm1893_vm12, %v1816_v35  ;;  %v1814_v43 = vpop.permute.xlu0 %1813  ;;  %v5563_v44 = vld [vmem:[#allocation2 + $0x18] sm:$0xff]   ;;  %v2885_v39 = vor.u32 %v2884_v26, %v2880_v25  ;;  %v2888_v35 = vshll.u32 %v5167_v32, 16 }
 0x1ee   : > { %1902 = vst.msk [vmem:[#allocation2 + $0x20] sm:$0xf] %vm1893_vm12, %v1814_v43  ;;  %2389 = vrot.lane.b32.xlu1 %v5117_v38, %s5603_s25  ;;  %5489 = vmatmul.mubr.msk.bf16.gmra.mxu0 %vm3492_vm1, %v5563_v44  ;;  %v2698_v38 = vrot.slane %v2696_v24, 5  ;;  %v2684_v43 = vrot.slane %v2683_v30, 4  ;;  %v2875_v44 = vor.u32 %v2874_v34, %v2871_v33  ;;  %v5213_v24 = vld [vmem:[%s5652_s19 + $0xcc] sm:$0xe] }
 0x1ef   : > { %2387 = vrot.lane.b32.xlu0 %v5116_v41, %s5603_s25  ;;  %v2886_v48 = vrot.slane %v2885_v39, 4  ;;  %v5231_v32 = vrot.slane %v5213_v24, 9 }
 0x1f0   : > { %v1848_v57 = vpop.permute.xlu1 %1847  ;;  %v2699_v46 = vsel %vm5663_vm2, %v2694_v37, %v2698_v38  ;;  %v2689_v52 = vsel %vm5663_vm2, %v2684_v43, %v7000_v9  ;;  %v2876_v47 = vrot.slane %v2875_v44, 4 }
 0x1f1   : > { %1919 = vst.msk [vmem:[#allocation2 + $0x64] sm:$0xf] %vm1893_vm12, %v1848_v57  ;;  %v1846_v61 = vpop.permute.xlu0 %1845  ;;  %v5564_v0 = vld [vmem:[#allocation2 + $0x58] sm:$0xff]  }
 0x1f2   : > { %1918 = vst.msk [vmem:[#allocation2 + $0x60] sm:$0xf] %vm1893_vm12, %v1846_v61  ;;  %2361 = vrot.lane.b32.xlu1 %v5103_v45, %s5603_s25  ;;  %5505 = vmatmul.mubr.msk.bf16.gmra.mxu1 %vm3492_vm1, %v5564_v0  ;;  %v5187_v45 = vld [vmem:[%s5652_s19 + $0x64] sm:$0xf]  ;;  %v2881_v0 = vsel %vm5663_vm2, %v2876_v47, %v2880_v25 }
 0x1f3   : > { %2359 = vrot.lane.b32.xlu0 %v5102_v49, %s5603_s25  ;;  %v2890_v49 = vrot.slane %v2888_v35, 5  ;;  %v3161_v50 = vrot.slane %v5187_v45, 5 }
 0x1f4   : > { %v1820_v12 = vpop.permute.xlu1 %1819 }
 0x1f5   : > { %1905 = vst.msk [vmem:[#allocation2 + $0x2c] sm:$0xf] %vm1893_vm12, %v1820_v12  ;;  %v1818_v18 = vpop.permute.xlu0 %1817  ;;  %v2891_v57 = vsel %vm5663_vm2, %v2886_v48, %v2890_v49  ;;  %v3163_v58 = vrot.slane %v3161_v50, 4  ;;  %v3162_v10 = vsel %vm5807_vm6, %v5222_v1, %v3161_v50  ;;  %v5214_v12 = vld [vmem:[%s5652_s19 + $0xd0] sm:$0xf]  ;;  %vm4686_vm2 = vcmask 1041409  }
 0x1f6   : > { %1904 = vst.msk [vmem:[#allocation2 + $0x28] sm:$0xf] %vm1893_vm12, %v1818_v18  ;;  %2393 = vrot.lane.b32.xlu1 %v5119_v3, %s5603_s25  ;;  %v5190_v3 = vld [vmem:[%s5652_s19 + $0x70] sm:$0xf]  ;;  %v3224_v18 = vrot.slane %v5214_v12, 5  ;;  %v3775_v12 = vunpack.c.l.s4 %v5607_v11 }
 0x1f7   : > { %2391 = vrot.lane.b32.xlu0 %v5118_v4, %s5603_s25  ;;  %v3165_v27 = vsel %vm5807_vm6, %v3163_v58, %v3164_v59  ;;  %v3168_v4 = vrot.slane %v5190_v3, 5 }
 0x1f8   : > { %v1852_v28 = vpop.permute.xlu1 %1851  ;;  %v3226_v26 = vrot.slane %v3224_v18, 4 }
 0x1f9   : > { %1921 = vst.msk [vmem:[#allocation2 + $0x6c] sm:$0xf] %vm1893_vm12, %v1852_v28  ;;  %v1850_v36 = vpop.permute.xlu0 %1849  ;;  %v3170_v16 = vrot.slane %v3168_v4, 4  ;;  %v3227_v28 = vrot.slane %v5215_v22, 5  ;;  %v3169_v30 = vsel %vm5807_vm6, %v5223_v21, %v3168_v4 }
 0x1fa   : > { %1920 = vst.msk [vmem:[#allocation2 + $0x68] sm:$0xf] %vm1893_vm12, %v1850_v36  ;;  %2918 = vrot.lane.b32.xlu1 %v2675_v19, %s5604_s26 }
 0x1fb   : > { %2916 = vrot.lane.b32.xlu0 %v2665_v8, %s5604_s26  ;;  %v3218_v8 = vsel %vm5807_vm6, %v5230_v63, %v3217_v60  ;;  %v3172_v25 = vsel %vm5807_vm6, %v3170_v16, %v3171_v17  ;;  %v3228_v34 = vsel %vm5807_vm6, %v3226_v26, %v3227_v28 }
 0x1fc   : > { %v2153_v41 = vpop.permute.xlu1 %2152 }
 0x1fd   : > { %2240 = vst.msk [vmem:[#allocation2 + $0x24] sm:$0xf] %vm2230_vm13, %v2153_v41  ;;  %v2151_v31 = vpop.permute.xlu0 %2150 }
 0x1fe   : > { %2239 = vst.msk [vmem:[#allocation2 + $0x20] sm:$0xf] %vm2230_vm13, %v2151_v31  ;;  %2950 = vrot.lane.b32.xlu1 %v2867_v20, %s5604_s26  ;;  %v3225_v20 = vsel %vm5807_vm6, %v5231_v32, %v3224_v18  ;;  %vm4698_vm6 = vcmask 1045509  }
 0x1ff   : > { %2948 = vrot.lane.b32.xlu0 %v2857_v42, %s5604_s26 }
 0x200   : > { %v2185_v51 = vpop.permute.xlu1 %2184 }
 0x201   : > { %2256 = vst.msk [vmem:[#allocation2 + $0x64] sm:$0xf] %vm2230_vm13, %v2185_v51  ;;  %v2183_v54 = vpop.permute.xlu0 %2182 }
 0x202   : > { %2255 = vst.msk [vmem:[#allocation2 + $0x60] sm:$0xf] %vm2230_vm13, %v2183_v54  ;;  %2922 = vrot.lane.b32.xlu1 %v2699_v46, %s5604_s26 }
 0x203   : > { %2920 = vrot.lane.b32.xlu0 %v2689_v52, %s5604_s26 }
 0x204   : > { %v2157_v61 = vpop.permute.xlu1 %2156 }
 0x205   : > { %2242 = vst.msk [vmem:[#allocation2 + $0x2c] sm:$0xf] %vm2230_vm13, %v2157_v61  ;;  %v2155_v5 = vpop.permute.xlu0 %2154 }
 0x206   : > { %2241 = vst.msk [vmem:[#allocation2 + $0x28] sm:$0xf] %vm2230_vm13, %v2155_v5  ;;  %2954 = vrot.lane.b32.xlu1 %v2891_v57, %s5604_s26 }
 0x207   : > { %2952 = vrot.lane.b32.xlu0 %v2881_v0, %s5604_s26 }
 0x208   : > { %v2189_v9 = vpop.permute.xlu1 %2188 }
 0x209   : > { %2258 = vst.msk [vmem:[#allocation2 + $0x6c] sm:$0xf] %vm2230_vm13, %v2189_v9  ;;  %v2187_v13 = vpop.permute.xlu0 %2186 }
 0x20a   : > { %2257 = vst.msk [vmem:[#allocation2 + $0x68] sm:$0xf] %vm2230_vm13, %v2187_v13  ;;  %3255 = vrot.lane.b32.xlu1 %v3165_v27, %s5606_s4  ;;  %v3777_v13 = vlaneseq }
 0x20b   : > { %3253 = vrot.lane.b32.xlu0 %v3162_v10, %s5606_s4 }
 0x20c   : > { %v2350_v19 = vpop.permute.xlu1 %2349 }
 0x20d   : > { %2437 = vst.msk [vmem:[#allocation2 + $0x24] sm:$0xf] %vm2427_vm14, %v2350_v19  ;;  %v2348_v23 = vpop.permute.xlu0 %2347  ;;  %v3776_v19 = vunpack.c.0.s8 %v3775_v12 }
 0x20e   : > { %2436 = vst.msk [vmem:[#allocation2 + $0x20] sm:$0xf] %vm2427_vm14, %v2348_v23  ;;  %3287 = vrot.lane.b32.xlu1 %v3221_v15, %s5606_s4  ;;  %v7130_v15 = vld [vmem:[%s7341_s2] ss:$0 sm:$0xff] }
 0x20f   : > { %3285 = vrot.lane.b32.xlu0 %v3218_v8, %s5606_s4  ;;  %v3778_v8 = vshrl.u32 %v3777_v13, 7 }
 0x210   : > { %v2382_v29 = vpop.permute.xlu1 %2381 }
 0x211   : > { %2453 = vst.msk [vmem:[#allocation2 + $0x64] sm:$0xf] %vm2427_vm14, %v2382_v29  ;;  %v2380_v33 = vpop.permute.xlu0 %2379  ;;  %v7137_v29 = vsub.s32 %v3776_v19, %v3778_v8 }
 0x212   : > { %2452 = vst.msk [vmem:[#allocation2 + $0x60] sm:$0xf] %vm2427_vm14, %v2380_v33  ;;  %3259 = vrot.lane.b32.xlu1 %v3172_v25, %s5606_s4 }
 0x213   : > { %3257 = vrot.lane.b32.xlu0 %v3169_v30, %s5606_s4 }
 0x214   : > { %v2354_v36 = vpop.permute.xlu1 %2353 }
 0x215   : > { %2439 = vst.msk [vmem:[#allocation2 + $0x2c] sm:$0xf] %vm2427_vm14, %v2354_v36  ;;  %v2352_v37 = vpop.permute.xlu0 %2351 }
 0x216   : > { %2438 = vst.msk [vmem:[#allocation2 + $0x28] sm:$0xf] %vm2427_vm14, %v2352_v37  ;;  %3291 = vrot.lane.b32.xlu1 %v3228_v34, %s5606_s4 }
 0x217   : > { %3289 = vrot.lane.b32.xlu0 %v3225_v20, %s5606_s4 }
 0x218   : > { %v2386_v38 = vpop.permute.xlu1 %2385 }
 0x219   : > { %2455 = vst.msk [vmem:[#allocation2 + $0x6c] sm:$0xf] %vm2427_vm14, %v2386_v38  ;;  %v2384_v39 = vpop.permute.xlu0 %2383 }
 0x21a   : > { %2454 = vst.msk [vmem:[#allocation2 + $0x68] sm:$0xf] %vm2427_vm14, %v2384_v39 }
 0x21c   : > { %v2911_v35 = vpop.permute.xlu1 %2910 }
 0x21d   : > { %2998 = vst.msk [vmem:[#allocation2 + $0x24] sm:$0xf] %vm2988_vm15, %v2911_v35  ;;  %v2909_v62 = vpop.permute.xlu0 %2908 }
 0x21e   : > { %2997 = vst.msk [vmem:[#allocation2 + $0x20] sm:$0xf] %vm2988_vm15, %v2909_v62 }
 0x220   : > { %v2943_v41 = vpop.permute.xlu1 %2942 }
 0x221   : > { %3014 = vst.msk [vmem:[#allocation2 + $0x64] sm:$0xf] %vm2988_vm15, %v2943_v41  ;;  %v2941_v42 = vpop.permute.xlu0 %2940 }
 0x222   : > { %3013 = vst.msk [vmem:[#allocation2 + $0x60] sm:$0xf] %vm2988_vm15, %v2941_v42 }
 0x224   : > { %v2915_v43 = vpop.permute.xlu1 %2914 }
 0x225   : > { %3000 = vst.msk [vmem:[#allocation2 + $0x2c] sm:$0xf] %vm2988_vm15, %v2915_v43  ;;  %v2913_v44 = vpop.permute.xlu0 %2912 }
 0x226   : > { %2999 = vst.msk [vmem:[#allocation2 + $0x28] sm:$0xf] %vm2988_vm15, %v2913_v44 }
 0x228   : > { %v2947_v45 = vpop.permute.xlu1 %2946 }
 0x229   : > { %3016 = vst.msk [vmem:[#allocation2 + $0x6c] sm:$0xf] %vm2988_vm15, %v2947_v45  ;;  %v2945_v31 = vpop.permute.xlu0 %2944 }
 0x22a   : > { %3015 = vst.msk [vmem:[#allocation2 + $0x68] sm:$0xf] %vm2988_vm15, %v2945_v31 }
 0x22c   : > { %v3248_v46 = vpop.permute.xlu1 %3247 }
 0x22d   : > { %3335 = vst.msk [vmem:[#allocation2 + $0x24] sm:$0xf] %vm3325_vm0, %v3248_v46  ;;  %v3246_v48 = vpop.permute.xlu0 %3245 }
 0x22e   : > { %3334 = vst.msk [vmem:[#allocation2 + $0x20] sm:$0xf] %vm3325_vm0, %v3246_v48 }
 0x230   : > { %v3280_v49 = vpop.permute.xlu1 %3279 }
 0x231   : > { %3351 = vst.msk [vmem:[#allocation2 + $0x64] sm:$0xf] %vm3325_vm0, %v3280_v49  ;;  %v3278_v50 = vpop.permute.xlu0 %3277 }
 0x232   : > { %3350 = vst.msk [vmem:[#allocation2 + $0x60] sm:$0xf] %vm3325_vm0, %v3278_v50 }
 0x234   : > { %v3252_v51 = vpop.permute.xlu1 %3251 }
 0x235   : > { %3337 = vst.msk [vmem:[#allocation2 + $0x2c] sm:$0xf] %vm3325_vm0, %v3252_v51  ;;  %v3250_v52 = vpop.permute.xlu0 %3249  ;;  %v5565_v47 = vld [vmem:[#allocation2 + $0x20] sm:$0xff]  }
 0x236   : > { %3336 = vst.msk [vmem:[#allocation2 + $0x28] sm:$0xf] %vm3325_vm0, %v3250_v52  ;;  %5492 = vmatprep.mubr.msk.bf16.mxu0 %vm3492_vm1, %v5565_v47 }
 0x238   : > { %v3284_v40 = vpop.permute.xlu1 %3283 }
 0x239   : > { %3353 = vst.msk [vmem:[#allocation2 + $0x6c] sm:$0xf] %vm3325_vm0, %v3284_v40  ;;  %v3282_v53 = vpop.permute.xlu0 %3281  ;;  %v5566_v54 = vld [vmem:[#allocation2 + $0x60] sm:$0xff]  }
 0x23a   : > { %3352 = vst.msk [vmem:[#allocation2 + $0x68] sm:$0xf] %vm3325_vm0, %v3282_v53  ;;  %5508 = vmatprep.mubr.msk.bf16.mxu1 %vm3492_vm1, %v5566_v54 }
 0x23c   : > { %v1824_v56 = vpop.permute.xlu1 %1823 }
 0x23d   : > { %1907 = vst.msk [vmem:[#allocation2 + $0x34] sm:$0xf] %vm1893_vm12, %v1824_v56  ;;  %v1822_v57 = vpop.permute.xlu0 %1821  ;;  %v5567_v58 = vld [vmem:[#allocation2 + $0x28] sm:$0xff]  }
 0x23e   : > { %1906 = vst.msk [vmem:[#allocation2 + $0x30] sm:$0xf] %vm1893_vm12, %v1822_v57  ;;  %5493 = vmatmul.mubr.msk.bf16.gmra.mxu0 %vm3492_vm1, %v5567_v58 }
 0x240   : > { %v1856_v59 = vpop.permute.xlu1 %1855 }
 0x241   : > { %1923 = vst.msk [vmem:[#allocation2 + $0x74] sm:$0xf] %vm1893_vm12, %v1856_v59  ;;  %v1854_v60 = vpop.permute.xlu0 %1853  ;;  %v5568_v61 = vld [vmem:[#allocation2 + $0x68] sm:$0xff]  }
 0x242   : > { %1922 = vst.msk [vmem:[#allocation2 + $0x70] sm:$0xf] %vm1893_vm12, %v1854_v60  ;;  %5509 = vmatmul.mubr.msk.bf16.gmra.mxu1 %vm3492_vm1, %v5568_v61 }
 0x244   : > { %v1828_v0 = vpop.permute.xlu1 %1827 }
 0x245   : > { %1909 = vst.msk [vmem:[#allocation2 + $0x3c] sm:$0xf] %vm1893_vm12, %v1828_v0  ;;  %v1826_v1 = vpop.permute.xlu0 %1825 }
 0x246   : > { %1908 = vst.msk [vmem:[#allocation2 + $0x38] sm:$0xf] %vm1893_vm12, %v1826_v1 }
 0x248   : > { %v1860_v2 = vpop.permute.xlu1 %1859 }
 0x249   : > { %1925 = vst.msk [vmem:[#allocation2 + $0x7c] sm:$0xf] %vm1893_vm12, %v1860_v2  ;;  %v1858_v3 = vpop.permute.xlu0 %1857 }
 0x24a   : > { %1924 = vst.msk [vmem:[#allocation2 + $0x78] sm:$0xf] %vm1893_vm12, %v1858_v3 }
 0x24c   : > { %v2161_v5 = vpop.permute.xlu1 %2160 }
 0x24d   : > { %2244 = vst.msk [vmem:[#allocation2 + $0x34] sm:$0xf] %vm2230_vm13, %v2161_v5  ;;  %v2159_v55 = vpop.permute.xlu0 %2158 }
 0x24e   : > { %2243 = vst.msk [vmem:[#allocation2 + $0x30] sm:$0xf] %vm2230_vm13, %v2159_v55 }
 0x250   : > { %v2193_v27 = vpop.permute.xlu1 %2192 }
 0x251   : > { %2260 = vst.msk [vmem:[#allocation2 + $0x74] sm:$0xf] %vm2230_vm13, %v2193_v27  ;;  %v2191_v6 = vpop.permute.xlu0 %2190 }
 0x252   : > { %2259 = vst.msk [vmem:[#allocation2 + $0x70] sm:$0xf] %vm2230_vm13, %v2191_v6 }
 0x254   : > { %v2165_v7 = vpop.permute.xlu1 %2164 }
 0x255   : > { %2246 = vst.msk [vmem:[#allocation2 + $0x3c] sm:$0xf] %vm2230_vm13, %v2165_v7  ;;  %v2163_v4 = vpop.permute.xlu0 %2162 }
 0x256   : > { %2245 = vst.msk [vmem:[#allocation2 + $0x38] sm:$0xf] %vm2230_vm13, %v2163_v4 }
 0x258   : > { %v2197_v9 = vpop.permute.xlu1 %2196 }
 0x259   : > { %2262 = vst.msk [vmem:[#allocation2 + $0x7c] sm:$0xf] %vm2230_vm13, %v2197_v9  ;;  %v2195_v10 = vpop.permute.xlu0 %2194 }
 0x25a   : > { %2261 = vst.msk [vmem:[#allocation2 + $0x78] sm:$0xf] %vm2230_vm13, %v2195_v10 }
 0x25c   : > { %v2358_v63 = vpop.permute.xlu1 %2357 }
 0x25d   : > { %2441 = vst.msk [vmem:[#allocation2 + $0x34] sm:$0xf] %vm2427_vm14, %v2358_v63  ;;  %v2356_v14 = vpop.permute.xlu0 %2355 }
 0x25e   : > { %2440 = vst.msk [vmem:[#allocation2 + $0x30] sm:$0xf] %vm2427_vm14, %v2356_v14  ;;  %v5486_v16 = vpop.f32.mrf.mxu0 }
 0x25f   : > { %v3591_v17 = vadd.f32 %v5486_v16, %v7130_v15 }
 0x260   : > { %v2390_v18 = vpop.permute.xlu1 %2389  ;;  %v3582_v22 = vpop.f32.mrf.mxu0 }
 0x261   : > { %2457 = vst.msk [vmem:[#allocation2 + $0x74] sm:$0xf] %vm2427_vm14, %v2390_v18  ;;  %v2388_v21 = vpop.permute.xlu0 %2387  ;;  %v3583_v23 = vadd.f32 %v7130_v15, %v3582_v22  ;;  %v3711_v26 = vmax.f32 %v3591_v17, 0.0 }
 0x262   : > { %2456 = vst.msk [vmem:[#allocation2 + $0x70] sm:$0xf] %vm2427_vm14, %v2388_v21  ;;  %v5487_v24 = vpop.f32.mrf.mxu0  ;;  %v5502_v25 = vpop.f32.mrf.mxu1 }
 0x263   : > { %v3709_v28 = vmax.f32 %v3583_v23, 0.0  ;;  %v3594_v30 = vadd.f32 %v5487_v24, %v7130_v15  ;;  %v3655_v33 = vadd.f32 %v5502_v25, %v7130_v15 }
 0x264   : > { %v2362_v32 = vpop.permute.xlu1 %2361  ;;  %v3585_v36 = vpop.f32.mrf.mxu0 }
 0x265   : > { %2443 = vst.msk [vmem:[#allocation2 + $0x3c] sm:$0xf] %vm2427_vm14, %v2362_v32  ;;  %v2360_v34 = vpop.permute.xlu0 %2359  ;;  %v3741_v20 = vmax.f32 %v3709_v28, %v3711_v26  ;;  %v3586_v37 = vadd.f32 %v7130_v15, %v3585_v36  ;;  %v3646_v38 = vpop.f32.mrf.mxu1  ;;  %v3712_v41 = vmax.f32 %v3594_v30, 0.0  ;;  %v3727_v45 = vmax.f32 %v3655_v33, 0.0 }
 0x266   : > { %2442 = vst.msk [vmem:[#allocation2 + $0x38] sm:$0xf] %vm2427_vm14, %v2360_v34  ;;  %v3647_v39 = vadd.f32 %v7130_v15, %v3646_v38 }
 0x267   : > { %v3773_v35 = vcombine.high %v3741_v20, %v3741_v20  ;;  %v3780_v62 = vrot.slane %v3741_v20, %v7137_v29  ;;  %v3710_v42 = vmax.f32 %v3586_v37, 0.0  ;;  %v5503_v43 = vpop.f32.mrf.mxu1 }
 0x268   : > { %v2394_v44 = vpop.permute.xlu1 %2393  ;;  %v3725_v31 = vmax.f32 %v3647_v39, 0.0  ;;  %v7150_v40 = vadd.f32 %v5503_v43, %v7130_v15 }
 0x269   : > { %2459 = vst.msk [vmem:[#allocation2 + $0x7c] sm:$0xf] %vm2427_vm14, %v2394_v44  ;;  %v2392_v46 = vpop.permute.xlu0 %2391  ;;  %v3787_v48 = vrot.slane %v3773_v35, %v7137_v29  ;;  %v3788_v49 = vcombine.high %v3780_v62, %v3780_v62  ;;  %v5267_v50 = vrot.slane %v3780_v62, 9  ;;  %v3742_v51 = vmax.f32 %v3710_v42, %v3712_v41  ;;  %v3649_v52 = vpop.f32.mrf.mxu1 }
 0x26a   : > { %2458 = vst.msk [vmem:[#allocation2 + $0x78] sm:$0xf] %vm2427_vm14, %v2392_v46  ;;  %v3749_v47 = vmax.f32 %v3725_v31, %v3727_v45  ;;  %v7153_v53 = vadd.f32 %v7130_v15, %v3649_v52 }
 0x26b   : > { %v3789_v54 = vcombine.high %v3787_v48, %v3787_v48  ;;  %v5268_v56 = vrot.slane %v3788_v49, 9  ;;  %v5269_v57 = vrot.slane %v3787_v48, 9  ;;  %v4301_v58 = vmax.f32 %v3780_v62, %v5267_v50 }
 0x26c   : > { %v2919_v59 = vpop.permute.xlu1 %2918  ;;  %v3790_v60 = vcombine.high %v3742_v51, %v3742_v51  ;;  %v3797_v61 = vrot.slane %v3742_v51, %v7137_v29  ;;  %v3909_v0 = vcombine.high %v3749_v47, %v3749_v47  ;;  %v7157_v1 = vrot.slane %v3749_v47, %v7137_v29 }
 0x26d   : > { %3002 = vst.msk [vmem:[#allocation2 + $0x34] sm:$0xf] %vm2988_vm15, %v2919_v59  ;;  %v2917_v2 = vpop.permute.xlu0 %2916  ;;  %v5270_v3 = vrot.slane %v3789_v54, 9  ;;  %v4302_v5 = vmax.f32 %v3788_v49, %v5268_v56  ;;  %v4303_v55 = vmax.f32 %v3787_v48, %v5269_v57  ;;  %v5398_v27 = vpack.c.bf16 %v4301_v58, %v4301_v58 }
 0x26e   : > { %3001 = vst.msk [vmem:[#allocation2 + $0x30] sm:$0xf] %vm2988_vm15, %v2917_v2  ;;  %v3804_v6 = vrot.slane %v3790_v60, %v7137_v29  ;;  %v3805_v7 = vcombine.high %v3797_v61, %v3797_v61  ;;  %v5271_v4 = vrot.slane %v3797_v61, 9  ;;  %v3923_v9 = vrot.slane %v3909_v0, %v7137_v29 }
 0x26f   : > { %v4304_v10 = vmax.f32 %v3789_v54, %v5270_v3  ;;  %v5399_v63 = vpack.c.bf16 %v4302_v5, %v4302_v5  ;;  %v5400_v11 = vpack.c.bf16 %v4303_v55, %v4303_v55  ;;  %v4621_v12 = vunpack.c.l.b16 %v5398_v27 }
 0x270   : > { %v2951_v13 = vpop.permute.xlu1 %2950  ;;  %v3806_v14 = vcombine.high %v3804_v6, %v3804_v6  ;;  %v5272_v16 = vrot.slane %v3805_v7, 9  ;;  %v5273_v17 = vrot.slane %v3804_v6, 9  ;;  %v4305_v18 = vmax.f32 %v3797_v61, %v5271_v4 }
 0x271   : > { %3018 = vst.msk [vmem:[#allocation2 + $0x74] sm:$0xf] %vm2988_vm15, %v2951_v13  ;;  %v2949_v19 = vpop.permute.xlu0 %2948  ;;  %v5401_v8 = vpack.c.bf16 %v4304_v10, %v4304_v10  ;;  %v4622_v21 = vunpack.c.l.b16 %v5399_v63  ;;  %v4623_v22 = vunpack.c.l.b16 %v5400_v11  ;;  %v3924_v23 = vcombine.high %v7157_v1, %v7157_v1 }
 0x272   : > { %3017 = vst.msk [vmem:[#allocation2 + $0x70] sm:$0xf] %vm2988_vm15, %v2949_v19  ;;  %v5274_v24 = vrot.slane %v3806_v14, 9  ;;  %v4306_v25 = vmax.f32 %v3805_v7, %v5272_v16  ;;  %v4307_v26 = vmax.f32 %v3804_v6, %v5273_v17  ;;  %v5402_v28 = vpack.c.bf16 %v4305_v18, %v4305_v18 }
 0x273   : > { %v4624_v30 = vunpack.c.l.b16 %v5401_v8  ;;  %v4685_v32 = vrot.slane %v4622_v21, 7  ;;  %v4688_v33 = vrot.slane %v4623_v22, 6  ;;  %v3925_v34 = vcombine.high %v3923_v9, %v3923_v9 }
 0x274   : > { %v2923_v36 = vpop.permute.xlu1 %2922  ;;  %v4308_v20 = vmax.f32 %v3806_v14, %v5274_v24  ;;  %v5403_v37 = vpack.c.bf16 %v4306_v25, %v4306_v25  ;;  %v5404_v38 = vpack.c.bf16 %v4307_v26, %v4307_v26  ;;  %v4625_v39 = vunpack.c.l.b16 %v5402_v28 }
 0x275   : > { %3004 = vst.msk [vmem:[#allocation2 + $0x3c] sm:$0xf] %vm2988_vm15, %v2923_v36  ;;  %v2921_v35 = vpop.permute.xlu0 %2920  ;;  %v4687_v62 = vsel %vm4686_vm2, %v4685_v32, %v4621_v12  ;;  %v4691_v41 = vrot.slane %v4624_v30, 5  ;;  %v5299_v42 = vrot.slane %v7157_v1, 9  ;;  %v5300_v43 = vrot.slane %v3924_v23, 9 }
 0x276   : > { %3003 = vst.msk [vmem:[#allocation2 + $0x38] sm:$0xf] %vm2988_vm15, %v2921_v35  ;;  %v4690_v44 = vsel %vm4689_vm3, %v4688_v33, %v4687_v62  ;;  %v5405_v45 = vpack.c.bf16 %v4308_v20, %v4308_v20  ;;  %v4626_v31 = vunpack.c.l.b16 %v5403_v37  ;;  %v4627_v46 = vunpack.c.l.b16 %v5404_v38 }
 0x277   : > { %v4693_v48 = vsel %vm4692_vm4, %v4691_v41, %v4690_v44  ;;  %v4694_v49 = vrot.slane %v4625_v39, 4  ;;  %v5301_v50 = vrot.slane %v3923_v9, 9  ;;  %v5302_v51 = vrot.slane %v3925_v34, 9 }
 0x278   : > { %v2955_v52 = vpop.permute.xlu1 %2954  ;;  %v4628_v47 = vunpack.c.l.b16 %v5405_v45  ;;  %v4697_v54 = vrot.slane %v4626_v31, 3  ;;  %v4700_v56 = vrot.slane %v4627_v46, 2  ;;  %v4333_v57 = vmax.f32 %v7157_v1, %v5299_v42 }
 0x279   : > { %3020 = vst.msk [vmem:[#allocation2 + $0x7c] sm:$0xf] %vm2988_vm15, %v2955_v52  ;;  %v2953_v58 = vpop.permute.xlu0 %2952  ;;  %v4696_v59 = vsel %vm4695_vm5, %v4694_v49, %v4693_v48  ;;  %v4334_v60 = vmax.f32 %v3924_v23, %v5300_v43  ;;  %v4335_v61 = vmax.f32 %v3923_v9, %v5301_v50  ;;  %v4336_v0 = vmax.f32 %v3925_v34, %v5302_v51 }
 0x27a   : > { %3019 = vst.msk [vmem:[#allocation2 + $0x78] sm:$0xf] %vm2988_vm15, %v2953_v58  ;;  %v4699_v2 = vsel %vm4698_vm6, %v4697_v54, %v4696_v59  ;;  %v4703_v3 = vrot.slane %v4628_v47, 1  ;;  %v3728_v5 = vmax.f32 %v7150_v40, 0.0  ;;  %v3726_v55 = vmax.f32 %v7153_v53, 0.0 }
 0x27b   : > { %v4702_v1 = vsel %vm4701_vm7, %v4700_v56, %v4699_v2  ;;  %v5430_v27 = vpack.c.bf16 %v4333_v57, %v4333_v57  ;;  %v5431_v6 = vpack.c.bf16 %v4334_v60, %v4334_v60  ;;  %v5432_v7 = vpack.c.bf16 %v4335_v61, %v4335_v61 }
 0x27c   : > { %v3256_v4 = vpop.permute.xlu1 %3255  ;;  %v4705_v9 = vsel %vm4704_vm8, %v4703_v3, %v4702_v1  ;;  %v5433_v10 = vpack.c.bf16 %v4336_v0, %v4336_v0  ;;  %v3750_v63 = vmax.f32 %v3726_v55, %v3728_v5 }
 0x27d   : > { %3339 = vst.msk [vmem:[#allocation2 + $0x34] sm:$0xf] %vm3325_vm0, %v3256_v4  ;;  %v3254_v40 = vpop.permute.xlu0 %3253  ;;  %v4804_v53 = vpack.c.b16 %v4705_v9, %v4705_v9  ;;  %v4654_v11 = vunpack.c.l.b16 %v5431_v6  ;;  %v4655_v12 = vunpack.c.l.b16 %v5432_v7  ;;  %v4653_v16 = vunpack.c.l.b16 %v5430_v27 }
 0x27e   : > { %3338 = vst.msk [vmem:[#allocation2 + $0x30] sm:$0xf] %vm3325_vm0, %v3254_v40  ;;  %v3926_v13 = vcombine.high %v3750_v63, %v3750_v63  ;;  %v3933_v14 = vrot.slane %v3750_v63, %v7137_v29  ;;  %v4656_v19 = vunpack.c.l.b16 %v5433_v10 }
 0x27f   : > { %4821 = vst.msk [vmem:[%s7185_s10] sm:$0xf] %vm4820_vm9, %v4804_v53  ;;  %v4748_v17 = vrot.slane %v4654_v11, 7  ;;  %v4750_v24 = vrot.slane %v4655_v12, 6 }
 0x280   : > { %v3288_v18 = vpop.permute.xlu1 %3287  ;;  %v3940_v8 = vrot.slane %v3926_v13, %v7137_v29  ;;  %v3941_v21 = vcombine.high %v3933_v14, %v3933_v14  ;;  %v5303_v22 = vrot.slane %v3933_v14, 9  ;;  %v4752_v34 = vrot.slane %v4656_v19, 5 }
 0x281   : > { %3355 = vst.msk [vmem:[#allocation2 + $0x74] sm:$0xf] %vm3325_vm0, %v3288_v18  ;;  %v3286_v23 = vpop.permute.xlu0 %3285  ;;  %v4749_v25 = vsel %vm4686_vm2, %v4748_v17, %v4653_v16 }
 0x282   : > { %3354 = vst.msk [vmem:[#allocation2 + $0x70] sm:$0xf] %vm3325_vm0, %v3286_v23  ;;  %v3942_v26 = vcombine.high %v3940_v8, %v3940_v8  ;;  %v5304_v28 = vrot.slane %v3941_v21, 9  ;;  %v5305_v30 = vrot.slane %v3940_v8, 9  ;;  %v4337_v32 = vmax.f32 %v3933_v14, %v5303_v22 }
 0x283   : > { %v4751_v35 = vsel %vm4689_vm3, %v4750_v24, %v4749_v25 }
 0x284   : > { %v3260_v33 = vpop.permute.xlu1 %3259  ;;  %v5306_v36 = vrot.slane %v3942_v26, 9  ;;  %v4338_v20 = vmax.f32 %v3941_v21, %v5304_v28  ;;  %v4339_v37 = vmax.f32 %v3940_v8, %v5305_v30  ;;  %v5434_v62 = vpack.c.bf16 %v4337_v32, %v4337_v32 }
 0x285   : > { %3341 = vst.msk [vmem:[#allocation2 + $0x3c] sm:$0xf] %vm3325_vm0, %v3260_v33  ;;  %v3258_v38 = vpop.permute.xlu0 %3257  ;;  %v5569_v39 = vld [vmem:[#allocation2 + $0x30] sm:$0xff]   ;;  %v4753_v49 = vsel %vm4692_vm4, %v4752_v34, %v4751_v35 }
 0x286   : > { %3340 = vst.msk [vmem:[#allocation2 + $0x38] sm:$0xf] %vm3325_vm0, %v3258_v38  ;;  %v4340_v41 = vmax.f32 %v3942_v26, %v5306_v36  ;;  %v5435_v42 = vpack.c.bf16 %v4338_v20, %v4338_v20  ;;  %v5436_v43 = vpack.c.bf16 %v4339_v37, %v4339_v37  ;;  %5496 = vmatprep.mubr.msk.bf16.mxu0 %vm3492_vm1, %v5569_v39  ;;  %v4657_v44 = vunpack.c.l.b16 %v5434_v62 }
 0x288   : > { %v3292_v45 = vpop.permute.xlu1 %3291  ;;  %v5437_v31 = vpack.c.bf16 %v4340_v41, %v4340_v41  ;;  %v4658_v46 = vunpack.c.l.b16 %v5435_v42  ;;  %v4659_v48 = vunpack.c.l.b16 %v5436_v43  ;;  %v4754_v52 = vrot.slane %v4657_v44, 4 }
 0x289   : > { %3357 = vst.msk [vmem:[#allocation2 + $0x7c] sm:$0xf] %vm3325_vm0, %v3292_v45  ;;  %v3290_v50 = vpop.permute.xlu0 %3289  ;;  %v5570_v51 = vld [vmem:[#allocation2 + $0x70] sm:$0xff]  }
 0x28a   : > { %3356 = vst.msk [vmem:[#allocation2 + $0x78] sm:$0xf] %vm3325_vm0, %v3290_v50  ;;  %v4660_v47 = vunpack.c.l.b16 %v5437_v31  ;;  %v4756_v54 = vrot.slane %v4658_v46, 3  ;;  %v4758_v56 = vrot.slane %v4659_v48, 2  ;;  %5512 = vmatprep.mubr.msk.bf16.mxu1 %vm3492_vm1, %v5570_v51  ;;  %v4755_v57 = vsel %vm4695_vm5, %v4754_v52, %v4753_v49 }
 0x28c   : > { %v4757_v58 = vsel %vm4698_vm6, %v4756_v54, %v4755_v57  ;;  %v4760_v59 = vrot.slane %v4660_v47, 1 }
 0x28d   : > { %v5571_v60 = vld [vmem:[#allocation2 + $0x38] sm:$0xff]   ;;  %v4759_v61 = vsel %vm4701_vm7, %v4758_v56, %v4757_v58 }
 0x28e   : > { %v4761_v0 = vsel %vm4704_vm8, %v4760_v59, %v4759_v61  ;;  %5497 = vmatmul.mubr.msk.bf16.gmra.mxu0 %vm3492_vm1, %v5571_v60 }
 0x28f   : > { %v4808_v2 = vpack.c.b16 %v4761_v0, %v4761_v0 }
 0x291   : > { %v5572_v3 = vld [vmem:[#allocation2 + $0x78] sm:$0xff]   ;;  %4825 = vst.msk [vmem:[%s7185_s10 + $0x10] sm:$0xf] %vm4820_vm9, %v4808_v2 }
 0x292   : > { %5513 = vmatmul.mubr.msk.bf16.gmra.mxu1 %vm3492_vm1, %v5572_v3 }
 0x2ae   : > { %v5490_v5 = vpop.f32.mrf.mxu0 }
 0x2af   : > { %v3607_v55 = vadd.f32 %v5490_v5, %v7130_v15 }
 0x2b0   : > { %v3598_v1 = vpop.f32.mrf.mxu0 }
 0x2b1   : > { %v3599_v27 = vadd.f32 %v7130_v15, %v3598_v1  ;;  %v3715_v4 = vmax.f32 %v3607_v55, 0.0 }
 0x2b2   : > { %v5491_v6 = vpop.f32.mrf.mxu0  ;;  %v5506_v7 = vpop.f32.mrf.mxu1 }
 0x2b3   : > { %v3713_v9 = vmax.f32 %v3599_v27, 0.0  ;;  %v3610_v10 = vadd.f32 %v5491_v6, %v7130_v15  ;;  %v3671_v63 = vadd.f32 %v5506_v7, %v7130_v15 }
 0x2b4   : > { %v3601_v40 = vpop.f32.mrf.mxu0  ;;  %v3662_v53 = vpop.f32.mrf.mxu1 }
 0x2b5   : > { %v3743_v11 = vmax.f32 %v3713_v9, %v3715_v4  ;;  %v3602_v12 = vadd.f32 %v7130_v15, %v3601_v40  ;;  %v3663_v13 = vadd.f32 %v7130_v15, %v3662_v53  ;;  %v3716_v18 = vmax.f32 %v3610_v10, 0.0 }
 0x2b6   : > { %v5507_v14 = vpop.f32.mrf.mxu1  ;;  %v3731_v8 = vmax.f32 %v3671_v63, 0.0 }
 0x2b7   : > { %v3807_v16 = vcombine.high %v3743_v11, %v3743_v11  ;;  %v3814_v17 = vrot.slane %v3743_v11, %v7137_v29  ;;  %v3714_v19 = vmax.f32 %v3602_v12, 0.0  ;;  %v3729_v21 = vmax.f32 %v3663_v13, 0.0 }
 0x2b8   : > { %v3665_v22 = vpop.f32.mrf.mxu1  ;;  %v7222_v30 = vadd.f32 %v5507_v14, %v7130_v15 }
 0x2b9   : > { %v3821_v23 = vrot.slane %v3807_v16, %v7137_v29  ;;  %v3822_v24 = vcombine.high %v3814_v17, %v3814_v17  ;;  %v5275_v25 = vrot.slane %v3814_v17, 9  ;;  %v3744_v26 = vmax.f32 %v3714_v19, %v3716_v18 }
 0x2ba   : > { %v3751_v28 = vmax.f32 %v3729_v21, %v3731_v8  ;;  %v7225_v32 = vadd.f32 %v7130_v15, %v3665_v22 }
 0x2bb   : > { %v3823_v33 = vcombine.high %v3821_v23, %v3821_v23  ;;  %v5276_v34 = vrot.slane %v3822_v24, 9  ;;  %v5277_v36 = vrot.slane %v3821_v23, 9  ;;  %v4309_v20 = vmax.f32 %v3814_v17, %v5275_v25 }
 0x2bc   : > { %v3824_v37 = vcombine.high %v3744_v26, %v3744_v26  ;;  %v3831_v38 = vrot.slane %v3744_v26, %v7137_v29  ;;  %v3943_v39 = vcombine.high %v3751_v28, %v3751_v28  ;;  %v3950_v35 = vrot.slane %v3751_v28, %v7137_v29 }
 0x2bd   : > { %v5278_v62 = vrot.slane %v3823_v33, 9  ;;  %v4310_v41 = vmax.f32 %v3822_v24, %v5276_v34  ;;  %v4311_v42 = vmax.f32 %v3821_v23, %v5277_v36  ;;  %v5406_v43 = vpack.c.bf16 %v4309_v20, %v4309_v20 }
 0x2be   : > { %v3838_v44 = vrot.slane %v3824_v37, %v7137_v29  ;;  %v3839_v45 = vcombine.high %v3831_v38, %v3831_v38  ;;  %v5279_v31 = vrot.slane %v3831_v38, 9  ;;  %v3957_v46 = vrot.slane %v3943_v39, %v7137_v29 }
 0x2bf   : > { %v4312_v48 = vmax.f32 %v3823_v33, %v5278_v62  ;;  %v5407_v49 = vpack.c.bf16 %v4310_v41, %v4310_v41  ;;  %v5408_v50 = vpack.c.bf16 %v4311_v42, %v4311_v42  ;;  %v4629_v51 = vunpack.c.l.b16 %v5406_v43 }
 0x2c0   : > { %v3840_v52 = vcombine.high %v3838_v44, %v3838_v44  ;;  %v5280_v47 = vrot.slane %v3839_v45, 9  ;;  %v5281_v54 = vrot.slane %v3838_v44, 9  ;;  %v4313_v56 = vmax.f32 %v3831_v38, %v5279_v31 }
 0x2c1   : > { %v5409_v57 = vpack.c.bf16 %v4312_v48, %v4312_v48  ;;  %v4630_v58 = vunpack.c.l.b16 %v5407_v49  ;;  %v4631_v59 = vunpack.c.l.b16 %v5408_v50  ;;  %v3958_v60 = vcombine.high %v3950_v35, %v3950_v35 }
 0x2c2   : > { %v5282_v61 = vrot.slane %v3840_v52, 9  ;;  %v4314_v0 = vmax.f32 %v3839_v45, %v5280_v47  ;;  %v4315_v2 = vmax.f32 %v3838_v44, %v5281_v54  ;;  %v5410_v3 = vpack.c.bf16 %v4313_v56, %v4313_v56 }
 0x2c3   : > { %v4632_v5 = vunpack.c.l.b16 %v5409_v57  ;;  %v4706_v55 = vrot.slane %v4630_v58, 7  ;;  %v4708_v1 = vrot.slane %v4631_v59, 6  ;;  %v3959_v27 = vcombine.high %v3957_v46, %v3957_v46 }
 0x2c4   : > { %v4316_v6 = vmax.f32 %v3840_v52, %v5282_v61  ;;  %v5411_v7 = vpack.c.bf16 %v4314_v0, %v4314_v0  ;;  %v5412_v4 = vpack.c.bf16 %v4315_v2, %v4315_v2  ;;  %v4633_v9 = vunpack.c.l.b16 %v5410_v3 }
 0x2c5   : > { %v4707_v10 = vsel %vm4686_vm2, %v4706_v55, %v4629_v51  ;;  %v4710_v63 = vrot.slane %v4632_v5, 5  ;;  %v5307_v40 = vrot.slane %v3950_v35, 9  ;;  %v5308_v53 = vrot.slane %v3958_v60, 9 }
 0x2c6   : > { %v4709_v11 = vsel %vm4689_vm3, %v4708_v1, %v4707_v10  ;;  %v5413_v12 = vpack.c.bf16 %v4316_v6, %v4316_v6  ;;  %v4634_v13 = vunpack.c.l.b16 %v5411_v7  ;;  %v4635_v14 = vunpack.c.l.b16 %v5412_v4 }
 0x2c7   : > { %v4711_v16 = vsel %vm4692_vm4, %v4710_v63, %v4709_v11  ;;  %v4712_v17 = vrot.slane %v4633_v9, 4  ;;  %v5309_v18 = vrot.slane %v3957_v46, 9  ;;  %v5310_v19 = vrot.slane %v3959_v27, 9 }
 0x2c8   : > { %v4636_v8 = vunpack.c.l.b16 %v5413_v12  ;;  %v4714_v21 = vrot.slane %v4634_v13, 3  ;;  %v4716_v22 = vrot.slane %v4635_v14, 2  ;;  %v4341_v23 = vmax.f32 %v3950_v35, %v5307_v40 }
 0x2c9   : > { %v4713_v24 = vsel %vm4695_vm5, %v4712_v17, %v4711_v16  ;;  %v4342_v25 = vmax.f32 %v3958_v60, %v5308_v53  ;;  %v4343_v26 = vmax.f32 %v3957_v46, %v5309_v18  ;;  %v4344_v28 = vmax.f32 %v3959_v27, %v5310_v19 }
 0x2ca   : > { %v4715_v33 = vsel %vm4698_vm6, %v4714_v21, %v4713_v24  ;;  %v4718_v34 = vrot.slane %v4636_v8, 1  ;;  %v3732_v36 = vmax.f32 %v7222_v30, 0.0  ;;  %v3730_v20 = vmax.f32 %v7225_v32, 0.0 }
 0x2cb   : > { %v4717_v37 = vsel %vm4701_vm7, %v4716_v22, %v4715_v33  ;;  %v5438_v38 = vpack.c.bf16 %v4341_v23, %v4341_v23  ;;  %v5439_v39 = vpack.c.bf16 %v4342_v25, %v4342_v25  ;;  %v5440_v62 = vpack.c.bf16 %v4343_v26, %v4343_v26 }
 0x2cc   : > { %v4719_v35 = vsel %vm4704_vm8, %v4718_v34, %v4717_v37  ;;  %v5441_v41 = vpack.c.bf16 %v4344_v28, %v4344_v28  ;;  %v3752_v42 = vmax.f32 %v3730_v20, %v3732_v36 }
 0x2cd   : > { %v4805_v43 = vpack.c.b16 %v4719_v35, %v4719_v35  ;;  %v4662_v44 = vunpack.c.l.b16 %v5439_v39  ;;  %v4663_v45 = vunpack.c.l.b16 %v5440_v62  ;;  %v4661_v30 = vunpack.c.l.b16 %v5438_v38 }
 0x2ce   : > { %v3960_v31 = vcombine.high %v3752_v42, %v3752_v42  ;;  %v3967_v46 = vrot.slane %v3752_v42, %v7137_v29  ;;  %v4664_v32 = vunpack.c.l.b16 %v5441_v41 }
 0x2cf   : > { %4822 = vst.msk [vmem:[%s7185_s10 + $0x4] sm:$0xf] %vm4820_vm9, %v4805_v43  ;;  %v4762_v48 = vrot.slane %v4662_v44, 7  ;;  %v4764_v52 = vrot.slane %v4663_v45, 6 }
 0x2d0   : > { %v3974_v49 = vrot.slane %v3960_v31, %v7137_v29  ;;  %v3975_v50 = vcombine.high %v3967_v46, %v3967_v46  ;;  %v5311_v51 = vrot.slane %v3967_v46, 9  ;;  %v4766_v59 = vrot.slane %v4664_v32, 5 }
 0x2d1   : > { %v4763_v47 = vsel %vm4686_vm2, %v4762_v48, %v4661_v30 }
 0x2d2   : > { %v3976_v54 = vcombine.high %v3974_v49, %v3974_v49  ;;  %v5312_v56 = vrot.slane %v3975_v50, 9  ;;  %v5313_v57 = vrot.slane %v3974_v49, 9  ;;  %v4345_v58 = vmax.f32 %v3967_v46, %v5311_v51 }
 0x2d3   : > { %v4765_v2 = vsel %vm4689_vm3, %v4764_v52, %v4763_v47 }
 0x2d4   : > { %v5314_v60 = vrot.slane %v3976_v54, 9  ;;  %v4346_v61 = vmax.f32 %v3975_v50, %v5312_v56  ;;  %v4347_v0 = vmax.f32 %v3974_v49, %v5313_v57  ;;  %v5442_v3 = vpack.c.bf16 %v4345_v58, %v4345_v58 }
 0x2d5   : > { %v4767_v9 = vsel %vm4692_vm4, %v4766_v59, %v4765_v2 }
 0x2d6   : > { %v4348_v5 = vmax.f32 %v3976_v54, %v5314_v60  ;;  %v5443_v55 = vpack.c.bf16 %v4346_v61, %v4346_v61  ;;  %v5444_v1 = vpack.c.bf16 %v4347_v0, %v4347_v0  ;;  %v4665_v27 = vunpack.c.l.b16 %v5442_v3 }
 0x2d8   : > { %v5445_v6 = vpack.c.bf16 %v4348_v5, %v4348_v5  ;;  %v4666_v7 = vunpack.c.l.b16 %v5443_v55  ;;  %v4667_v4 = vunpack.c.l.b16 %v5444_v1  ;;  %v4768_v10 = vrot.slane %v4665_v27, 4 }
 0x2da   : > { %v4668_v63 = vunpack.c.l.b16 %v5445_v6  ;;  %v4770_v40 = vrot.slane %v4666_v7, 3  ;;  %v4772_v53 = vrot.slane %v4667_v4, 2  ;;  %v4769_v11 = vsel %vm4695_vm5, %v4768_v10, %v4767_v9 }
 0x2dc   : > { %v4771_v12 = vsel %vm4698_vm6, %v4770_v40, %v4769_v11  ;;  %v4774_v13 = vrot.slane %v4668_v63, 1 }
 0x2dd   : > { %v4773_v14 = vsel %vm4701_vm7, %v4772_v53, %v4771_v12 }
 0x2de   : > { %v4775_v16 = vsel %vm4704_vm8, %v4774_v13, %v4773_v14 }
 0x2df   : > { %v4809_v17 = vpack.c.b16 %v4775_v16, %v4775_v16 }
 0x2e1   : > { %4826 = vst.msk [vmem:[%s7185_s10 + $0x14] sm:$0xf] %vm4820_vm9, %v4809_v17 }
 0x2fe   : > { %v5494_v18 = vpop.f32.mrf.mxu0 }
 0x2ff   : > { %v3623_v19 = vadd.f32 %v5494_v18, %v7130_v15 }
 0x300   : > { %v3614_v8 = vpop.f32.mrf.mxu0 }
 0x301   : > { %v3615_v21 = vadd.f32 %v7130_v15, %v3614_v8  ;;  %v3719_v24 = vmax.f32 %v3623_v19, 0.0 }
 0x302   : > { %v5495_v22 = vpop.f32.mrf.mxu0  ;;  %v5510_v23 = vpop.f32.mrf.mxu1 }
 0x303   : > { %v3717_v25 = vmax.f32 %v3615_v21, 0.0  ;;  %v3626_v26 = vadd.f32 %v5495_v22, %v7130_v15  ;;  %v3687_v28 = vadd.f32 %v5510_v23, %v7130_v15 }
 0x304   : > { %v3617_v33 = vpop.f32.mrf.mxu0  ;;  %v3678_v34 = vpop.f32.mrf.mxu1 }
 0x305   : > { %v3745_v36 = vmax.f32 %v3717_v25, %v3719_v24  ;;  %v3618_v20 = vadd.f32 %v7130_v15, %v3617_v33  ;;  %v3679_v37 = vadd.f32 %v7130_v15, %v3678_v34  ;;  %v3720_v35 = vmax.f32 %v3626_v26, 0.0 }
 0x306   : > { %v5511_v38 = vpop.f32.mrf.mxu1  ;;  %v3735_v42 = vmax.f32 %v3687_v28, 0.0 }
 0x307   : > { %v3841_v39 = vcombine.high %v3745_v36, %v3745_v36  ;;  %v3848_v62 = vrot.slane %v3745_v36, %v7137_v29  ;;  %v3718_v41 = vmax.f32 %v3618_v20, 0.0  ;;  %v3733_v43 = vmax.f32 %v3679_v37, 0.0 }
 0x308   : > { %v3681_v44 = vpop.f32.mrf.mxu1  ;;  %v7262_v32 = vadd.f32 %v5511_v38, %v7130_v15 }
 0x309   : > { %v3855_v45 = vrot.slane %v3841_v39, %v7137_v29  ;;  %v3856_v31 = vcombine.high %v3848_v62, %v3848_v62  ;;  %v5283_v46 = vrot.slane %v3848_v62, 9  ;;  %v3746_v30 = vmax.f32 %v3718_v41, %v3720_v35 }
 0x30a   : > { %v3753_v48 = vmax.f32 %v3733_v43, %v3735_v42  ;;  %v7265_v49 = vadd.f32 %v7130_v15, %v3681_v44 }
 0x30b   : > { %v3857_v50 = vcombine.high %v3855_v45, %v3855_v45  ;;  %v5284_v51 = vrot.slane %v3856_v31, 9  ;;  %v5285_v52 = vrot.slane %v3855_v45, 9  ;;  %v4317_v47 = vmax.f32 %v3848_v62, %v5283_v46 }
 0x30c   : > { %v3858_v54 = vcombine.high %v3746_v30, %v3746_v30  ;;  %v3865_v56 = vrot.slane %v3746_v30, %v7137_v29  ;;  %v3977_v57 = vcombine.high %v3753_v48, %v3753_v48  ;;  %v3984_v58 = vrot.slane %v3753_v48, %v7137_v29 }
 0x30d   : > { %v5286_v59 = vrot.slane %v3857_v50, 9  ;;  %v4318_v60 = vmax.f32 %v3856_v31, %v5284_v51  ;;  %v4319_v61 = vmax.f32 %v3855_v45, %v5285_v52  ;;  %v5414_v0 = vpack.c.bf16 %v4317_v47, %v4317_v47 }
 0x30e   : > { %v3872_v2 = vrot.slane %v3858_v54, %v7137_v29  ;;  %v3873_v3 = vcombine.high %v3865_v56, %v3865_v56  ;;  %v5287_v5 = vrot.slane %v3865_v56, 9  ;;  %v3991_v55 = vrot.slane %v3977_v57, %v7137_v29 }
 0x30f   : > { %v4320_v1 = vmax.f32 %v3857_v50, %v5286_v59  ;;  %v5415_v27 = vpack.c.bf16 %v4318_v60, %v4318_v60  ;;  %v5416_v6 = vpack.c.bf16 %v4319_v61, %v4319_v61  ;;  %v4637_v7 = vunpack.c.l.b16 %v5414_v0 }
 0x310   : > { %v3874_v4 = vcombine.high %v3872_v2, %v3872_v2  ;;  %v5288_v9 = vrot.slane %v3873_v3, 9  ;;  %v5289_v10 = vrot.slane %v3872_v2, 9  ;;  %v4321_v63 = vmax.f32 %v3865_v56, %v5287_v5 }
 0x311   : > { %v5417_v40 = vpack.c.bf16 %v4320_v1, %v4320_v1  ;;  %v4638_v53 = vunpack.c.l.b16 %v5415_v27  ;;  %v4639_v11 = vunpack.c.l.b16 %v5416_v6  ;;  %v3992_v12 = vcombine.high %v3984_v58, %v3984_v58 }
 0x312   : > { %v5290_v13 = vrot.slane %v3874_v4, 9  ;;  %v4322_v14 = vmax.f32 %v3873_v3, %v5288_v9  ;;  %v4323_v16 = vmax.f32 %v3872_v2, %v5289_v10  ;;  %v5418_v17 = vpack.c.bf16 %v4321_v63, %v4321_v63 }
 0x313   : > { %v4640_v18 = vunpack.c.l.b16 %v5417_v40  ;;  %v4720_v19 = vrot.slane %v4638_v53, 7  ;;  %v4722_v8 = vrot.slane %v4639_v11, 6  ;;  %v3993_v21 = vcombine.high %v3991_v55, %v3991_v55 }
 0x314   : > { %v4324_v22 = vmax.f32 %v3874_v4, %v5290_v13  ;;  %v5419_v23 = vpack.c.bf16 %v4322_v14, %v4322_v14  ;;  %v5420_v24 = vpack.c.bf16 %v4323_v16, %v4323_v16  ;;  %v4641_v25 = vunpack.c.l.b16 %v5418_v17 }
 0x315   : > { %v4721_v26 = vsel %vm4686_vm2, %v4720_v19, %v4637_v7  ;;  %v4724_v28 = vrot.slane %v4640_v18, 5  ;;  %v5315_v33 = vrot.slane %v3984_v58, 9  ;;  %v5316_v34 = vrot.slane %v3992_v12, 9 }
 0x316   : > { %v4723_v36 = vsel %vm4689_vm3, %v4722_v8, %v4721_v26  ;;  %v5421_v20 = vpack.c.bf16 %v4324_v22, %v4324_v22  ;;  %v4642_v37 = vunpack.c.l.b16 %v5419_v23  ;;  %v4643_v38 = vunpack.c.l.b16 %v5420_v24 }
 0x317   : > { %v4725_v39 = vsel %vm4692_vm4, %v4724_v28, %v4723_v36  ;;  %v4726_v62 = vrot.slane %v4641_v25, 4  ;;  %v5317_v35 = vrot.slane %v3991_v55, 9  ;;  %v5318_v41 = vrot.slane %v3993_v21, 9 }
 0x318   : > { %v4644_v42 = vunpack.c.l.b16 %v5421_v20  ;;  %v4728_v43 = vrot.slane %v4642_v37, 3  ;;  %v4730_v44 = vrot.slane %v4643_v38, 2  ;;  %v4349_v45 = vmax.f32 %v3984_v58, %v5315_v33 }
 0x319   : > { %v4727_v31 = vsel %vm4695_vm5, %v4726_v62, %v4725_v39  ;;  %v4350_v46 = vmax.f32 %v3992_v12, %v5316_v34  ;;  %v4351_v30 = vmax.f32 %v3991_v55, %v5317_v35  ;;  %v4352_v48 = vmax.f32 %v3993_v21, %v5318_v41 }
 0x31a   : > { %v4729_v50 = vsel %vm4698_vm6, %v4728_v43, %v4727_v31  ;;  %v4732_v51 = vrot.slane %v4644_v42, 1  ;;  %v3736_v52 = vmax.f32 %v7262_v32, 0.0  ;;  %v3734_v47 = vmax.f32 %v7265_v49, 0.0 }
 0x31b   : > { %v4731_v54 = vsel %vm4701_vm7, %v4730_v44, %v4729_v50  ;;  %v5446_v56 = vpack.c.bf16 %v4349_v45, %v4349_v45  ;;  %v5447_v57 = vpack.c.bf16 %v4350_v46, %v4350_v46  ;;  %v5448_v59 = vpack.c.bf16 %v4351_v30, %v4351_v30  ;;  %v5573_v30 = vld [vmem:[%s7341_s2] ss:$0 sm:$0xff] }
 0x31c   : > { %v4733_v58 = vsel %vm4704_vm8, %v4732_v51, %v4731_v54  ;;  %v5449_v60 = vpack.c.bf16 %v4352_v48, %v4352_v48  ;;  %v3754_v61 = vmax.f32 %v3734_v47, %v3736_v52 }
 0x31d   : > { %v4806_v0 = vpack.c.b16 %v4733_v58, %v4733_v58  ;;  %v4670_v2 = vunpack.c.l.b16 %v5447_v57  ;;  %v4671_v3 = vunpack.c.l.b16 %v5448_v59  ;;  %v4669_v32 = vunpack.c.l.b16 %v5446_v56 }
 0x31e   : > { %v3994_v5 = vcombine.high %v3754_v61, %v3754_v61  ;;  %v4001_v55 = vrot.slane %v3754_v61, %v7137_v29  ;;  %v4672_v49 = vunpack.c.l.b16 %v5449_v60 }
 0x31f   : > { %4823 = vst.msk [vmem:[%s7185_s10 + $0x8] sm:$0xf] %vm4820_vm9, %v4806_v0  ;;  %v4776_v1 = vrot.slane %v4670_v2, 7  ;;  %v4778_v4 = vrot.slane %v4671_v3, 6 }
 0x320   : > { %v4008_v27 = vrot.slane %v3994_v5, %v7137_v29  ;;  %v4009_v6 = vcombine.high %v4001_v55, %v4001_v55  ;;  %v5319_v7 = vrot.slane %v4001_v55, 9  ;;  %v4780_v11 = vrot.slane %v4672_v49, 5 }
 0x321   : > { %v4777_v9 = vsel %vm4686_vm2, %v4776_v1, %v4669_v32 }
 0x322   : > { %v4010_v10 = vcombine.high %v4008_v27, %v4008_v27  ;;  %v5320_v63 = vrot.slane %v4009_v6, 9  ;;  %v5321_v40 = vrot.slane %v4008_v27, 9  ;;  %v4353_v53 = vmax.f32 %v4001_v55, %v5319_v7 }
 0x323   : > { %v4779_v16 = vsel %vm4689_vm3, %v4778_v4, %v4777_v9 }
 0x324   : > { %v5322_v12 = vrot.slane %v4010_v10, 9  ;;  %v4354_v13 = vmax.f32 %v4009_v6, %v5320_v63  ;;  %v4355_v14 = vmax.f32 %v4008_v27, %v5321_v40  ;;  %v5450_v17 = vpack.c.bf16 %v4353_v53, %v4353_v53 }
 0x325   : > { %v4781_v25 = vsel %vm4692_vm4, %v4780_v11, %v4779_v16 }
 0x326   : > { %v4356_v18 = vmax.f32 %v4010_v10, %v5322_v12  ;;  %v5451_v19 = vpack.c.bf16 %v4354_v13, %v4354_v13  ;;  %v5452_v8 = vpack.c.bf16 %v4355_v14, %v4355_v14  ;;  %v4673_v21 = vunpack.c.l.b16 %v5450_v17 }
 0x328   : > { %v5453_v22 = vpack.c.bf16 %v4356_v18, %v4356_v18  ;;  %v4674_v23 = vunpack.c.l.b16 %v5451_v19  ;;  %v4675_v24 = vunpack.c.l.b16 %v5452_v8  ;;  %v4782_v26 = vrot.slane %v4673_v21, 4 }
 0x32a   : > { %v4676_v28 = vunpack.c.l.b16 %v5453_v22  ;;  %v4784_v33 = vrot.slane %v4674_v23, 3  ;;  %v4786_v34 = vrot.slane %v4675_v24, 2  ;;  %v4783_v36 = vsel %vm4695_vm5, %v4782_v26, %v4781_v25 }
 0x32c   : > { %v4785_v20 = vsel %vm4698_vm6, %v4784_v33, %v4783_v36  ;;  %v4788_v37 = vrot.slane %v4676_v28, 1 }
 0x32d   : > { %v4787_v38 = vsel %vm4701_vm7, %v4786_v34, %v4785_v20 }
 0x32e   : > { %v4789_v39 = vsel %vm4704_vm8, %v4788_v37, %v4787_v38 }
 0x32f   : > { %v4810_v62 = vpack.c.b16 %v4789_v39, %v4789_v39 }
 0x331   : > { %4827 = vst.msk [vmem:[%s7185_s10 + $0x18] sm:$0xf] %vm4820_vm9, %v4810_v62 }
 0x34e   : > { %v5498_v35 = vpop.f32.mrf.mxu0 }
 0x34f   : > { %v3639_v41 = vadd.f32 %v5498_v35, %v7130_v15 }
 0x350   : > { %v3630_v42 = vpop.f32.mrf.mxu0 }
 0x351   : > { %v3631_v43 = vadd.f32 %v7130_v15, %v3630_v42  ;;  %v3723_v31 = vmax.f32 %v3639_v41, 0.0 }
 0x352   : > { %v5499_v44 = vpop.f32.mrf.mxu0  ;;  %v5514_v45 = vpop.f32.mrf.mxu1 }
 0x353   : > { %v3721_v46 = vmax.f32 %v3631_v43, 0.0  ;;  %v3642_v48 = vadd.f32 %v5573_v30, %v5499_v44  ;;  %v3703_v50 = vadd.f32 %v5573_v30, %v5514_v45 }
 0x354   : > { %v3633_v51 = vpop.f32.mrf.mxu0  ;;  %v3694_v52 = vpop.f32.mrf.mxu1 }
 0x355   : > { %v3747_v47 = vmax.f32 %v3721_v46, %v3723_v31  ;;  %v3634_v54 = vadd.f32 %v5573_v30, %v3633_v51  ;;  %v3695_v56 = vadd.f32 %v5573_v30, %v3694_v52  ;;  %v3724_v15 = vmax.f32 %v3642_v48, 0.0 }
 0x356   : > { %v5515_v57 = vpop.f32.mrf.mxu1  ;;  %v3739_v61 = vmax.f32 %v3703_v50, 0.0 }
 0x357   : > { %v3875_v59 = vcombine.high %v3747_v47, %v3747_v47  ;;  %v3882_v58 = vrot.slane %v3747_v47, %v7137_v29  ;;  %v3722_v60 = vmax.f32 %v3634_v54, 0.0  ;;  %v3737_v0 = vmax.f32 %v3695_v56, 0.0 }
 0x358   : > { %v3697_v2 = vpop.f32.mrf.mxu1  ;;  %v7300_v49 = vadd.f32 %v5573_v30, %v5515_v57 }
 0x359   : > { %v3889_v3 = vrot.slane %v3875_v59, %v7137_v29  ;;  %v3890_v5 = vcombine.high %v3882_v58, %v3882_v58  ;;  %v5291_v55 = vrot.slane %v3882_v58, 9  ;;  %v3748_v32 = vmax.f32 %v3722_v60, %v3724_v15 }
 0x35a   : > { %v3755_v1 = vmax.f32 %v3737_v0, %v3739_v61  ;;  %v7302_v27 = vadd.f32 %v5573_v30, %v3697_v2 }
 0x35b   : > { %v3891_v6 = vcombine.high %v3889_v3, %v3889_v3  ;;  %v5292_v7 = vrot.slane %v3890_v5, 9  ;;  %v5293_v4 = vrot.slane %v3889_v3, 9  ;;  %v4325_v9 = vmax.f32 %v3882_v58, %v5291_v55 }
 0x35c   : > { %v3892_v10 = vcombine.high %v3748_v32, %v3748_v32  ;;  %v3899_v63 = vrot.slane %v3748_v32, %v7137_v29  ;;  %v4011_v40 = vcombine.high %v3755_v1, %v3755_v1  ;;  %v4018_v53 = vrot.slane %v3755_v1, %v7137_v29 }
 0x35d   : > { %v5294_v11 = vrot.slane %v3891_v6, 9  ;;  %v4326_v12 = vmax.f32 %v3890_v5, %v5292_v7  ;;  %v4327_v13 = vmax.f32 %v3889_v3, %v5293_v4  ;;  %v5422_v14 = vpack.c.bf16 %v4325_v9, %v4325_v9 }
 0x35e   : > { %v3906_v16 = vrot.slane %v3892_v10, %v7137_v29  ;;  %v3907_v17 = vcombine.high %v3899_v63, %v3899_v63  ;;  %v5295_v18 = vrot.slane %v3899_v63, 9  ;;  %v4025_v19 = vrot.slane %v4011_v40, %v7137_v29 }
 0x35f   : > { %v4328_v8 = vmax.f32 %v3891_v6, %v5294_v11  ;;  %v5423_v21 = vpack.c.bf16 %v4326_v12, %v4326_v12  ;;  %v5424_v22 = vpack.c.bf16 %v4327_v13, %v4327_v13  ;;  %v4645_v23 = vunpack.c.l.b16 %v5422_v14 }
 0x360   : > { %v3908_v24 = vcombine.high %v3906_v16, %v3906_v16  ;;  %v5296_v25 = vrot.slane %v3907_v17, 9  ;;  %v5297_v26 = vrot.slane %v3906_v16, 9  ;;  %v4329_v28 = vmax.f32 %v3899_v63, %v5295_v18 }
 0x361   : > { %v5425_v33 = vpack.c.bf16 %v4328_v8, %v4328_v8  ;;  %v4646_v34 = vunpack.c.l.b16 %v5423_v21  ;;  %v4647_v36 = vunpack.c.l.b16 %v5424_v22  ;;  %v4026_v20 = vcombine.high %v4018_v53, %v4018_v53 }
 0x362   : > { %v5298_v37 = vrot.slane %v3908_v24, 9  ;;  %v4330_v38 = vmax.f32 %v3907_v17, %v5296_v25  ;;  %v4331_v39 = vmax.f32 %v3906_v16, %v5297_v26  ;;  %v5426_v62 = vpack.c.bf16 %v4329_v28, %v4329_v28 }
 0x363   : > { %v4648_v35 = vunpack.c.l.b16 %v5425_v33  ;;  %v4734_v41 = vrot.slane %v4646_v34, 7  ;;  %v4736_v42 = vrot.slane %v4647_v36, 6  ;;  %v4027_v43 = vcombine.high %v4025_v19, %v4025_v19 }
 0x364   : > { %v4332_v44 = vmax.f32 %v3908_v24, %v5298_v37  ;;  %v5427_v45 = vpack.c.bf16 %v4330_v38, %v4330_v38  ;;  %v5428_v31 = vpack.c.bf16 %v4331_v39, %v4331_v39  ;;  %v4649_v46 = vunpack.c.l.b16 %v5426_v62 }
 0x365   : > { %v4735_v30 = vsel %vm4686_vm2, %v4734_v41, %v4645_v23  ;;  %v4738_v48 = vrot.slane %v4648_v35, 5  ;;  %v5323_v50 = vrot.slane %v4018_v53, 9  ;;  %v5324_v51 = vrot.slane %v4026_v20, 9 }
 0x366   : > { %v4737_v52 = vsel %vm4689_vm3, %v4736_v42, %v4735_v30  ;;  %v5429_v47 = vpack.c.bf16 %v4332_v44, %v4332_v44  ;;  %v4650_v54 = vunpack.c.l.b16 %v5427_v45  ;;  %v4651_v56 = vunpack.c.l.b16 %v5428_v31 }
 0x367   : > { %v4739_v57 = vsel %vm4692_vm4, %v4738_v48, %v4737_v52  ;;  %v4740_v59 = vrot.slane %v4649_v46, 4  ;;  %v5325_v58 = vrot.slane %v4025_v19, 9  ;;  %v5326_v15 = vrot.slane %v4027_v43, 9 }
 0x368   : > { %v4652_v60 = vunpack.c.l.b16 %v5429_v47  ;;  %v4742_v61 = vrot.slane %v4650_v54, 3  ;;  %v4744_v0 = vrot.slane %v4651_v56, 2  ;;  %v4357_v2 = vmax.f32 %v4018_v53, %v5323_v50 }
 0x369   : > { %v4741_v3 = vsel %vm4695_vm5, %v4740_v59, %v4739_v57  ;;  %v4358_v5 = vmax.f32 %v4026_v20, %v5324_v51  ;;  %v4359_v55 = vmax.f32 %v4025_v19, %v5325_v58  ;;  %v4360_v32 = vmax.f32 %v4027_v43, %v5326_v15 }
 0x36a   : > { %v4743_v1 = vsel %vm4698_vm6, %v4742_v61, %v4741_v3  ;;  %v4746_v6 = vrot.slane %v4652_v60, 1  ;;  %v3740_v7 = vmax.f32 %v7300_v49, 0.0  ;;  %v3738_v4 = vmax.f32 %v7302_v27, 0.0 }
 0x36b   : > { %v4745_v9 = vsel %vm4701_vm7, %v4744_v0, %v4743_v1  ;;  %v5454_v10 = vpack.c.bf16 %v4357_v2, %v4357_v2  ;;  %v5455_v63 = vpack.c.bf16 %v4358_v5, %v4358_v5  ;;  %v5456_v40 = vpack.c.bf16 %v4359_v55, %v4359_v55 }
 0x36c   : > { %v4747_v53 = vsel %vm4704_vm8, %v4746_v6, %v4745_v9  ;;  %v5457_v11 = vpack.c.bf16 %v4360_v32, %v4360_v32  ;;  %v3756_v12 = vmax.f32 %v3738_v4, %v3740_v7 }
 0x36d   : > { %v4807_v13 = vpack.c.b16 %v4747_v53, %v4747_v53  ;;  %v4678_v14 = vunpack.c.l.b16 %v5455_v63  ;;  %v4679_v16 = vunpack.c.l.b16 %v5456_v40  ;;  %v4677_v49 = vunpack.c.l.b16 %v5454_v10 }
 0x36e   : > { %v4028_v17 = vcombine.high %v3756_v12, %v3756_v12  ;;  %v4035_v18 = vrot.slane %v3756_v12, %v7137_v29  ;;  %v4680_v27 = vunpack.c.l.b16 %v5457_v11 }
 0x36f   : > { %4824 = vst.msk [vmem:[%s7185_s10 + $0xc] sm:$0xf] %vm4820_vm9, %v4807_v13  ;;  %v4790_v19 = vrot.slane %v4678_v14, 7  ;;  %v4792_v23 = vrot.slane %v4679_v16, 6 }
 0x370   : > { %v4042_v8 = vrot.slane %v4028_v17, %v7137_v29  ;;  %v4043_v21 = vcombine.high %v4035_v18, %v4035_v18  ;;  %v5327_v22 = vrot.slane %v4035_v18, 9  ;;  %v4794_v34 = vrot.slane %v4680_v27, 5 }
 0x371   : > { %v4791_v24 = vsel %vm4686_vm2, %v4790_v19, %v4677_v49 }
 0x372   : > { %v4044_v25 = vcombine.high %v4042_v8, %v4042_v8  ;;  %v5328_v26 = vrot.slane %v4043_v21, 9  ;;  %v5329_v28 = vrot.slane %v4042_v8, 9  ;;  %v4361_v33 = vmax.f32 %v4035_v18, %v5327_v22 }
 0x373   : > { %v4793_v38 = vsel %vm4689_vm3, %v4792_v23, %v4791_v24 }
 0x374   : > { %v5330_v36 = vrot.slane %v4044_v25, 9  ;;  %v4362_v20 = vmax.f32 %v4043_v21, %v5328_v26  ;;  %v4363_v37 = vmax.f32 %v4042_v8, %v5329_v28  ;;  %v5458_v39 = vpack.c.bf16 %v4361_v33, %v4361_v33 }
 0x375   : > { %v4795_v45 = vsel %vm4692_vm4, %v4794_v34, %v4793_v38 }
 0x376   : > { %v4364_v62 = vmax.f32 %v4044_v25, %v5330_v36  ;;  %v5459_v35 = vpack.c.bf16 %v4362_v20, %v4362_v20  ;;  %v5460_v41 = vpack.c.bf16 %v4363_v37, %v4363_v37  ;;  %v4681_v29 = vunpack.c.l.b16 %v5458_v39 }
 0x378   : > { %v5461_v42 = vpack.c.bf16 %v4364_v62, %v4364_v62  ;;  %v4682_v43 = vunpack.c.l.b16 %v5459_v35  ;;  %v4683_v44 = vunpack.c.l.b16 %v5460_v41  ;;  %v4796_v31 = vrot.slane %v4681_v29, 4 }
 0x37a   : > { %v4684_v46 = vunpack.c.l.b16 %v5461_v42  ;;  %v4798_v30 = vrot.slane %v4682_v43, 3  ;;  %v4800_v48 = vrot.slane %v4683_v44, 2  ;;  %v4797_v50 = vsel %vm4695_vm5, %v4796_v31, %v4795_v45 }
 0x37c   : > { %v4799_v51 = vsel %vm4698_vm6, %v4798_v30, %v4797_v50  ;;  %v4802_v52 = vrot.slane %v4684_v46, 1 }
 0x37d   : > { %v4801_v47 = vsel %vm4701_vm7, %v4800_v48, %v4799_v51 }
 0x37e   : > { %v4803_v54 = vsel %vm4704_vm8, %v4802_v52, %v4801_v47 }
 0x37f   : > { %v4811_v56 = vpack.c.b16 %v4803_v54, %v4803_v54 }
 0x381   : > { %4828 = vst.msk [vmem:[%s7185_s10 + $0x1c] sm:$0xf] %vm4820_vm9, %v4811_v56 }
 0x382 PF: > { %s13_s14 = sadd.s32 1, %s5596_s14   ;;  %s7347_s12 = smov %s5592_s13 }
 0x383   : > { %p10_p5 = scmp.ge.s32.totalorder %s13_s14, 4   ;;  %s7348_s13 = smov %s7350_s15 }
 0x385   :  { %12 = sbr.rel (!%p10_p5) target bundleno = 2 (0x2), region = 65 }

// kernel: autoencoder_forward.9
= control target key start
LH: loop header
LB: loop body
LE: loop exit
PB: predicated region body
PF: predicated region fallthrough
CT: control target
= control target key end

     0   :  { %s1506_s12 = smov 0   ;;  %s1508_s13 = smov 0   ;;  %s1773_s0 = inlined_call_operand.vmem [shape: bf16[2,3,9,128], index: 0, kind: input, shape index: {}]   ;;  %s1774_s1 = inlined_call_operand.vmem [shape: bf16[2,2,256,128], index: 1, kind: input, shape index: {}]   ;;  %s1775_s2 = inlined_call_operand.vmem [shape: f32[1,128], index: 2, kind: input, shape index: {}]   ;;  %s1776_s3 = inlined_call_operand.vmem [shape: bf16[2,2,2,2,128], index: 3, kind: output, shape index: {}]  }
   0x1   :  { %s1510_s14 = smov 0  }
   0x2 LB: > { %s25_s15 = sadd.s32 1, %s1480_s13  ;;  %p1104_p0 = scmp.ge.s32.totalorder %s1484_s14, 1  ;;  %s1484_s14 = sphi %s1510_s14, %s13_s14   ;;  %s1480_s13 = sphi %s1508_s13, %s1780_s13   ;;  %s1476_s12 = sphi %s1506_s12, %s1779_s12  }
   0x3   : > { %p27_p1 = scmp.ge.s32.totalorder %s25_s15, 2  ;;  %p151_p2 = scmp.lt.s32.totalorder %s1484_s14, 3 }
   0x5   : > { %s1782_s15 = smov (%p27_p1, %s25_s15), 0  ;;  %p152_p3 = pnand %p1104_p0, %p151_p2 }
   0x6   : > { %p179_p4 = scmp.lt.s32.totalorder (!%p152_p3), %s1476_s12, 1 }
   0x7   : > { %155 = sbr.rel (%p152_p3) target bundleno = 295 (0x127), region = 32 }
   0xc   : > { %v1395_v0 = vld [vmem:[%s1774_s1 + $0x178] sm:$0xff]   ;;  %v1399_v4 = vld [vmem:[%s1774_s1 + $0x170] sm:$0xff]   ;;  %v1403_v8 = vld [vmem:[%s1774_s1 + $0x168] sm:$0xff]   ;;  %s1784_s12 = smov (!%p179_p4, %s1476_s12), 1  ;;  %vm207_vm0 = vsmask.f32 3328 }
   0xd   : > { %v1396_v1 = vld [vmem:[%s1774_s1 + $0x78] sm:$0xff]   ;;  %1282 = vmatprep.subr.bf16.mxu0 %v1395_v0  ;;  %v1400_v5 = vld [vmem:[%s1774_s1 + $0x70] sm:$0xff]   ;;  %v1404_v9 = vld [vmem:[%s1774_s1 + $0x68] sm:$0xff]   ;;  %s1370_s22 = smul.u32 24, %s1784_s12  ;;  %vm208_vm1 = vsmask.f32 7440 }
   0xe   : > { %v1397_v2 = vld [vmem:[%s1774_s1 + $0x138] sm:$0xff]   ;;  %1304 = vmatprep.subr.bf16.mxu1 %v1396_v1  ;;  %v1401_v6 = vld [vmem:[%s1774_s1 + $0x130] sm:$0xff]   ;;  %v1405_v10 = vld [vmem:[%s1774_s1 + $0x128] sm:$0xff]   ;;  %s1106_s8 = sshll.u32 %s1784_s12, 2 }
   0xf   : > { %v1398_v3 = vld [vmem:[%s1774_s1 + $0x38] sm:$0xff]   ;;  %1283 = vmatpush3.bf16.msra.mxu0 %v1397_v2  ;;  %v1402_v7 = vld [vmem:[%s1774_s1 + $0x30] sm:$0xff]   ;;  %v1406_v11 = vld [vmem:[%s1774_s1 + $0x28] sm:$0xff]   ;;  %s1624_s6 = scalar_lea.vmem %s1773_s0, %s1370_s22  ;;  %s192_s11 = scalar_lea.vmem %s1776_s3, %s1106_s8 }
  0x10   : > { %1305 = vmatpush3.bf16.msra.mxu1 %v1398_v3  ;;  %1284 = vmatprep.subr.bf16.mxu0 %v1399_v4  ;;  %v1407_v12 = vld [vmem:[%s1774_s1 + $0x160] sm:$0xff]   ;;  %v1411_v16 = vld [vmem:[%s1774_s1 + $0x158] sm:$0xff]   ;;  %v1415_v20 = vld [vmem:[%s1774_s1 + $0x150] sm:$0xff]  }
  0x11   : > { %1306 = vmatprep.subr.bf16.mxu1 %v1400_v5  ;;  %v1408_v13 = vld [vmem:[%s1774_s1 + $0x60] sm:$0xff]   ;;  %v1412_v17 = vld [vmem:[%s1774_s1 + $0x58] sm:$0xff]   ;;  %v1416_v21 = vld [vmem:[%s1774_s1 + $0x50] sm:$0xff]  }
  0x12   : > { %v1409_v14 = vld [vmem:[%s1774_s1 + $0x120] sm:$0xff]   ;;  %v1413_v18 = vld [vmem:[%s1774_s1 + $0x118] sm:$0xff]   ;;  %v1417_v22 = vld [vmem:[%s1774_s1 + $0x110] sm:$0xff]  }
  0x13   : > { %1285 = vmatpush3.bf16.msra.mxu0 %v1401_v6  ;;  %v1410_v15 = vld [vmem:[%s1774_s1 + $0x20] sm:$0xff]   ;;  %v1414_v19 = vld [vmem:[%s1774_s1 + $0x18] sm:$0xff]   ;;  %v1418_v23 = vld [vmem:[%s1774_s1 + $0x10] sm:$0xff]  }
  0x14   : > { %1307 = vmatpush3.bf16.msra.mxu1 %v1402_v7  ;;  %1286 = vmatprep.subr.bf16.mxu0 %v1403_v8  ;;  %v1419_v24 = vld [vmem:[%s1774_s1 + $0x148] sm:$0xff]   ;;  %v1423_v28 = vld [vmem:[%s1774_s1 + $0x140] sm:$0xff]   ;;  %v1143_v52 = vld [vmem:[%s1624_s6 + $0x10] sm:$0xf] }
  0x15   : > { %1308 = vmatprep.subr.bf16.mxu1 %v1404_v9  ;;  %v1420_v25 = vld [vmem:[%s1774_s1 + $0x48] sm:$0xff]   ;;  %v1424_v29 = vld [vmem:[%s1774_s1 + $0x40] sm:$0xff]   ;;  %v1144_v53 = vld [vmem:[%s1624_s6 + $0x14] sm:$0x1]  ;;  %v336_v59 = vshrl.u32 %v1143_v52, 16  ;;  %v339_v60 = vshll.u32 %v1143_v52, 16 }
  0x16   : > { %v1421_v26 = vld [vmem:[%s1774_s1 + $0x108] sm:$0xff]   ;;  %v1425_v30 = vld [vmem:[%s1774_s1 + $0x100] sm:$0xff]   ;;  %vm1643_vm2 = vmor %vm207_vm0, %vm208_vm1  ;;  %v345_v5 = vshll.u32 %v1144_v53, 16 }
  0x17   : > { %1287 = vmatpush3.bf16.msra.mxu0 %v1405_v10  ;;  %v1422_v27 = vld [vmem:[%s1774_s1 + $0x8] sm:$0xff]   ;;  %v1426_v31 = vld [vmem:[%s1774_s1] sm:$0xff]   ;;  %v1430_v61 = vld [vmem:[%s1774_s1 + $0x1f8] sm:$0xff]   ;;  %v338_v3 = vrot.slane %v336_v59, 4  ;;  %v341_v4 = vrot.slane %v339_v60, 5 }
  0x18   : > { %1309 = vmatpush3.bf16.msra.mxu1 %v1406_v11  ;;  %1288 = vmatprep.subr.bf16.mxu0 %v1407_v12  ;;  %v199_v32 = vld [vmem:[%s1624_s6] sm:$0xf]  ;;  %v200_v33 = vld [vmem:[%s1624_s6 + $0x8] sm:$0xf]  ;;  %v204_v35 = vld [vmem:[%s1624_s6 + $0x4] sm:$0x1] }
  0x19   : > { %1310 = vmatprep.subr.bf16.mxu1 %v1408_v13  ;;  %v203_v34 = vld [vmem:[%s1624_s6] sm:$0xf]  ;;  %201 = vst [vmem:[#allocation2] sm:$0xf] %v199_v32  ;;  %202 = vst [vmem:[#allocation2 + $0x8] sm:$0xf] %v200_v33  ;;  %v342_v10 = vor.u32 %v341_v4, %v338_v3 }
  0x1a   : > { %v205_v36 = vld [vmem:[%s1624_s6 + $0x8] sm:$0xf]  ;;  %v206_v37 = vld [vmem:[%s1624_s6 + $0xc] sm:$0x1]  ;;  %v211_v38 = vshrl.u32 %v203_v34, 16  ;;  %v214_v39 = vshll.u32 %v203_v34, 16 }
  0x1b   : > { %1289 = vmatpush3.bf16.msra.mxu0 %v1409_v14  ;;  %v220_v40 = vshll.u32 %v204_v35, 16  ;;  %v225_v41 = vshrl.u32 %v205_v36, 16  ;;  %v228_v42 = vshll.u32 %v205_v36, 16  ;;  %v234_v43 = vshll.u32 %v206_v37, 16  ;;  %v1141_v46 = vld [vmem:[%s1624_s6 + $0x8] sm:$0xf] }
  0x1c   : > { %1311 = vmatpush3.bf16.msra.mxu1 %v1410_v15  ;;  %1290 = vmatprep.subr.bf16.mxu0 %v1411_v16  ;;  %v213_v44 = vrot.slane %v211_v38, 4  ;;  %v216_v45 = vrot.slane %v214_v39, 5  ;;  %v1142_v50 = vld [vmem:[%s1624_s6 + $0xc] sm:$0x1]  ;;  %v322_v54 = vshrl.u32 %v1141_v46, 16  ;;  %v325_v55 = vshll.u32 %v1141_v46, 16 }
  0x1d   : > { %1312 = vmatprep.subr.bf16.mxu1 %v1412_v17  ;;  %v222_v47 = vrot.slane %v220_v40, 5  ;;  %v227_v48 = vrot.slane %v225_v41, 4  ;;  %v230_v49 = vrot.slane %v228_v42, 5  ;;  %v236_v58 = vrot.slane %v234_v43, 5  ;;  %v1431_v8 = vld [vmem:[%s1774_s1 + $0xf8] sm:$0xff]   ;;  %v1443_v32 = vld [vmem:[%s1774_s1 + $0xe0] sm:$0xff]  }
  0x1e   : > { %v217_v51 = vor.u32 %v216_v45, %v213_v44  ;;  %v324_v63 = vrot.slane %v322_v54, 4  ;;  %v327_v0 = vrot.slane %v325_v55, 5  ;;  %v331_v1 = vshll.u32 %v1142_v50, 16  ;;  %v1139_v15 = vld [vmem:[%s1624_s6 + $0x8] sm:$0xf]  ;;  %v1436_v33 = vld [vmem:[%s1774_s1 + $0x1b0] sm:$0xff]  }
  0x1f   : > { %1291 = vmatpush3.bf16.msra.mxu0 %v1413_v18  ;;  %v231_v57 = vor.u32 %v230_v49, %v227_v48  ;;  %v343_v13 = vrot.slane %v342_v10, 4  ;;  %v347_v14 = vrot.slane %v345_v5, 5  ;;  %v1140_v17 = vld [vmem:[%s1624_s6 + $0x10] sm:$0xf]  ;;  %v1438_v34 = vld [vmem:[%s1774_s1 + $0x1e8] sm:$0xff]   ;;  %v1445_v35 = vld [vmem:[%s1774_s1 + $0xa0] sm:$0xff]  }
  0x20   : > { %1313 = vmatpush3.bf16.msra.mxu1 %v1414_v19  ;;  %1292 = vmatprep.subr.bf16.mxu0 %v1415_v20  ;;  %v218_v62 = vrot.slane %v217_v51, 4  ;;  %v328_v7 = vor.u32 %v327_v0, %v324_v63  ;;  %v333_v12 = vrot.slane %v331_v1, 5  ;;  %v1447_v36 = vld [vmem:[%s1774_s1 + $0xd8] sm:$0xff]   ;;  %v1440_v37 = vld [vmem:[%s1774_s1 + $0x1a8] sm:$0xff]   ;;  %v1442_v38 = vld [vmem:[%s1774_s1 + $0x1e0] sm:$0xff]  }
  0x21   : > { %1314 = vmatprep.subr.bf16.mxu1 %v1416_v21  ;;  %v232_v2 = vrot.slane %v231_v57, 4  ;;  %v348_v18 = vsel %vm1643_vm2, %v343_v13, %v347_v14  ;;  %v1449_v39 = vld [vmem:[%s1774_s1 + $0x98] sm:$0xff]   ;;  %v1451_v40 = vld [vmem:[%s1774_s1 + $0xd0] sm:$0xff]   ;;  %v1444_v41 = vld [vmem:[%s1774_s1 + $0x1a0] sm:$0xff]  }
  0x22   : > { %v223_v6 = vsel %vm1643_vm2, %v218_v62, %v222_v47  ;;  %v329_v11 = vrot.slane %v328_v7, 4  ;;  %v1446_v42 = vld [vmem:[%s1774_s1 + $0x1d8] sm:$0xff]   ;;  %v1453_v43 = vld [vmem:[%s1774_s1 + $0x90] sm:$0xff]   ;;  %v1455_v44 = vld [vmem:[%s1774_s1 + $0xc8] sm:$0xff]  }
  0x23   : > { %1293 = vmatpush3.bf16.msra.mxu0 %v1417_v22  ;;  %v237_v9 = vsel %vm1643_vm2, %v232_v2, %v236_v58  ;;  %240 = vst [vmem:[#allocation2 + $0x4] sm:$0xf] %v223_v6  ;;  %v1448_v45 = vld [vmem:[%s1774_s1 + $0x198] sm:$0xff]   ;;  %v1450_v46 = vld [vmem:[%s1774_s1 + $0x1d0] sm:$0xff]   ;;  %v1457_v47 = vld [vmem:[%s1774_s1 + $0x88] sm:$0xff]  }
  0x24   : > { %1315 = vmatpush3.bf16.msra.mxu1 %v1418_v23  ;;  %1294 = vmatprep.subr.bf16.mxu0 %v1419_v24  ;;  %241 = vst [vmem:[#allocation2 + $0xc] sm:$0xf] %v237_v9  ;;  %v334_v16 = vsel %vm1643_vm2, %v329_v11, %v333_v12  ;;  %v1433_v23 = vld [vmem:[%s1774_s1 + $0xb8] sm:$0xff]   ;;  %v1435_v24 = vld [vmem:[%s1774_s1 + $0xf0] sm:$0xff]   ;;  %v1459_v48 = vld [vmem:[%s1774_s1 + $0xc0] sm:$0xff]  }
  0x25   : > { %1316 = vmatprep.subr.bf16.mxu1 %v1420_v25  ;;  %v1437_v25 = vld [vmem:[%s1774_s1 + $0xb0] sm:$0xff]   ;;  %v1454_v50 = vld [vmem:[%s1774_s1 + $0x1c8] sm:$0xff]   ;;  %v1461_v51 = vld [vmem:[%s1774_s1 + $0x80] sm:$0xff]  }
  0x26   : > { %v1452_v49 = vld [vmem:[%s1774_s1 + $0x190] sm:$0xff]   ;;  %v1456_v52 = vld [vmem:[%s1774_s1 + $0x188] sm:$0xff]   ;;  %v1458_v53 = vld [vmem:[%s1774_s1 + $0x1c0] sm:$0xff]  }
  0x27   : > { %1295 = vmatpush3.bf16.msra.mxu0 %v1421_v26  ;;  %v1432_v26 = vld [vmem:[%s1774_s1 + $0x1b8] sm:$0xff]   ;;  %v1460_v54 = vld [vmem:[%s1774_s1 + $0x180] sm:$0xff]  }
  0x28   : > { %1317 = vmatpush3.bf16.msra.mxu1 %v1422_v27  ;;  %1296 = vmatprep.subr.bf16.mxu0 %v1423_v28  ;;  %v1439_v27 = vld [vmem:[%s1774_s1 + $0xe8] sm:$0xff]   ;;  %v1434_v28 = vld [vmem:[%s1774_s1 + $0x1f0] sm:$0xff]   ;;  %v1277_v63 = vld [vmem:[%s1775_s2] ss:$0 sm:$0xff] }
  0x29   : > { %1318 = vmatprep.subr.bf16.mxu1 %v1424_v29 }
  0x2a   : > { %v242_v19 = vld [vmem:[#allocation2] sm:$0xff] }
  0x2b   : > { %1297 = vmatpush3.bf16.msra.mxu0 %v1425_v30  ;;  %v243_v20 = vld [vmem:[#allocation2 + $0x8] sm:$0xff]  ;;  %315 = vst [vmem:[#allocation2] sm:$0xf] %v1139_v15  ;;  %351 = vst [vmem:[#allocation2 + $0x4] sm:$0xf] %v334_v16 }
  0x2c   : > { %1319 = vmatpush3.bf16.msra.mxu1 %v1426_v31  ;;  %1326 = vmatprep.subr.bf16.mxu0 %v1430_v61  ;;  %316 = vst [vmem:[#allocation2 + $0x8] sm:$0xf] %v1140_v17  ;;  %352 = vst [vmem:[#allocation2 + $0xc] sm:$0xf] %v348_v18  ;;  %v1196_v21 = vcombine.high %v242_v19, %v243_v20  ;;  %v1663_v22 = vcombine.low %v242_v19, %v243_v20  ;;  %v1441_v31 = vld [vmem:[%s1774_s1 + $0xa8] sm:$0xff]  }
  0x2d   : > { %1348 = vmatprep.subr.bf16.mxu1 %v1431_v8 }
  0x2e   : > { %673 = vmatprep.mubr.bf16.mxu1 %v1196_v21 }
  0x2f   : > { %674 = vmatmul.mubr.bf16.vlgmr.msra.gmra.mxu1 %v1663_v22 }
  0x30   : > { %1349 = vmatpush3.bf16.msra.mxu1 %v1433_v23  ;;  %980 = vmatprep.mubr.bf16.mxu1 %v1196_v21 }
  0x31   : > { %1350 = vmatprep.subr.bf16.mxu1 %v1435_v24 }
  0x33   : > { %v1427_v29 = vld [vmem:[#allocation2] ss:$8 sps:$4 sm:$0xff]   ;;  %v1429_v30 = vld [vmem:[#allocation2 + $0x4] ss:$8 sps:$4 sm:$0xff]  }
  0x34   : > { %1351 = vmatpush3.bf16.msra.mxu1 %v1437_v25  ;;  %526 = vmatprep.mubr.bf16.mxu0 %v1429_v30 }
  0x35   : > { %1352 = vmatprep.subr.bf16.mxu1 %v1439_v27  ;;  %527 = vmatmul.mubr.bf16.vlgmr.msra.gmra.mxu0 %v1427_v29 }
  0x36   : > { %1327 = vmatpush3.bf16.msra.mxu0 %v1432_v26  ;;  %843 = vmatprep.mubr.bf16.mxu0 %v1429_v30 }
  0x37   : > { %1328 = vmatprep.subr.bf16.mxu0 %v1434_v28 }
  0x38   : > { %1353 = vmatpush3.bf16.msra.mxu1 %v1441_v31 }
  0x39   : > { %1354 = vmatprep.subr.bf16.mxu1 %v1443_v32 }
  0x3a   : > { %1329 = vmatpush3.bf16.msra.mxu0 %v1436_v33 }
  0x3b   : > { %1330 = vmatprep.subr.bf16.mxu0 %v1438_v34 }
  0x3c   : > { %1355 = vmatpush3.bf16.msra.mxu1 %v1445_v35 }
  0x3d   : > { %1356 = vmatprep.subr.bf16.mxu1 %v1447_v36 }
  0x3e   : > { %1331 = vmatpush3.bf16.msra.mxu0 %v1440_v37 }
  0x3f   : > { %1332 = vmatprep.subr.bf16.mxu0 %v1442_v38 }
  0x40   : > { %1357 = vmatpush3.bf16.msra.mxu1 %v1449_v39 }
  0x41   : > { %1358 = vmatprep.subr.bf16.mxu1 %v1451_v40 }
  0x42   : > { %1333 = vmatpush3.bf16.msra.mxu0 %v1444_v41 }
  0x43   : > { %1334 = vmatprep.subr.bf16.mxu0 %v1446_v42 }
  0x44   : > { %1359 = vmatpush3.bf16.msra.mxu1 %v1453_v43 }
  0x45   : > { %1360 = vmatprep.subr.bf16.mxu1 %v1455_v44 }
  0x46   : > { %1335 = vmatpush3.bf16.msra.mxu0 %v1448_v45 }
  0x47   : > { %1336 = vmatprep.subr.bf16.mxu0 %v1450_v46 }
  0x48   : > { %1361 = vmatpush3.bf16.msra.mxu1 %v1457_v47 }
  0x49   : > { %1362 = vmatprep.subr.bf16.mxu1 %v1459_v48 }
  0x4a   : > { %1337 = vmatpush3.bf16.msra.mxu0 %v1452_v49 }
  0x4b   : > { %1338 = vmatprep.subr.bf16.mxu0 %v1454_v50 }
  0x4c   : > { %1363 = vmatpush3.bf16.msra.mxu1 %v1461_v51 }
  0x4e   : > { %1339 = vmatpush3.bf16.msra.mxu0 %v1456_v52 }
  0x4f   : > { %981 = vmatmul.mubr.bf16.vlgmr.msra.gmra.mxu1 %v1663_v22  ;;  %1340 = vmatprep.subr.bf16.mxu0 %v1458_v53 }
  0x52   : > { %1341 = vmatpush3.bf16.msra.mxu0 %v1460_v54 }
  0x55   : > { %844 = vmatmul.mubr.bf16.vlgmr.msra.gmra.mxu0 %v1427_v29 }
  0xef   : > { %v1320_v55 = vpop.f32.mrf.mxu1 }
  0xf1   : > { %v1321_v56 = vpop.f32.mrf.mxu1 }
  0xf2   : > { %v1322_v59 = vadd.f32 %v1321_v56, %v1320_v55 }
  0xf3   : > { %v1323_v57 = vpop.f32.mrf.mxu1 }
  0xf5   : > { %v1298_v58 = vpop.f32.mrf.mxu0  ;;  %v1324_v61 = vpop.f32.mrf.mxu1 }
  0xf6   : > { %v1325_v2 = vadd.f32 %v1324_v61, %v1323_v57 }
  0xf7   : > { %v1299_v60 = vpop.f32.mrf.mxu0 }
  0xf8   : > { %v1300_v62 = vadd.f32 %v1299_v60, %v1298_v58 }
  0xf9   : > { %v1301_v0 = vpop.f32.mrf.mxu0 }
  0xfa   : > { %v676_v1 = vadd.f32 %v1322_v59, %v1300_v62 }
  0xfb   : > { %v1302_v3 = vpop.f32.mrf.mxu0 }
  0xfc   : > { %v996_v4 = vadd.f32 %v1277_v63, %v676_v1  ;;  %v1303_v5 = vadd.f32 %v1302_v3, %v1301_v0 }
  0xfe   : > { %v1000_v6 = vmax.f32 %v996_v4, 0.0  ;;  %v679_v7 = vadd.f32 %v1325_v2, %v1303_v5 }
 0x100   : > { %v1004_v8 = vpack.c.bf16 %v1000_v6, %v1000_v6  ;;  %v997_v9 = vadd.f32 %v1277_v63, %v679_v7 }
 0x102   : > { %1008 = vst [vmem:[%s192_s11] sm:$0x1] %v1004_v8  ;;  %v1001_v10 = vmax.f32 %v997_v9, 0.0 }
 0x104   : > { %v1005_v11 = vpack.c.bf16 %v1001_v10, %v1001_v10 }
 0x106   : > { %1009 = vst [vmem:[%s192_s11 + $0x2] sm:$0x1] %v1005_v11 }
 0x10f   : > { %v1364_v12 = vpop.f32.mrf.mxu1 }
 0x111   : > { %v1365_v13 = vpop.f32.mrf.mxu1 }
 0x112   : > { %v1366_v16 = vadd.f32 %v1365_v13, %v1364_v12 }
 0x113   : > { %v1367_v14 = vpop.f32.mrf.mxu1 }
 0x115   : > { %v1342_v15 = vpop.f32.mrf.mxu0  ;;  %v1368_v18 = vpop.f32.mrf.mxu1 }
 0x116   : > { %v1369_v22 = vadd.f32 %v1368_v18, %v1367_v14 }
 0x117   : > { %v1343_v17 = vpop.f32.mrf.mxu0 }
 0x118   : > { %v1344_v19 = vadd.f32 %v1343_v17, %v1342_v15 }
 0x119   : > { %v1345_v20 = vpop.f32.mrf.mxu0 }
 0x11a   : > { %v983_v21 = vadd.f32 %v1366_v16, %v1344_v19 }
 0x11b   : > { %v1346_v23 = vpop.f32.mrf.mxu0 }
 0x11c   : > { %v998_v24 = vadd.f32 %v1277_v63, %v983_v21  ;;  %v1347_v25 = vadd.f32 %v1346_v23, %v1345_v20 }
 0x11e   : > { %v1002_v26 = vmax.f32 %v998_v24, 0.0  ;;  %v986_v27 = vadd.f32 %v1369_v22, %v1347_v25 }
 0x120   : > { %v1006_v28 = vpack.c.bf16 %v1002_v26, %v1002_v26  ;;  %v999_v29 = vadd.f32 %v1277_v63, %v986_v27 }
 0x122   : > { %1278 = vst [vmem:[%s192_s11 + $0x1] sm:$0x1] %v1006_v28  ;;  %v1003_v30 = vmax.f32 %v999_v29, 0.0 }
 0x124   : > { %v1007_v31 = vpack.c.bf16 %v1003_v30, %v1003_v30 }
 0x126   : > { %1279 = vst [vmem:[%s192_s11 + $0x3] sm:$0x1] %v1007_v31 }
 0x127 PF: > { %s13_s14 = sadd.s32 1, %s1484_s14   ;;  %s1779_s12 = smov %s1480_s13 }
 0x128   : > { %p10_p5 = scmp.ge.s32.totalorder %s13_s14, 4   ;;  %s1780_s13 = smov %s1782_s15 }
 0x12a   :  { %12 = sbr.rel (!%p10_p5) target bundleno = 2 (0x2), region = 68 }

// kernel: autoencoder_forward.10
= control target key start
LH: loop header
LB: loop body
LE: loop exit
PB: predicated region body
PF: predicated region fallthrough
CT: control target
= control target key end

     0   :  { %s1152_s12 = smov 0   ;;  %s1154_s13 = smov 0   ;;  %s1378_s0 = inlined_call_operand.vmem [shape: bf16[2,5,9,64], index: 0, kind: input, shape index: {}]   ;;  %s1379_s1 = inlined_call_operand.vmem [shape: bf16[1,2,256,64], index: 1, kind: input, shape index: {}]   ;;  %s1380_s2 = inlined_call_operand.vmem [shape: f32[1,64], index: 2, kind: input, shape index: {}]   ;;  %s1381_s3 = inlined_call_operand.vmem [shape: bf16[2,4,2,4,64], index: 3, kind: output, shape index: {}]  }
   0x1   :  { %s1156_s14 = smov 0  }
   0x2 LB: > { %s25_s15 = sadd.s32 1, %s1125_s13  ;;  %p895_p0 = scmp.ge.s32.totalorder %s1129_s14, 1  ;;  %s1129_s14 = sphi %s1156_s14, %s13_s14   ;;  %s1125_s13 = sphi %s1154_s13, %s1385_s13   ;;  %s1121_s12 = sphi %s1152_s12, %s1384_s12  }
   0x3   : > { %p27_p1 = scmp.ge.s32.totalorder %s25_s15, 2  ;;  %p151_p2 = scmp.lt.s32.totalorder %s1129_s14, 3 }
   0x5   : > { %s1387_s15 = smov (%p27_p1, %s25_s15), 0  ;;  %p152_p3 = pnand %p895_p0, %p151_p2 }
   0x6   : > { %p180_p4 = scmp.lt.s32.totalorder (!%p152_p3), %s1121_s12, 1  ;;  %s1131_s9 = smov (!%p152_p3), 64  }
   0x7   : > { %155 = sbr.rel (%p152_p3) target bundleno = 372 (0x174), region = 32 }
   0xc   : > { %s1389_s12 = smov (!%p180_p4, %s1121_s12), 1  ;;  %vm218_vm0 = vsmask.f32 3328  ;;  %vm219_vm1 = vsmask.f32 7440  ;;  %v1069_v0 = vld [vmem:[%s1379_s1 + $0x78] sm:$0xff]  }
   0xd   : > { %v1070_v1 = vld [vmem:[%s1379_s1 + $0xf8] sm:$0xff]   ;;  %s1043_s20 = smul.u32 40, %s1389_s12  ;;  %987 = vmatprep.subr.bf16.mxu0 %v1069_v0  ;;  %v1073_v4 = vld [vmem:[%s1379_s1 + $0x70] sm:$0xff]   ;;  %vm1207_vm2 = vmor %vm218_vm0, %vm219_vm1  ;;  %vm205_vm3 = vcmask 519168   ;;  %vm289_vm4 = vcmask 1043968   ;;  %s986_s19 = sshll.u32 %s1389_s12, 4 }
   0xe   : > { %v1071_v2 = vld [vmem:[%s1379_s1 + $0x38] sm:$0xff]   ;;  %1015 = vmatprep.subr.bf16.mxu1 %v1070_v1  ;;  %v1074_v32 = vld [vmem:[%s1379_s1 + $0xf0] sm:$0xff]   ;;  %v1077_v62 = vld [vmem:[%s1379_s1 + $0x68] sm:$0xff]   ;;  %s1351_s22 = scalar_lea.vmem %s1381_s3, %s986_s19  ;;  %vm788_vm5 = vcmask 517120  }
   0xf   : > { %v1072_v3 = vld [vmem:[%s1379_s1 + $0xb8] sm:$0xff]   ;;  %s1188_s27 = scalar_lea.vmem %s1378_s0, %s1043_s20  ;;  %988 = vmatpush3.bf16.msra.mxu0 %v1071_v2  ;;  %v1075_v39 = vld [vmem:[%s1379_s1 + $0x30] sm:$0xff]  }
  0x10   : > { %v903_v5 = vld [vmem:[%s1188_s27 + $0x8] sm:$0xf]  ;;  %v904_v6 = vld [vmem:[%s1188_s27 + $0xc] sm:$0x1]  ;;  %v210_v7 = vld [vmem:[%s1188_s27] sm:$0xf]  ;;  %1016 = vmatpush3.bf16.msra.mxu1 %v1072_v3  ;;  %989 = vmatprep.subr.bf16.mxu0 %v1073_v4 }
  0x11   : > { %v315_v8 = vshrl.u32 %v903_v5, 16  ;;  %v318_v9 = vshll.u32 %v903_v5, 16  ;;  %v324_v10 = vshll.u32 %v904_v6, 16  ;;  %v211_v11 = vld [vmem:[%s1188_s27 + $0x4] sm:$0x1]  ;;  %v222_v12 = vshrl.u32 %v210_v7, 16  ;;  %1017 = vmatprep.subr.bf16.mxu1 %v1074_v32 }
  0x12   : > { %v225_v13 = vshll.u32 %v210_v7, 16  ;;  %v231_v14 = vshll.u32 %v211_v11, 16  ;;  %v905_v15 = vld [vmem:[%s1188_s27 + $0x10] sm:$0xf]  ;;  %v906_v16 = vld [vmem:[%s1188_s27 + $0x14] sm:$0x1] }
  0x13   : > { %v317_v17 = vrot.slane %v315_v8, 4  ;;  %v320_v18 = vrot.slane %v318_v9, 5  ;;  %v326_v19 = vrot.slane %v324_v10, 5  ;;  %v224_v20 = vrot.slane %v222_v12, 4  ;;  %v212_v21 = vld [vmem:[%s1188_s27 + $0x8] sm:$0xf]  ;;  %990 = vmatpush3.bf16.msra.mxu0 %v1075_v39 }
  0x14   : > { %v227_v22 = vrot.slane %v225_v13, 5  ;;  %v233_v23 = vrot.slane %v231_v14, 5  ;;  %v329_v24 = vshrl.u32 %v905_v15, 16  ;;  %v332_v25 = vshll.u32 %v905_v15, 16  ;;  %v213_v26 = vld [vmem:[%s1188_s27 + $0xc] sm:$0x1]  ;;  %991 = vmatprep.subr.bf16.mxu0 %v1077_v62 }
  0x15   : > { %v321_v27 = vor.u32 %v320_v18, %v317_v17  ;;  %v338_v28 = vshll.u32 %v906_v16, 16  ;;  %v236_v29 = vshrl.u32 %v212_v21, 16  ;;  %v239_v30 = vshll.u32 %v212_v21, 16  ;;  %v216_v31 = vld [vmem:[%s1188_s27 + $0x18] sm:$0xf]  ;;  %v1076_v50 = vld [vmem:[%s1379_s1 + $0xb0] sm:$0xff]  }
  0x16   : > { %v228_v34 = vor.u32 %v227_v22, %v224_v20  ;;  %v331_v35 = vrot.slane %v329_v24, 4  ;;  %v334_v36 = vrot.slane %v332_v25, 5  ;;  %v245_v37 = vshll.u32 %v213_v26, 16  ;;  %v217_v38 = vld [vmem:[%s1188_s27 + $0x1c] sm:$0x1]  ;;  %1018 = vmatpush3.bf16.msra.mxu1 %v1076_v50  ;;  %v1078_v8 = vld [vmem:[%s1379_s1 + $0xe8] sm:$0xff]  }
  0x17   : > { %v322_v40 = vrot.slane %v321_v27, 4  ;;  %v340_v41 = vrot.slane %v338_v28, 5  ;;  %v238_v42 = vrot.slane %v236_v29, 4  ;;  %v241_v43 = vrot.slane %v239_v30, 5  ;;  %v214_v44 = vld [vmem:[%s1188_s27 + $0x10] sm:$0xf]  ;;  %1019 = vmatprep.subr.bf16.mxu1 %v1078_v8 }
  0x18   : > { %v229_v45 = vrot.slane %v228_v34, 4  ;;  %v335_v46 = vor.u32 %v334_v36, %v331_v35  ;;  %v247_v47 = vrot.slane %v245_v37, 5  ;;  %v264_v48 = vshrl.u32 %v216_v31, 16  ;;  %v215_v49 = vld [vmem:[%s1188_s27 + $0x14] sm:$0x1]  ;;  %v1079_v21 = vld [vmem:[%s1379_s1 + $0x28] sm:$0xff]  }
  0x19   : > { %v327_v51 = vsel %vm1207_vm2, %v322_v40, %v326_v19  ;;  %v242_v52 = vor.u32 %v241_v43, %v238_v42  ;;  %v267_v53 = vshll.u32 %v216_v31, 16  ;;  %v273_v54 = vshll.u32 %v217_v38, 16  ;;  %v909_v55 = vld [vmem:[%s1188_s27 + $0x20] sm:$0xf]  ;;  %v910_v56 = vld [vmem:[%s1188_s27 + $0x24] sm:$0x1]  ;;  %992 = vmatpush3.bf16.msra.mxu0 %v1079_v21 }
  0x1a   : > { %370 = vrot.lane.b32.xlu1 %v327_v51, %s1131_s9  ;;  %v234_v57 = vsel %vm1207_vm2, %v229_v45, %v233_v23  ;;  %v336_v58 = vrot.slane %v335_v46, 4  ;;  %v266_v59 = vrot.slane %v264_v48, 4  ;;  %v250_v60 = vshrl.u32 %v214_v44, 16  ;;  %v907_v61 = vld [vmem:[%s1188_s27 + $0x18] sm:$0xf]  ;;  %v1080_v25 = vld [vmem:[%s1379_s1 + $0xa8] sm:$0xff]  }
  0x1b   : > { %277 = vrot.lane.b32.xlu0 %v234_v57, %s1131_s9  ;;  %v243_v63 = vrot.slane %v242_v52, 4  ;;  %v269_v0 = vrot.slane %v267_v53, 5  ;;  %v275_v1 = vrot.slane %v273_v54, 5  ;;  %v253_v2 = vshll.u32 %v214_v44, 16  ;;  %v908_v3 = vld [vmem:[%s1188_s27 + $0x1c] sm:$0x1]  ;;  %1020 = vmatpush3.bf16.msra.mxu1 %v1080_v25 }
  0x1c   : > { %v341_v4 = vsel %vm1207_vm2, %v336_v58, %v340_v41  ;;  %v252_v5 = vrot.slane %v250_v60, 4  ;;  %v259_v6 = vshll.u32 %v215_v49, 16  ;;  %v357_v7 = vshrl.u32 %v909_v55, 16  ;;  %v1081_v31 = vld [vmem:[%s1379_s1 + $0x60] sm:$0xff]   ;;  %v1085_v42 = vld [vmem:[%s1379_s1 + $0x58] sm:$0xff]   ;;  %v1090_v48 = vld [vmem:[%s1379_s1 + $0xd0] sm:$0xff]  }
  0x1d   : > { %v248_v9 = vsel %vm1207_vm2, %v243_v63, %v247_v47  ;;  %v270_v10 = vor.u32 %v269_v0, %v266_v59  ;;  %v255_v11 = vrot.slane %v253_v2, 5  ;;  %v360_v12 = vshll.u32 %v909_v55, 16  ;;  %v1082_v36 = vld [vmem:[%s1379_s1 + $0xe0] sm:$0xff]   ;;  %993 = vmatprep.subr.bf16.mxu0 %v1081_v31  ;;  %v1086_v33 = vld [vmem:[%s1379_s1 + $0xd8] sm:$0xff]   ;;  %v899_v43 = vld [vmem:[%s1188_s27 + $0x8] sm:$0xf] }
  0x1e   : > { %372 = vrot.lane.b32.xlu1 %v341_v4, %s1131_s9  ;;  %v261_v13 = vrot.slane %v259_v6, 5  ;;  %v359_v14 = vrot.slane %v357_v7, 4  ;;  %v366_v15 = vshll.u32 %v910_v56, 16  ;;  %v343_v16 = vshrl.u32 %v907_v61, 16  ;;  %1021 = vmatprep.subr.bf16.mxu1 %v1082_v36  ;;  %v1083_v39 = vld [vmem:[%s1379_s1 + $0x20] sm:$0xff]   ;;  %v1087_v45 = vld [vmem:[%s1379_s1 + $0x18] sm:$0xff]  }
  0x1f   : > { %279 = vrot.lane.b32.xlu0 %v248_v9, %s1131_s9  ;;  %v271_v17 = vrot.slane %v270_v10, 4  ;;  %v256_v18 = vor.u32 %v255_v11, %v252_v5  ;;  %v362_v19 = vrot.slane %v360_v12, 5  ;;  %v346_v20 = vshll.u32 %v907_v61, 16  ;;  %994 = vmatpush3.bf16.msra.mxu0 %v1083_v39  ;;  %v1084_v41 = vld [vmem:[%s1379_s1 + $0xa0] sm:$0xff]   ;;  %302 = vst.msk [vmem:[#allocation2 + $0x4] sm:$0xf] %vm205_vm3, %v899_v43 }
  0x20   : > { %v368_v22 = vrot.slane %v366_v15, 5  ;;  %v345_v23 = vrot.slane %v343_v16, 4  ;;  %v352_v24 = vshll.u32 %v908_v3, 16  ;;  %1022 = vmatpush3.bf16.msra.mxu1 %v1084_v41  ;;  %v201_v44 = vld [vmem:[%s1188_s27] sm:$0xf]  ;;  %995 = vmatprep.subr.bf16.mxu0 %v1085_v42  ;;  %v1088_v46 = vld [vmem:[%s1379_s1 + $0x98] sm:$0xff]  }
  0x21   : > { %v276_v26 = vsel %vm1207_vm2, %v271_v17, %v275_v1  ;;  %v257_v27 = vrot.slane %v256_v18, 4  ;;  %v363_v28 = vor.u32 %v362_v19, %v359_v14  ;;  %v348_v29 = vrot.slane %v346_v20, 5  ;;  %206 = vst.msk [vmem:[#allocation2] sm:$0xf] %vm205_vm3, %v201_v44  ;;  %1023 = vmatprep.subr.bf16.mxu1 %v1086_v33  ;;  %v1089_v47 = vld [vmem:[%s1379_s1 + $0x50] sm:$0xff]   ;;  %v1093_v53 = vld [vmem:[%s1379_s1 + $0x48] sm:$0xff]  }
  0x22   : > { %283 = vrot.lane.b32.xlu1 %v276_v26, %s1131_s9  ;;  %v354_v30 = vrot.slane %v352_v24, 5  ;;  %v900_v49 = vld [vmem:[%s1188_s27 + $0x10] sm:$0xf]  ;;  %v202_v50 = vld [vmem:[%s1188_s27 + $0x8] sm:$0xf]  ;;  %v1097_v59 = vld [vmem:[%s1379_s1 + $0x40] sm:$0xff]  }
  0x23   : > { %v262_v32 = vsel %vm1207_vm2, %v257_v27, %v261_v13  ;;  %v364_v34 = vrot.slane %v363_v28, 4  ;;  %v349_v35 = vor.u32 %v348_v29, %v345_v23  ;;  %996 = vmatpush3.bf16.msra.mxu0 %v1087_v45  ;;  %303 = vst.msk [vmem:[#allocation2 + $0xc] sm:$0xf] %vm205_vm3, %v900_v49  ;;  %207 = vst.msk [vmem:[#allocation2 + $0x8] sm:$0xf] %vm205_vm3, %v202_v50  ;;  %v1091_v51 = vld [vmem:[%s1379_s1 + $0x10] sm:$0xff]  }
  0x24   : > { %281 = vrot.lane.b32.xlu0 %v262_v32, %s1131_s9  ;;  %1024 = vmatpush3.bf16.msra.mxu1 %v1088_v46  ;;  %v1092_v52 = vld [vmem:[%s1379_s1 + $0x90] sm:$0xff]   ;;  %v1094_v54 = vld [vmem:[%s1379_s1 + $0xc8] sm:$0xff]   ;;  %v204_v55 = vld [vmem:[%s1188_s27 + $0x18] sm:$0xf] }
  0x25   : > { %v369_v37 = vsel %vm1207_vm2, %v364_v34, %v368_v22  ;;  %v350_v38 = vrot.slane %v349_v35, 4  ;;  %997 = vmatprep.subr.bf16.mxu0 %v1089_v47  ;;  %1025 = vmatprep.subr.bf16.mxu1 %v1090_v48  ;;  %209 = vst.msk [vmem:[#allocation2 + $0x18] sm:$0xf] %vm205_vm3, %v204_v55  ;;  %v203_v56 = vld [vmem:[%s1188_s27 + $0x10] sm:$0xf]  ;;  %v1095_v57 = vld [vmem:[%s1379_s1 + $0x8] sm:$0xff]  }
  0x26   : > { %376 = vrot.lane.b32.xlu1 %v369_v37, %s1131_s9  ;;  %208 = vst.msk [vmem:[#allocation2 + $0x10] sm:$0xf] %vm205_vm3, %v203_v56  ;;  %v1096_v58 = vld [vmem:[%s1379_s1 + $0x88] sm:$0xff]   ;;  %v1098_v60 = vld [vmem:[%s1379_s1 + $0xc0] sm:$0xff]   ;;  %v901_v62 = vld [vmem:[%s1188_s27 + $0x18] sm:$0xf] }
  0x27   : > { %v355_v40 = vsel %vm1207_vm2, %v350_v38, %v354_v30  ;;  %998 = vmatpush3.bf16.msra.mxu0 %v1091_v51  ;;  %v902_v61 = vld [vmem:[%s1188_s27 + $0x20] sm:$0xf]  ;;  %304 = vst.msk [vmem:[#allocation2 + $0x14] sm:$0xf] %vm205_vm3, %v901_v62 }
  0x28   : > { %374 = vrot.lane.b32.xlu0 %v355_v40, %s1131_s9  ;;  %1026 = vmatpush3.bf16.msra.mxu1 %v1092_v52  ;;  %305 = vst.msk [vmem:[#allocation2 + $0x1c] sm:$0xf] %vm205_vm3, %v902_v61  ;;  %v1099_v63 = vld [vmem:[%s1379_s1] sm:$0xff]  }
  0x29   : > { %999 = vmatprep.subr.bf16.mxu0 %v1093_v53  ;;  %1027 = vmatprep.subr.bf16.mxu1 %v1094_v54  ;;  %v1100_v0 = vld [vmem:[%s1379_s1 + $0x80] sm:$0xff]  }
  0x2a   : > { %v943_v15 = vld [vmem:[%s1380_s2] ss:$0 sm:$0xff] }
  0x2b   : > { %1000 = vmatpush3.bf16.msra.mxu0 %v1095_v57 }
  0x2c   : > { %1028 = vmatpush3.bf16.msra.mxu1 %v1096_v58  ;;  %1001 = vmatprep.subr.bf16.mxu0 %v1097_v59 }
  0x2d   : > { %1029 = vmatprep.subr.bf16.mxu1 %v1098_v60 }
  0x2f   : > { %1002 = vmatpush3.bf16.msra.mxu0 %v1099_v63 }
  0x30   : > { %1030 = vmatpush3.bf16.msra.mxu1 %v1100_v0 }
  0x8c   : > { %v371_v1 = vpop.permute.xlu1 %370 }
  0x8d   : > { %382 = vst.msk [vmem:[#allocation2 + $0x4] sm:$0xf] %vm289_vm4, %v371_v1  ;;  %v278_v2 = vpop.permute.xlu0 %277 }
  0x8e   : > { %290 = vst.msk [vmem:[#allocation2] sm:$0xf] %vm289_vm4, %v278_v2 }
  0x90   : > { %v373_v3 = vpop.permute.xlu1 %372 }
  0x91   : > { %383 = vst.msk [vmem:[#allocation2 + $0xc] sm:$0xf] %vm289_vm4, %v373_v3  ;;  %v280_v4 = vpop.permute.xlu0 %279 }
  0x92   : > { %291 = vst.msk [vmem:[#allocation2 + $0x8] sm:$0xf] %vm289_vm4, %v280_v4 }
  0x94   : > { %v284_v5 = vpop.permute.xlu1 %283 }
  0x95   : > { %293 = vst.msk [vmem:[#allocation2 + $0x18] sm:$0xf] %vm289_vm4, %v284_v5 }
  0x96   : > { %v282_v6 = vpop.permute.xlu0 %281 }
  0x97   : > { %292 = vst.msk [vmem:[#allocation2 + $0x10] sm:$0xf] %vm289_vm4, %v282_v6 }
  0x98   : > { %v377_v7 = vpop.permute.xlu1 %376  ;;  %v1103_v9 = vld [vmem:[#allocation2 + $0x4] ss:$8 sps:$4 sm:$0xff]  }
  0x99   : > { %385 = vst.msk [vmem:[#allocation2 + $0x1c] sm:$0xf] %vm289_vm4, %v377_v7  ;;  %v1101_v8 = vld [vmem:[#allocation2] ss:$8 sps:$4 sm:$0xff]   ;;  %610 = vmatprep.mubr.bf16.mxu0 %v1103_v9  ;;  %755 = vmatprep.mubr.bf16.mxu1 %v1103_v9 }
  0x9a   : > { %v375_v10 = vpop.permute.xlu0 %374  ;;  %611 = vmatmul.mubr.bf16.vlgmr.msra.gmra.mxu0 %v1101_v8  ;;  %756 = vmatmul.mubr.bf16.vlgmr.msra.gmra.mxu1 %v1101_v8 }
  0x9b   : > { %384 = vst.msk [vmem:[#allocation2 + $0x14] sm:$0xf] %vm289_vm4, %v375_v10 }
  0x9e   : > { %v1106_v12 = vld [vmem:[#allocation2 + $0x10] ss:$8 sps:$4 sm:$0xff]  }
  0xa2   : > { %v1104_v11 = vld [vmem:[#allocation2 + $0x14] ss:$8 sps:$4 sm:$0xff]  }
  0xa3   : > { %618 = vmatprep.mubr.bf16.mxu0 %v1104_v11  ;;  %763 = vmatprep.mubr.bf16.mxu1 %v1104_v11 }
  0xa4   : > { %619 = vmatmul.mubr.bf16.gmra.mxu0 %v1106_v12  ;;  %764 = vmatmul.mubr.bf16.gmra.mxu1 %v1106_v12 }
 0x15a   : > { %v1003_v13 = vpop.f32.mrf.mxu0  ;;  %v1031_v14 = vpop.f32.mrf.mxu1 }
 0x15c   : > { %v1004_v16 = vpop.f32.mrf.mxu0  ;;  %v1032_v17 = vpop.f32.mrf.mxu1 }
 0x15d   : > { %v1005_v18 = vadd.f32 %v1004_v16, %v1003_v13  ;;  %v1033_v19 = vadd.f32 %v1032_v17, %v1031_v14 }
 0x15e   : > { %v1006_v20 = vpop.f32.mrf.mxu0  ;;  %v1034_v21 = vpop.f32.mrf.mxu1 }
 0x15f   : > { %v613_v22 = vadd.f32 %v1005_v18, %v943_v15  ;;  %v758_v23 = vadd.f32 %v1033_v19, %v943_v15 }
 0x160   : > { %v1007_v24 = vpop.f32.mrf.mxu0  ;;  %v1035_v25 = vpop.f32.mrf.mxu1 }
 0x161   : > { %v772_v26 = vmax.f32 %v613_v22, 0.0  ;;  %v776_v27 = vmax.f32 %v758_v23, 0.0  ;;  %v1008_v28 = vadd.f32 %v1007_v24, %v1006_v20  ;;  %v1036_v29 = vadd.f32 %v1035_v25, %v1034_v21 }
 0x163   : > { %v780_v30 = vpack.c.bf16 %v772_v26, %v772_v26  ;;  %v784_v31 = vpack.c.bf16 %v776_v27, %v776_v27  ;;  %v616_v32 = vadd.f32 %v1008_v28, %v943_v15  ;;  %v761_v34 = vadd.f32 %v1036_v29, %v943_v15 }
 0x164   : > { %v1009_v35 = vpop.f32.mrf.mxu0  ;;  %v1037_v36 = vpop.f32.mrf.mxu1 }
 0x165   : > { %789 = vst.msk [vmem:[%s1351_s22] sm:$0x3] %vm788_vm5, %v780_v30  ;;  %980 = vst.msk [vmem:[%s1351_s22 + $0x2] sm:$0x3] %vm788_vm5, %v784_v31  ;;  %v773_v37 = vmax.f32 %v616_v32, 0.0  ;;  %v777_v38 = vmax.f32 %v761_v34, 0.0 }
 0x166   : > { %v1010_v39 = vpop.f32.mrf.mxu0  ;;  %v1038_v40 = vpop.f32.mrf.mxu1 }
 0x167   : > { %v1011_v41 = vadd.f32 %v1010_v39, %v1009_v35  ;;  %v1039_v42 = vadd.f32 %v1038_v40, %v1037_v36  ;;  %v781_v33 = vpack.c.bf16 %v773_v37, %v773_v37  ;;  %v785_v43 = vpack.c.bf16 %v777_v38, %v777_v38 }
 0x168   : > { %v1012_v44 = vpop.f32.mrf.mxu0  ;;  %v1040_v45 = vpop.f32.mrf.mxu1 }
 0x169   : > { %v621_v46 = vadd.f32 %v1011_v41, %v943_v15  ;;  %v766_v47 = vadd.f32 %v1039_v42, %v943_v15  ;;  %790 = vst.msk [vmem:[%s1351_s22 + $0x4] sm:$0x3] %vm788_vm5, %v781_v33  ;;  %981 = vst.msk [vmem:[%s1351_s22 + $0x6] sm:$0x3] %vm788_vm5, %v785_v43 }
 0x16a   : > { %v1013_v48 = vpop.f32.mrf.mxu0  ;;  %v1041_v49 = vpop.f32.mrf.mxu1 }
 0x16b   : > { %v774_v50 = vmax.f32 %v621_v46, 0.0  ;;  %v778_v51 = vmax.f32 %v766_v47, 0.0  ;;  %v1014_v52 = vadd.f32 %v1013_v48, %v1012_v44  ;;  %v1042_v53 = vadd.f32 %v1041_v49, %v1040_v45 }
 0x16d   : > { %v782_v54 = vpack.c.bf16 %v774_v50, %v774_v50  ;;  %v786_v55 = vpack.c.bf16 %v778_v51, %v778_v51  ;;  %v624_v56 = vadd.f32 %v1014_v52, %v943_v15  ;;  %v769_v57 = vadd.f32 %v1042_v53, %v943_v15 }
 0x16f   : > { %791 = vst.msk [vmem:[%s1351_s22 + $0x8] sm:$0x3] %vm788_vm5, %v782_v54  ;;  %982 = vst.msk [vmem:[%s1351_s22 + $0xa] sm:$0x3] %vm788_vm5, %v786_v55  ;;  %v775_v58 = vmax.f32 %v624_v56, 0.0  ;;  %v779_v59 = vmax.f32 %v769_v57, 0.0 }
 0x171   : > { %v783_v60 = vpack.c.bf16 %v775_v58, %v775_v58  ;;  %v787_v61 = vpack.c.bf16 %v779_v59, %v779_v59 }
 0x173   : > { %792 = vst.msk [vmem:[%s1351_s22 + $0xc] sm:$0x3] %vm788_vm5, %v783_v60  ;;  %983 = vst.msk [vmem:[%s1351_s22 + $0xe] sm:$0x3] %vm788_vm5, %v787_v61 }
 0x174 PF: > { %s13_s14 = sadd.s32 1, %s1129_s14   ;;  %s1384_s12 = smov %s1125_s13 }
 0x175   : > { %p10_p5 = scmp.ge.s32.totalorder %s13_s14, 4   ;;  %s1385_s13 = smov %s1387_s15 }
 0x177   :  { %12 = sbr.rel (!%p10_p5) target bundleno = 2 (0x2), region = 66 }

// kernel: tile.28
= control target key start
LH: loop header
LB: loop body
LE: loop exit
PB: predicated region body
PF: predicated region fallthrough
CT: control target
= control target key end

     0   :  { %s22_s0 = inlined_call_operand.vmem [shape: f32[3], index: 0, kind: input, shape index: {}]   ;;  %s23_s1 = inlined_call_operand.vmem [shape: f32[2,3], index: 1, kind: output, shape index: {}]  }
   0x1   :  { %v4_v0 = vld [vmem:[%s22_s0] ss:$0 sm:$0xff] }
   0x2   :  { %5 = vst [vmem:[%s23_s1] sm:$0x3] %v4_v0 }

// kernel: tile.29
= control target key start
LH: loop header
LB: loop body
LE: loop exit
PB: predicated region body
PF: predicated region fallthrough
CT: control target
= control target key end

     0   :  { %vm8_vm0 = vcmask 23552   ;;  %vm14_vm1 = vcmask 48152   ;;  %s42_s0 = inlined_call_operand.vmem [shape: f32[2,3], index: 0, kind: input, shape index: {}]   ;;  %s43_s1 = inlined_call_operand.vmem [shape: f32[1,6], index: 1, kind: output, shape index: {}]  }
   0x1   :  { %v5_v0 = vld [vmem:[%s42_s0] sm:$0x3]  ;;  %s25_s0 = smov 3  }
   0x2   :  { %6 = vst [vmem:[#allocation1] sm:$0x3] %v5_v0 }
   0x9   :  { %v11_v1 = vld [vmem:[#allocation1 + $0x1] sm:$0x1]   ;;  %v7_v2 = vld [vmem:[#allocation1] sm:$0x1]  }
   0xa   :  { %12 = vrot.lane.b32.xlu0 %v11_v1, %s25_s0  ;;  %9 = vst.msk [vmem:[#allocation0] sm:$0x1] %vm8_vm0, %v7_v2  }
  0x7c   :  { %v13_v3 = vpop.permute.xlu0 %12  }
  0x7d   :  { %15 = vst.msk [vmem:[#allocation0] sm:$0x1] %vm14_vm1, %v13_v3  }
  0x84   :  { %v20_v4 = vld [vmem:[#allocation0] sm:$0x1] }
  0x85   :  { %23 = vst [vmem:[%s43_s1] sm:$0x1] %v20_v4 }

// kernel: autoencoder_forward.11
= control target key start
LH: loop header
LB: loop body
LE: loop exit
PB: predicated region body
PF: predicated region fallthrough
CT: control target
= control target key end

     0   :  { %s1364_s12 = smov 0   ;;  %s1366_s13 = smov 0   ;;  %s1648_s0 = inlined_call_operand.vmem [shape: bf16[2,9,9,32], index: 0, kind: input, shape index: {}]   ;;  %s1649_s1 = inlined_call_operand.vmem [shape: bf16[1,2,128,6], index: 1, kind: input, shape index: {}]   ;;  %s1650_s2 = inlined_call_operand.vmem [shape: f32[1,6], index: 2, kind: input, shape index: {}]   ;;  %s1651_s3 = inlined_call_operand.vmem [shape: bf16[2,8,2,8,6], index: 3, kind: output, shape index: {}]  }
   0x1   :  { %s1368_s14 = smov 0  }
   0x2 LB: > { %s25_s15 = sadd.s32 1, %s1335_s13  ;;  %p1089_p0 = scmp.ge.s32.totalorder %s1339_s14, 1  ;;  %s1339_s14 = sphi %s1368_s14, %s13_s14   ;;  %s1335_s13 = sphi %s1366_s13, %s1655_s13   ;;  %s1331_s12 = sphi %s1364_s12, %s1654_s12  }
   0x3   : > { %p27_p1 = scmp.ge.s32.totalorder %s25_s15, 2  ;;  %p151_p2 = scmp.lt.s32.totalorder %s1339_s14, 3 }
   0x5   : > { %s1657_s15 = smov (%p27_p1, %s25_s15), 0  ;;  %p152_p3 = pnand %p1089_p0, %p151_p2 }
   0x6   : > { %p180_p4 = scmp.lt.s32.totalorder (!%p152_p3), %s1331_s12, 1  ;;  %s1341_s30 = smov (!%p152_p3), 64  }
   0x7   : > { %155 = sbr.rel (%p152_p3) target bundleno = 414 (0x19e), region = 32  ;;  %s1342_s16 = smov (!%p152_p3), 32  }
   0x8   : > { %s1343_s23 = smov (!%p152_p3), 96  }
   0xc   : > { %s1659_s12 = smov (!%p180_p4, %s1331_s12), 1  ;;  %v1265_v0 = vld [vmem:[%s1649_s1 + $0x38] sm:$0xff]   ;;  %vm234_vm0 = vsmask.f32 3328  ;;  %vm235_vm1 = vsmask.f32 7440 }
   0xd   : > { %v1266_v1 = vld [vmem:[%s1649_s1 + $0x78] sm:$0xff]   ;;  %s1237_s20 = smul.u32 72, %s1659_s12  ;;  %1189 = vmatprep.subr.bf16.mxu0 %v1265_v0  ;;  %v1267_v2 = vld [vmem:[%s1649_s1 + $0x30] sm:$0xff]   ;;  %v1269_v4 = vld [vmem:[%s1649_s1 + $0x28] sm:$0xff]   ;;  %vm209_vm3 = vcmask 257024   ;;  %vm373_vm4 = vcmask 519424  }
   0xe   : > { %1213 = vmatprep.subr.bf16.mxu1 %v1266_v1  ;;  %1190 = vmatpush3.bf16.msra.mxu0 %v1265_v0  ;;  %v1268_v3 = vld [vmem:[%s1649_s1 + $0x70] sm:$0xff]   ;;  %v1270_v18 = vld [vmem:[%s1649_s1 + $0x68] sm:$0xff]   ;;  %v1271_v23 = vld [vmem:[%s1649_s1 + $0x20] sm:$0xff]   ;;  %vm426_vm5 = vcmask 781824   ;;  %vm587_vm6 = vcmask 1044224   ;;  %s1164_s7 = sshll.u32 %s1659_s12, 6 }
   0xf   : > { %s1400_s27 = scalar_lea.vmem %s1648_s0, %s1237_s20  ;;  %1214 = vmatpush3.bf16.msra.mxu1 %v1266_v1  ;;  %1191 = vmatprep.subr.bf16.mxu0 %v1267_v2  ;;  %v1272_v34 = vld [vmem:[%s1649_s1 + $0x60] sm:$0xff]   ;;  %vm1431_vm2 = vmor %vm234_vm0, %vm235_vm1  ;;  %v1273_v41 = vld [vmem:[%s1649_s1 + $0x18] sm:$0xff]   ;;  %s1597_s10 = scalar_lea.vmem %s1651_s3, %s1164_s7  ;;  %vm974_vm7 = vcmask 44032  }
  0x10   : > { %v1094_v5 = vld [vmem:[%s1400_s27 + $0x10] sm:$0xf]  ;;  %v1093_v6 = vld [vmem:[%s1400_s27 + $0x8] sm:$0xf]  ;;  %v1096_v7 = vld [vmem:[%s1400_s27 + $0x20] sm:$0xf]  ;;  %1215 = vmatprep.subr.bf16.mxu1 %v1268_v3 }
  0x11   : > { %404 = vrot.lane.b32.xlu1 %v1094_v5, %s1341_s30  ;;  %402 = vrot.lane.b32.xlu0 %v1093_v6, %s1341_s30  ;;  %v1095_v8 = vld [vmem:[%s1400_s27 + $0x18] sm:$0xf]  ;;  %v222_v9 = vld [vmem:[%s1400_s27 + $0x10] sm:$0xf] }
  0x12   : > { %v223_v10 = vld [vmem:[%s1400_s27 + $0x14] sm:$0x1]  ;;  %v266_v11 = vshrl.u32 %v222_v9, 16  ;;  %v269_v12 = vshll.u32 %v222_v9, 16  ;;  %v218_v13 = vld [vmem:[%s1400_s27] sm:$0xf]  ;;  %1192 = vmatpush3.bf16.msra.mxu0 %v1267_v2 }
  0x13   : > { %v275_v14 = vshll.u32 %v223_v10, 16  ;;  %v219_v15 = vld [vmem:[%s1400_s27 + $0x4] sm:$0x1]  ;;  %v238_v16 = vshrl.u32 %v218_v13, 16  ;;  %v241_v17 = vshll.u32 %v218_v13, 16  ;;  %1216 = vmatpush3.bf16.msra.mxu1 %v1268_v3  ;;  %1193 = vmatprep.subr.bf16.mxu0 %v1269_v4 }
  0x14   : > { %v268_v19 = vrot.slane %v266_v11, 4  ;;  %v271_v20 = vrot.slane %v269_v12, 5  ;;  %v247_v21 = vshll.u32 %v219_v15, 16  ;;  %v224_v22 = vld [vmem:[%s1400_s27 + $0x18] sm:$0xf]  ;;  %1217 = vmatprep.subr.bf16.mxu1 %v1270_v18 }
  0x15   : > { %408 = vrot.lane.b32.xlu1 %v1096_v7, %s1341_s30  ;;  %406 = vrot.lane.b32.xlu0 %v1095_v8, %s1341_s30  ;;  %v277_v24 = vrot.slane %v275_v14, 5  ;;  %v240_v25 = vrot.slane %v238_v16, 4  ;;  %v243_v26 = vrot.slane %v241_v17, 5  ;;  %v225_v27 = vld [vmem:[%s1400_s27 + $0x1c] sm:$0x1]  ;;  %v280_v28 = vshrl.u32 %v224_v22, 16 }
  0x16   : > { %v272_v29 = vor.u32 %v271_v20, %v268_v19  ;;  %v249_v30 = vrot.slane %v247_v21, 5  ;;  %v283_v31 = vshll.u32 %v224_v22, 16  ;;  %v289_v32 = vshll.u32 %v225_v27, 16  ;;  %v220_v33 = vld [vmem:[%s1400_s27 + $0x8] sm:$0xf]  ;;  %1194 = vmatpush3.bf16.msra.mxu0 %v1269_v4  ;;  %v1274_v19 = vld [vmem:[%s1649_s1 + $0x58] sm:$0xff]  }
  0x17   : > { %v244_v36 = vor.u32 %v243_v26, %v240_v25  ;;  %v282_v37 = vrot.slane %v280_v28, 4  ;;  %v221_v38 = vld [vmem:[%s1400_s27 + $0xc] sm:$0x1]  ;;  %v252_v39 = vshrl.u32 %v220_v33, 16  ;;  %v255_v40 = vshll.u32 %v220_v33, 16  ;;  %1218 = vmatpush3.bf16.msra.mxu1 %v1270_v18  ;;  %1195 = vmatprep.subr.bf16.mxu0 %v1271_v23  ;;  %v1275_v25 = vld [vmem:[%s1649_s1 + $0x10] sm:$0xff]  }
  0x18   : > { %v273_v42 = vrot.slane %v272_v29, 4  ;;  %v285_v43 = vrot.slane %v283_v31, 5  ;;  %v291_v44 = vrot.slane %v289_v32, 5  ;;  %v261_v45 = vshll.u32 %v221_v38, 16  ;;  %v1103_v46 = vld [vmem:[%s1400_s27 + $0x10] sm:$0xf]  ;;  %1219 = vmatprep.subr.bf16.mxu1 %v1272_v34 }
  0x19   : > { %v245_v47 = vrot.slane %v244_v36, 4  ;;  %v254_v48 = vrot.slane %v252_v39, 4  ;;  %v257_v49 = vrot.slane %v255_v40, 5  ;;  %v1104_v50 = vld [vmem:[%s1400_s27 + $0x14] sm:$0x1]  ;;  %v466_v51 = vshrl.u32 %v1103_v46, 16 }
  0x1a   : > { %v278_v52 = vsel %vm1431_vm2, %v273_v42, %v277_v24  ;;  %v286_v53 = vor.u32 %v285_v43, %v282_v37  ;;  %v263_v54 = vrot.slane %v261_v45, 5  ;;  %v469_v55 = vshll.u32 %v1103_v46, 16  ;;  %v1101_v56 = vld [vmem:[%s1400_s27 + $0x8] sm:$0xf]  ;;  %v1102_v57 = vld [vmem:[%s1400_s27 + $0xc] sm:$0x1]  ;;  %1196 = vmatpush3.bf16.msra.mxu0 %v1271_v23 }
  0x1b   : > { %353 = vrot.lane.b32.xlu1 %v278_v52, %s1342_s16  ;;  %v250_v58 = vsel %vm1431_vm2, %v245_v47, %v249_v30  ;;  %v258_v59 = vor.u32 %v257_v49, %v254_v48  ;;  %v468_v60 = vrot.slane %v466_v51, 4  ;;  %v475_v61 = vshll.u32 %v1104_v50, 16  ;;  %v1107_v62 = vld [vmem:[%s1400_s27 + $0x20] sm:$0xf]  ;;  %1220 = vmatpush3.bf16.msra.mxu1 %v1272_v34  ;;  %v1108_v3 = vld [vmem:[%s1400_s27 + $0x24] sm:$0x1] }
  0x1c   : > { %349 = vrot.lane.b32.xlu0 %v250_v58, %s1342_s16  ;;  %v287_v63 = vrot.slane %v286_v53, 4  ;;  %v471_v0 = vrot.slane %v469_v55, 5  ;;  %v452_v1 = vshrl.u32 %v1101_v56, 16  ;;  %v455_v2 = vshll.u32 %v1101_v56, 16  ;;  %1197 = vmatprep.subr.bf16.mxu0 %v1273_v41  ;;  %v1105_v8 = vld [vmem:[%s1400_s27 + $0x18] sm:$0xf] }
  0x1d   : > { %v259_v4 = vrot.slane %v258_v59, 4  ;;  %v477_v5 = vrot.slane %v475_v61, 5  ;;  %v461_v6 = vshll.u32 %v1102_v57, 16  ;;  %v494_v7 = vshrl.u32 %v1107_v62, 16  ;;  %v1106_v13 = vld [vmem:[%s1400_s27 + $0x1c] sm:$0x1]  ;;  %1221 = vmatprep.subr.bf16.mxu1 %v1274_v19 }
  0x1e   : > { %v292_v9 = vsel %vm1431_vm2, %v287_v63, %v291_v44  ;;  %v472_v10 = vor.u32 %v471_v0, %v468_v60  ;;  %v454_v11 = vrot.slane %v452_v1, 4  ;;  %v457_v12 = vrot.slane %v455_v2, 5  ;;  %v228_v14 = vld [vmem:[%s1400_s27 + $0x28] sm:$0xf]  ;;  %1198 = vmatpush3.bf16.msra.mxu0 %v1273_v41  ;;  %v229_v24 = vld [vmem:[%s1400_s27 + $0x2c] sm:$0x1] }
  0x1f   : > { %355 = vrot.lane.b32.xlu1 %v292_v9, %s1342_s16  ;;  %v264_v15 = vsel %vm1431_vm2, %v259_v4, %v263_v54  ;;  %v463_v16 = vrot.slane %v461_v6, 5  ;;  %v496_v17 = vrot.slane %v494_v7, 4  ;;  %v497_v18 = vshll.u32 %v1107_v62, 16  ;;  %v226_v30 = vld [vmem:[%s1400_s27 + $0x20] sm:$0xf]  ;;  %1222 = vmatpush3.bf16.msra.mxu1 %v1274_v19  ;;  %v1276_v37 = vld [vmem:[%s1649_s1 + $0x50] sm:$0xff]  }
  0x20   : > { %351 = vrot.lane.b32.xlu0 %v264_v15, %s1342_s16  ;;  %v473_v20 = vrot.slane %v472_v10, 4  ;;  %v458_v21 = vor.u32 %v457_v12, %v454_v11  ;;  %v503_v22 = vshll.u32 %v1108_v3, 16  ;;  %v480_v23 = vshrl.u32 %v1105_v8, 16  ;;  %v227_v36 = vld [vmem:[%s1400_s27 + $0x24] sm:$0x1]  ;;  %1199 = vmatprep.subr.bf16.mxu0 %v1275_v25  ;;  %v1277_v43 = vld [vmem:[%s1649_s1 + $0x8] sm:$0xff]  }
  0x21   : > { %v499_v26 = vrot.slane %v497_v18, 5  ;;  %v483_v27 = vshll.u32 %v1105_v8, 16  ;;  %v489_v28 = vshll.u32 %v1106_v13, 16  ;;  %v308_v29 = vshrl.u32 %v228_v14, 16  ;;  %v232_v42 = vld [vmem:[%s1400_s27 + $0x38] sm:$0xf]  ;;  %1223 = vmatprep.subr.bf16.mxu1 %v1276_v37 }
  0x22   : > { %v478_v31 = vsel %vm1431_vm2, %v473_v20, %v477_v5  ;;  %v459_v32 = vrot.slane %v458_v21, 4  ;;  %v505_v33 = vrot.slane %v503_v22, 5  ;;  %v482_v34 = vrot.slane %v480_v23, 4  ;;  %1200 = vmatpush3.bf16.msra.mxu0 %v1275_v25  ;;  %v1278_v48 = vld [vmem:[%s1649_s1 + $0x48] sm:$0xff]   ;;  %v233_v53 = vld [vmem:[%s1400_s27 + $0x3c] sm:$0x1] }
  0x23   : > { %565 = vrot.lane.b32.xlu1 %v478_v31, %s1343_s23  ;;  %v500_v38 = vor.u32 %v499_v26, %v496_v17  ;;  %v485_v39 = vrot.slane %v483_v27, 5  ;;  %v491_v40 = vrot.slane %v489_v28, 5  ;;  %v310_v41 = vrot.slane %v308_v29, 4  ;;  %1201 = vmatprep.subr.bf16.mxu0 %v1277_v43  ;;  %v1279_v54 = vld [vmem:[%s1649_s1] sm:$0xff]   ;;  %v230_v59 = vld [vmem:[%s1400_s27 + $0x30] sm:$0xf] }
  0x24   : > { %v464_v44 = vsel %vm1431_vm2, %v459_v32, %v463_v16  ;;  %v311_v45 = vshll.u32 %v228_v14, 16  ;;  %v317_v46 = vshll.u32 %v229_v24, 16  ;;  %v294_v47 = vshrl.u32 %v226_v30, 16  ;;  %1224 = vmatpush3.bf16.msra.mxu1 %v1276_v37  ;;  %v231_v0 = vld [vmem:[%s1400_s27 + $0x34] sm:$0x1]  ;;  %v1281_v1 = vld [vmem:[%s1649_s1 + $0x40] sm:$0xff]  }
  0x25   : > { %563 = vrot.lane.b32.xlu0 %v464_v44, %s1343_s23  ;;  %v501_v49 = vrot.slane %v500_v38, 4  ;;  %v486_v50 = vor.u32 %v485_v39, %v482_v34  ;;  %v297_v51 = vshll.u32 %v226_v30, 16  ;;  %v303_v52 = vshll.u32 %v227_v36, 16  ;;  %1225 = vmatprep.subr.bf16.mxu1 %v1278_v48  ;;  %v1111_v10 = vld [vmem:[%s1400_s27 + $0x30] sm:$0xf] }
  0x26   : > { %v313_v55 = vrot.slane %v311_v45, 5  ;;  %v319_v56 = vrot.slane %v317_v46, 5  ;;  %v296_v57 = vrot.slane %v294_v47, 4  ;;  %v336_v58 = vshrl.u32 %v232_v42, 16  ;;  %1202 = vmatpush3.bf16.msra.mxu0 %v1277_v43  ;;  %v1112_v14 = vld [vmem:[%s1400_s27 + $0x34] sm:$0x1] }
  0x27   : > { %v506_v60 = vsel %vm1431_vm2, %v501_v49, %v505_v33  ;;  %v487_v61 = vrot.slane %v486_v50, 4  ;;  %v299_v62 = vrot.slane %v297_v51, 5  ;;  %v305_v63 = vrot.slane %v303_v52, 5  ;;  %1203 = vmatprep.subr.bf16.mxu0 %v1279_v54  ;;  %v1109_v19 = vld [vmem:[%s1400_s27 + $0x28] sm:$0xf] }
  0x28   : > { %569 = vrot.lane.b32.xlu1 %v506_v60, %s1343_s23  ;;  %v314_v2 = vor.u32 %v313_v55, %v310_v41  ;;  %v338_v3 = vrot.slane %v336_v58, 4  ;;  %v339_v4 = vshll.u32 %v232_v42, 16  ;;  %v345_v5 = vshll.u32 %v233_v53, 16  ;;  %1226 = vmatpush3.bf16.msra.mxu1 %v1278_v48  ;;  %v1110_v24 = vld [vmem:[%s1400_s27 + $0x2c] sm:$0x1] }
  0x29   : > { %v492_v6 = vsel %vm1431_vm2, %v487_v61, %v491_v40  ;;  %v300_v7 = vor.u32 %v299_v62, %v296_v57  ;;  %v322_v8 = vshrl.u32 %v230_v59, 16  ;;  %v325_v9 = vshll.u32 %v230_v59, 16  ;;  %1227 = vmatprep.subr.bf16.mxu1 %v1281_v1  ;;  %v1115_v25 = vld [vmem:[%s1400_s27 + $0x40] sm:$0xf]  ;;  %v1113_v30 = vld [vmem:[%s1400_s27 + $0x38] sm:$0xf] }
  0x2a   : > { %567 = vrot.lane.b32.xlu0 %v492_v6, %s1343_s23  ;;  %v315_v11 = vrot.slane %v314_v2, 4  ;;  %v341_v12 = vrot.slane %v339_v4, 5  ;;  %v331_v13 = vshll.u32 %v231_v0, 16  ;;  %v522_v18 = vshrl.u32 %v1111_v10, 16  ;;  %1204 = vmatpush3.bf16.msra.mxu0 %v1279_v54  ;;  %v1116_v36 = vld [vmem:[%s1400_s27 + $0x44] sm:$0x1] }
  0x2b   : > { %v301_v15 = vrot.slane %v300_v7, 4  ;;  %v324_v16 = vrot.slane %v322_v8, 4  ;;  %v327_v17 = vrot.slane %v325_v9, 5  ;;  %v347_v22 = vrot.slane %v345_v5, 5  ;;  %v1114_v37 = vld [vmem:[%s1400_s27 + $0x3c] sm:$0x1] }
  0x2c   : > { %v320_v20 = vsel %vm1431_vm2, %v315_v11, %v319_v56  ;;  %v342_v21 = vor.u32 %v341_v12, %v338_v3  ;;  %v525_v23 = vshll.u32 %v1111_v10, 16  ;;  %v333_v28 = vrot.slane %v331_v13, 5  ;;  %v203_v38 = vld [vmem:[%s1400_s27 + $0x10] sm:$0xf]  ;;  %1228 = vmatpush3.bf16.msra.mxu1 %v1281_v1  ;;  %v201_v43 = vld [vmem:[%s1400_s27] sm:$0xf] }
  0x2d   : > { %359 = vrot.lane.b32.xlu1 %v320_v20, %s1342_s16  ;;  %v306_v26 = vsel %vm1431_vm2, %v301_v15, %v305_v63  ;;  %v328_v27 = vor.u32 %v327_v17, %v324_v16  ;;  %v524_v29 = vrot.slane %v522_v18, 4  ;;  %v508_v33 = vshrl.u32 %v1109_v19, 16  ;;  %212 = vst.msk [vmem:[#allocation2 + $0x8] sm:$0xf] %vm209_vm3, %v203_v38  ;;  %210 = vst.msk [vmem:[#allocation2] sm:$0xf] %vm209_vm3, %v201_v43 }
  0x2e   : > { %357 = vrot.lane.b32.xlu0 %v306_v26, %s1342_s16  ;;  %v343_v31 = vrot.slane %v342_v21, 4  ;;  %v527_v32 = vrot.slane %v525_v23, 5  ;;  %v511_v34 = vshll.u32 %v1109_v19, 16  ;;  %v531_v40 = vshll.u32 %v1112_v14, 16  ;;  %v1098_v49 = vld [vmem:[%s1400_s27 + $0x30] sm:$0xf] }
  0x2f   : > { %v329_v39 = vrot.slane %v328_v27, 4  ;;  %v517_v41 = vshll.u32 %v1110_v24, 16  ;;  %v550_v42 = vshrl.u32 %v1115_v25, 16  ;;  %v510_v46 = vrot.slane %v508_v33, 4  ;;  %v1097_v52 = vld [vmem:[%s1400_s27 + $0x28] sm:$0xf] }
  0x30   : > { %v348_v44 = vsel %vm1431_vm2, %v343_v31, %v347_v22  ;;  %v528_v45 = vor.u32 %v527_v32, %v524_v29  ;;  %v513_v47 = vrot.slane %v511_v34, 5  ;;  %v553_v51 = vshll.u32 %v1115_v25, 16  ;;  %v204_v59 = vld [vmem:[%s1400_s27 + $0x18] sm:$0xf]  ;;  %v1100_v60 = vld [vmem:[%s1400_s27 + $0x40] sm:$0xf] }
  0x31   : > { %363 = vrot.lane.b32.xlu1 %v348_v44, %s1342_s16  ;;  %v334_v48 = vsel %vm1431_vm2, %v329_v39, %v333_v28  ;;  %v552_v50 = vrot.slane %v550_v42, 4  ;;  %v536_v54 = vshrl.u32 %v1113_v30, 16  ;;  %v559_v56 = vshll.u32 %v1116_v36, 16  ;;  %213 = vst.msk [vmem:[#allocation2 + $0xc] sm:$0xf] %vm209_vm3, %v204_v59 }
  0x32   : > { %361 = vrot.lane.b32.xlu0 %v334_v48, %s1342_s16  ;;  %v514_v53 = vor.u32 %v513_v47, %v510_v46  ;;  %v555_v55 = vrot.slane %v553_v51, 5  ;;  %v539_v57 = vshll.u32 %v1113_v30, 16  ;;  %v545_v58 = vshll.u32 %v1114_v37, 16  ;;  %v202_v1 = vld [vmem:[%s1400_s27 + $0x8] sm:$0xf] }
  0x33   : > { %v529_v61 = vrot.slane %v528_v45, 4  ;;  %v533_v62 = vrot.slane %v531_v40, 5  ;;  %v519_v63 = vrot.slane %v517_v41, 5  ;;  %v538_v0 = vrot.slane %v536_v54, 4  ;;  %v1099_v2 = vld [vmem:[%s1400_s27 + $0x38] sm:$0xf] }
  0x34   : > { %v515_v3 = vrot.slane %v514_v53, 4  ;;  %v556_v4 = vor.u32 %v555_v55, %v552_v50  ;;  %v541_v5 = vrot.slane %v539_v57, 5  ;;  %211 = vst.msk [vmem:[#allocation2 + $0x4] sm:$0xf] %vm209_vm3, %v202_v1  ;;  %v561_v6 = vrot.slane %v559_v56, 5 }
  0x35   : > { %412 = vrot.lane.b32.xlu1 %v1098_v49, %s1341_s30  ;;  %v547_v8 = vrot.slane %v545_v58, 5  ;;  %v534_v11 = vsel %vm1431_vm2, %v529_v61, %v533_v62  ;;  %v206_v12 = vld [vmem:[%s1400_s27 + $0x28] sm:$0xf]  ;;  %v205_v13 = vld [vmem:[%s1400_s27 + $0x20] sm:$0xf] }
  0x36   : > { %410 = vrot.lane.b32.xlu0 %v1097_v52, %s1341_s30  ;;  %v542_v7 = vor.u32 %v541_v5, %v538_v0  ;;  %v557_v9 = vrot.slane %v556_v4, 4  ;;  %v520_v14 = vsel %vm1431_vm2, %v515_v3, %v519_v63  ;;  %215 = vst.msk [vmem:[#allocation2 + $0x14] sm:$0xf] %vm209_vm3, %v206_v12  ;;  %214 = vst.msk [vmem:[#allocation2 + $0x10] sm:$0xf] %vm209_vm3, %v205_v13 }
  0x37   : > { %v208_v15 = vld [vmem:[%s1400_s27 + $0x38] sm:$0xf]  ;;  %v207_v16 = vld [vmem:[%s1400_s27 + $0x30] sm:$0xf]  ;;  %v1583_v47 = vld [vmem:[%s1650_s2] ss:$0 sm:$0xff] }
  0x38   : > { %v543_v10 = vrot.slane %v542_v7, 4  ;;  %217 = vst.msk [vmem:[#allocation2 + $0x1c] sm:$0xf] %vm209_vm3, %v208_v15  ;;  %216 = vst.msk [vmem:[#allocation2 + $0x18] sm:$0xf] %vm209_vm3, %v207_v16  ;;  %v562_v17 = vsel %vm1431_vm2, %v557_v9, %v561_v6 }
  0x39   : > { %416 = vrot.lane.b32.xlu1 %v1100_v60, %s1341_s30 }
  0x3a   : > { %414 = vrot.lane.b32.xlu0 %v1099_v2, %s1341_s30  ;;  %v548_v18 = vsel %vm1431_vm2, %v543_v10, %v547_v8 }
  0x3d   : > { %573 = vrot.lane.b32.xlu1 %v534_v11, %s1343_s23 }
  0x3e   : > { %571 = vrot.lane.b32.xlu0 %v520_v14, %s1343_s23 }
  0x41   : > { %577 = vrot.lane.b32.xlu1 %v562_v17, %s1343_s23 }
  0x42   : > { %575 = vrot.lane.b32.xlu0 %v548_v18, %s1343_s23 }
  0x83   : > { %v405_v19 = vpop.permute.xlu1 %404  ;;  %v403_v20 = vpop.permute.xlu0 %402 }
  0x87   : > { %v409_v21 = vpop.permute.xlu1 %408  ;;  %v407_v22 = vpop.permute.xlu0 %406 }
  0x8d   : > { %v354_v23 = vpop.permute.xlu1 %353 }
  0x8e   : > { %376 = vst.msk [vmem:[#allocation2 + $0x8] sm:$0xf] %vm373_vm4, %v354_v23  ;;  %v350_v24 = vpop.permute.xlu0 %349 }
  0x8f   : > { %374 = vst.msk [vmem:[#allocation2] sm:$0xf] %vm373_vm4, %v350_v24 }
  0x90   : > { %429 = vst.msk [vmem:[#allocation2 + $0x8] sm:$0xf] %vm426_vm5, %v407_v22  ;;  %427 = vst.msk [vmem:[#allocation2] sm:$0xf] %vm426_vm5, %v403_v20 }
  0x91   : > { %v356_v35 = vpop.permute.xlu1 %355 }
  0x92   : > { %377 = vst.msk [vmem:[#allocation2 + $0xc] sm:$0xf] %vm373_vm4, %v356_v35  ;;  %v352_v25 = vpop.permute.xlu0 %351 }
  0x93   : > { %375 = vst.msk [vmem:[#allocation2 + $0x4] sm:$0xf] %vm373_vm4, %v352_v25 }
  0x94   : > { %430 = vst.msk [vmem:[#allocation2 + $0xc] sm:$0xf] %vm426_vm5, %v409_v21  ;;  %428 = vst.msk [vmem:[#allocation2 + $0x4] sm:$0xf] %vm426_vm5, %v405_v19 }
  0x95   : > { %v566_v26 = vpop.permute.xlu1 %565 }
  0x96   : > { %589 = vst.msk [vmem:[#allocation2 + $0x4] sm:$0xf] %vm587_vm6, %v566_v26 }
  0x97   : > { %v564_v27 = vpop.permute.xlu0 %563 }
  0x98   : > { %588 = vst.msk [vmem:[#allocation2] sm:$0xf] %vm587_vm6, %v564_v27 }
  0x9a   : > { %v570_v28 = vpop.permute.xlu1 %569 }
  0x9b   : > { %591 = vst.msk [vmem:[#allocation2 + $0xc] sm:$0xf] %vm587_vm6, %v570_v28 }
  0x9c   : > { %v568_v29 = vpop.permute.xlu0 %567 }
  0x9d   : > { %590 = vst.msk [vmem:[#allocation2 + $0x8] sm:$0xf] %vm587_vm6, %v568_v29 }
  0x9f   : > { %v360_v30 = vpop.permute.xlu1 %359  ;;  %v1280_v31 = vld [vmem:[#allocation2] sm:$0xff]  }
  0xa0   : > { %379 = vst.msk [vmem:[#allocation2 + $0x14] sm:$0xf] %vm373_vm4, %v360_v30  ;;  %v358_v32 = vpop.permute.xlu0 %357  ;;  %1205 = vmatprep.mubr.bf16.mxu0 %v1280_v31  ;;  %1229 = vmatprep.mubr.bf16.mxu1 %v1280_v31 }
  0xa1   : > { %378 = vst.msk [vmem:[#allocation2 + $0x10] sm:$0xf] %vm373_vm4, %v358_v32 }
  0xa3   : > { %v364_v33 = vpop.permute.xlu1 %363 }
  0xa4   : > { %381 = vst.msk [vmem:[#allocation2 + $0x1c] sm:$0xf] %vm373_vm4, %v364_v33  ;;  %v362_v34 = vpop.permute.xlu0 %361  ;;  %v1282_v36 = vld [vmem:[#allocation2 + $0x8] sm:$0xff]  }
  0xa5   : > { %380 = vst.msk [vmem:[#allocation2 + $0x18] sm:$0xf] %vm373_vm4, %v362_v34  ;;  %1206 = vmatmul.mubr.bf16.vlgmr.msra.gmra.mxu0 %v1282_v36  ;;  %1230 = vmatmul.mubr.bf16.vlgmr.msra.gmra.mxu1 %v1282_v36 }
  0xa7   : > { %v413_v37 = vpop.permute.xlu1 %412 }
  0xa8   : > { %432 = vst.msk [vmem:[#allocation2 + $0x14] sm:$0xf] %vm426_vm5, %v413_v37  ;;  %v411_v38 = vpop.permute.xlu0 %410 }
  0xa9   : > { %431 = vst.msk [vmem:[#allocation2 + $0x10] sm:$0xf] %vm426_vm5, %v411_v38 }
  0xab   : > { %v417_v39 = vpop.permute.xlu1 %416 }
  0xac   : > { %434 = vst.msk [vmem:[#allocation2 + $0x1c] sm:$0xf] %vm426_vm5, %v417_v39  ;;  %v415_v40 = vpop.permute.xlu0 %414 }
  0xad   : > { %433 = vst.msk [vmem:[#allocation2 + $0x18] sm:$0xf] %vm426_vm5, %v415_v40 }
  0xaf   : > { %v574_v41 = vpop.permute.xlu1 %573 }
  0xb0   : > { %593 = vst.msk [vmem:[#allocation2 + $0x14] sm:$0xf] %vm587_vm6, %v574_v41  ;;  %v572_v42 = vpop.permute.xlu0 %571 }
  0xb1   : > { %592 = vst.msk [vmem:[#allocation2 + $0x10] sm:$0xf] %vm587_vm6, %v572_v42 }
  0xb3   : > { %v578_v43 = vpop.permute.xlu1 %577 }
  0xb4   : > { %595 = vst.msk [vmem:[#allocation2 + $0x1c] sm:$0xf] %vm587_vm6, %v578_v43  ;;  %v576_v44 = vpop.permute.xlu0 %575 }
  0xb5   : > { %594 = vst.msk [vmem:[#allocation2 + $0x18] sm:$0xf] %vm587_vm6, %v576_v44 }
  0xb8   : > { %v1283_v45 = vld [vmem:[#allocation2 + $0x10] sm:$0xff]  }
  0xb9   : > { %1209 = vmatprep.mubr.bf16.mxu0 %v1283_v45  ;;  %1233 = vmatprep.mubr.bf16.mxu1 %v1283_v45 }
  0xbc   : > { %v1284_v46 = vld [vmem:[#allocation2 + $0x18] sm:$0xff]  }
  0xbd   : > { %1210 = vmatmul.mubr.bf16.gmra.mxu0 %v1284_v46  ;;  %1234 = vmatmul.mubr.bf16.gmra.mxu1 %v1284_v46 }
 0x165   : > { %v1207_v48 = vpop.f32.mrf.mxu0  ;;  %v1231_v49 = vpop.f32.mrf.mxu1 }
 0x166   : > { %v759_v50 = vadd.f32 %v1207_v48, %v1583_v47  ;;  %v872_v51 = vadd.f32 %v1231_v49, %v1583_v47 }
 0x167   : > { %v750_v52 = vpop.f32.mrf.mxu0  ;;  %v863_v53 = vpop.f32.mrf.mxu1 }
 0x168   : > { %v896_v54 = vmul.f32 0.5, %v759_v50  ;;  %v928_v55 = vmul.f32 0.5, %v872_v51  ;;  %v751_v56 = vadd.f32 %v1583_v47, %v750_v52  ;;  %v864_v57 = vadd.f32 %v1583_v47, %v863_v53 }
 0x169   : > { %v1208_v58 = vpop.f32.mrf.mxu0  ;;  %v1232_v59 = vpop.f32.mrf.mxu1 }
 0x16a   : > { %1285 = vtanh.f32 %v896_v54  ;;  %v894_v60 = vmul.f32 0.5, %v751_v56  ;;  %v926_v61 = vmul.f32 0.5, %v864_v57  ;;  %v762_v62 = vadd.f32 %v1208_v58, %v1583_v47 }
 0x16b   : > { %1287 = vtanh.f32 %v928_v55  ;;  %v875_v63 = vadd.f32 %v1232_v59, %v1583_v47  ;;  %v753_v0 = vpop.f32.mrf.mxu0  ;;  %v866_v1 = vpop.f32.mrf.mxu1 }
 0x16c   : > { %1289 = vtanh.f32 %v894_v60  ;;  %v897_v2 = vmul.f32 0.5, %v762_v62  ;;  %v754_v3 = vadd.f32 %v1583_v47, %v753_v0  ;;  %v867_v4 = vadd.f32 %v1583_v47, %v866_v1 }
 0x16d   : > { %1291 = vtanh.f32 %v926_v61  ;;  %v929_v5 = vmul.f32 0.5, %v875_v63 }
 0x16e   : > { %1293 = vtanh.f32 %v897_v2  ;;  %v895_v6 = vmul.f32 0.5, %v754_v3  ;;  %v927_v7 = vmul.f32 0.5, %v867_v4 }
 0x16f   : > { %1295 = vtanh.f32 %v929_v5 }
 0x170   : > { %1297 = vtanh.f32 %v895_v6 }
 0x171   : > { %1299 = vtanh.f32 %v927_v7 }
 0x177   : > { %v1286_v8 = vpop.eup %1285 }
 0x178   : > { %v1288_v9 = vpop.eup %1287  ;;  %v912_v10 = vadd.f32 1.0, %v1286_v8 }
 0x179   : > { %v1290_v11 = vpop.eup %1289  ;;  %v944_v12 = vadd.f32 1.0, %v1288_v9 }
 0x17a   : > { %v1292_v13 = vpop.eup %1291  ;;  %v920_v14 = vmul.f32 0.5, %v912_v10  ;;  %v910_v15 = vadd.f32 1.0, %v1290_v11 }
 0x17b   : > { %v1294_v16 = vpop.eup %1293  ;;  %v952_v17 = vmul.f32 0.5, %v944_v12  ;;  %v942_v18 = vadd.f32 1.0, %v1292_v13 }
 0x17c   : > { %v1296_v19 = vpop.eup %1295  ;;  %v960_v20 = vpack.c.bf16 %v920_v14, %v920_v14  ;;  %v918_v21 = vmul.f32 0.5, %v910_v15  ;;  %v913_v22 = vadd.f32 1.0, %v1294_v16 }
 0x17d   : > { %v1298_v23 = vpop.eup %1297  ;;  %v968_v24 = vpack.c.bf16 %v952_v17, %v952_v17  ;;  %v950_v35 = vmul.f32 0.5, %v942_v18  ;;  %v945_v25 = vadd.f32 1.0, %v1296_v19  ;;  %v1211_v26 = vpop.f32.mrf.mxu0 }
 0x17e   : > { %v1235_v27 = vpop.f32.mrf.mxu1  ;;  %v1300_v28 = vpop.eup %1299  ;;  %977 = vst.msk [vmem:[%s1597_s10 + $0x10] sm:$0xf] %vm974_vm7, %v960_v20  ;;  %v958_v29 = vpack.c.bf16 %v918_v21, %v918_v21  ;;  %v921_v30 = vmul.f32 0.5, %v913_v22  ;;  %v911_v31 = vadd.f32 1.0, %v1298_v23  ;;  %v775_v32 = vadd.f32 %v1211_v26, %v1583_v47 }
 0x17f   : > { %1156 = vst.msk [vmem:[%s1597_s10 + $0x14] sm:$0xf] %vm974_vm7, %v968_v24  ;;  %v966_v33 = vpack.c.bf16 %v950_v35, %v950_v35  ;;  %v953_v34 = vmul.f32 0.5, %v945_v25  ;;  %v943_v36 = vadd.f32 1.0, %v1300_v28  ;;  %v888_v37 = vadd.f32 %v1235_v27, %v1583_v47  ;;  %v766_v38 = vpop.f32.mrf.mxu0 }
 0x180   : > { %v879_v39 = vpop.f32.mrf.mxu1  ;;  %975 = vst.msk [vmem:[%s1597_s10] sm:$0xf] %vm974_vm7, %v958_v29  ;;  %v961_v40 = vpack.c.bf16 %v921_v30, %v921_v30  ;;  %v919_v41 = vmul.f32 0.5, %v911_v31  ;;  %v900_v42 = vmul.f32 0.5, %v775_v32  ;;  %v767_v43 = vadd.f32 %v1583_v47, %v766_v38 }
 0x181   : > { %1154 = vst.msk [vmem:[%s1597_s10 + $0x4] sm:$0xf] %vm974_vm7, %v966_v33  ;;  %v969_v44 = vpack.c.bf16 %v953_v34, %v953_v34  ;;  %v951_v45 = vmul.f32 0.5, %v943_v36  ;;  %v932_v46 = vmul.f32 0.5, %v888_v37  ;;  %v880_v48 = vadd.f32 %v1583_v47, %v879_v39  ;;  %v1212_v49 = vpop.f32.mrf.mxu0 }
 0x182   : > { %v1236_v50 = vpop.f32.mrf.mxu1  ;;  %978 = vst.msk [vmem:[%s1597_s10 + $0x18] sm:$0xf] %vm974_vm7, %v961_v40  ;;  %v959_v51 = vpack.c.bf16 %v919_v41, %v919_v41  ;;  %1301 = vtanh.f32 %v900_v42  ;;  %v898_v52 = vmul.f32 0.5, %v767_v43  ;;  %v778_v53 = vadd.f32 %v1212_v49, %v1583_v47 }
 0x183   : > { %1157 = vst.msk [vmem:[%s1597_s10 + $0x1c] sm:$0xf] %vm974_vm7, %v969_v44  ;;  %v967_v54 = vpack.c.bf16 %v951_v45, %v951_v45  ;;  %1303 = vtanh.f32 %v932_v46  ;;  %v930_v55 = vmul.f32 0.5, %v880_v48  ;;  %v891_v56 = vadd.f32 %v1236_v50, %v1583_v47  ;;  %v769_v57 = vpop.f32.mrf.mxu0 }
 0x184   : > { %v882_v58 = vpop.f32.mrf.mxu1  ;;  %976 = vst.msk [vmem:[%s1597_s10 + $0x8] sm:$0xf] %vm974_vm7, %v959_v51  ;;  %1305 = vtanh.f32 %v898_v52  ;;  %v901_v59 = vmul.f32 0.5, %v778_v53  ;;  %v770_v60 = vadd.f32 %v1583_v47, %v769_v57 }
 0x185   : > { %v883_v61 = vadd.f32 %v1583_v47, %v882_v58  ;;  %1155 = vst.msk [vmem:[%s1597_s10 + $0xc] sm:$0xf] %vm974_vm7, %v967_v54  ;;  %1307 = vtanh.f32 %v930_v55  ;;  %v933_v62 = vmul.f32 0.5, %v891_v56 }
 0x186   : > { %1309 = vtanh.f32 %v901_v59  ;;  %v899_v63 = vmul.f32 0.5, %v770_v60 }
 0x187   : > { %v931_v0 = vmul.f32 0.5, %v883_v61  ;;  %1311 = vtanh.f32 %v933_v62 }
 0x188   : > { %1313 = vtanh.f32 %v899_v63 }
 0x189   : > { %1315 = vtanh.f32 %v931_v0 }
 0x18f   : > { %v1302_v1 = vpop.eup %1301 }
 0x190   : > { %v1304_v2 = vpop.eup %1303  ;;  %v916_v3 = vadd.f32 1.0, %v1302_v1 }
 0x191   : > { %v1306_v4 = vpop.eup %1305  ;;  %v948_v5 = vadd.f32 1.0, %v1304_v2 }
 0x192   : > { %v1308_v6 = vpop.eup %1307  ;;  %v924_v7 = vmul.f32 0.5, %v916_v3  ;;  %v914_v8 = vadd.f32 1.0, %v1306_v4 }
 0x193   : > { %v1310_v47 = vpop.eup %1309  ;;  %v956_v9 = vmul.f32 0.5, %v948_v5  ;;  %v946_v10 = vadd.f32 1.0, %v1308_v6 }
 0x194   : > { %v1312_v11 = vpop.eup %1311  ;;  %v964_v12 = vpack.c.bf16 %v924_v7, %v924_v7  ;;  %v922_v13 = vmul.f32 0.5, %v914_v8  ;;  %v917_v14 = vadd.f32 1.0, %v1310_v47 }
 0x195   : > { %v1314_v15 = vpop.eup %1313  ;;  %v972_v16 = vpack.c.bf16 %v956_v9, %v956_v9  ;;  %v954_v17 = vmul.f32 0.5, %v946_v10  ;;  %v949_v18 = vadd.f32 1.0, %v1312_v11 }
 0x196   : > { %v1316_v19 = vpop.eup %1315  ;;  %981 = vst.msk [vmem:[%s1597_s10 + $0x30] sm:$0xf] %vm974_vm7, %v964_v12  ;;  %v962_v20 = vpack.c.bf16 %v922_v13, %v922_v13  ;;  %v925_v21 = vmul.f32 0.5, %v917_v14  ;;  %v915_v22 = vadd.f32 1.0, %v1314_v15 }
 0x197   : > { %1160 = vst.msk [vmem:[%s1597_s10 + $0x34] sm:$0xf] %vm974_vm7, %v972_v16  ;;  %v970_v23 = vpack.c.bf16 %v954_v17, %v954_v17  ;;  %v957_v24 = vmul.f32 0.5, %v949_v18  ;;  %v947_v35 = vadd.f32 1.0, %v1316_v19 }
 0x198   : > { %979 = vst.msk [vmem:[%s1597_s10 + $0x20] sm:$0xf] %vm974_vm7, %v962_v20  ;;  %v965_v25 = vpack.c.bf16 %v925_v21, %v925_v21  ;;  %v923_v26 = vmul.f32 0.5, %v915_v22 }
 0x199   : > { %1158 = vst.msk [vmem:[%s1597_s10 + $0x24] sm:$0xf] %vm974_vm7, %v970_v23  ;;  %v973_v27 = vpack.c.bf16 %v957_v24, %v957_v24  ;;  %v955_v28 = vmul.f32 0.5, %v947_v35 }
 0x19a   : > { %982 = vst.msk [vmem:[%s1597_s10 + $0x38] sm:$0xf] %vm974_vm7, %v965_v25  ;;  %v963_v29 = vpack.c.bf16 %v923_v26, %v923_v26 }
 0x19b   : > { %1161 = vst.msk [vmem:[%s1597_s10 + $0x3c] sm:$0xf] %vm974_vm7, %v973_v27  ;;  %v971_v30 = vpack.c.bf16 %v955_v28, %v955_v28 }
 0x19c   : > { %980 = vst.msk [vmem:[%s1597_s10 + $0x28] sm:$0xf] %vm974_vm7, %v963_v29 }
 0x19d   : > { %1159 = vst.msk [vmem:[%s1597_s10 + $0x2c] sm:$0xf] %vm974_vm7, %v971_v30 }
 0x19e PF: > { %s13_s14 = sadd.s32 1, %s1339_s14   ;;  %s1654_s12 = smov %s1335_s13 }
 0x19f   : > { %p10_p5 = scmp.ge.s32.totalorder %s13_s14, 4   ;;  %s1655_s13 = smov %s1657_s15 }
 0x1a1   :  { %12 = sbr.rel (!%p10_p5) target bundleno = 2 (0x2), region = 66 }

</bundles_post_ra>
